<compile_context>
chip_gen: v7x
topology: tpu7x:2x2x1
jax: 0.10.0
libtpu: 0.0.40
codegen_flags: <defaults>
</compile_context>

<pallas_src>
import jax
import jax.numpy as jnp
from jax.experimental import pallas as pl
from jax.experimental.pallas import tpu as pltpu

KERNEL_SIZE = 4
STRIDE = 2
PADDING = 1
BN_EPS = 1e-5


def _round_up(x, m):
    return -(-x // m) * m


def _vmem_limit():
    # Per-generation scoped-VMEM budget: ~3/4 of physical (<= 96 MiB on 128 MiB parts,
    # 48 MiB on v7x's 64 MiB).  Falls back to a safe 48 MiB if the query is unavailable.
    try:
        cap = int(pltpu.get_tpu_info().vmem_capacity_bytes)
        return min(96 * 1024 * 1024, (cap * 3) // 4)
    except Exception:
        return 48 * 1024 * 1024


VMEM_LIMIT = _vmem_limit()


def _pick_tile(n, cap):
    """Largest multiple of 8 that divides n and is <= cap (falls back to n)."""
    t = min(cap, n) // 8 * 8
    while t >= 8:
        if n % t == 0:
            return t
        t -= 8
    return n


def _tile_and_pad(d, cap):
    """(tile, padded_extent).  d <= cap -> full-dim block (no padding needed, the
    full-dim exception covers alignment); else tile = cap (multiple of 8 and 128)."""
    if d <= cap:
        return d, d
    return cap, _round_up(d, cap)


# ------------------ batched matmul (MXU) with fused epilogues ------------------

def _make_mm_kernel(has_bias, epilogue):
    """grid = (G, Mt, Nt, Kt); refs = a, b, [bias], out, [stats], acc_scratch."""

    def kernel(*refs):
        a_ref, b_ref = refs[0], refs[1]
        pos = 2
        bias_ref = None
        if has_bias:
            bias_ref = refs[pos]
            pos += 1
        o_ref = refs[pos]
        pos += 1
        stats_ref = None
        if epilogue == "bn_stats":
            stats_ref = refs[pos]
            pos += 1
        acc_ref = refs[pos]

        kk = pl.program_id(3)

        @pl.when(kk == 0)
        def _():
            acc_ref[...] = jnp.zeros_like(acc_ref)

        acc_ref[...] += jnp.dot(a_ref[0], b_ref[0],
                                preferred_element_type=jnp.float32)

        @pl.when(kk == pl.num_programs(3) - 1)
        def _():
            acc = acc_ref[...]
            if has_bias:
                acc = acc + bias_ref[...]
            if epilogue == "tanh":
                acc = jnp.tanh(acc)              # EUP slot: free under the MXU-bound loop
            o_ref[0] = acc.astype(o_ref.dtype)
            if epilogue == "bn_stats":
                # per-channel sum / sum-of-squares from the resident f32 accumulator
                stats_ref[0, 0, 0:1, :] = jnp.sum(acc, axis=0, keepdims=True)
                stats_ref[0, 0, 1:2, :] = jnp.sum(acc * acc, axis=0, keepdims=True)

    return kernel


def pallas_matmul_g(a, b, bias=None, epilogue="none", out_dtype=jnp.bfloat16):
    """Batched matmul: a (G, M, K) @ b (G, K, N) -> (G, Mp, Np) in out_dtype.
    Operands are bf16 on the MXU with an f32 VMEM accumulator.  epilogue:
      "none"     : plain store (+ optional bias (1, N))
      "tanh"     : tanh(acc) store
      "bn_stats" : also returns (G, Mt, 2, Np) f32 per-tile column sum / sum-of-squares.
    N is always padded to a multiple of 128 (lane-dense output stores); callers slice."""
    G, M, K = a.shape
    Gb, Kb, N = b.shape
    assert G == Gb and K == Kb
    if a.dtype != jnp.bfloat16:
        a = a.astype(jnp.bfloat16)   # no-op on the hot path (producers already emit bf16)
    if b.dtype != jnp.bfloat16:
        b = b.astype(jnp.bfloat16)

    tm, Mp = _tile_and_pad(M, 512)
    tk, Kp = _tile_and_pad(K, 512)
    tn, Np = _tile_and_pad(_round_up(N, 128), 512)
    if (Mp, Kp) != (M, K):
        a = jnp.pad(a, ((0, 0), (0, Mp - M), (0, Kp - K)))
    if (Kp, Np) != (K, N):
        b = jnp.pad(b, ((0, 0), (0, Kp - K), (0, Np - N)))
    n_mt, n_nt, n_kt = Mp // tm, Np // tn, Kp // tk

    has_bias = bias is not None
    inputs = [a, b]
    in_specs = [pl.BlockSpec((1, tm, tk), lambda g, i, j, kk: (g, i, kk)),
                pl.BlockSpec((1, tk, tn), lambda g, i, j, kk: (g, kk, j))]
    if has_bias:
        bias2 = bias.astype(jnp.float32).reshape(1, N)
        if Np != N:
            bias2 = jnp.pad(bias2, ((0, 0), (0, Np - N)))
        inputs.append(bias2)
        in_specs.append(pl.BlockSpec((1, tn), lambda g, i, j, kk: (0, j)))

    out_shape = [jax.ShapeDtypeStruct((G, Mp, Np), out_dtype)]
    out_specs = [pl.BlockSpec((1, tm, tn), lambda g, i, j, kk: (g, i, j))]
    if epilogue == "bn_stats":
        out_shape.append(jax.ShapeDtypeStruct((G, n_mt, 2, Np), jnp.float32))
        out_specs.append(pl.BlockSpec((1, 1, 2, tn), lambda g, i, j, kk: (g, i, 0, j)))

    res = pl.pallas_call(
        _make_mm_kernel(has_bias, epilogue),
        grid=(G, n_mt, n_nt, n_kt),
        in_specs=in_specs,
        out_specs=tuple(out_specs) if epilogue == "bn_stats" else out_specs[0],
        out_shape=tuple(out_shape) if epilogue == "bn_stats" else out_shape[0],
        scratch_shapes=[pltpu.VMEM((tm, tn), jnp.float32)],
        compiler_params=pltpu.CompilerParams(
            dimension_semantics=("parallel", "parallel", "parallel", "arbitrary"),
            vmem_limit_bytes=VMEM_LIMIT),
    )(*inputs)

    if epilogue == "bn_stats":
        return res[0], res[1]
    return res


# ------------------------- BatchNorm apply + ReLU -------------------------

def _bn_relu_kernel(x_ref, scale_ref, shift_ref, o_ref):
    x = x_ref[...].astype(jnp.float32)
    o_ref[...] = jnp.maximum(x * scale_ref[...] + shift_ref[...], 0.0).astype(o_ref.dtype)


def pallas_bn_relu(x2, scale, shift):
    """x2: (R, C) bf16; scale/shift: (1, C) f32 -> (R, C) bf16 (ready as MXU operand)."""
    R, C = x2.shape
    tr = _pick_tile(R, 1024)
    return pl.pallas_call(
        _bn_relu_kernel,
        grid=(R // tr,),
        in_specs=[pl.BlockSpec((tr, C), lambda i: (i, 0)),
                  pl.BlockSpec((1, C), lambda i: (0, 0)),
                  pl.BlockSpec((1, C), lambda i: (0, 0))],
        out_specs=pl.BlockSpec((tr, C), lambda i: (i, 0)),
        out_shape=jax.ShapeDtypeStruct((R, C), jnp.bfloat16),
        compiler_params=pltpu.CompilerParams(
            dimension_semantics=("parallel",), vmem_limit_bytes=VMEM_LIMIT),
    )(x2, scale, shift)


def _bn_scale_shift(s, count, gamma, beta):
    """s: (2, C) [sum, sumsq]; train-mode (biased) BN affine coefficients."""
    mean = s[0] / count
    var = jnp.maximum(s[1] / count - mean * mean, 0.0)
    scale = gamma * jax.lax.rsqrt(var + BN_EPS)
    shift = beta - mean * scale
    return scale.reshape(1, -1).astype(jnp.float32), shift.reshape(1, -1).astype(jnp.float32)


# -------------------- self-attention (flash-style over keys) --------------------

def _attn_kernel(x_ref, q_ref, k_ref, v_ref, g_ref, o_ref, m_sc, l_sc, acc_sc):
    kj = pl.program_id(2)

    @pl.when(kj == 0)
    def _():
        m_sc[...] = jnp.full(m_sc.shape, -jnp.inf, m_sc.dtype)
        l_sc[...] = jnp.zeros_like(l_sc)
        acc_sc[...] = jnp.zeros_like(acc_sc)

    q = q_ref[0]                                  # (tq, 128) bf16 (Cq zero-padded)
    kt = k_ref[0]                                 # (tkv, 128) bf16
    v = v_ref[0]                                  # (tkv, Cp) bf16
    e = jax.lax.dot_general(q, kt, (((1,), (1,)), ((), ())),
                            preferred_element_type=jnp.float32)          # (tq, tkv)
    m_prev = m_sc[...]
    m_new = jnp.maximum(m_prev, jnp.max(e, axis=1, keepdims=True))       # (tq, 1)
    alpha = jnp.exp(m_prev - m_new)
    p = jnp.exp(e - m_new)
    l_sc[...] = alpha * l_sc[...] + jnp.sum(p, axis=1, keepdims=True)
    acc_sc[...] = alpha * acc_sc[...] + jnp.dot(
        p.astype(jnp.bfloat16), v, preferred_element_type=jnp.float32)   # (tq, Cp)
    m_sc[...] = m_new

    @pl.when(kj == pl.num_programs(2) - 1)
    def _():
        attn = acc_sc[...] / l_sc[...]            # exact divide (epilogue-only, EUP)
        o_ref[0] = (g_ref[0, 0] * attn + x_ref[0].astype(jnp.float32)).astype(o_ref.dtype)


def pallas_self_attn(y, p, c_model):
    """SAGAN Self_Attn: softmax-over-keys attention + gamma-scaled residual.
    y: (B, H, W, Ca) bf16 with Ca in {c_model, Cp}.  Returns (B, H, W, Cp) bf16 where
    Cp = round_up(c_model, 128); lanes >= c_model stay exactly zero."""
    B, H, W, Ca = y.shape
    N = H * W
    Cp = _round_up(c_model, 128)
    Cq = p["wq"].shape[0]

    # Fused projection: one matmul produces the [ value | residual(x) | query | key ]
    # column segments (each 128-lane aligned) that the attention kernel reads in place.
    Wv = jnp.zeros((Ca, Cp), jnp.float32).at[:c_model, :c_model].set(p["wv"].T)
    Wx = jnp.eye(Ca, Cp, dtype=jnp.float32)                    # exact bf16 pass-through
    Wq = jnp.zeros((Ca, 128), jnp.float32).at[:c_model, :Cq].set(p["wq"].T)
    Wk = jnp.zeros((Ca, 128), jnp.float32).at[:c_model, :Cq].set(p["wk"].T)
    W_all = jnp.concatenate([Wv, Wx, Wq, Wk], axis=1).astype(jnp.bfloat16)   # (Ca, 2Cp+256)
    bias = jnp.concatenate([
        jnp.zeros((Cp,), jnp.float32).at[:c_model].set(p["bv"].reshape(-1)),
        jnp.zeros((Cp,), jnp.float32),
        jnp.zeros((128,), jnp.float32).at[:Cq].set(p["bq"].reshape(-1)),
        jnp.zeros((128,), jnp.float32).at[:Cq].set(p["bk"].reshape(-1)),
    ]).reshape(1, -1)

    proj = pallas_matmul_g(y.reshape(1, B * N, Ca), W_all[None], bias=bias,
                           out_dtype=jnp.bfloat16)[0]
    qkv = proj[:B * N].reshape(B, N, 2 * Cp + 256)

    tq_cap = 256
    if B * (N // min(N, tq_cap)) < 2:     # ensure parallel extent >= 2 (v7x megacore)
        tq_cap = max(8, N // 2)
    tq = _pick_tile(N, tq_cap)            # parallel query tiles
    tkv = _pick_tile(N, 512)              # larger key tiles -> fewer accumulator rescales
    qcol = (2 * Cp) // 128
    kcol = qcol + 1

    out = pl.pallas_call(
        _attn_kernel,
        grid=(B, N // tq, N // tkv),
        in_specs=[
            pl.BlockSpec((1, tq, Cp), lambda b, qi, kj: (b, qi, 1)),       # residual x
            pl.BlockSpec((1, tq, 128), lambda b, qi, kj: (b, qi, qcol)),   # q tile
            pl.BlockSpec((1, tkv, 128), lambda b, qi, kj: (b, kj, kcol)),  # k tile
            pl.BlockSpec((1, tkv, Cp), lambda b, qi, kj: (b, kj, 0)),      # v tile
            pl.BlockSpec(memory_space=pltpu.MemorySpace.SMEM),             # gamma scalar
        ],
        out_specs=pl.BlockSpec((1, tq, Cp), lambda b, qi, kj: (b, qi, 0)),
        out_shape=jax.ShapeDtypeStruct((B, N, Cp), jnp.bfloat16),
        scratch_shapes=[pltpu.VMEM((tq, 1), jnp.float32),    # running max
                        pltpu.VMEM((tq, 1), jnp.float32),    # running denom
                        pltpu.VMEM((tq, Cp), jnp.float32)],  # output accumulator
        compiler_params=pltpu.CompilerParams(
            dimension_semantics=("parallel", "parallel", "arbitrary"),
            vmem_limit_bytes=VMEM_LIMIT),
    )(qkv, qkv, qkv, qkv, p["gamma"])
    return out.reshape(B, H, W, Cp)


# ------------- sub-pixel phase decomposition of the stride-2 deconv -------------

def _phase_weight_mats(w):
    """w: (Cin, Cout, 4, 4) -> (4, 4*Cin, Cout) bf16 phase matrices.
    Phase p = ry*2+rx; tap order (dh, dw); tap (dh, dw) uses kernel element
    kh = 3 - ry - 2*dh, kw = 3 - rx - 2*dw (direct transposed-conv mapping, no flip)."""
    mats = []
    for ry in range(2):
        for rx in range(2):
            taps = []
            for dh in range(2):
                for dw in range(2):
                    kh = 3 - ry - 2 * dh
                    kw = 3 - rx - 2 * dw
                    taps.append(w[:, :, kh, kw])
            mats.append(jnp.concatenate(taps, axis=0))
    return jnp.stack(mats, axis=0).astype(jnp.bfloat16)


def _phase_patches(x):
    """x: (B, H, W, C) bf16 -> (4, B*H*W, 4*C) bf16 per-phase 2x2 im2col patches.
    Tap (dh, dw) of phase (ry, rx) reads the padded input window shifted by (ry+dh, rx+dw)."""
    # TODO(synk): this window gather (pad + 4 shifted slices per phase) and the phase
    # interleave below remain XLA glue; folding them into the matmul needs element-offset
    # rectangular-window BlockSpecs.
    B, H, W, C = x.shape
    xp = jnp.pad(x, ((0, 0), (1, 1), (1, 1), (0, 0)))
    phases = []
    for ry in range(2):
        for rx in range(2):
            taps = [xp[:, ry + dh:ry + dh + H, rx + dw:rx + dw + W, :]
                    for dh in range(2) for dw in range(2)]
            phases.append(jnp.concatenate(taps, axis=-1).reshape(B * H * W, 4 * C))
    return jnp.stack(phases, axis=0)


def gen_layer(y, p):
    """GenLayerSN: spectral-normed ConvTranspose2d(4, 2, 1, bias=False) + BN + ReLU."""
    B, H, W, Cin = y.shape
    Cout = p["w_ph"].shape[-1]
    M = B * H * W
    patches = _phase_patches(y)                                        # (4, M, 4*Cin)
    out, stats = pallas_matmul_g(patches, p["w_ph"], epilogue="bn_stats")
    Mp, Np = out.shape[1], out.shape[2]
    gamma = p["bn_g"] if Np == Cout else jnp.pad(p["bn_g"], (0, Np - Cout))
    beta = p["bn_b"] if Np == Cout else jnp.pad(p["bn_b"], (0, Np - Cout))
    s = jnp.sum(stats, axis=(0, 1))                                    # (2, Np)
    scale, shift = _bn_scale_shift(s, 4 * M, gamma, beta)
    z = pallas_bn_relu(out.reshape(4 * Mp, Np), scale, shift)
    z = z.reshape(4, Mp, Np)[:, :M, :Cout].reshape(2, 2, B, H, W, Cout)
    z = jnp.transpose(z, (2, 3, 0, 4, 1, 5)).reshape(B, 2 * H, 2 * W, Cout)
    return z


def final_layer(y, w_ph):
    """Last ConvTranspose2d(4, 2, 1, bias=False) with tanh fused into the matmul epilogue."""
    B, H, W, _ = y.shape
    nc = w_ph.shape[-1]
    M = B * H * W
    patches = _phase_patches(y)
    out = pallas_matmul_g(patches, w_ph, epilogue="tanh", out_dtype=jnp.float32)
    out = out[:, :M, :nc].reshape(2, 2, B, H, W, nc)
    out = jnp.transpose(out, (2, 5, 3, 0, 4, 1)).reshape(B, nc, 2 * H, 2 * W)
    return out


# ---------------------------- params & forward ----------------------------

def spectral_normalize(w):
    # torch spectral_norm(dim=1 for ConvTranspose2d); here the exact largest singular
    # value is used instead of the one-step power-iteration estimate.
    cin, cout, kh, kw = w.shape
    wmat = jnp.transpose(w, (1, 0, 2, 3)).reshape(cout, cin * kh * kw)
    sigma = jnp.linalg.norm(wmat, ord=2)
    return w / (sigma + 1e-12)


def init_params(key, nz, ngf, nc, k):
    keys = iter(jax.random.split(key, 64))
    params = {}
    d_in = 2 ** k
    C0 = ngf * d_in
    w0 = 0.02 * jax.random.normal(next(keys), (nz, C0, KERNEL_SIZE, KERNEL_SIZE), jnp.float32)
    # first deconv (1x1 input, stride 1, pad 0) == one matmul; columns ordered (kh, kw, co)
    params["w0_mat"] = jnp.transpose(w0, (0, 2, 3, 1)).reshape(
        nz, KERNEL_SIZE * KERNEL_SIZE * C0).astype(jnp.bfloat16)
    params["bn0_g"] = 1.0 + 0.02 * jax.random.normal(next(keys), (C0,), jnp.float32)
    params["bn0_b"] = 0.02 * jax.random.normal(next(keys), (C0,), jnp.float32)
    params["gen"] = []
    for i in range(k):
        n = k - i
        cin, cout = ngf * 2 ** n, ngf * 2 ** (n - 1)
        w = 0.02 * jax.random.normal(next(keys), (cin, cout, KERNEL_SIZE, KERNEL_SIZE), jnp.float32)
        params["gen"].append({
            "w_ph": _phase_weight_mats(spectral_normalize(w)),     # (4, 4*cin, cout) bf16
            "bn_g": 1.0 + 0.02 * jax.random.normal(next(keys), (cout,), jnp.float32),
            "bn_b": 0.02 * jax.random.normal(next(keys), (cout,), jnp.float32),
        })
    params["attn"] = []
    cq = max(1, ngf // 8)
    for _ in range(2):
        params["attn"].append({
            "wq": 0.05 * jax.random.normal(next(keys), (cq, ngf), jnp.float32),
            "bq": 0.05 * jax.random.normal(next(keys), (cq, 1), jnp.float32),
            "wk": 0.05 * jax.random.normal(next(keys), (cq, ngf), jnp.float32),
            "bk": 0.05 * jax.random.normal(next(keys), (cq, 1), jnp.float32),
            "wv": 0.05 * jax.random.normal(next(keys), (ngf, ngf), jnp.float32),
            "bv": 0.05 * jax.random.normal(next(keys), (ngf, 1), jnp.float32),
            # Module __init__ sets gamma = zeros(1); use 0.1 so the attention path is exercised.
            "gamma": jnp.full((1, 1), 0.1, jnp.float32),
        })
    Cp = _round_up(ngf, 128)
    w_last = 0.02 * jax.random.normal(next(keys), (ngf, nc, KERNEL_SIZE, KERNEL_SIZE), jnp.float32)
    w_last = jnp.pad(w_last, ((0, Cp - ngf), (0, 0), (0, 0), (0, 0)))   # Cin padded to the
    params["w_last_ph"] = _phase_weight_mats(w_last)                    # attention lane width
    return params


def generator_forward(x_nchw, params, k):
    # x: (B, nz, 1, 1), same as the PyTorch module input
    B, nz = x_nchw.shape[0], x_nchw.shape[1]
    x = x_nchw.reshape(B, nz).astype(jnp.bfloat16)

    # --- first ConvTranspose2d (1x1 -> 4x4) as a matmul with fused BN statistics
    C0 = params["w0_mat"].shape[1] // (KERNEL_SIZE * KERNEL_SIZE)
    ncols0 = KERNEL_SIZE * KERNEL_SIZE * C0
    out0, stats0 = pallas_matmul_g(x[None], params["w0_mat"][None], epilogue="bn_stats")
    s0 = jnp.sum(stats0, axis=(0, 1))[:, :ncols0].reshape(2, KERNEL_SIZE * KERNEL_SIZE, C0).sum(axis=1)
    scale0, shift0 = _bn_scale_shift(s0, B * KERNEL_SIZE * KERNEL_SIZE,
                                     params["bn0_g"], params["bn0_b"])
    y0 = out0[0][:B, :ncols0]
    y = pallas_bn_relu(y0, jnp.tile(scale0, (1, KERNEL_SIZE * KERNEL_SIZE)),
                       jnp.tile(shift0, (1, KERNEL_SIZE * KERNEL_SIZE)))
    y = y.reshape(B, KERNEL_SIZE, KERNEL_SIZE, C0)

    # --- k GenLayerSN blocks (sub-pixel deconv + BN + ReLU)
    for p in params["gen"]:
        y = gen_layer(y, p)

    # --- 2 Self_Attn blocks (channels stay zero-padded to 128 lanes between them)
    c_model = params["attn"][0]["wv"].shape[0]
    for p in params["attn"]:
        y = pallas_self_attn(y, p, c_model)

    # --- final ConvTranspose2d -> nc channels, tanh fused, NCHW out
    return final_layer(y, params["w_last_ph"])


if __name__ == "__main__":
    B, nz, ngf, nc, k = 2, 8, 8, 3, 2
    key = jax.random.PRNGKey(0)
    pkey, xkey = jax.random.split(key)
    params = init_params(pkey, nz, ngf, nc, k)
    x = jax.random.normal(xkey, (B, nz, 1, 1), jnp.float32)

    fwd = jax.jit(lambda xx: generator_forward(xx, params, k))
    out = jax.block_until_ready(fwd(x))
    S = 4 * 2 ** (k + 1)   # 4 (first deconv) -> x2 per GenLayerSN -> x2 final deconv
    assert out.shape == (B, nc, S, S), out.shape
    assert jnp.all(jnp.isfinite(out))
    print("KERNEL_OK")
</pallas_src>

<mosaic_0001>
module attributes {stable_mosaic.version = 11 : i64} {
  func.func @_bn_relu_kernel(%arg0: i32, %arg1: memref<2x512xbf16, #tpu.memory_space<vmem>>, %arg2: memref<1x512xf32, #tpu.memory_space<vmem>>, %arg3: memref<1x512xf32, #tpu.memory_space<vmem>>, %arg4: memref<2x512xbf16, #tpu.memory_space<vmem>>) attributes {dimension_semantics = [#tpu.dimension_semantics<parallel>], iteration_bounds = array<i64: 1>, scalar_prefetch = 0 : i64, scratch_operands = 0 : i64, tpu.core_type = #tpu.core_type<tc>, window_params = [{transform_indices = @transform_0, window_bounds = array<i64: 2, 512>}, {pipeline_mode = #tpu.pipeline_mode<synchronous>, transform_indices = @transform_1, window_bounds = array<i64: 1, 512>}, {pipeline_mode = #tpu.pipeline_mode<synchronous>, transform_indices = @transform_2, window_bounds = array<i64: 1, 512>}, {transform_indices = @transform_3, window_bounds = array<i64: 2, 512>}]} {
    %c0 = arith.constant 0 : index
    %c0_0 = arith.constant 0 : index
    %0 = vector.load %arg1[%c0, %c0_0] : memref<2x512xbf16, #tpu.memory_space<vmem>>, vector<2x512xbf16>
    %1 = arith.extf %0 : vector<2x512xbf16> to vector<2x512xf32>
    %c0_1 = arith.constant 0 : index
    %c0_2 = arith.constant 0 : index
    %2 = vector.load %arg2[%c0_1, %c0_2] : memref<1x512xf32, #tpu.memory_space<vmem>>, vector<1x512xf32>
    %3 = vector.broadcast %2 : vector<1x512xf32> to vector<2x512xf32>
    %4 = arith.mulf %1, %3 : vector<2x512xf32>
    %c0_3 = arith.constant 0 : index
    %c0_4 = arith.constant 0 : index
    %5 = vector.load %arg3[%c0_3, %c0_4] : memref<1x512xf32, #tpu.memory_space<vmem>>, vector<1x512xf32>
    %6 = vector.broadcast %5 : vector<1x512xf32> to vector<2x512xf32>
    %7 = arith.addf %4, %6 : vector<2x512xf32>
    %cst = arith.constant 0.000000e+00 : f32
    %8 = vector.broadcast %cst : f32 to vector<2x512xf32>
    %9 = arith.maximumf %7, %8 : vector<2x512xf32>
    %10 = arith.truncf %9 : vector<2x512xf32> to vector<2x512xbf16>
    %c0_5 = arith.constant 0 : index
    %c0_6 = arith.constant 0 : index
    %11 = vector.load %arg4[%c0_5, %c0_6] : memref<2x512xbf16, #tpu.memory_space<vmem>>, vector<2x512xbf16>
    tpu.vector_store %arg4[%c0_5, %c0_6], %10 {strides = array<i32>} : memref<2x512xbf16, #tpu.memory_space<vmem>>, vector<2x512xbf16>,
    return
  }
  func.func @transform_0(%arg0: i32) -> (i32, i32) {
    %c0_i32 = arith.constant 0 : i32
    %c0_i32_0 = arith.constant 0 : i32
    return %arg0, %c0_i32 : i32, i32
  }
  func.func @transform_1(%arg0: i32) -> (i32, i32) {
    %c0_i32 = arith.constant 0 : i32
    %c0_i32_0 = arith.constant 0 : i32
    %c0_i32_1 = arith.constant 0 : i32
    return %c0_i32, %c0_i32_0 : i32, i32
  }
  func.func @transform_2(%arg0: i32) -> (i32, i32) {
    %c0_i32 = arith.constant 0 : i32
    %c0_i32_0 = arith.constant 0 : i32
    %c0_i32_1 = arith.constant 0 : i32
    return %c0_i32, %c0_i32_0 : i32, i32
  }
  func.func @transform_3(%arg0: i32) -> (i32, i32) {
    %c0_i32 = arith.constant 0 : i32
    %c0_i32_0 = arith.constant 0 : i32
    return %arg0, %c0_i32 : i32, i32
  }
}

module attributes {stable_mosaic.version = 11 : i64} {
  func.func @kernel(%arg0: i32, %arg1: i32, %arg2: i32, %arg3: i32, %arg4: memref<1x2x8xbf16, #tpu.memory_space<vmem>>, %arg5: memref<1x8x512xbf16, #tpu.memory_space<vmem>>, %arg6: memref<1x2x512xbf16, #tpu.memory_space<vmem>>, %arg7: memref<1x1x2x512xf32, #tpu.memory_space<vmem>>, %arg8: memref<2x512xf32, #tpu.memory_space<vmem>>) attributes {dimension_semantics = [#tpu.dimension_semantics<parallel>, #tpu.dimension_semantics<parallel>, #tpu.dimension_semantics<parallel>, #tpu.dimension_semantics<arbitrary>], iteration_bounds = array<i64: 1, 1, 1, 1>, scalar_prefetch = 0 : i64, scratch_operands = 1 : i64, tpu.core_type = #tpu.core_type<tc>, window_params = [{transform_indices = @transform_0, window_bounds = array<i64: 1, 2, 8>}, {transform_indices = @transform_1, window_bounds = array<i64: 1, 8, 512>}, {transform_indices = @transform_2, window_bounds = array<i64: 1, 2, 512>}, {transform_indices = @transform_3, window_bounds = array<i64: 1, 1, 2, 512>}]} {
    %c0_i32 = arith.constant 0 : i32
    %0 = arith.cmpi eq, %arg3, %c0_i32 : i32
    %1 = arith.extui %0 : i1 to i32
    %c0_i32_0 = arith.constant 0 : i32
    %2 = arith.cmpi ne, %1, %c0_i32_0 : i32
    scf.if %2 {
      %cst_12 = arith.constant 0.000000e+00 : f32
      %14 = vector.broadcast %cst_12 : f32 to vector<2x512xf32>
      %c0_13 = arith.constant 0 : index
      %c0_14 = arith.constant 0 : index
      %15 = vector.load %arg8[%c0_13, %c0_14] : memref<2x512xf32, #tpu.memory_space<vmem>>, vector<2x512xf32>
      tpu.vector_store %arg8[%c0_13, %c0_14], %14 {strides = array<i32>} : memref<2x512xf32, #tpu.memory_space<vmem>>, vector<2x512xf32>,
    } else {
    }
    %c0 = arith.constant 0 : index
    %c0_1 = arith.constant 0 : index
    %3 = vector.load %arg8[%c0, %c0_1] : memref<2x512xf32, #tpu.memory_space<vmem>>, vector<2x512xf32>
    %c0_2 = arith.constant 0 : index
    %c0_3 = arith.constant 0 : index
    %c0_4 = arith.constant 0 : index
    %4 = vector.load %arg4[%c0_2, %c0_3, %c0_4] : memref<1x2x8xbf16, #tpu.memory_space<vmem>>, vector<1x2x8xbf16>
    %5 = vector.shape_cast %4 : vector<1x2x8xbf16> to vector<2x8xbf16>
    %c0_5 = arith.constant 0 : index
    %c0_6 = arith.constant 0 : index
    %c0_7 = arith.constant 0 : index
    %6 = vector.load %arg5[%c0_5, %c0_6, %c0_7] : memref<1x8x512xbf16, #tpu.memory_space<vmem>>, vector<1x8x512xbf16>
    %7 = vector.shape_cast %6 : vector<1x8x512xbf16> to vector<8x512xbf16>
    %cst = arith.constant dense<0.000000e+00> : vector<2x512xf32>
    %8 = tpu.matmul %5, %7, %cst {dimension_numbers = #tpu.dot_dimension_numbers<[1], [0], [0], [1], [0, 0, 1, 1], [], []>} : vector<2x8xbf16>, vector<8x512xbf16>, vector<2x512xf32> -> vector<2x512xf32>
    %9 = arith.addf %3, %8 : vector<2x512xf32>
    %c0_8 = arith.constant 0 : index
    %c0_9 = arith.constant 0 : index
    %10 = vector.load %arg8[%c0_8, %c0_9] : memref<2x512xf32, #tpu.memory_space<vmem>>, vector<2x512xf32>
    tpu.vector_store %arg8[%c0_8, %c0_9], %9 {strides = array<i32>} : memref<2x512xf32, #tpu.memory_space<vmem>>, vector<2x512xf32>,
    %c0_i32_10 = arith.constant 0 : i32
    %11 = arith.cmpi eq, %arg3, %c0_i32_10 : i32
    %12 = arith.extui %11 : i1 to i32
    %c0_i32_11 = arith.constant 0 : i32
    %13 = arith.cmpi ne, %12, %c0_i32_11 : i32
    scf.if %13 {
      %c0_12 = arith.constant 0 : index
      %c0_13 = arith.constant 0 : index
      %14 = vector.load %arg8[%c0_12, %c0_13] : memref<2x512xf32, #tpu.memory_space<vmem>>, vector<2x512xf32>
      %15 = arith.truncf %14 : vector<2x512xf32> to vector<2x512xbf16>
      %c0_14 = arith.constant 0 : index
      %c0_15 = arith.constant 0 : index
      %c0_16 = arith.constant 0 : index
      %16 = vector.load %arg6[%c0_14, %c0_15, %c0_16] : memref<1x2x512xbf16, #tpu.memory_space<vmem>>, vector<1x2x512xbf16>
      %17 = vector.shape_cast %16 : vector<1x2x512xbf16> to vector<2x512xbf16>
      %18 = vector.shape_cast %15 : vector<2x512xbf16> to vector<1x2x512xbf16>
      tpu.vector_store %arg6[%c0_14, %c0_15, %c0_16], %18 {strides = array<i32>} : memref<1x2x512xbf16, #tpu.memory_space<vmem>>, vector<1x2x512xbf16>,
      %cst_17 = arith.constant dense<0.000000e+00> : vector<512xf32>
      %19 = vector.multi_reduction <add>, %14, %cst_17 [0] : vector<2x512xf32> to vector<512xf32>
      %20 = vector.shape_cast %19 : vector<512xf32> to vector<1x512xf32>
      %c0_18 = arith.constant 0 : index
      %c0_19 = arith.constant 0 : index
      %c0_20 = arith.constant 0 : index
      %c0_21 = arith.constant 0 : index
      %21 = vector.load %arg7[%c0_18, %c0_19, %c0_20, %c0_21] : memref<1x1x2x512xf32, #tpu.memory_space<vmem>>, vector<1x1x1x512xf32>
      %22 = vector.shape_cast %21 : vector<1x1x1x512xf32> to vector<1x512xf32>
      %23 = vector.shape_cast %20 : vector<1x512xf32> to vector<1x1x1x512xf32>
      tpu.vector_store %arg7[%c0_18, %c0_19, %c0_20, %c0_21], %23 {strides = array<i32>} : memref<1x1x2x512xf32, #tpu.memory_space<vmem>>, vector<1x1x1x512xf32>,
      %24 = arith.mulf %14, %14 : vector<2x512xf32>
      %cst_22 = arith.constant dense<0.000000e+00> : vector<512xf32>
      %25 = vector.multi_reduction <add>, %24, %cst_22 [0] : vector<2x512xf32> to vector<512xf32>
      %26 = vector.shape_cast %25 : vector<512xf32> to vector<1x512xf32>
      %c0_23 = arith.constant 0 : index
      %c0_24 = arith.constant 0 : index
      %c1 = arith.constant 1 : index
      %c0_25 = arith.constant 0 : index
      %27 = vector.load %arg7[%c0_23, %c0_24, %c1, %c0_25] : memref<1x1x2x512xf32, #tpu.memory_space<vmem>>, vector<1x1x1x512xf32>
      %28 = vector.shape_cast %27 : vector<1x1x1x512xf32> to vector<1x512xf32>
      %29 = vector.shape_cast %26 : vector<1x512xf32> to vector<1x1x1x512xf32>
      tpu.vector_store %arg7[%c0_23, %c0_24, %c1, %c0_25], %29 {strides = array<i32>} : memref<1x1x2x512xf32, #tpu.memory_space<vmem>>, vector<1x1x1x512xf32>,
    } else {
    }
    return
  }
  func.func @transform_0(%arg0: i32, %arg1: i32, %arg2: i32, %arg3: i32) -> (i32, i32, i32) {
    %c0_i32 = arith.constant 0 : i32
    return %arg0, %arg1, %arg3 : i32, i32, i32
  }
  func.func @transform_1(%arg0: i32, %arg1: i32, %arg2: i32, %arg3: i32) -> (i32, i32, i32) {
    %c0_i32 = arith.constant 0 : i32
    return %arg0, %arg3, %arg2 : i32, i32, i32
  }
  func.func @transform_2(%arg0: i32, %arg1: i32, %arg2: i32, %arg3: i32) -> (i32, i32, i32) {
    %c0_i32 = arith.constant 0 : i32
    return %arg0, %arg1, %arg2 : i32, i32, i32
  }
  func.func @transform_3(%arg0: i32, %arg1: i32, %arg2: i32, %arg3: i32) -> (i32, i32, i32, i32) {
    %c0_i32 = arith.constant 0 : i32
    %c0_i32_0 = arith.constant 0 : i32
    return %arg0, %arg1, %c0_i32, %arg2 : i32, i32, i32, i32
  }
}

module attributes {stable_mosaic.version = 11 : i64} {
  func.func @kernel(%arg0: i32, %arg1: i32, %arg2: i32, %arg3: i32, %arg4: memref<1x32x128xbf16, #tpu.memory_space<vmem>>, %arg5: memref<1x128x128xbf16, #tpu.memory_space<vmem>>, %arg6: memref<1x32x128xbf16, #tpu.memory_space<vmem>>, %arg7: memref<1x1x2x128xf32, #tpu.memory_space<vmem>>, %arg8: memref<32x128xf32, #tpu.memory_space<vmem>>) attributes {dimension_semantics = [#tpu.dimension_semantics<parallel>, #tpu.dimension_semantics<parallel>, #tpu.dimension_semantics<parallel>, #tpu.dimension_semantics<arbitrary>], iteration_bounds = array<i64: 4, 1, 1, 1>, scalar_prefetch = 0 : i64, scratch_operands = 1 : i64, tpu.core_type = #tpu.core_type<tc>, window_params = [{transform_indices = @transform_0, window_bounds = array<i64: 1, 32, 128>}, {transform_indices = @transform_1, window_bounds = array<i64: 1, 128, 128>}, {transform_indices = @transform_2, window_bounds = array<i64: 1, 32, 128>}, {transform_indices = @transform_3, window_bounds = array<i64: 1, 1, 2, 128>}]} {
    %c0_i32 = arith.constant 0 : i32
    %0 = arith.cmpi eq, %arg3, %c0_i32 : i32
    %1 = arith.extui %0 : i1 to i32
    %c0_i32_0 = arith.constant 0 : i32
    %2 = arith.cmpi ne, %1, %c0_i32_0 : i32
    scf.if %2 {
      %cst_12 = arith.constant 0.000000e+00 : f32
      %14 = vector.broadcast %cst_12 : f32 to vector<32x128xf32>
      %c0_13 = arith.constant 0 : index
      %c0_14 = arith.constant 0 : index
      %15 = vector.load %arg8[%c0_13, %c0_14] : memref<32x128xf32, #tpu.memory_space<vmem>>, vector<32x128xf32>
      tpu.vector_store %arg8[%c0_13, %c0_14], %14 {strides = array<i32>} : memref<32x128xf32, #tpu.memory_space<vmem>>, vector<32x128xf32>,
    } else {
    }
    %c0 = arith.constant 0 : index
    %c0_1 = arith.constant 0 : index
    %3 = vector.load %arg8[%c0, %c0_1] : memref<32x128xf32, #tpu.memory_space<vmem>>, vector<32x128xf32>
    %c0_2 = arith.constant 0 : index
    %c0_3 = arith.constant 0 : index
    %c0_4 = arith.constant 0 : index
    %4 = vector.load %arg4[%c0_2, %c0_3, %c0_4] : memref<1x32x128xbf16, #tpu.memory_space<vmem>>, vector<1x32x128xbf16>
    %5 = vector.shape_cast %4 : vector<1x32x128xbf16> to vector<32x128xbf16>
    %c0_5 = arith.constant 0 : index
    %c0_6 = arith.constant 0 : index
    %c0_7 = arith.constant 0 : index
    %6 = vector.load %arg5[%c0_5, %c0_6, %c0_7] : memref<1x128x128xbf16, #tpu.memory_space<vmem>>, vector<1x128x128xbf16>
    %7 = vector.shape_cast %6 : vector<1x128x128xbf16> to vector<128x128xbf16>
    %cst = arith.constant dense<0.000000e+00> : vector<32x128xf32>
    %8 = tpu.matmul %5, %7, %cst {dimension_numbers = #tpu.dot_dimension_numbers<[1], [0], [0], [1], [0, 0, 1, 1], [], []>} : vector<32x128xbf16>, vector<128x128xbf16>, vector<32x128xf32> -> vector<32x128xf32>
    %9 = arith.addf %3, %8 : vector<32x128xf32>
    %c0_8 = arith.constant 0 : index
    %c0_9 = arith.constant 0 : index
    %10 = vector.load %arg8[%c0_8, %c0_9] : memref<32x128xf32, #tpu.memory_space<vmem>>, vector<32x128xf32>
    tpu.vector_store %arg8[%c0_8, %c0_9], %9 {strides = array<i32>} : memref<32x128xf32, #tpu.memory_space<vmem>>, vector<32x128xf32>,
    %c0_i32_10 = arith.constant 0 : i32
    %11 = arith.cmpi eq, %arg3, %c0_i32_10 : i32
    %12 = arith.extui %11 : i1 to i32
    %c0_i32_11 = arith.constant 0 : i32
    %13 = arith.cmpi ne, %12, %c0_i32_11 : i32
    scf.if %13 {
      %c0_12 = arith.constant 0 : index
      %c0_13 = arith.constant 0 : index
      %14 = vector.load %arg8[%c0_12, %c0_13] : memref<32x128xf32, #tpu.memory_space<vmem>>, vector<32x128xf32>
      %15 = arith.truncf %14 : vector<32x128xf32> to vector<32x128xbf16>
      %c0_14 = arith.constant 0 : index
      %c0_15 = arith.constant 0 : index
      %c0_16 = arith.constant 0 : index
      %16 = vector.load %arg6[%c0_14, %c0_15, %c0_16] : memref<1x32x128xbf16, #tpu.memory_space<vmem>>, vector<1x32x128xbf16>
      %17 = vector.shape_cast %16 : vector<1x32x128xbf16> to vector<32x128xbf16>
      %18 = vector.shape_cast %15 : vector<32x128xbf16> to vector<1x32x128xbf16>
      tpu.vector_store %arg6[%c0_14, %c0_15, %c0_16], %18 {strides = array<i32>} : memref<1x32x128xbf16, #tpu.memory_space<vmem>>, vector<1x32x128xbf16>,
      %cst_17 = arith.constant dense<0.000000e+00> : vector<128xf32>
      %19 = vector.multi_reduction <add>, %14, %cst_17 [0] : vector<32x128xf32> to vector<128xf32>
      %20 = vector.shape_cast %19 : vector<128xf32> to vector<1x128xf32>
      %c0_18 = arith.constant 0 : index
      %c0_19 = arith.constant 0 : index
      %c0_20 = arith.constant 0 : index
      %c0_21 = arith.constant 0 : index
      %21 = vector.load %arg7[%c0_18, %c0_19, %c0_20, %c0_21] : memref<1x1x2x128xf32, #tpu.memory_space<vmem>>, vector<1x1x1x128xf32>
      %22 = vector.shape_cast %21 : vector<1x1x1x128xf32> to vector<1x128xf32>
      %23 = vector.shape_cast %20 : vector<1x128xf32> to vector<1x1x1x128xf32>
      tpu.vector_store %arg7[%c0_18, %c0_19, %c0_20, %c0_21], %23 {strides = array<i32>} : memref<1x1x2x128xf32, #tpu.memory_space<vmem>>, vector<1x1x1x128xf32>,
      %24 = arith.mulf %14, %14 : vector<32x128xf32>
      %cst_22 = arith.constant dense<0.000000e+00> : vector<128xf32>
      %25 = vector.multi_reduction <add>, %24, %cst_22 [0] : vector<32x128xf32> to vector<128xf32>
      %26 = vector.shape_cast %25 : vector<128xf32> to vector<1x128xf32>
      %c0_23 = arith.constant 0 : index
      %c0_24 = arith.constant 0 : index
      %c1 = arith.constant 1 : index
      %c0_25 = arith.constant 0 : index
      %27 = vector.load %arg7[%c0_23, %c0_24, %c1, %c0_25] : memref<1x1x2x128xf32, #tpu.memory_space<vmem>>, vector<1x1x1x128xf32>
      %28 = vector.shape_cast %27 : vector<1x1x1x128xf32> to vector<1x128xf32>
      %29 = vector.shape_cast %26 : vector<1x128xf32> to vector<1x1x1x128xf32>
      tpu.vector_store %arg7[%c0_23, %c0_24, %c1, %c0_25], %29 {strides = array<i32>} : memref<1x1x2x128xf32, #tpu.memory_space<vmem>>, vector<1x1x1x128xf32>,
    } else {
    }
    return
  }
  func.func @transform_0(%arg0: i32, %arg1: i32, %arg2: i32, %arg3: i32) -> (i32, i32, i32) {
    %c0_i32 = arith.constant 0 : i32
    return %arg0, %arg1, %arg3 : i32, i32, i32
  }
  func.func @transform_1(%arg0: i32, %arg1: i32, %arg2: i32, %arg3: i32) -> (i32, i32, i32) {
    %c0_i32 = arith.constant 0 : i32
    return %arg0, %arg3, %arg2 : i32, i32, i32
  }
  func.func @transform_2(%arg0: i32, %arg1: i32, %arg2: i32, %arg3: i32) -> (i32, i32, i32) {
    %c0_i32 = arith.constant 0 : i32
    return %arg0, %arg1, %arg2 : i32, i32, i32
  }
  func.func @transform_3(%arg0: i32, %arg1: i32, %arg2: i32, %arg3: i32) -> (i32, i32, i32, i32) {
    %c0_i32 = arith.constant 0 : i32
    %c0_i32_0 = arith.constant 0 : i32
    return %arg0, %arg1, %c0_i32, %arg2 : i32, i32, i32, i32
  }
}

module attributes {stable_mosaic.version = 11 : i64} {
  func.func @_bn_relu_kernel(%arg0: i32, %arg1: memref<128x128xbf16, #tpu.memory_space<vmem>>, %arg2: memref<1x128xf32, #tpu.memory_space<vmem>>, %arg3: memref<1x128xf32, #tpu.memory_space<vmem>>, %arg4: memref<128x128xbf16, #tpu.memory_space<vmem>>) attributes {dimension_semantics = [#tpu.dimension_semantics<parallel>], iteration_bounds = array<i64: 1>, scalar_prefetch = 0 : i64, scratch_operands = 0 : i64, tpu.core_type = #tpu.core_type<tc>, window_params = [{transform_indices = @transform_0, window_bounds = array<i64: 128, 128>}, {pipeline_mode = #tpu.pipeline_mode<synchronous>, transform_indices = @transform_1, window_bounds = array<i64: 1, 128>}, {pipeline_mode = #tpu.pipeline_mode<synchronous>, transform_indices = @transform_2, window_bounds = array<i64: 1, 128>}, {transform_indices = @transform_3, window_bounds = array<i64: 128, 128>}]} {
    %c0 = arith.constant 0 : index
    %c0_0 = arith.constant 0 : index
    %0 = vector.load %arg1[%c0, %c0_0] : memref<128x128xbf16, #tpu.memory_space<vmem>>, vector<128x128xbf16>
    %1 = arith.extf %0 : vector<128x128xbf16> to vector<128x128xf32>
    %c0_1 = arith.constant 0 : index
    %c0_2 = arith.constant 0 : index
    %2 = vector.load %arg2[%c0_1, %c0_2] : memref<1x128xf32, #tpu.memory_space<vmem>>, vector<1x128xf32>
    %3 = vector.broadcast %2 : vector<1x128xf32> to vector<128x128xf32>
    %4 = arith.mulf %1, %3 : vector<128x128xf32>
    %c0_3 = arith.constant 0 : index
    %c0_4 = arith.constant 0 : index
    %5 = vector.load %arg3[%c0_3, %c0_4] : memref<1x128xf32, #tpu.memory_space<vmem>>, vector<1x128xf32>
    %6 = vector.broadcast %5 : vector<1x128xf32> to vector<128x128xf32>
    %7 = arith.addf %4, %6 : vector<128x128xf32>
    %cst = arith.constant 0.000000e+00 : f32
    %8 = vector.broadcast %cst : f32 to vector<128x128xf32>
    %9 = arith.maximumf %7, %8 : vector<128x128xf32>
    %10 = arith.truncf %9 : vector<128x128xf32> to vector<128x128xbf16>
    %c0_5 = arith.constant 0 : index
    %c0_6 = arith.constant 0 : index
    %11 = vector.load %arg4[%c0_5, %c0_6] : memref<128x128xbf16, #tpu.memory_space<vmem>>, vector<128x128xbf16>
    tpu.vector_store %arg4[%c0_5, %c0_6], %10 {strides = array<i32>} : memref<128x128xbf16, #tpu.memory_space<vmem>>, vector<128x128xbf16>,
    return
  }
  func.func @transform_0(%arg0: i32) -> (i32, i32) {
    %c0_i32 = arith.constant 0 : i32
    %c0_i32_0 = arith.constant 0 : i32
    return %arg0, %c0_i32 : i32, i32
  }
  func.func @transform_1(%arg0: i32) -> (i32, i32) {
    %c0_i32 = arith.constant 0 : i32
    %c0_i32_0 = arith.constant 0 : i32
    %c0_i32_1 = arith.constant 0 : i32
    return %c0_i32, %c0_i32_0 : i32, i32
  }
  func.func @transform_2(%arg0: i32) -> (i32, i32) {
    %c0_i32 = arith.constant 0 : i32
    %c0_i32_0 = arith.constant 0 : i32
    %c0_i32_1 = arith.constant 0 : i32
    return %c0_i32, %c0_i32_0 : i32, i32
  }
  func.func @transform_3(%arg0: i32) -> (i32, i32) {
    %c0_i32 = arith.constant 0 : i32
    %c0_i32_0 = arith.constant 0 : i32
    return %arg0, %c0_i32 : i32, i32
  }
}

module attributes {stable_mosaic.version = 11 : i64} {
  func.func @kernel(%arg0: i32, %arg1: i32, %arg2: i32, %arg3: i32, %arg4: memref<1x128x64xbf16, #tpu.memory_space<vmem>>, %arg5: memref<1x64x128xbf16, #tpu.memory_space<vmem>>, %arg6: memref<1x128x128xbf16, #tpu.memory_space<vmem>>, %arg7: memref<1x1x2x128xf32, #tpu.memory_space<vmem>>, %arg8: memref<128x128xf32, #tpu.memory_space<vmem>>) attributes {dimension_semantics = [#tpu.dimension_semantics<parallel>, #tpu.dimension_semantics<parallel>, #tpu.dimension_semantics<parallel>, #tpu.dimension_semantics<arbitrary>], iteration_bounds = array<i64: 4, 1, 1, 1>, scalar_prefetch = 0 : i64, scratch_operands = 1 : i64, tpu.core_type = #tpu.core_type<tc>, window_params = [{transform_indices = @transform_0, window_bounds = array<i64: 1, 128, 64>}, {transform_indices = @transform_1, window_bounds = array<i64: 1, 64, 128>}, {transform_indices = @transform_2, window_bounds = array<i64: 1, 128, 128>}, {transform_indices = @transform_3, window_bounds = array<i64: 1, 1, 2, 128>}]} {
    %c0_i32 = arith.constant 0 : i32
    %0 = arith.cmpi eq, %arg3, %c0_i32 : i32
    %1 = arith.extui %0 : i1 to i32
    %c0_i32_0 = arith.constant 0 : i32
    %2 = arith.cmpi ne, %1, %c0_i32_0 : i32
    scf.if %2 {
      %cst_12 = arith.constant 0.000000e+00 : f32
      %14 = vector.broadcast %cst_12 : f32 to vector<128x128xf32>
      %c0_13 = arith.constant 0 : index
      %c0_14 = arith.constant 0 : index
      %15 = vector.load %arg8[%c0_13, %c0_14] : memref<128x128xf32, #tpu.memory_space<vmem>>, vector<128x128xf32>
      tpu.vector_store %arg8[%c0_13, %c0_14], %14 {strides = array<i32>} : memref<128x128xf32, #tpu.memory_space<vmem>>, vector<128x128xf32>,
    } else {
    }
    %c0 = arith.constant 0 : index
    %c0_1 = arith.constant 0 : index
    %3 = vector.load %arg8[%c0, %c0_1] : memref<128x128xf32, #tpu.memory_space<vmem>>, vector<128x128xf32>
    %c0_2 = arith.constant 0 : index
    %c0_3 = arith.constant 0 : index
    %c0_4 = arith.constant 0 : index
    %4 = vector.load %arg4[%c0_2, %c0_3, %c0_4] : memref<1x128x64xbf16, #tpu.memory_space<vmem>>, vector<1x128x64xbf16>
    %5 = vector.shape_cast %4 : vector<1x128x64xbf16> to vector<128x64xbf16>
    %c0_5 = arith.constant 0 : index
    %c0_6 = arith.constant 0 : index
    %c0_7 = arith.constant 0 : index
    %6 = vector.load %arg5[%c0_5, %c0_6, %c0_7] : memref<1x64x128xbf16, #tpu.memory_space<vmem>>, vector<1x64x128xbf16>
    %7 = vector.shape_cast %6 : vector<1x64x128xbf16> to vector<64x128xbf16>
    %cst = arith.constant dense<0.000000e+00> : vector<128x128xf32>
    %8 = tpu.matmul %5, %7, %cst {dimension_numbers = #tpu.dot_dimension_numbers<[1], [0], [0], [1], [0, 0, 1, 1], [], []>} : vector<128x64xbf16>, vector<64x128xbf16>, vector<128x128xf32> -> vector<128x128xf32>
    %9 = arith.addf %3, %8 : vector<128x128xf32>
    %c0_8 = arith.constant 0 : index
    %c0_9 = arith.constant 0 : index
    %10 = vector.load %arg8[%c0_8, %c0_9] : memref<128x128xf32, #tpu.memory_space<vmem>>, vector<128x128xf32>
    tpu.vector_store %arg8[%c0_8, %c0_9], %9 {strides = array<i32>} : memref<128x128xf32, #tpu.memory_space<vmem>>, vector<128x128xf32>,
    %c0_i32_10 = arith.constant 0 : i32
    %11 = arith.cmpi eq, %arg3, %c0_i32_10 : i32
    %12 = arith.extui %11 : i1 to i32
    %c0_i32_11 = arith.constant 0 : i32
    %13 = arith.cmpi ne, %12, %c0_i32_11 : i32
    scf.if %13 {
      %c0_12 = arith.constant 0 : index
      %c0_13 = arith.constant 0 : index
      %14 = vector.load %arg8[%c0_12, %c0_13] : memref<128x128xf32, #tpu.memory_space<vmem>>, vector<128x128xf32>
      %15 = arith.truncf %14 : vector<128x128xf32> to vector<128x128xbf16>
      %c0_14 = arith.constant 0 : index
      %c0_15 = arith.constant 0 : index
      %c0_16 = arith.constant 0 : index
      %16 = vector.load %arg6[%c0_14, %c0_15, %c0_16] : memref<1x128x128xbf16, #tpu.memory_space<vmem>>, vector<1x128x128xbf16>
      %17 = vector.shape_cast %16 : vector<1x128x128xbf16> to vector<128x128xbf16>
      %18 = vector.shape_cast %15 : vector<128x128xbf16> to vector<1x128x128xbf16>
      tpu.vector_store %arg6[%c0_14, %c0_15, %c0_16], %18 {strides = array<i32>} : memref<1x128x128xbf16, #tpu.memory_space<vmem>>, vector<1x128x128xbf16>,
      %cst_17 = arith.constant dense<0.000000e+00> : vector<128xf32>
      %19 = vector.multi_reduction <add>, %14, %cst_17 [0] : vector<128x128xf32> to vector<128xf32>
      %20 = vector.shape_cast %19 : vector<128xf32> to vector<1x128xf32>
      %c0_18 = arith.constant 0 : index
      %c0_19 = arith.constant 0 : index
      %c0_20 = arith.constant 0 : index
      %c0_21 = arith.constant 0 : index
      %21 = vector.load %arg7[%c0_18, %c0_19, %c0_20, %c0_21] : memref<1x1x2x128xf32, #tpu.memory_space<vmem>>, vector<1x1x1x128xf32>
      %22 = vector.shape_cast %21 : vector<1x1x1x128xf32> to vector<1x128xf32>
      %23 = vector.shape_cast %20 : vector<1x128xf32> to vector<1x1x1x128xf32>
      tpu.vector_store %arg7[%c0_18, %c0_19, %c0_20, %c0_21], %23 {strides = array<i32>} : memref<1x1x2x128xf32, #tpu.memory_space<vmem>>, vector<1x1x1x128xf32>,
      %24 = arith.mulf %14, %14 : vector<128x128xf32>
      %cst_22 = arith.constant dense<0.000000e+00> : vector<128xf32>
      %25 = vector.multi_reduction <add>, %24, %cst_22 [0] : vector<128x128xf32> to vector<128xf32>
      %26 = vector.shape_cast %25 : vector<128xf32> to vector<1x128xf32>
      %c0_23 = arith.constant 0 : index
      %c0_24 = arith.constant 0 : index
      %c1 = arith.constant 1 : index
      %c0_25 = arith.constant 0 : index
      %27 = vector.load %arg7[%c0_23, %c0_24, %c1, %c0_25] : memref<1x1x2x128xf32, #tpu.memory_space<vmem>>, vector<1x1x1x128xf32>
      %28 = vector.shape_cast %27 : vector<1x1x1x128xf32> to vector<1x128xf32>
      %29 = vector.shape_cast %26 : vector<1x128xf32> to vector<1x1x1x128xf32>
      tpu.vector_store %arg7[%c0_23, %c0_24, %c1, %c0_25], %29 {strides = array<i32>} : memref<1x1x2x128xf32, #tpu.memory_space<vmem>>, vector<1x1x1x128xf32>,
    } else {
    }
    return
  }
  func.func @transform_0(%arg0: i32, %arg1: i32, %arg2: i32, %arg3: i32) -> (i32, i32, i32) {
    %c0_i32 = arith.constant 0 : i32
    return %arg0, %arg1, %arg3 : i32, i32, i32
  }
  func.func @transform_1(%arg0: i32, %arg1: i32, %arg2: i32, %arg3: i32) -> (i32, i32, i32) {
    %c0_i32 = arith.constant 0 : i32
    return %arg0, %arg3, %arg2 : i32, i32, i32
  }
  func.func @transform_2(%arg0: i32, %arg1: i32, %arg2: i32, %arg3: i32) -> (i32, i32, i32) {
    %c0_i32 = arith.constant 0 : i32
    return %arg0, %arg1, %arg2 : i32, i32, i32
  }
  func.func @transform_3(%arg0: i32, %arg1: i32, %arg2: i32, %arg3: i32) -> (i32, i32, i32, i32) {
    %c0_i32 = arith.constant 0 : i32
    %c0_i32_0 = arith.constant 0 : i32
    return %arg0, %arg1, %c0_i32, %arg2 : i32, i32, i32, i32
  }
}

module attributes {stable_mosaic.version = 11 : i64} {
  func.func @_bn_relu_kernel(%arg0: i32, %arg1: memref<512x128xbf16, #tpu.memory_space<vmem>>, %arg2: memref<1x128xf32, #tpu.memory_space<vmem>>, %arg3: memref<1x128xf32, #tpu.memory_space<vmem>>, %arg4: memref<512x128xbf16, #tpu.memory_space<vmem>>) attributes {dimension_semantics = [#tpu.dimension_semantics<parallel>], iteration_bounds = array<i64: 1>, scalar_prefetch = 0 : i64, scratch_operands = 0 : i64, tpu.core_type = #tpu.core_type<tc>, window_params = [{transform_indices = @transform_0, window_bounds = array<i64: 512, 128>}, {pipeline_mode = #tpu.pipeline_mode<synchronous>, transform_indices = @transform_1, window_bounds = array<i64: 1, 128>}, {pipeline_mode = #tpu.pipeline_mode<synchronous>, transform_indices = @transform_2, window_bounds = array<i64: 1, 128>}, {transform_indices = @transform_3, window_bounds = array<i64: 512, 128>}]} {
    %c0 = arith.constant 0 : index
    %c0_0 = arith.constant 0 : index
    %0 = vector.load %arg1[%c0, %c0_0] : memref<512x128xbf16, #tpu.memory_space<vmem>>, vector<512x128xbf16>
    %1 = arith.extf %0 : vector<512x128xbf16> to vector<512x128xf32>
    %c0_1 = arith.constant 0 : index
    %c0_2 = arith.constant 0 : index
    %2 = vector.load %arg2[%c0_1, %c0_2] : memref<1x128xf32, #tpu.memory_space<vmem>>, vector<1x128xf32>
    %3 = vector.broadcast %2 : vector<1x128xf32> to vector<512x128xf32>
    %4 = arith.mulf %1, %3 : vector<512x128xf32>
    %c0_3 = arith.constant 0 : index
    %c0_4 = arith.constant 0 : index
    %5 = vector.load %arg3[%c0_3, %c0_4] : memref<1x128xf32, #tpu.memory_space<vmem>>, vector<1x128xf32>
    %6 = vector.broadcast %5 : vector<1x128xf32> to vector<512x128xf32>
    %7 = arith.addf %4, %6 : vector<512x128xf32>
    %cst = arith.constant 0.000000e+00 : f32
    %8 = vector.broadcast %cst : f32 to vector<512x128xf32>
    %9 = arith.maximumf %7, %8 : vector<512x128xf32>
    %10 = arith.truncf %9 : vector<512x128xf32> to vector<512x128xbf16>
    %c0_5 = arith.constant 0 : index
    %c0_6 = arith.constant 0 : index
    %11 = vector.load %arg4[%c0_5, %c0_6] : memref<512x128xbf16, #tpu.memory_space<vmem>>, vector<512x128xbf16>
    tpu.vector_store %arg4[%c0_5, %c0_6], %10 {strides = array<i32>} : memref<512x128xbf16, #tpu.memory_space<vmem>>, vector<512x128xbf16>,
    return
  }
  func.func @transform_0(%arg0: i32) -> (i32, i32) {
    %c0_i32 = arith.constant 0 : i32
    %c0_i32_0 = arith.constant 0 : i32
    return %arg0, %c0_i32 : i32, i32
  }
  func.func @transform_1(%arg0: i32) -> (i32, i32) {
    %c0_i32 = arith.constant 0 : i32
    %c0_i32_0 = arith.constant 0 : i32
    %c0_i32_1 = arith.constant 0 : i32
    return %c0_i32, %c0_i32_0 : i32, i32
  }
  func.func @transform_2(%arg0: i32) -> (i32, i32) {
    %c0_i32 = arith.constant 0 : i32
    %c0_i32_0 = arith.constant 0 : i32
    %c0_i32_1 = arith.constant 0 : i32
    return %c0_i32, %c0_i32_0 : i32, i32
  }
  func.func @transform_3(%arg0: i32) -> (i32, i32) {
    %c0_i32 = arith.constant 0 : i32
    %c0_i32_0 = arith.constant 0 : i32
    return %arg0, %c0_i32 : i32, i32
  }
}

module attributes {stable_mosaic.version = 11 : i64} {
  func.func @kernel(%arg0: i32, %arg1: i32, %arg2: i32, %arg3: i32, %arg4: memref<1x512x8xbf16, #tpu.memory_space<vmem>>, %arg5: memref<1x8x512xbf16, #tpu.memory_space<vmem>>, %arg6: memref<1x512xf32, #tpu.memory_space<vmem>>, %arg7: memref<1x512x512xbf16, #tpu.memory_space<vmem>>, %arg8: memref<512x512xf32, #tpu.memory_space<vmem>>) attributes {dimension_semantics = [#tpu.dimension_semantics<parallel>, #tpu.dimension_semantics<parallel>, #tpu.dimension_semantics<parallel>, #tpu.dimension_semantics<arbitrary>], iteration_bounds = array<i64: 1, 1, 1, 1>, scalar_prefetch = 0 : i64, scratch_operands = 1 : i64, tpu.core_type = #tpu.core_type<tc>, window_params = [{transform_indices = @transform_0, window_bounds = array<i64: 1, 512, 8>}, {transform_indices = @transform_1, window_bounds = array<i64: 1, 8, 512>}, {transform_indices = @transform_2, window_bounds = array<i64: 1, 512>}, {transform_indices = @transform_3, window_bounds = array<i64: 1, 512, 512>}]} {
    %c0_i32 = arith.constant 0 : i32
    %0 = arith.cmpi eq, %arg3, %c0_i32 : i32
    %1 = arith.extui %0 : i1 to i32
    %c0_i32_0 = arith.constant 0 : i32
    %2 = arith.cmpi ne, %1, %c0_i32_0 : i32
    scf.if %2 {
      %cst_12 = arith.constant 0.000000e+00 : f32
      %14 = vector.broadcast %cst_12 : f32 to vector<512x512xf32>
      %c0_13 = arith.constant 0 : index
      %c0_14 = arith.constant 0 : index
      %15 = vector.load %arg8[%c0_13, %c0_14] : memref<512x512xf32, #tpu.memory_space<vmem>>, vector<512x512xf32>
      tpu.vector_store %arg8[%c0_13, %c0_14], %14 {strides = array<i32>} : memref<512x512xf32, #tpu.memory_space<vmem>>, vector<512x512xf32>,
    } else {
    }
    %c0 = arith.constant 0 : index
    %c0_1 = arith.constant 0 : index
    %3 = vector.load %arg8[%c0, %c0_1] : memref<512x512xf32, #tpu.memory_space<vmem>>, vector<512x512xf32>
    %c0_2 = arith.constant 0 : index
    %c0_3 = arith.constant 0 : index
    %c0_4 = arith.constant 0 : index
    %4 = vector.load %arg4[%c0_2, %c0_3, %c0_4] : memref<1x512x8xbf16, #tpu.memory_space<vmem>>, vector<1x512x8xbf16>
    %5 = vector.shape_cast %4 : vector<1x512x8xbf16> to vector<512x8xbf16>
    %c0_5 = arith.constant 0 : index
    %c0_6 = arith.constant 0 : index
    %c0_7 = arith.constant 0 : index
    %6 = vector.load %arg5[%c0_5, %c0_6, %c0_7] : memref<1x8x512xbf16, #tpu.memory_space<vmem>>, vector<1x8x512xbf16>
    %7 = vector.shape_cast %6 : vector<1x8x512xbf16> to vector<8x512xbf16>
    %cst = arith.constant dense<0.000000e+00> : vector<512x512xf32>
    %8 = tpu.matmul %5, %7, %cst {dimension_numbers = #tpu.dot_dimension_numbers<[1], [0], [0], [1], [0, 0, 1, 1], [], []>} : vector<512x8xbf16>, vector<8x512xbf16>, vector<512x512xf32> -> vector<512x512xf32>
    %9 = arith.addf %3, %8 : vector<512x512xf32>
    %c0_8 = arith.constant 0 : index
    %c0_9 = arith.constant 0 : index
    %10 = vector.load %arg8[%c0_8, %c0_9] : memref<512x512xf32, #tpu.memory_space<vmem>>, vector<512x512xf32>
    tpu.vector_store %arg8[%c0_8, %c0_9], %9 {strides = array<i32>} : memref<512x512xf32, #tpu.memory_space<vmem>>, vector<512x512xf32>,
    %c0_i32_10 = arith.constant 0 : i32
    %11 = arith.cmpi eq, %arg3, %c0_i32_10 : i32
    %12 = arith.extui %11 : i1 to i32
    %c0_i32_11 = arith.constant 0 : i32
    %13 = arith.cmpi ne, %12, %c0_i32_11 : i32
    scf.if %13 {
      %c0_12 = arith.constant 0 : index
      %c0_13 = arith.constant 0 : index
      %14 = vector.load %arg8[%c0_12, %c0_13] : memref<512x512xf32, #tpu.memory_space<vmem>>, vector<512x512xf32>
      %c0_14 = arith.constant 0 : index
      %c0_15 = arith.constant 0 : index
      %15 = vector.load %arg6[%c0_14, %c0_15] : memref<1x512xf32, #tpu.memory_space<vmem>>, vector<1x512xf32>
      %16 = vector.broadcast %15 : vector<1x512xf32> to vector<512x512xf32>
      %17 = arith.addf %14, %16 : vector<512x512xf32>
      %18 = arith.truncf %17 : vector<512x512xf32> to vector<512x512xbf16>
      %c0_16 = arith.constant 0 : index
      %c0_17 = arith.constant 0 : index
      %c0_18 = arith.constant 0 : index
      %19 = vector.load %arg7[%c0_16, %c0_17, %c0_18] : memref<1x512x512xbf16, #tpu.memory_space<vmem>>, vector<1x512x512xbf16>
      %20 = vector.shape_cast %19 : vector<1x512x512xbf16> to vector<512x512xbf16>
      %21 = vector.shape_cast %18 : vector<512x512xbf16> to vector<1x512x512xbf16>
      tpu.vector_store %arg7[%c0_16, %c0_17, %c0_18], %21 {strides = array<i32>} : memref<1x512x512xbf16, #tpu.memory_space<vmem>>, vector<1x512x512xbf16>,
    } else {
    }
    return
  }
  func.func @transform_0(%arg0: i32, %arg1: i32, %arg2: i32, %arg3: i32) -> (i32, i32, i32) {
    %c0_i32 = arith.constant 0 : i32
    return %arg0, %arg1, %arg3 : i32, i32, i32
  }
  func.func @transform_1(%arg0: i32, %arg1: i32, %arg2: i32, %arg3: i32) -> (i32, i32, i32) {
    %c0_i32 = arith.constant 0 : i32
    return %arg0, %arg3, %arg2 : i32, i32, i32
  }
  func.func @transform_2(%arg0: i32, %arg1: i32, %arg2: i32, %arg3: i32) -> (i32, i32) {
    %c0_i32 = arith.constant 0 : i32
    %c0_i32_0 = arith.constant 0 : i32
    return %c0_i32, %arg2 : i32, i32
  }
  func.func @transform_3(%arg0: i32, %arg1: i32, %arg2: i32, %arg3: i32) -> (i32, i32, i32) {
    %c0_i32 = arith.constant 0 : i32
    return %arg0, %arg1, %arg2 : i32, i32, i32
  }
}

module attributes {stable_mosaic.version = 11 : i64} {
  func.func @_attn_kernel(%arg0: i32, %arg1: i32, %arg2: i32, %arg3: memref<1x256x128xbf16, #tpu.memory_space<vmem>>, %arg4: memref<1x256x128xbf16, #tpu.memory_space<vmem>>, %arg5: memref<1x256x128xbf16, #tpu.memory_space<vmem>>, %arg6: memref<1x256x128xbf16, #tpu.memory_space<vmem>>, %arg7: memref<1x1xf32, #tpu.memory_space<smem>>, %arg8: memref<1x256x128xbf16, #tpu.memory_space<vmem>>, %arg9: memref<256x1xf32, #tpu.memory_space<vmem>>, %arg10: memref<256x1xf32, #tpu.memory_space<vmem>>, %arg11: memref<256x128xf32, #tpu.memory_space<vmem>>) attributes {dimension_semantics = [#tpu.dimension_semantics<parallel>, #tpu.dimension_semantics<parallel>, #tpu.dimension_semantics<arbitrary>], iteration_bounds = array<i64: 2, 1, 1>, scalar_prefetch = 0 : i64, scratch_operands = 3 : i64, tpu.core_type = #tpu.core_type<tc>, window_params = [{transform_indices = @transform_0, window_bounds = array<i64: 1, 256, 128>}, {transform_indices = @transform_1, window_bounds = array<i64: 1, 256, 128>}, {transform_indices = @transform_2, window_bounds = array<i64: 1, 256, 128>}, {transform_indices = @transform_3, window_bounds = array<i64: 1, 256, 128>}, {transform_indices = @transform_4, window_bounds = array<i64: 1, 1>}, {transform_indices = @transform_5, window_bounds = array<i64: 1, 256, 128>}]} {
    %c0_i32 = arith.constant 0 : i32
    %0 = arith.cmpi eq, %arg2, %c0_i32 : i32
    %1 = arith.extui %0 : i1 to i32
    %c0_i32_0 = arith.constant 0 : i32
    %2 = arith.cmpi ne, %1, %c0_i32_0 : i32
    scf.if %2 {
      %cst_26 = arith.constant 0xFF800000 : f32
      %36 = vector.broadcast %cst_26 : f32 to vector<256x1xf32>
      %c0_27 = arith.constant 0 : index
      %c0_28 = arith.constant 0 : index
      %37 = vector.load %arg9[%c0_27, %c0_28] : memref<256x1xf32, #tpu.memory_space<vmem>>, vector<256x1xf32>
      tpu.vector_store %arg9[%c0_27, %c0_28], %36 {strides = array<i32>} : memref<256x1xf32, #tpu.memory_space<vmem>>, vector<256x1xf32>,
      %cst_29 = arith.constant 0.000000e+00 : f32
      %38 = vector.broadcast %cst_29 : f32 to vector<256x1xf32>
      %c0_30 = arith.constant 0 : index
      %c0_31 = arith.constant 0 : index
      %39 = vector.load %arg10[%c0_30, %c0_31] : memref<256x1xf32, #tpu.memory_space<vmem>>, vector<256x1xf32>
      tpu.vector_store %arg10[%c0_30, %c0_31], %38 {strides = array<i32>} : memref<256x1xf32, #tpu.memory_space<vmem>>, vector<256x1xf32>,
      %cst_32 = arith.constant 0.000000e+00 : f32
      %40 = vector.broadcast %cst_32 : f32 to vector<256x128xf32>
      %c0_33 = arith.constant 0 : index
      %c0_34 = arith.constant 0 : index
      %41 = vector.load %arg11[%c0_33, %c0_34] : memref<256x128xf32, #tpu.memory_space<vmem>>, vector<256x128xf32>
      tpu.vector_store %arg11[%c0_33, %c0_34], %40 {strides = array<i32>} : memref<256x128xf32, #tpu.memory_space<vmem>>, vector<256x128xf32>,
    } else {
    }
    %c0 = arith.constant 0 : index
    %c0_1 = arith.constant 0 : index
    %c0_2 = arith.constant 0 : index
    %3 = vector.load %arg4[%c0, %c0_1, %c0_2] : memref<1x256x128xbf16, #tpu.memory_space<vmem>>, vector<1x256x128xbf16>
    %4 = vector.shape_cast %3 : vector<1x256x128xbf16> to vector<256x128xbf16>
    %c0_3 = arith.constant 0 : index
    %c0_4 = arith.constant 0 : index
    %c0_5 = arith.constant 0 : index
    %5 = vector.load %arg5[%c0_3, %c0_4, %c0_5] : memref<1x256x128xbf16, #tpu.memory_space<vmem>>, vector<1x256x128xbf16>
    %6 = vector.shape_cast %5 : vector<1x256x128xbf16> to vector<256x128xbf16>
    %c0_6 = arith.constant 0 : index
    %c0_7 = arith.constant 0 : index
    %c0_8 = arith.constant 0 : index
    %7 = vector.load %arg6[%c0_6, %c0_7, %c0_8] : memref<1x256x128xbf16, #tpu.memory_space<vmem>>, vector<1x256x128xbf16>
    %8 = vector.shape_cast %7 : vector<1x256x128xbf16> to vector<256x128xbf16>
    %cst = arith.constant dense<0.000000e+00> : vector<256x256xf32>
    %9 = tpu.matmul %4, %6, %cst {dimension_numbers = #tpu.dot_dimension_numbers<[1], [1], [0], [0], [0, 0, 1, 0], [], []>} : vector<256x128xbf16>, vector<256x128xbf16>, vector<256x256xf32> -> vector<256x256xf32>
    %c0_9 = arith.constant 0 : index
    %c0_10 = arith.constant 0 : index
    %10 = vector.load %arg9[%c0_9, %c0_10] : memref<256x1xf32, #tpu.memory_space<vmem>>, vector<256x1xf32>
    %cst_11 = arith.constant dense<0xFF800000> : vector<256xf32>
    %11 = vector.multi_reduction <maximumf>, %9, %cst_11 [1] : vector<256x256xf32> to vector<256xf32>
    %12 = vector.shape_cast %11 : vector<256xf32> to vector<256x1xf32>
    %13 = arith.maximumf %10, %12 : vector<256x1xf32>
    %14 = arith.subf %10, %13 : vector<256x1xf32>
    %15 = math.exp %14 : vector<256x1xf32>
    %16 = vector.broadcast %13 : vector<256x1xf32> to vector<256x256xf32>
    %17 = arith.subf %9, %16 : vector<256x256xf32>
    %18 = math.exp %17 : vector<256x256xf32>
    %c0_12 = arith.constant 0 : index
    %c0_13 = arith.constant 0 : index
    %19 = vector.load %arg10[%c0_12, %c0_13] : memref<256x1xf32, #tpu.memory_space<vmem>>, vector<256x1xf32>
    %20 = arith.mulf %15, %19 : vector<256x1xf32>
    %cst_14 = arith.constant dense<0.000000e+00> : vector<256xf32>
    %21 = vector.multi_reduction <add>, %18, %cst_14 [1] : vector<256x256xf32> to vector<256xf32>
    %22 = vector.shape_cast %21 : vector<256xf32> to vector<256x1xf32>
    %23 = arith.addf %20, %22 : vector<256x1xf32>
    %c0_15 = arith.constant 0 : index
    %c0_16 = arith.constant 0 : index
    %24 = vector.load %arg10[%c0_15, %c0_16] : memref<256x1xf32, #tpu.memory_space<vmem>>, vector<256x1xf32>
    tpu.vector_store %arg10[%c0_15, %c0_16], %23 {strides = array<i32>} : memref<256x1xf32, #tpu.memory_space<vmem>>, vector<256x1xf32>,
    %c0_17 = arith.constant 0 : index
    %c0_18 = arith.constant 0 : index
    %25 = vector.load %arg11[%c0_17, %c0_18] : memref<256x128xf32, #tpu.memory_space<vmem>>, vector<256x128xf32>
    %26 = vector.broadcast %15 : vector<256x1xf32> to vector<256x128xf32>
    %27 = arith.mulf %26, %25 : vector<256x128xf32>
    %28 = arith.truncf %18 : vector<256x256xf32> to vector<256x256xbf16>
    %cst_19 = arith.constant dense<0.000000e+00> : vector<256x128xf32>
    %29 = tpu.matmul %28, %8, %cst_19 {dimension_numbers = #tpu.dot_dimension_numbers<[1], [0], [0], [1], [0, 0, 1, 1], [], []>} : vector<256x256xbf16>, vector<256x128xbf16>, vector<256x128xf32> -> vector<256x128xf32>
    %30 = arith.addf %27, %29 : vector<256x128xf32>
    %c0_20 = arith.constant 0 : index
    %c0_21 = arith.constant 0 : index
    %31 = vector.load %arg11[%c0_20, %c0_21] : memref<256x128xf32, #tpu.memory_space<vmem>>, vector<256x128xf32>
    tpu.vector_store %arg11[%c0_20, %c0_21], %30 {strides = array<i32>} : memref<256x128xf32, #tpu.memory_space<vmem>>, vector<256x128xf32>,
    %c0_22 = arith.constant 0 : index
    %c0_23 = arith.constant 0 : index
    %32 = vector.load %arg9[%c0_22, %c0_23] : memref<256x1xf32, #tpu.memory_space<vmem>>, vector<256x1xf32>
    tpu.vector_store %arg9[%c0_22, %c0_23], %13 {strides = array<i32>} : memref<256x1xf32, #tpu.memory_space<vmem>>, vector<256x1xf32>,
    %c0_i32_24 = arith.constant 0 : i32
    %33 = arith.cmpi eq, %arg2, %c0_i32_24 : i32
    %34 = arith.extui %33 : i1 to i32
    %c0_i32_25 = arith.constant 0 : i32
    %35 = arith.cmpi ne, %34, %c0_i32_25 : i32
    scf.if %35 {
      %c0_26 = arith.constant 0 : index
      %c0_27 = arith.constant 0 : index
      %36 = vector.load %arg11[%c0_26, %c0_27] : memref<256x128xf32, #tpu.memory_space<vmem>>, vector<256x128xf32>
      %c0_28 = arith.constant 0 : index
      %c0_29 = arith.constant 0 : index
      %37 = vector.load %arg10[%c0_28, %c0_29] : memref<256x1xf32, #tpu.memory_space<vmem>>, vector<256x1xf32>
      %38 = vector.broadcast %37 : vector<256x1xf32> to vector<256x128xf32>
      %39 = arith.divf %36, %38 : vector<256x128xf32>
      %c0_30 = arith.constant 0 : index
      %c0_31 = arith.constant 0 : index
      %40 = memref.load %arg7[%c0_30, %c0_31] : memref<1x1xf32, #tpu.memory_space<smem>>
      %41 = vector.broadcast %40 : f32 to vector<256x128xf32>
      %42 = arith.mulf %41, %39 : vector<256x128xf32>
      %c0_32 = arith.constant 0 : index
      %c0_33 = arith.constant 0 : index
      %c0_34 = arith.constant 0 : index
      %43 = vector.load %arg3[%c0_32, %c0_33, %c0_34] : memref<1x256x128xbf16, #tpu.memory_space<vmem>>, vector<1x256x128xbf16>
      %44 = vector.shape_cast %43 : vector<1x256x128xbf16> to vector<256x128xbf16>
      %45 = arith.extf %44 : vector<256x128xbf16> to vector<256x128xf32>
      %46 = arith.addf %42, %45 : vector<256x128xf32>
      %47 = arith.truncf %46 : vector<256x128xf32> to vector<256x128xbf16>
      %c0_35 = arith.constant 0 : index
      %c0_36 = arith.constant 0 : index
      %c0_37 = arith.constant 0 : index
      %48 = vector.load %arg8[%c0_35, %c0_36, %c0_37] : memref<1x256x128xbf16, #tpu.memory_space<vmem>>, vector<1x256x128xbf16>
      %49 = vector.shape_cast %48 : vector<1x256x128xbf16> to vector<256x128xbf16>
      %50 = vector.shape_cast %47 : vector<256x128xbf16> to vector<1x256x128xbf16>
      tpu.vector_store %arg8[%c0_35, %c0_36, %c0_37], %50 {strides = array<i32>} : memref<1x256x128xbf16, #tpu.memory_space<vmem>>, vector<1x256x128xbf16>,
    } else {
    }
    return
  }
  func.func @transform_0(%arg0: i32, %arg1: i32, %arg2: i32) -> (i32, i32, i32) {
    %c1_i32 = arith.constant 1 : i32
    %c0_i32 = arith.constant 0 : i32
    return %arg0, %arg1, %c1_i32 : i32, i32, i32
  }
  func.func @transform_1(%arg0: i32, %arg1: i32, %arg2: i32) -> (i32, i32, i32) {
    %c2_i32 = arith.constant 2 : i32
    %c0_i32 = arith.constant 0 : i32
    return %arg0, %arg1, %c2_i32 : i32, i32, i32
  }
  func.func @transform_2(%arg0: i32, %arg1: i32, %arg2: i32) -> (i32, i32, i32) {
    %c3_i32 = arith.constant 3 : i32
    %c0_i32 = arith.constant 0 : i32
    return %arg0, %arg2, %c3_i32 : i32, i32, i32
  }
  func.func @transform_3(%arg0: i32, %arg1: i32, %arg2: i32) -> (i32, i32, i32) {
    %c0_i32 = arith.constant 0 : i32
    %c0_i32_0 = arith.constant 0 : i32
    return %arg0, %arg2, %c0_i32 : i32, i32, i32
  }
  func.func @transform_4(%arg0: i32, %arg1: i32, %arg2: i32) -> (i32, i32) {
    %c0_i32 = arith.constant 0 : i32
    %c0_i32_0 = arith.constant 0 : i32
    %c0_i32_1 = arith.constant 0 : i32
    return %c0_i32, %c0_i32_0 : i32, i32
  }
  func.func @transform_5(%arg0: i32, %arg1: i32, %arg2: i32) -> (i32, i32, i32) {
    %c0_i32 = arith.constant 0 : i32
    %c0_i32_0 = arith.constant 0 : i32
    return %arg0, %arg1, %c0_i32 : i32, i32, i32
  }
}

module attributes {stable_mosaic.version = 11 : i64} {
  func.func @kernel(%arg0: i32, %arg1: i32, %arg2: i32, %arg3: i32, %arg4: memref<1x512x128xbf16, #tpu.memory_space<vmem>>, %arg5: memref<1x128x512xbf16, #tpu.memory_space<vmem>>, %arg6: memref<1x512xf32, #tpu.memory_space<vmem>>, %arg7: memref<1x512x512xbf16, #tpu.memory_space<vmem>>, %arg8: memref<512x512xf32, #tpu.memory_space<vmem>>) attributes {dimension_semantics = [#tpu.dimension_semantics<parallel>, #tpu.dimension_semantics<parallel>, #tpu.dimension_semantics<parallel>, #tpu.dimension_semantics<arbitrary>], iteration_bounds = array<i64: 1, 1, 1, 1>, scalar_prefetch = 0 : i64, scratch_operands = 1 : i64, tpu.core_type = #tpu.core_type<tc>, window_params = [{transform_indices = @transform_0, window_bounds = array<i64: 1, 512, 128>}, {transform_indices = @transform_1, window_bounds = array<i64: 1, 128, 512>}, {transform_indices = @transform_2, window_bounds = array<i64: 1, 512>}, {transform_indices = @transform_3, window_bounds = array<i64: 1, 512, 512>}]} {
    %c0_i32 = arith.constant 0 : i32
    %0 = arith.cmpi eq, %arg3, %c0_i32 : i32
    %1 = arith.extui %0 : i1 to i32
    %c0_i32_0 = arith.constant 0 : i32
    %2 = arith.cmpi ne, %1, %c0_i32_0 : i32
    scf.if %2 {
      %cst_12 = arith.constant 0.000000e+00 : f32
      %14 = vector.broadcast %cst_12 : f32 to vector<512x512xf32>
      %c0_13 = arith.constant 0 : index
      %c0_14 = arith.constant 0 : index
      %15 = vector.load %arg8[%c0_13, %c0_14] : memref<512x512xf32, #tpu.memory_space<vmem>>, vector<512x512xf32>
      tpu.vector_store %arg8[%c0_13, %c0_14], %14 {strides = array<i32>} : memref<512x512xf32, #tpu.memory_space<vmem>>, vector<512x512xf32>,
    } else {
    }
    %c0 = arith.constant 0 : index
    %c0_1 = arith.constant 0 : index
    %3 = vector.load %arg8[%c0, %c0_1] : memref<512x512xf32, #tpu.memory_space<vmem>>, vector<512x512xf32>
    %c0_2 = arith.constant 0 : index
    %c0_3 = arith.constant 0 : index
    %c0_4 = arith.constant 0 : index
    %4 = vector.load %arg4[%c0_2, %c0_3, %c0_4] : memref<1x512x128xbf16, #tpu.memory_space<vmem>>, vector<1x512x128xbf16>
    %5 = vector.shape_cast %4 : vector<1x512x128xbf16> to vector<512x128xbf16>
    %c0_5 = arith.constant 0 : index
    %c0_6 = arith.constant 0 : index
    %c0_7 = arith.constant 0 : index
    %6 = vector.load %arg5[%c0_5, %c0_6, %c0_7] : memref<1x128x512xbf16, #tpu.memory_space<vmem>>, vector<1x128x512xbf16>
    %7 = vector.shape_cast %6 : vector<1x128x512xbf16> to vector<128x512xbf16>
    %cst = arith.constant dense<0.000000e+00> : vector<512x512xf32>
    %8 = tpu.matmul %5, %7, %cst {dimension_numbers = #tpu.dot_dimension_numbers<[1], [0], [0], [1], [0, 0, 1, 1], [], []>} : vector<512x128xbf16>, vector<128x512xbf16>, vector<512x512xf32> -> vector<512x512xf32>
    %9 = arith.addf %3, %8 : vector<512x512xf32>
    %c0_8 = arith.constant 0 : index
    %c0_9 = arith.constant 0 : index
    %10 = vector.load %arg8[%c0_8, %c0_9] : memref<512x512xf32, #tpu.memory_space<vmem>>, vector<512x512xf32>
    tpu.vector_store %arg8[%c0_8, %c0_9], %9 {strides = array<i32>} : memref<512x512xf32, #tpu.memory_space<vmem>>, vector<512x512xf32>,
    %c0_i32_10 = arith.constant 0 : i32
    %11 = arith.cmpi eq, %arg3, %c0_i32_10 : i32
    %12 = arith.extui %11 : i1 to i32
    %c0_i32_11 = arith.constant 0 : i32
    %13 = arith.cmpi ne, %12, %c0_i32_11 : i32
    scf.if %13 {
      %c0_12 = arith.constant 0 : index
      %c0_13 = arith.constant 0 : index
      %14 = vector.load %arg8[%c0_12, %c0_13] : memref<512x512xf32, #tpu.memory_space<vmem>>, vector<512x512xf32>
      %c0_14 = arith.constant 0 : index
      %c0_15 = arith.constant 0 : index
      %15 = vector.load %arg6[%c0_14, %c0_15] : memref<1x512xf32, #tpu.memory_space<vmem>>, vector<1x512xf32>
      %16 = vector.broadcast %15 : vector<1x512xf32> to vector<512x512xf32>
      %17 = arith.addf %14, %16 : vector<512x512xf32>
      %18 = arith.truncf %17 : vector<512x512xf32> to vector<512x512xbf16>
      %c0_16 = arith.constant 0 : index
      %c0_17 = arith.constant 0 : index
      %c0_18 = arith.constant 0 : index
      %19 = vector.load %arg7[%c0_16, %c0_17, %c0_18] : memref<1x512x512xbf16, #tpu.memory_space<vmem>>, vector<1x512x512xbf16>
      %20 = vector.shape_cast %19 : vector<1x512x512xbf16> to vector<512x512xbf16>
      %21 = vector.shape_cast %18 : vector<512x512xbf16> to vector<1x512x512xbf16>
      tpu.vector_store %arg7[%c0_16, %c0_17, %c0_18], %21 {strides = array<i32>} : memref<1x512x512xbf16, #tpu.memory_space<vmem>>, vector<1x512x512xbf16>,
    } else {
    }
    return
  }
  func.func @transform_0(%arg0: i32, %arg1: i32, %arg2: i32, %arg3: i32) -> (i32, i32, i32) {
    %c0_i32 = arith.constant 0 : i32
    return %arg0, %arg1, %arg3 : i32, i32, i32
  }
  func.func @transform_1(%arg0: i32, %arg1: i32, %arg2: i32, %arg3: i32) -> (i32, i32, i32) {
    %c0_i32 = arith.constant 0 : i32
    return %arg0, %arg3, %arg2 : i32, i32, i32
  }
  func.func @transform_2(%arg0: i32, %arg1: i32, %arg2: i32, %arg3: i32) -> (i32, i32) {
    %c0_i32 = arith.constant 0 : i32
    %c0_i32_0 = arith.constant 0 : i32
    return %c0_i32, %arg2 : i32, i32
  }
  func.func @transform_3(%arg0: i32, %arg1: i32, %arg2: i32, %arg3: i32) -> (i32, i32, i32) {
    %c0_i32 = arith.constant 0 : i32
    return %arg0, %arg1, %arg2 : i32, i32, i32
  }
}

module attributes {stable_mosaic.version = 11 : i64} {
  func.func @kernel(%arg0: i32, %arg1: i32, %arg2: i32, %arg3: i32, %arg4: memref<1x512x512xbf16, #tpu.memory_space<vmem>>, %arg5: memref<1x512x128xbf16, #tpu.memory_space<vmem>>, %arg6: memref<1x512x128xf32, #tpu.memory_space<vmem>>, %arg7: memref<512x128xf32, #tpu.memory_space<vmem>>) attributes {dimension_semantics = [#tpu.dimension_semantics<parallel>, #tpu.dimension_semantics<parallel>, #tpu.dimension_semantics<parallel>, #tpu.dimension_semantics<arbitrary>], iteration_bounds = array<i64: 4, 1, 1, 1>, scalar_prefetch = 0 : i64, scratch_operands = 1 : i64, tpu.core_type = #tpu.core_type<tc>, window_params = [{transform_indices = @transform_0, window_bounds = array<i64: 1, 512, 512>}, {transform_indices = @transform_1, window_bounds = array<i64: 1, 512, 128>}, {transform_indices = @transform_2, window_bounds = array<i64: 1, 512, 128>}]} {
    %c0_i32 = arith.constant 0 : i32
    %0 = arith.cmpi eq, %arg3, %c0_i32 : i32
    %1 = arith.extui %0 : i1 to i32
    %c0_i32_0 = arith.constant 0 : i32
    %2 = arith.cmpi ne, %1, %c0_i32_0 : i32
    scf.if %2 {
      %cst_12 = arith.constant 0.000000e+00 : f32
      %14 = vector.broadcast %cst_12 : f32 to vector<512x128xf32>
      %c0_13 = arith.constant 0 : index
      %c0_14 = arith.constant 0 : index
      %15 = vector.load %arg7[%c0_13, %c0_14] : memref<512x128xf32, #tpu.memory_space<vmem>>, vector<512x128xf32>
      tpu.vector_store %arg7[%c0_13, %c0_14], %14 {strides = array<i32>} : memref<512x128xf32, #tpu.memory_space<vmem>>, vector<512x128xf32>,
    } else {
    }
    %c0 = arith.constant 0 : index
    %c0_1 = arith.constant 0 : index
    %3 = vector.load %arg7[%c0, %c0_1] : memref<512x128xf32, #tpu.memory_space<vmem>>, vector<512x128xf32>
    %c0_2 = arith.constant 0 : index
    %c0_3 = arith.constant 0 : index
    %c0_4 = arith.constant 0 : index
    %4 = vector.load %arg4[%c0_2, %c0_3, %c0_4] : memref<1x512x512xbf16, #tpu.memory_space<vmem>>, vector<1x512x512xbf16>
    %5 = vector.shape_cast %4 : vector<1x512x512xbf16> to vector<512x512xbf16>
    %c0_5 = arith.constant 0 : index
    %c0_6 = arith.constant 0 : index
    %c0_7 = arith.constant 0 : index
    %6 = vector.load %arg5[%c0_5, %c0_6, %c0_7] : memref<1x512x128xbf16, #tpu.memory_space<vmem>>, vector<1x512x128xbf16>
    %7 = vector.shape_cast %6 : vector<1x512x128xbf16> to vector<512x128xbf16>
    %cst = arith.constant dense<0.000000e+00> : vector<512x128xf32>
    %8 = tpu.matmul %5, %7, %cst {dimension_numbers = #tpu.dot_dimension_numbers<[1], [0], [0], [1], [0, 0, 1, 1], [], []>} : vector<512x512xbf16>, vector<512x128xbf16>, vector<512x128xf32> -> vector<512x128xf32>
    %9 = arith.addf %3, %8 : vector<512x128xf32>
    %c0_8 = arith.constant 0 : index
    %c0_9 = arith.constant 0 : index
    %10 = vector.load %arg7[%c0_8, %c0_9] : memref<512x128xf32, #tpu.memory_space<vmem>>, vector<512x128xf32>
    tpu.vector_store %arg7[%c0_8, %c0_9], %9 {strides = array<i32>} : memref<512x128xf32, #tpu.memory_space<vmem>>, vector<512x128xf32>,
    %c0_i32_10 = arith.constant 0 : i32
    %11 = arith.cmpi eq, %arg3, %c0_i32_10 : i32
    %12 = arith.extui %11 : i1 to i32
    %c0_i32_11 = arith.constant 0 : i32
    %13 = arith.cmpi ne, %12, %c0_i32_11 : i32
    scf.if %13 {
      %c0_12 = arith.constant 0 : index
      %c0_13 = arith.constant 0 : index
      %14 = vector.load %arg7[%c0_12, %c0_13] : memref<512x128xf32, #tpu.memory_space<vmem>>, vector<512x128xf32>
      %15 = math.tanh %14 : vector<512x128xf32>
      %c0_14 = arith.constant 0 : index
      %c0_15 = arith.constant 0 : index
      %c0_16 = arith.constant 0 : index
      %16 = vector.load %arg6[%c0_14, %c0_15, %c0_16] : memref<1x512x128xf32, #tpu.memory_space<vmem>>, vector<1x512x128xf32>
      %17 = vector.shape_cast %16 : vector<1x512x128xf32> to vector<512x128xf32>
      %18 = vector.shape_cast %15 : vector<512x128xf32> to vector<1x512x128xf32>
      tpu.vector_store %arg6[%c0_14, %c0_15, %c0_16], %18 {strides = array<i32>} : memref<1x512x128xf32, #tpu.memory_space<vmem>>, vector<1x512x128xf32>,
    } else {
    }
    return
  }
  func.func @transform_0(%arg0: i32, %arg1: i32, %arg2: i32, %arg3: i32) -> (i32, i32, i32) {
    %c0_i32 = arith.constant 0 : i32
    return %arg0, %arg1, %arg3 : i32, i32, i32
  }
  func.func @transform_1(%arg0: i32, %arg1: i32, %arg2: i32, %arg3: i32) -> (i32, i32, i32) {
    %c0_i32 = arith.constant 0 : i32
    return %arg0, %arg3, %arg2 : i32, i32, i32
  }
  func.func @transform_2(%arg0: i32, %arg1: i32, %arg2: i32, %arg3: i32) -> (i32, i32, i32) {
    %c0_i32 = arith.constant 0 : i32
    return %arg0, %arg1, %arg2 : i32, i32, i32
  }
}

</mosaic_0001>

<bundles_post_ra>
// kernel: _lambda_.12
= control target key start
LH: loop header
LB: loop body
LE: loop exit
PB: predicated region body
PF: predicated region fallthrough
CT: control target
= control target key end

     0   :  { %v18_v0 = vlaneseq  ;;  %v156_v1 = vmov 1983009808   ;;  %v157_v33 = vmov 1966171168   ;;  %s190_s1 = inlined_call_operand.vmem [shape: f32[1,512], index: 1, kind: input, shape index: {}]   ;;  %s191_s2 = inlined_call_operand.vmem [shape: f32[1,512], index: 2, kind: input, shape index: {}]   ;;  %s192_s0 = inlined_call_operand.vmem [shape: bf16[2,512], index: 0, kind: input, shape index: {}]   ;;  %s193_s3 = inlined_call_operand.vmem [shape: bf16[2,512], index: 3, kind: output, shape index: {}]  }
   0x1   :  { %v37_v2 = vunpack.c.l.s4 %v156_v1  ;;  %v16_v4 = vld [vmem:[%s190_s1] sm:$0xf]  ;;  %v124_v34 = vunpack.c.l.s4 %v157_v33 }
   0x2   :  { %v19_v3 = vshrl.u32 %v18_v0, 7  ;;  %v53_v10 = vld [vmem:[%s191_s2] sm:$0xf] }
   0x3   :  { %v38_v5 = vunpack.c.0.s8 %v37_v2  ;;  %v14_v16 = vld [vmem:[%s192_s0] sm:$0xf]  ;;  %v125_v37 = vunpack.c.0.s8 %v124_v34 }
   0x4   :  { %v20_v6 = vsub.s32 0, %v19_v3  ;;  %v24_v7 = vsub.s32 1, %v19_v3  ;;  %v28_v8 = vsub.s32 2, %v19_v3  ;;  %v32_v9 = vsub.s32 3, %v19_v3 }
   0x5   :  { %v41_v11 = vsub.s32 %v38_v5, %v19_v3  ;;  %v15_v25 = vunpack.c.l.bf16 %v14_v16  ;;  %v128_v42 = vsub.s32 %v125_v37, %v19_v3 }
   0x6   :  { %v21_v12 = vrot.slane %v16_v4, %v20_v6  ;;  %v25_v13 = vrot.slane %v16_v4, %v24_v7  ;;  %v29_v14 = vrot.slane %v16_v4, %v28_v8  ;;  %v33_v15 = vrot.slane %v16_v4, %v32_v9 }
   0x7   :  { %v58_v17 = vrot.slane %v53_v10, %v20_v6  ;;  %v62_v18 = vrot.slane %v53_v10, %v24_v7  ;;  %v66_v19 = vrot.slane %v53_v10, %v28_v8  ;;  %v70_v20 = vrot.slane %v53_v10, %v32_v9 }
   0x8   :  { %v34_v21 = vcombine.low %v21_v12, %v25_v13  ;;  %v35_v22 = vcombine.low %v29_v14, %v33_v15 }
   0x9   :  { %v71_v23 = vcombine.low %v58_v17, %v62_v18  ;;  %v72_v24 = vcombine.low %v66_v19, %v70_v20 }
   0xa   :  { %v42_v26 = vrot.slane %v34_v21, %v41_v11  ;;  %v49_v27 = vrot.slane %v35_v22, %v41_v11 }
   0xb   :  { %v79_v28 = vrot.slane %v71_v23, %v41_v11  ;;  %v86_v29 = vrot.slane %v72_v24, %v41_v11 }
   0xc   :  { %v50_v30 = vcombine.low %v42_v26, %v49_v27 }
   0xd   :  { %v87_v31 = vcombine.low %v79_v28, %v86_v29 }
   0xe   :  { %v52_v32 = vmul.f32 %v50_v30, %v15_v25 }
  0x10   :  { %v89_v35 = vadd.f32 %v87_v31, %v52_v32 }
  0x12   :  { %v90_v36 = vmax.f32 %v89_v35, 0.0 }
  0x14   :  { %v92_v38 = vcombine.high %v90_v36, %v90_v36  ;;  %v99_v39 = vrot.slane %v90_v36, %v41_v11 }
  0x16   :  { %v106_v40 = vrot.slane %v92_v38, %v41_v11  ;;  %v107_v41 = vcombine.high %v99_v39, %v99_v39 }
  0x18   :  { %v108_v43 = vcombine.high %v106_v40, %v106_v40  ;;  %v151_v44 = vpack.c.bf16 %v107_v41, %v99_v39 }
  0x1a   :  { %v152_v45 = vpack.c.bf16 %v108_v43, %v106_v40  ;;  %v129_v46 = vrot.slane %v151_v44, %v128_v42 }
  0x1c   :  { %v136_v47 = vrot.slane %v152_v45, %v128_v42 }
  0x1e   :  { %v137_v48 = vcombine.low %v129_v46, %v136_v47 }
  0x20   :  { %153 = vst.sshfl [vmem:[%s193_s3] sm:$0x55 pattern:$0x73625140] %v137_v48 }

// kernel: _lambda_.11
= control target key start
LH: loop header
LB: loop body
LE: loop exit
PB: predicated region body
PF: predicated region fallthrough
CT: control target
= control target key end

     0   :  { %9 = vsyncpa [#allocation4], 0  ;;  %s427_s12 = smov [#allocation3]   ;;  %s495_s0 = inlined_call_operand.vmem [shape: bf16[1,2,8], index: 0, kind: input, shape index: {}]   ;;  %s496_s1 = inlined_call_operand.hbm [shape: bf16[1,8,512], index: 1, kind: input, shape index: {}]   ;;  %s497_s2 = inlined_call_operand.vmem [shape: bf16[1,2,512], index: 2, kind: output, shape index: {0}]   ;;  %s498_s3 = inlined_call_operand.vmem [shape: f32[1,1,2,512], index: 3, kind: output, shape index: {1}]  }
   0x1   :  { %s18_s13 = sshll.u32 %s427_s12, 4  ;;  %s403_s16 = scalar_lea.hbm %s496_s1, 256  ;;  %s19_s13 = int_to_ptr.vmem [resolvable:$true] %s18_s13 }
   0x2   :  { %p404_p0 = scmp.ne.s32.totalorder %s496_s1, %s403_s16  ;;  %p407_p1 = scmp.lt.u32.totalorder %s403_s16, %s496_s1 }
   0x4   :  { %p409_p2 = pnand %p407_p1, %p404_p0 }
   0x6   :  { %412 = shalt.err (!%p409_p2)
}
   0x7   :  { %s413_s21 = scalar_lea.vmem %s19_s13, 256  ;;  %p418_p4 = scmp.lt.s32.totalorder %s19_s13, %s19_s13 }
   0x8   :  { %p414_p3 = scmp.ne.s32.totalorder %s19_s13, %s413_s21  ;;  %p419_p5 = scmp.lt.s32.totalorder %s413_s21, %s413_s21 }
   0xa   :  { %p420_p6 = por %p419_p5, %p418_p4 }
   0xc   :  { %p421_p7 = pnand %p420_p6, %p414_p3 }
   0xe   :  { %424 = shalt.err (!%p421_p7)
}
   0xf   :  { %21 = dma.hbm_to_vmem [thread:$0]  %s496_s1, 256, %s19_s13, [#allocation4]  }
  0x10   :  { %425 = dma.done.wait [#allocation4], 256  }
  0x11   :  { %426 = vsyncadd [#allocation4], 4294967040  ;;  %v428_v0 = vmov 0   ;;  %v33_v1 = vld [vmem:[#allocation3] sm:$0xff]  ;;  %vm49_vm0 = vcmask 1043456   ;;  %v34_v2 = vld [vmem:[#allocation3 + $0x8] sm:$0xff]  ;;  %v153_v12 = vlaneseq }
  0x12   :  { %94 = vmatprep.mubr.bf16.mxu0 %v428_v0  ;;  %135 = vmatprep.mubr.bf16.mxu1 %v428_v0  ;;  %v383_v3 = vcombine.high %v33_v1, %v33_v1  ;;  %v385_v4 = vcombine.high %v34_v2, %v34_v2  ;;  %v382_v5 = vcombine.low %v33_v1, %v33_v1  ;;  %v32_v9 = vld [vmem:[%s495_s0] sm:$0x1]  ;;  %vm45_vm1 = vcmask 64512  }
  0x13   :  { %v384_v6 = vcombine.low %v34_v2, %v34_v2  ;;  %v429_v10 = vmov 1983009808   ;;  %v154_v14 = vshrl.u32 %v153_v12, 7  ;;  %v430_v19 = vmov 1966171168  }
  0x14   :  { %386 = vmatprep.subr.msk.bf16.mxu0 %vm49_vm0, %v383_v3  ;;  %388 = vmatprep.subr.msk.bf16.mxu1 %vm49_vm0, %v385_v4  ;;  %v51_v7 = vsel %vm49_vm0, %v382_v5, 0  ;;  %v151_v11 = vunpack.c.l.s4 %v429_v10  ;;  %v205_v20 = vunpack.c.l.s4 %v430_v19  ;;  %vm228_vm2 = vcmask 1041408  }
  0x15   :  { %v57_v8 = vsel %vm49_vm0, %v384_v6, 0  ;;  %63 = vmatpush1.bf16.msra.mxu0 %v51_v7  ;;  %vm288_vm3 = vcmp.lt.s32.totalorder %v153_v12, 512 }
  0x16   :  { %104 = vmatpush1.bf16.msra.mxu1 %v57_v8  ;;  %v152_v13 = vunpack.c.0.s8 %v151_v11  ;;  %v206_v30 = vunpack.c.0.s8 %v205_v20 }
  0x18   :  { %387 = vmatmul.mubr.msk.bf16.vlgmr.msra.gmra.mrb[0].mxu0 %vm45_vm1, %v32_v9  ;;  %v155_v17 = vsub.s32 %v152_v13, %v154_v14  ;;  %v467_v36 = vsub.s32 %v206_v30, %v154_v14 }
  0x19   :  { %389 = vmatmul.mubr.msk.bf16.vlgmr.msra.gmra.mrb[0].mxu1 %vm45_vm1, %v32_v9 }
  0xeb   :  { %v96_v15 = vpop.f32.mrb[0].mxu0 }
  0xec   :  { %v137_v16 = vpop.f32.mrb[0].mxu1  ;;  %v98_v18 = vpop.f32.mrb[1].mxu0 }
  0xed   :  { %v139_v21 = vpop.f32.mrb[1].mxu1  ;;  %v148_v22 = vcombine.low %v96_v15, %v98_v18  ;;  %v100_v24 = vpop.f32.mrb[2].mxu0 }
  0xee   :  { %v149_v23 = vcombine.low %v137_v16, %v139_v21  ;;  %v141_v25 = vpop.f32.mrb[2].mxu1  ;;  %v101_v26 = vpop.f32.mrb[3].mxu0 }
  0xef   :  { %v142_v27 = vpop.f32.mrb[3].mxu1  ;;  %v156_v28 = vrot.slane %v148_v22, %v155_v17 }
  0xf0   :  { %v163_v29 = vrot.slane %v149_v23, %v155_v17 }
  0xf2   :  { %v164_v31 = vcombine.low %v156_v28, %v163_v29  ;;  %v394_v32 = vcombine.low %v163_v29, %v163_v29 }
  0xf4   :  { %v180_v33 = vrot.slane %v164_v31, %v155_v17  ;;  %v187_v34 = vrot.slane %v394_v32, %v155_v17  ;;  %v291_v35 = vmul.f32 %v164_v31, %v164_v31 }
  0xf6   :  { %v188_v37 = vcombine.high %v180_v33, %v180_v33  ;;  %v189_v38 = vcombine.high %v187_v34, %v187_v34  ;;  %v229_v39 = vsel %vm228_vm2, %v180_v33, 0.0  ;;  %v243_v40 = vsel %vm228_vm2, %v187_v34, 0.0 }
  0xf7   :  { %v230_v41 = vrot.slane %v229_v39, 4  ;;  %v244_v42 = vrot.slane %v243_v40, 4  ;;  %v293_v43 = vcombine.high %v291_v35, %v291_v35  ;;  %v300_v44 = vrot.slane %v291_v35, %v155_v17 }
  0xf8   :  { %v390_v45 = vpack.c.bf16 %v188_v37, %v180_v33  ;;  %v391_v46 = vpack.c.bf16 %v189_v38, %v187_v34  ;;  %v236_v47 = vsel %vm228_vm2, %v188_v37, 0.0  ;;  %v250_v48 = vsel %vm228_vm2, %v189_v38, 0.0 }
  0xf9   :  { %v231_v49 = vadd.f32 %v230_v41, %v229_v39  ;;  %v237_v50 = vrot.slane %v236_v47, 4  ;;  %v245_v51 = vadd.f32 %v244_v42, %v243_v40  ;;  %v251_v52 = vrot.slane %v250_v48, 4 }
  0xfa   :  { %v210_v53 = vrot.slane %v390_v45, %v467_v36  ;;  %v217_v54 = vrot.slane %v391_v46, %v467_v36  ;;  %v307_v55 = vrot.slane %v293_v43, %v155_v17  ;;  %v308_v56 = vcombine.high %v300_v44, %v300_v44 }
  0xfb   :  { %v232_v57 = vrot.slane %v231_v49, 2  ;;  %v238_v58 = vadd.f32 %v237_v50, %v236_v47  ;;  %v246_v59 = vrot.slane %v245_v51, 2  ;;  %v252_v60 = vadd.f32 %v251_v52, %v250_v48 }
  0xfc   :  { %v218_v61 = vcombine.low %v210_v53, %v217_v54  ;;  %v309_v62 = vcombine.high %v307_v55, %v307_v55  ;;  %v314_v63 = vsel %vm228_vm2, %v300_v44, 0.0  ;;  %v321_v0 = vsel %vm228_vm2, %v308_v56, 0.0 }
  0xfd   :  { %v233_v1 = vadd.f32 %v232_v57, %v231_v49  ;;  %v239_v2 = vrot.slane %v238_v58, 2  ;;  %v247_v3 = vadd.f32 %v246_v59, %v245_v51  ;;  %v253_v4 = vrot.slane %v252_v60, 2 }
  0xfe   :  { %392 = vst.sshfl [vmem:[%s497_s2] sm:$0x55 pattern:$0x73625140] %v218_v61  ;;  %v315_v5 = vrot.slane %v314_v63, 4  ;;  %v322_v6 = vrot.slane %v321_v0, 4  ;;  %v328_v7 = vsel %vm228_vm2, %v307_v55, 0.0 }
  0xff   :  { %v335_v8 = vsel %vm228_vm2, %v309_v62, 0.0  ;;  %v234_v9 = vrot.slane %v233_v1, 1  ;;  %v240_v10 = vadd.f32 %v239_v2, %v238_v58  ;;  %v248_v11 = vrot.slane %v247_v3, 1 }
 0x100   :  { %v254_v13 = vadd.f32 %v253_v4, %v252_v60  ;;  %v316_v14 = vadd.f32 %v315_v5, %v314_v63  ;;  %v323_v15 = vadd.f32 %v322_v6, %v321_v0  ;;  %v329_v16 = vrot.slane %v328_v7, 4 }
 0x101   :  { %v336_v17 = vrot.slane %v335_v8, 4  ;;  %v241_v18 = vrot.slane %v240_v10, 1  ;;  %v235_v24 = vadd.f32 %v234_v9, %v233_v1  ;;  %v249_v26 = vadd.f32 %v248_v11, %v247_v3 }
 0x102   :  { %v255_v19 = vrot.slane %v254_v13, 1  ;;  %v317_v20 = vrot.slane %v316_v14, 2  ;;  %v324_v21 = vrot.slane %v323_v15, 2  ;;  %v330_v22 = vadd.f32 %v329_v16, %v328_v7 }
 0x103   :  { %v337_v23 = vadd.f32 %v336_v17, %v335_v8  ;;  %v242_v25 = vadd.f32 %v241_v18, %v240_v10 }
 0x104   :  { %v256_v27 = vadd.f32 %v255_v19, %v254_v13  ;;  %v318_v28 = vadd.f32 %v317_v20, %v316_v14  ;;  %v325_v29 = vadd.f32 %v324_v21, %v323_v15  ;;  %v331_v30 = vrot.slane %v330_v22, 2 }
 0x105   :  { %v338_v31 = vrot.slane %v337_v23, 2  ;;  %v261_v32 = vcombine.low %v235_v24, %v242_v25 }
 0x106   :  { %v262_v33 = vcombine.low %v249_v26, %v256_v27  ;;  %v319_v34 = vrot.slane %v318_v28, 1  ;;  %v326_v35 = vrot.slane %v325_v29, 1  ;;  %v332_v37 = vadd.f32 %v331_v30, %v330_v22 }
 0x107   :  { %v339_v38 = vadd.f32 %v338_v31, %v337_v23  ;;  %v269_v39 = vrot.slane %v261_v32, %v467_v36 }
 0x108   :  { %v276_v40 = vrot.slane %v262_v33, %v467_v36  ;;  %v320_v41 = vadd.f32 %v319_v34, %v318_v28  ;;  %v327_v42 = vadd.f32 %v326_v35, %v325_v29  ;;  %v333_v43 = vrot.slane %v332_v37, 1 }
 0x109   :  { %v340_v44 = vrot.slane %v339_v38, 1 }
 0x10a   :  { %v277_v45 = vcombine.low %v269_v39, %v276_v40  ;;  %v334_v46 = vadd.f32 %v333_v43, %v332_v37  ;;  %v346_v48 = vcombine.low %v320_v41, %v327_v42 }
 0x10b   :  { %v341_v47 = vadd.f32 %v340_v44, %v339_v38 }
 0x10c   :  { %v284_v49 = vrot.slane %v277_v45, %v467_v36  ;;  %v354_v51 = vrot.slane %v346_v48, %v467_v36 }
 0x10d   :  { %v347_v50 = vcombine.low %v334_v46, %v341_v47 }
 0x10e   :  { %290 = vst.msk [vmem:[%s498_s3] ss:$2 sm:$0xf] %vm288_vm3, %v284_v49 }
 0x10f   :  { %v361_v52 = vrot.slane %v347_v50, %v467_v36 }
 0x111   :  { %v362_v53 = vcombine.low %v354_v51, %v361_v52 }
 0x113   :  { %v369_v54 = vrot.slane %v362_v53, %v467_v36 }
 0x115   :  { %393 = vst.msk [vmem:[%s498_s3 + $0x1] ss:$2 sm:$0xf] %vm288_vm3, %v369_v54 }
 0x116   :  { %381 = vsyncpa [#allocation4], 1 }

// kernel: _lambda_.13
= control target key start
LH: loop header
LB: loop body
LE: loop exit
PB: predicated region body
PF: predicated region fallthrough
CT: control target
= control target key end

     0   :  { %9 = vsyncpa [#allocation4], 0  ;;  %s1091_s0 = inlined_call_operand.vmem [shape: bf16[4,32,128], index: 0, kind: input, shape index: {}]   ;;  %s1092_s1 = inlined_call_operand.hbm [shape: bf16[4,128,128], index: 1, kind: input, shape index: {}]   ;;  %s1093_s2 = inlined_call_operand.vmem [shape: bf16[4,32,128], index: 2, kind: output, shape index: {0}]   ;;  %s1094_s3 = inlined_call_operand.vmem [shape: f32[4,1,2,128], index: 3, kind: output, shape index: {1}]  }
   0x1   :  { %11 = vsyncpa [#allocation4 + $0x1], 0  ;;  %s953_s12 = smov 0   ;;  %s955_s13 = smov 0  }
   0x2   :  { %s957_s14 = smov 0   ;;  %s959_s15 = smov 0  }
   0x3   :  { %s961_s16 = smov 0   ;;  %s963_s17 = smov 0  }
   0x4 LB: > { %s703_s18 = sadd.s32 4294967295, %s928_s17   ;;  %s43_s19 = sadd.s32 1, %s924_s16  ;;  %s928_s17 = sphi %s963_s17, %s17_s17   ;;  %s924_s16 = sphi %s961_s16, %s1102_s16   ;;  %s920_s15 = sphi %s959_s15, %s1101_s15   ;;  %s916_s14 = sphi %s957_s14, %s1100_s14   ;;  %s912_s13 = sphi %s955_s13, %s1099_s13   ;;  %s908_s12 = sphi %s953_s12, %s1098_s12  }
   0x5   : > { %p45_p0 = scmp.ge.s32.totalorder %s43_s19, 4  ;;  %s84_s20 = sadd.s32 1, %s916_s14 }
   0x6   : > { %p91_p1 = scmp.ne.s32.totalorder %s916_s14, %s912_s13  ;;  %p92_p2 = scmp.eq.s32.totalorder %s928_s17, 0 }
   0x7   : > { %s1104_s19 = smov (%p45_p0, %s43_s19), 0  ;;  %p97_p4 = scmp.ne.s32.totalorder %s912_s13, %s908_s12 }
   0x8   : > { %p989_p3 = por %p92_p2, %p91_p1  ;;  %s77_s22 = ssub.s32 %s924_s16, %s1104_s19 }
   0x9   : > { %p98_p5 = scmp.eq.s32.totalorder %s703_s18, 0  ;;  %p82_p6 = scmp.eq.s32.totalorder %s77_s22, 0 }
   0xa   : > { %p787_p8 = scmp.lt.s32.totalorder %s928_s17, 4  ;;  %s197_s25 = sand.u32 1, %s916_s14  }
   0xb   : > { %p996_p7 = por %p98_p5, %p97_p4  ;;  %s733_s26 = sshll.u32 %s924_s16, 10 }
   0xc   : > { %s1002_s24 = scalar_select %p82_p6, %s916_s14, %s84_s20  }
   0xd   : > { %s707_s27 = sshll.u32 %s197_s25, 6  ;;  %s1009_s30 = scalar_lea.hbm %s1092_s1, %s733_s26 }
   0xe   : > { %s201_s4 = scalar_lea.vmem [#allocation3], %s707_s27  ;;  %p1013_p9 = pnand %p787_p8, %p989_p3 }
   0xf   : > { %s211_s5 = sshll.u32 %s201_s4, 4  ;;  %s1019_s7 = scalar_lea.sflag [#allocation4], %s197_s25  ;;  %s1017_s5 = int_to_ptr.vmem [resolvable:$true] %s211_s5 }
  0x10   : > { %s848_s8 = scalar_lea.hbm %s1009_s30, 1024  ;;  %p850_p11 = pneg %p1013_p9 }
  0x11   : > { %p849_p10 = scmp.ne.s32.totalorder %s1009_s30, %s848_s8  ;;  %s853_s11 = scalar_lea.hbm %s1092_s1, 4096 }
  0x12   : > { %p854_p0 = scmp.lt.u32.totalorder %s1009_s30, %s1092_s1  ;;  %p855_p1 = scmp.lt.u32.totalorder %s853_s11, %s848_s8 }
  0x13   : > { %p851_p12 = pnand %p850_p11, %p849_p10  ;;  %p857_p3 = scmp.lt.u32.totalorder %s848_s8, %s1009_s30 }
  0x14   : > { %p856_p2 = por %p855_p1, %p854_p0 }
  0x15   : > { %p852_p13 = pneg %p851_p12 }
  0x16   : > { %p858_p4 = por %p857_p3, %p856_p2 }
  0x18   : > { %p859_p5 = pnand %p858_p4, %p852_p13 }
  0x1a   : > { %862 = shalt.err (!%p859_p5)
}
  0x1b   : > { %s863_s20 = scalar_lea.vmem %s1017_s5, 1024  ;;  %s930_s21 = smov [#allocation3]  }
  0x1c   : > { %p864_p6 = scmp.ne.s32.totalorder %s1017_s5, %s863_s20  ;;  %s868_s22 = sshll.u32 %s930_s21, 4  ;;  %s869_s22 = int_to_ptr.vmem [resolvable:$false] %s868_s22 }
  0x1d   : > { %s870_s25 = scalar_lea.vmem %s869_s22, 2048  ;;  %p871_p12 = scmp.lt.s32.totalorder %s1017_s5, %s869_s22 }
  0x1e   : > { %p866_p8 = pnand %p864_p6, %p850_p11  ;;  %p872_p0 = scmp.lt.s32.totalorder %s870_s25, %s863_s20 }
  0x20   : > { %p867_p10 = pneg %p866_p8  ;;  %p873_p1 = por %p872_p0, %p871_p12 }
  0x22   : > { %p874_p2 = pnand %p873_p1, %p867_p10 }
  0x24   : > { %877 = shalt.err (!%p874_p2)
}
  0x25   : > { %s931_s26 = smov 64   ;;  %s932_s27 = smov 4  }
  0x26   : > { %786 = dma.hbm_to_vmem [thread:$0]  (!%p1013_p9), %s1009_s30, 1024, %s1017_s5, %s1019_s7, %s931_s26, %s931_s26, %s932_s27  }
  0x27   : > { %p710_p11 = scmp.ge.s32.totalorder %s928_s17, 1  ;;  %p219_p13 = scmp.lt.s32.totalorder %s928_s17, 5 }
  0x29   : > { %p220_p3 = pnand %p710_p11, %p219_p13 }
  0x2a   : > { %s225_s28 = sand.u32 (!%p220_p3), 1, %s912_s13  }
  0x2b   : > { %223 = sbr.rel (%p220_p3) target bundleno = 320 (0x140), region = 28  ;;  %s711_s29 = sshll.u32 (!%p220_p3), %s225_s28, 6 }
  0x2c   : > { %s226_s4 = scalar_lea.sflag (!%p220_p3), [#allocation4], %s225_s28  ;;  %s229_s8 = scalar_lea.vmem (!%p220_p3), [#allocation3], %s711_s29 }
  0x32   : > { %903 = dma.done.wait (%p996_p7), %s226_s4, 1024  }
  0x33   : > { %905 = vsyncadd (%p996_p7), %s226_s4, 4294966272  ;;  %p282_p4 = scmp.lt.s32.totalorder %s920_s15, 3  ;;  %v838_v0 = vld [vmem:[%s229_s8] sm:$0xff]   ;;  %v839_v1 = vld [vmem:[%s229_s8 + $0x8] sm:$0xff]  }
  0x34   : > { %761 = vmatprep.subr.bf16.mxu0 %v838_v0  ;;  %v840_v2 = vld [vmem:[%s229_s8 + $0x10] sm:$0xff]   ;;  %v841_v3 = vld [vmem:[%s229_s8 + $0x18] sm:$0xff]   ;;  %v842_v5 = vld [vmem:[%s229_s8 + $0x20] sm:$0xff]  }
  0x35   : > { %s1106_s15 = smov (!%p282_p4, %s920_s15), 3  ;;  %762 = vmatpush3.bf16.msra.mxu0 %v838_v0  ;;  %v843_v6 = vld [vmem:[%s229_s8 + $0x28] sm:$0xff]   ;;  %v844_v7 = vld [vmem:[%s229_s8 + $0x30] sm:$0xff]   ;;  %v845_v8 = vld [vmem:[%s229_s8 + $0x38] sm:$0xff]  }
  0x36   : > { %s734_s30 = sshll.u32 %s1106_s15, 4  ;;  %763 = vmatprep.subr.bf16.mxu0 %v839_v1  ;;  %s716_s11 = sshll.u32 %s1106_s15, 1 }
  0x37   : > { %s292_s23 = scalar_lea.vmem %s1091_s0, %s734_s30  ;;  %s306_s10 = scalar_lea.vmem %s1093_s2, %s734_s30 }
  0x38   : > { %v846_v4 = vld [vmem:[%s292_s23] sm:$0xff]   ;;  %v847_v9 = vld [vmem:[%s292_s23 + $0x8] sm:$0xff]   ;;  %s317_s20 = scalar_lea.vmem %s1094_s3, %s716_s11 }
  0x39   : > { %764 = vmatpush3.bf16.msra.mxu0 %v839_v1  ;;  %777 = vmatprep.mubr.bf16.mxu0 %v846_v4 }
  0x3a   : > { %765 = vmatprep.subr.bf16.mxu0 %v840_v2 }
  0x3d   : > { %766 = vmatpush3.bf16.msra.mxu0 %v840_v2 }
  0x3e   : > { %767 = vmatprep.subr.bf16.mxu0 %v841_v3 }
  0x41   : > { %768 = vmatpush3.bf16.msra.mxu0 %v841_v3 }
  0x42   : > { %769 = vmatprep.subr.bf16.mxu0 %v842_v5 }
  0x45   : > { %770 = vmatpush3.bf16.msra.mxu0 %v842_v5 }
  0x46   : > { %771 = vmatprep.subr.bf16.mxu0 %v843_v6 }
  0x49   : > { %772 = vmatpush3.bf16.msra.mxu0 %v843_v6 }
  0x4a   : > { %773 = vmatprep.subr.bf16.mxu0 %v844_v7 }
  0x4d   : > { %774 = vmatpush3.bf16.msra.mxu0 %v844_v7 }
  0x4e   : > { %775 = vmatprep.subr.bf16.mxu0 %v845_v8 }
  0x51   : > { %776 = vmatpush3.bf16.msra.mxu0 %v845_v8 }
  0x54   : > { %778 = vmatmul.mubr.bf16.vlgmr.msra.gmra.mrb[0].mxu0 %v847_v9 }
 0x127   : > { %v779_v10 = vpop.f32.mrb[0].mxu0 }
 0x128   : > { %v445_v11 = vpop.f32.mrb[1].mxu0  ;;  %v507_v19 = vmul.f32 %v779_v10, %v779_v10 }
 0x129   : > { %v780_v12 = vpop.f32.mrb[2].mxu0  ;;  %v505_v15 = vmul.f32 %v445_v11, %v445_v11 }
 0x12a   : > { %v748_v13 = vpack.c.bf16 %v780_v12, %v779_v10  ;;  %v448_v14 = vpop.f32.mrb[3].mxu0  ;;  %v508_v22 = vmul.f32 %v780_v12, %v780_v12 }
 0x12b   : > { %v743_v16 = vpack.c.bf16 %v448_v14, %v445_v11  ;;  %v495_v17 = vadd.f32 %v448_v14, %v445_v11  ;;  %v506_v18 = vmul.f32 %v448_v14, %v448_v14 }
 0x12c   : > { %750 = vst [vmem:[%s306_s10 + $0x8] sm:$0xff] %v748_v13  }
 0x12d   : > { %744 = vst [vmem:[%s306_s10] sm:$0xff] %v743_v16   ;;  %v496_v20 = vadd.f32 %v779_v10, %v495_v17  ;;  %v509_v21 = vadd.f32 %v506_v18, %v505_v15 }
 0x12f   : > { %v497_v23 = vadd.f32 %v780_v12, %v496_v20  ;;  %v510_v24 = vadd.f32 %v509_v21, %v507_v19 }
 0x131   : > { %v498_v25 = vrot.slane %v497_v23, 4  ;;  %v511_v26 = vadd.f32 %v510_v24, %v508_v22 }
 0x133   : > { %v499_v27 = vadd.f32 %v498_v25, %v497_v23  ;;  %v512_v28 = vrot.slane %v511_v26, 4 }
 0x135   : > { %v500_v29 = vrot.slane %v499_v27, 2  ;;  %v513_v30 = vadd.f32 %v512_v28, %v511_v26 }
 0x137   : > { %v501_v31 = vadd.f32 %v500_v29, %v499_v27  ;;  %v514_v32 = vrot.slane %v513_v30, 2 }
 0x139   : > { %v502_v33 = vrot.slane %v501_v31, 1  ;;  %v515_v34 = vadd.f32 %v514_v32, %v513_v30 }
 0x13b   : > { %v503_v35 = vadd.f32 %v502_v33, %v501_v31  ;;  %v516_v36 = vrot.slane %v515_v34, 1 }
 0x13d   : > { %504 = vst [vmem:[%s317_s20] sm:$0x1] %v503_v35  ;;  %v517_v37 = vadd.f32 %v516_v36, %v515_v34 }
 0x13f   : > { %518 = vst [vmem:[%s317_s20 + $0x1] sm:$0x1] %v517_v37 }
 0x140 PF: > { %s17_s17 = sadd.s32 1, %s928_s17   ;;  %s1098_s12 = smov %s912_s13 }
 0x141   : > { %p14_p7 = scmp.ge.s32.totalorder %s17_s17, 6   ;;  %s1099_s13 = smov %s916_s14 }
 0x142   : > { %s1100_s14 = smov %s1002_s24  ;;  %s1101_s15 = smov %s924_s16 }
 0x143   : > { %s1102_s16 = smov %s1104_s19  ;;  %16 = sbr.rel (!%p14_p7) target bundleno = 4 (0x4), region = 91 }
 0x14a   :  { %581 = vsyncpa [#allocation4], 1 }
 0x14b   :  { %583 = vsyncpa [#allocation4 + $0x1], 1 }

// kernel: _lambda_.14
= control target key start
LH: loop header
LB: loop body
LE: loop exit
PB: predicated region body
PF: predicated region fallthrough
CT: control target
= control target key end

     0   :  { %s422_s0 = inlined_call_operand.vmem [shape: bf16[128,128], index: 0, kind: input, shape index: {}]   ;;  %s423_s1 = inlined_call_operand.vmem [shape: f32[1,128], index: 1, kind: input, shape index: {}]   ;;  %s424_s2 = inlined_call_operand.vmem [shape: f32[1,128], index: 2, kind: input, shape index: {}]   ;;  %s425_s3 = inlined_call_operand.vmem [shape: bf16[128,128], index: 3, kind: output, shape index: {}]  }
   0x1   :  { %v227_v0 = vld [vmem:[%s422_s0] sm:$0xff]   ;;  %v298_v4 = vld [vmem:[%s422_s0 + $0x8] sm:$0xff]   ;;  %v299_v5 = vld [vmem:[%s422_s0 + $0x10] sm:$0xff]  }
   0x2   :  { %v338_v1 = vld [vmem:[%s423_s1] ss:$0 sm:$0xff]  ;;  %v228_v2 = vunpack.c.l.bf16 %v227_v0  ;;  %v229_v3 = vunpack.c.h.bf16 %v227_v0  ;;  %v300_v6 = vld [vmem:[%s422_s0 + $0x18] sm:$0xff]   ;;  %v232_v8 = vunpack.c.l.bf16 %v298_v4  ;;  %v233_v9 = vunpack.c.h.bf16 %v298_v4  ;;  %v302_v33 = vld [vmem:[%s422_s0 + $0x28] sm:$0xff]  }
   0x3   :  { %v352_v7 = vld [vmem:[%s424_s2] ss:$0 sm:$0xff]  ;;  %v236_v10 = vunpack.c.l.bf16 %v299_v5  ;;  %v237_v11 = vunpack.c.h.bf16 %v299_v5  ;;  %v240_v14 = vunpack.c.l.bf16 %v300_v6  ;;  %v241_v15 = vunpack.c.h.bf16 %v300_v6  ;;  %v303_v38 = vld [vmem:[%s422_s0 + $0x30] sm:$0xff]   ;;  %v304_v43 = vld [vmem:[%s422_s0 + $0x38] sm:$0xff]  }
   0x4   :  { %v53_v12 = vmul.f32 %v228_v2, %v338_v1  ;;  %v54_v13 = vmul.f32 %v229_v3, %v338_v1  ;;  %v55_v16 = vmul.f32 %v232_v8, %v338_v1  ;;  %v56_v17 = vmul.f32 %v233_v9, %v338_v1  ;;  %v301_v28 = vld [vmem:[%s422_s0 + $0x20] sm:$0xff]  }
   0x5   :  { %v57_v18 = vmul.f32 %v236_v10, %v338_v1  ;;  %v58_v19 = vmul.f32 %v237_v11, %v338_v1  ;;  %v59_v22 = vmul.f32 %v240_v14, %v338_v1  ;;  %v60_v23 = vmul.f32 %v241_v15, %v338_v1 }
   0x6   :  { %v76_v20 = vadd.f32 %v352_v7, %v53_v12  ;;  %v77_v21 = vadd.f32 %v352_v7, %v54_v13  ;;  %v78_v24 = vadd.f32 %v352_v7, %v55_v16  ;;  %v79_v25 = vadd.f32 %v352_v7, %v56_v17 }
   0x7   :  { %v80_v26 = vadd.f32 %v352_v7, %v57_v18  ;;  %v81_v27 = vadd.f32 %v352_v7, %v58_v19  ;;  %v82_v31 = vadd.f32 %v352_v7, %v59_v22  ;;  %v83_v32 = vadd.f32 %v352_v7, %v60_v23 }
   0x8   :  { %v92_v29 = vmax.f32 %v76_v20, 0.0  ;;  %v93_v30 = vmax.f32 %v77_v21, 0.0  ;;  %v94_v34 = vmax.f32 %v78_v24, 0.0  ;;  %v95_v35 = vmax.f32 %v79_v25, 0.0 }
   0x9   :  { %v96_v36 = vmax.f32 %v80_v26, 0.0  ;;  %v97_v37 = vmax.f32 %v81_v27, 0.0  ;;  %v98_v40 = vmax.f32 %v82_v31, 0.0  ;;  %v99_v41 = vmax.f32 %v83_v32, 0.0 }
   0xa   :  { %v261_v39 = vpack.c.bf16 %v93_v30, %v92_v29  ;;  %v244_v42 = vunpack.c.l.bf16 %v301_v28  ;;  %v266_v44 = vpack.c.bf16 %v95_v35, %v94_v34  ;;  %v245_v46 = vunpack.c.h.bf16 %v301_v28 }
   0xb   :  { %v271_v45 = vpack.c.bf16 %v97_v37, %v96_v36  ;;  %v248_v47 = vunpack.c.l.bf16 %v302_v33  ;;  %v276_v48 = vpack.c.bf16 %v99_v41, %v98_v40  ;;  %v249_v50 = vunpack.c.h.bf16 %v302_v33 }
   0xc   :  { %262 = vst [vmem:[%s425_s3] sm:$0xff] %v261_v39   ;;  %v61_v49 = vmul.f32 %v244_v42, %v338_v1  ;;  %v252_v51 = vunpack.c.l.bf16 %v303_v38  ;;  %305 = vst [vmem:[%s425_s3 + $0x8] sm:$0xff] %v266_v44   ;;  %v62_v52 = vmul.f32 %v245_v46, %v338_v1  ;;  %v253_v54 = vunpack.c.h.bf16 %v303_v38 }
   0xd   :  { %306 = vst [vmem:[%s425_s3 + $0x10] sm:$0xff] %v271_v45   ;;  %v63_v53 = vmul.f32 %v248_v47, %v338_v1  ;;  %v256_v55 = vunpack.c.l.bf16 %v304_v43  ;;  %307 = vst [vmem:[%s425_s3 + $0x18] sm:$0xff] %v276_v48   ;;  %v64_v57 = vmul.f32 %v249_v50, %v338_v1  ;;  %v257_v59 = vunpack.c.h.bf16 %v304_v43 }
   0xe   :  { %v84_v56 = vadd.f32 %v352_v7, %v61_v49  ;;  %v65_v58 = vmul.f32 %v252_v51, %v338_v1  ;;  %v85_v60 = vadd.f32 %v352_v7, %v62_v52  ;;  %v66_v62 = vmul.f32 %v253_v54, %v338_v1 }
   0xf   :  { %v86_v61 = vadd.f32 %v352_v7, %v63_v53  ;;  %v67_v63 = vmul.f32 %v256_v55, %v338_v1  ;;  %v87_v2 = vadd.f32 %v352_v7, %v64_v57  ;;  %v68_v4 = vmul.f32 %v257_v59, %v338_v1 }
  0x10   :  { %v100_v0 = vmax.f32 %v84_v56, 0.0  ;;  %v88_v3 = vadd.f32 %v352_v7, %v65_v58  ;;  %v101_v5 = vmax.f32 %v85_v60, 0.0  ;;  %v89_v8 = vadd.f32 %v352_v7, %v66_v62 }
  0x11   :  { %v102_v6 = vmax.f32 %v86_v61, 0.0  ;;  %v90_v9 = vadd.f32 %v352_v7, %v67_v63  ;;  %v103_v10 = vmax.f32 %v87_v2, 0.0  ;;  %v91_v12 = vadd.f32 %v352_v7, %v68_v4 }
  0x12   :  { %v104_v11 = vmax.f32 %v88_v3, 0.0  ;;  %v281_v13 = vpack.c.bf16 %v101_v5, %v100_v0  ;;  %v105_v14 = vmax.f32 %v89_v8, 0.0 }
  0x13   :  { %v106_v15 = vmax.f32 %v90_v9, 0.0  ;;  %v286_v16 = vpack.c.bf16 %v103_v10, %v102_v6  ;;  %v107_v17 = vmax.f32 %v91_v12, 0.0 }
  0x14   :  { %308 = vst [vmem:[%s425_s3 + $0x20] sm:$0xff] %v281_v13   ;;  %v291_v1 = vpack.c.bf16 %v105_v14, %v104_v11 }
  0x15   :  { %309 = vst [vmem:[%s425_s3 + $0x28] sm:$0xff] %v286_v16   ;;  %v296_v18 = vpack.c.bf16 %v107_v17, %v106_v15 }
  0x16   :  { %310 = vst [vmem:[%s425_s3 + $0x30] sm:$0xff] %v291_v1  }
  0x17   :  { %311 = vst [vmem:[%s425_s3 + $0x38] sm:$0xff] %v296_v18  }

// kernel: _lambda_.15
= control target key start
LH: loop header
LB: loop body
LE: loop exit
PB: predicated region body
PF: predicated region fallthrough
CT: control target
= control target key end

     0   :  { %9 = vsyncpa [#allocation4], 0  ;;  %s1442_s0 = inlined_call_operand.vmem [shape: bf16[4,128,64], index: 0, kind: input, shape index: {}]   ;;  %s1443_s1 = inlined_call_operand.hbm [shape: bf16[4,64,128], index: 1, kind: input, shape index: {}]   ;;  %s1444_s2 = inlined_call_operand.vmem [shape: bf16[4,128,128], index: 2, kind: output, shape index: {0}]   ;;  %s1445_s3 = inlined_call_operand.vmem [shape: f32[4,1,2,128], index: 3, kind: output, shape index: {1}]  }
   0x1   :  { %11 = vsyncpa [#allocation4 + $0x1], 0  ;;  %s1276_s12 = smov 0   ;;  %s1278_s13 = smov 0  }
   0x2   :  { %s1280_s14 = smov 0   ;;  %s1282_s15 = smov 0  }
   0x3   :  { %s1284_s16 = smov 0   ;;  %s1286_s17 = smov 0  }
   0x4 LB: > { %s940_s18 = sadd.s32 4294967295, %s1251_s17   ;;  %s43_s19 = sadd.s32 1, %s1247_s16  ;;  %s1251_s17 = sphi %s1286_s17, %s17_s17   ;;  %s1247_s16 = sphi %s1284_s16, %s1453_s16   ;;  %s1243_s15 = sphi %s1282_s15, %s1452_s15   ;;  %s1239_s14 = sphi %s1280_s14, %s1451_s14   ;;  %s1235_s13 = sphi %s1278_s13, %s1450_s13   ;;  %s1231_s12 = sphi %s1276_s12, %s1449_s12  }
   0x5   : > { %p45_p0 = scmp.ge.s32.totalorder %s43_s19, 4  ;;  %s84_s20 = sadd.s32 1, %s1239_s14 }
   0x6   : > { %p91_p1 = scmp.ne.s32.totalorder %s1239_s14, %s1235_s13  ;;  %p92_p2 = scmp.eq.s32.totalorder %s1251_s17, 0 }
   0x7   : > { %s1455_s19 = smov (%p45_p0, %s43_s19), 0  ;;  %p97_p4 = scmp.ne.s32.totalorder %s1235_s13, %s1231_s12 }
   0x8   : > { %p1312_p3 = por %p92_p2, %p91_p1  ;;  %s77_s22 = ssub.s32 %s1247_s16, %s1455_s19 }
   0x9   : > { %p98_p5 = scmp.eq.s32.totalorder %s940_s18, 0  ;;  %p82_p6 = scmp.eq.s32.totalorder %s77_s22, 0 }
   0xa   : > { %p1108_p8 = scmp.lt.s32.totalorder %s1251_s17, 4  ;;  %s197_s25 = sand.u32 1, %s1239_s14  }
   0xb   : > { %p1319_p7 = por %p98_p5, %p97_p4  ;;  %s992_s26 = sshll.u32 %s1247_s16, 9 }
   0xc   : > { %s1325_s24 = scalar_select %p82_p6, %s1239_s14, %s84_s20  }
   0xd   : > { %s944_s27 = sshll.u32 %s197_s25, 5  ;;  %s1332_s30 = scalar_lea.hbm %s1443_s1, %s992_s26 }
   0xe   : > { %s201_s4 = scalar_lea.vmem [#allocation3], %s944_s27  ;;  %p1336_p9 = pnand %p1108_p8, %p1312_p3 }
   0xf   : > { %s211_s5 = sshll.u32 %s201_s4, 4  ;;  %s1342_s7 = scalar_lea.sflag [#allocation4], %s197_s25  ;;  %s1340_s5 = int_to_ptr.vmem [resolvable:$true] %s211_s5 }
  0x10   : > { %s1171_s8 = scalar_lea.hbm %s1332_s30, 512  ;;  %p1173_p11 = pneg %p1336_p9 }
  0x11   : > { %p1172_p10 = scmp.ne.s32.totalorder %s1332_s30, %s1171_s8  ;;  %s1176_s11 = scalar_lea.hbm %s1443_s1, 2048 }
  0x12   : > { %p1177_p0 = scmp.lt.u32.totalorder %s1332_s30, %s1443_s1  ;;  %p1178_p1 = scmp.lt.u32.totalorder %s1176_s11, %s1171_s8 }
  0x13   : > { %p1174_p12 = pnand %p1173_p11, %p1172_p10  ;;  %p1180_p3 = scmp.lt.u32.totalorder %s1171_s8, %s1332_s30 }
  0x14   : > { %p1179_p2 = por %p1178_p1, %p1177_p0 }
  0x15   : > { %p1175_p13 = pneg %p1174_p12 }
  0x16   : > { %p1181_p4 = por %p1180_p3, %p1179_p2 }
  0x18   : > { %p1182_p5 = pnand %p1181_p4, %p1175_p13 }
  0x1a   : > { %1185 = shalt.err (!%p1182_p5)
}
  0x1b   : > { %s1186_s20 = scalar_lea.vmem %s1340_s5, 512  ;;  %s1253_s21 = smov [#allocation3]  }
  0x1c   : > { %p1187_p6 = scmp.ne.s32.totalorder %s1340_s5, %s1186_s20  ;;  %s1191_s22 = sshll.u32 %s1253_s21, 4  ;;  %s1192_s22 = int_to_ptr.vmem [resolvable:$false] %s1191_s22 }
  0x1d   : > { %s1193_s25 = scalar_lea.vmem %s1192_s22, 1024  ;;  %p1194_p12 = scmp.lt.s32.totalorder %s1340_s5, %s1192_s22 }
  0x1e   : > { %p1189_p8 = pnand %p1187_p6, %p1173_p11  ;;  %p1195_p0 = scmp.lt.s32.totalorder %s1193_s25, %s1186_s20 }
  0x20   : > { %p1190_p10 = pneg %p1189_p8  ;;  %p1196_p1 = por %p1195_p0, %p1194_p12 }
  0x22   : > { %p1197_p2 = pnand %p1196_p1, %p1190_p10 }
  0x24   : > { %1200 = shalt.err (!%p1197_p2)
}
  0x25   : > { %s1254_s26 = smov 64   ;;  %s1255_s27 = smov 4  }
  0x26   : > { %1107 = dma.hbm_to_vmem [thread:$0]  (!%p1336_p9), %s1332_s30, 512, %s1340_s5, %s1342_s7, %s1254_s26, %s1254_s26, %s1255_s27  }
  0x27   : > { %p947_p11 = scmp.ge.s32.totalorder %s1251_s17, 1  ;;  %p219_p13 = scmp.lt.s32.totalorder %s1251_s17, 5 }
  0x29   : > { %p220_p3 = pnand %p947_p11, %p219_p13 }
  0x2a   : > { %s225_s28 = sand.u32 (!%p220_p3), 1, %s1235_s13  }
  0x2b   : > { %223 = sbr.rel (%p220_p3) target bundleno = 329 (0x149), region = 28  ;;  %s948_s29 = sshll.u32 (!%p220_p3), %s225_s28, 5 }
  0x2c   : > { %s226_s4 = scalar_lea.sflag (!%p220_p3), [#allocation4], %s225_s28  ;;  %s229_s8 = scalar_lea.vmem (!%p220_p3), [#allocation3], %s948_s29 }
  0x32   : > { %1226 = dma.done.wait (%p1319_p7), %s226_s4, 512  }
  0x33   : > { %1228 = vsyncadd (%p1319_p7), %s226_s4, 4294966784  ;;  %p282_p4 = scmp.lt.s32.totalorder %s1243_s15, 3  ;;  %v1159_v0 = vld [vmem:[%s229_s8] sm:$0xff]   ;;  %v1160_v1 = vld [vmem:[%s229_s8 + $0x8] sm:$0xff]   ;;  %vm443_vm0 = vcmask 523264  }
  0x34   : > { %1070 = vmatprep.subr.bf16.mxu0 %v1159_v0  ;;  %1094 = vmatprep.subr.bf16.mxu1 %v1159_v0  ;;  %v1161_v2 = vld [vmem:[%s229_s8 + $0x10] sm:$0xff]   ;;  %v1162_v4 = vld [vmem:[%s229_s8 + $0x18] sm:$0xff]  }
  0x35   : > { %s1457_s15 = smov (!%p282_p4, %s1243_s15), 3  ;;  %1071 = vmatpush3.bf16.msra.mxu0 %v1159_v0  ;;  %1098 = vmatpush3.bf16.msra.mxu1 %v1159_v0 }
  0x36   : > { %s993_s30 = sshll.u32 %s1457_s15, 6  ;;  %1072 = vmatprep.subr.bf16.mxu0 %v1160_v1  ;;  %1095 = vmatprep.subr.bf16.mxu1 %v1160_v1  ;;  %s953_s11 = sshll.u32 %s1457_s15, 1 }
  0x37   : > { %s1387_s7 = scalar_lea.vmem %s1442_s0, %s993_s30  ;;  %s1410_s10 = scalar_lea.vmem %s1444_s2, %s993_s30 }
  0x38   : > { %v1163_v3 = vld [vmem:[%s1387_s7] sm:$0xff]   ;;  %v1164_v6 = vld [vmem:[%s1387_s7 + $0x8] sm:$0xff]   ;;  %v1165_v8 = vld [vmem:[%s1387_s7 + $0x10] sm:$0xff]   ;;  %s317_s20 = scalar_lea.vmem %s1445_s3, %s953_s11 }
  0x39   : > { %1078 = vmatprep.mubr.msk.bf16.mxu0 %vm443_vm0, %v1163_v3  ;;  %1073 = vmatpush3.bf16.msra.mxu0 %v1160_v1  ;;  %v1167_v5 = vld [vmem:[%s1387_s7 + $0x20] sm:$0xff]   ;;  %v1168_v7 = vld [vmem:[%s1387_s7 + $0x28] sm:$0xff]   ;;  %v1169_v9 = vld [vmem:[%s1387_s7 + $0x30] sm:$0xff]  }
  0x3a   : > { %1099 = vmatpush3.bf16.msra.mxu1 %v1160_v1  ;;  %1074 = vmatprep.subr.bf16.mxu0 %v1161_v2  ;;  %v1166_v10 = vld [vmem:[%s1387_s7 + $0x18] sm:$0xff]  }
  0x3b   : > { %1096 = vmatprep.subr.bf16.mxu1 %v1161_v2  ;;  %1086 = vmatprep.mubr.msk.bf16.mxu1 %vm443_vm0, %v1167_v5  ;;  %v1170_v11 = vld [vmem:[%s1387_s7 + $0x38] sm:$0xff]  }
  0x3d   : > { %1075 = vmatpush3.bf16.msra.mxu0 %v1161_v2 }
  0x3e   : > { %1100 = vmatpush3.bf16.msra.mxu1 %v1161_v2  ;;  %1076 = vmatprep.subr.bf16.mxu0 %v1162_v4 }
  0x3f   : > { %1097 = vmatprep.subr.bf16.mxu1 %v1162_v4 }
  0x41   : > { %1077 = vmatpush3.bf16.msra.mxu0 %v1162_v4 }
  0x42   : > { %1101 = vmatpush3.bf16.msra.mxu1 %v1162_v4 }
  0x44   : > { %1079 = vmatmul.mubr.msk.bf16.vlgmr.msra.gmra.mrb[0].mxu0 %vm443_vm0, %v1164_v6 }
  0x45   : > { %1087 = vmatmul.mubr.msk.bf16.vlgmr.msra.gmra.mrb[0].mxu1 %vm443_vm0, %v1168_v7  ;;  %1082 = vmatprep.mubr.msk.bf16.mxu0 %vm443_vm0, %v1165_v8 }
  0x46   : > { %1090 = vmatprep.mubr.msk.bf16.mxu1 %vm443_vm0, %v1169_v9 }
  0x4c   : > { %1083 = vmatmul.mubr.msk.bf16.gmra.mrb[4].mxu0 %vm443_vm0, %v1166_v10 }
  0x4d   : > { %1091 = vmatmul.mubr.msk.bf16.gmra.mrb[4].mxu1 %vm443_vm0, %v1170_v11 }
 0x117   : > { %v1080_v12 = vpop.f32.mrb[0].mxu0 }
 0x118   : > { %v1088_v13 = vpop.f32.mrb[0].mxu1  ;;  %v502_v14 = vpop.f32.mrb[1].mxu0  ;;  %v720_v27 = vmul.f32 %v1080_v12, %v1080_v12 }
 0x119   : > { %v534_v15 = vpop.f32.mrb[1].mxu1  ;;  %v1081_v16 = vpop.f32.mrb[2].mxu0  ;;  %v718_v18 = vmul.f32 %v502_v14, %v502_v14  ;;  %v728_v63 = vmul.f32 %v1088_v13, %v1088_v13 }
 0x11a   : > { %v1089_v17 = vpop.f32.mrb[2].mxu1  ;;  %v1019_v19 = vpack.c.bf16 %v1081_v16, %v1080_v12  ;;  %v505_v20 = vpop.f32.mrb[3].mxu0  ;;  %v721_v30 = vmul.f32 %v1081_v16, %v1081_v16  ;;  %v726_v57 = vmul.f32 %v534_v15, %v534_v15 }
 0x11b   : > { %v1039_v21 = vpack.c.bf16 %v1089_v17, %v1088_v13  ;;  %v537_v22 = vpop.f32.mrb[3].mxu1  ;;  %v1014_v23 = vpack.c.bf16 %v505_v20, %v502_v14  ;;  %v696_v24 = vadd.f32 %v505_v20, %v502_v14  ;;  %v719_v25 = vmul.f32 %v505_v20, %v505_v20 }
 0x11c   : > { %v1034_v26 = vpack.c.bf16 %v537_v22, %v534_v15  ;;  %1051 = vst [vmem:[%s1410_s10 + $0x8] sm:$0xff] %v1019_v19   ;;  %v727_v62 = vmul.f32 %v537_v22, %v537_v22  ;;  %v729_v2 = vmul.f32 %v1089_v17, %v1089_v17 }
 0x11d   : > { %1055 = vst [vmem:[%s1410_s10 + $0x28] sm:$0xff] %v1039_v21   ;;  %1015 = vst [vmem:[%s1410_s10] sm:$0xff] %v1014_v23   ;;  %v697_v28 = vadd.f32 %v1080_v12, %v696_v24  ;;  %v734_v29 = vadd.f32 %v719_v25, %v718_v18 }
 0x11e   : > { %1054 = vst [vmem:[%s1410_s10 + $0x20] sm:$0xff] %v1034_v26  }
 0x11f   : > { %v735_v31 = vadd.f32 %v734_v29, %v720_v27  ;;  %v1084_v32 = vpop.f32.mrb[4].mxu0  ;;  %v698_v33 = vadd.f32 %v1081_v16, %v697_v28 }
 0x120   : > { %v1092_v34 = vpop.f32.mrb[4].mxu1  ;;  %v518_v35 = vpop.f32.mrb[5].mxu0  ;;  %v724_v51 = vmul.f32 %v1084_v32, %v1084_v32 }
 0x121   : > { %v550_v36 = vpop.f32.mrb[5].mxu1  ;;  %v699_v37 = vadd.f32 %v698_v33, %v518_v35  ;;  %v722_v38 = vmul.f32 %v518_v35, %v518_v35  ;;  %v736_v39 = vadd.f32 %v735_v31, %v721_v30  ;;  %v1085_v40 = vpop.f32.mrb[6].mxu0  ;;  %v732_v11 = vmul.f32 %v1092_v34, %v1092_v34 }
 0x122   : > { %v1093_v41 = vpop.f32.mrb[6].mxu1  ;;  %v1029_v42 = vpack.c.bf16 %v1085_v40, %v1084_v32  ;;  %v521_v43 = vpop.f32.mrb[7].mxu0  ;;  %v725_v54 = vmul.f32 %v1085_v40, %v1085_v40  ;;  %v730_v5 = vmul.f32 %v550_v36, %v550_v36 }
 0x123   : > { %v1049_v44 = vpack.c.bf16 %v1093_v41, %v1092_v34  ;;  %v553_v45 = vpop.f32.mrb[7].mxu1  ;;  %v737_v46 = vadd.f32 %v736_v39, %v722_v38  ;;  %v1024_v47 = vpack.c.bf16 %v521_v43, %v518_v35  ;;  %v700_v48 = vadd.f32 %v699_v37, %v521_v43 }
 0x124   : > { %v723_v49 = vmul.f32 %v521_v43, %v521_v43  ;;  %1053 = vst [vmem:[%s1410_s10 + $0x18] sm:$0xff] %v1029_v42   ;;  %v1044_v50 = vpack.c.bf16 %v553_v45, %v550_v36  ;;  %v731_v10 = vmul.f32 %v553_v45, %v553_v45 }
 0x125   : > { %1057 = vst [vmem:[%s1410_s10 + $0x38] sm:$0xff] %v1049_v44   ;;  %1052 = vst [vmem:[%s1410_s10 + $0x10] sm:$0xff] %v1024_v47   ;;  %v701_v52 = vadd.f32 %v1084_v32, %v700_v48 }
 0x126   : > { %v738_v53 = vadd.f32 %v737_v46, %v723_v49  ;;  %1056 = vst [vmem:[%s1410_s10 + $0x30] sm:$0xff] %v1044_v50  }
 0x127   : > { %v702_v56 = vadd.f32 %v1085_v40, %v701_v52 }
 0x128   : > { %v739_v55 = vadd.f32 %v738_v53, %v724_v51 }
 0x129   : > { %v703_v58 = vadd.f32 %v702_v56, %v534_v15  ;;  %v733_v15 = vmul.f32 %v1093_v41, %v1093_v41 }
 0x12a   : > { %v740_v59 = vadd.f32 %v739_v55, %v725_v54 }
 0x12b   : > { %v704_v61 = vadd.f32 %v703_v58, %v537_v22 }
 0x12c   : > { %v741_v60 = vadd.f32 %v740_v59, %v726_v57 }
 0x12d   : > { %v705_v0 = vadd.f32 %v1088_v13, %v704_v61 }
 0x12e   : > { %v742_v1 = vadd.f32 %v741_v60, %v727_v62 }
 0x12f   : > { %v706_v4 = vadd.f32 %v1089_v17, %v705_v0 }
 0x130   : > { %v743_v3 = vadd.f32 %v742_v1, %v728_v63 }
 0x131   : > { %v707_v6 = vadd.f32 %v706_v4, %v550_v36 }
 0x132   : > { %v744_v7 = vadd.f32 %v743_v3, %v729_v2 }
 0x133   : > { %v708_v9 = vadd.f32 %v707_v6, %v553_v45 }
 0x134   : > { %v745_v8 = vadd.f32 %v744_v7, %v730_v5 }
 0x135   : > { %v709_v12 = vadd.f32 %v1092_v34, %v708_v9 }
 0x136   : > { %v746_v14 = vadd.f32 %v745_v8, %v731_v10 }
 0x137   : > { %v710_v16 = vadd.f32 %v1093_v41, %v709_v12 }
 0x138   : > { %v747_v18 = vadd.f32 %v746_v14, %v732_v11 }
 0x139   : > { %v711_v19 = vrot.slane %v710_v16, 4 }
 0x13a   : > { %v748_v20 = vadd.f32 %v747_v18, %v733_v15 }
 0x13b   : > { %v712_v13 = vadd.f32 %v711_v19, %v710_v16 }
 0x13c   : > { %v749_v21 = vrot.slane %v748_v20, 4 }
 0x13d   : > { %v713_v22 = vrot.slane %v712_v13, 2 }
 0x13e   : > { %v750_v23 = vadd.f32 %v749_v21, %v748_v20 }
 0x13f   : > { %v714_v17 = vadd.f32 %v713_v22, %v712_v13 }
 0x140   : > { %v751_v24 = vrot.slane %v750_v23, 2 }
 0x141   : > { %v715_v25 = vrot.slane %v714_v17, 1 }
 0x142   : > { %v752_v26 = vadd.f32 %v751_v24, %v750_v23 }
 0x143   : > { %v716_v27 = vadd.f32 %v715_v25, %v714_v17 }
 0x144   : > { %v753_v28 = vrot.slane %v752_v26, 1 }
 0x145   : > { %717 = vst [vmem:[%s317_s20] sm:$0x1] %v716_v27 }
 0x146   : > { %v754_v29 = vadd.f32 %v753_v28, %v752_v26 }
 0x148   : > { %755 = vst [vmem:[%s317_s20 + $0x1] sm:$0x1] %v754_v29 }
 0x149 PF: > { %s17_s17 = sadd.s32 1, %s1251_s17   ;;  %s1449_s12 = smov %s1235_s13 }
 0x14a   : > { %p14_p7 = scmp.ge.s32.totalorder %s17_s17, 6   ;;  %s1450_s13 = smov %s1239_s14 }
 0x14b   : > { %s1451_s14 = smov %s1325_s24  ;;  %s1452_s15 = smov %s1247_s16 }
 0x14c   : > { %s1453_s16 = smov %s1455_s19  ;;  %16 = sbr.rel (!%p14_p7) target bundleno = 4 (0x4), region = 91 }
 0x153   :  { %818 = vsyncpa [#allocation4], 1 }
 0x154   :  { %820 = vsyncpa [#allocation4 + $0x1], 1 }

// kernel: _lambda_.16
= control target key start
LH: loop header
LB: loop body
LE: loop exit
PB: predicated region body
PF: predicated region fallthrough
CT: control target
= control target key end

     0   :  { %s1502_s0 = inlined_call_operand.vmem [shape: bf16[512,128], index: 0, kind: input, shape index: {}]   ;;  %s1503_s1 = inlined_call_operand.vmem [shape: f32[1,128], index: 1, kind: input, shape index: {}]   ;;  %s1504_s2 = inlined_call_operand.vmem [shape: f32[1,128], index: 2, kind: input, shape index: {}]   ;;  %s1505_s3 = inlined_call_operand.vmem [shape: bf16[512,128], index: 3, kind: output, shape index: {}]  }
   0x1   :  { %v803_v0 = vld [vmem:[%s1502_s0] sm:$0xff]   ;;  %v1090_v4 = vld [vmem:[%s1502_s0 + $0x8] sm:$0xff]   ;;  %v1091_v5 = vld [vmem:[%s1502_s0 + $0x10] sm:$0xff]  }
   0x2   :  { %v1178_v1 = vld [vmem:[%s1503_s1] ss:$0 sm:$0xff]  ;;  %v804_v2 = vunpack.c.l.bf16 %v803_v0  ;;  %v805_v3 = vunpack.c.h.bf16 %v803_v0  ;;  %v1092_v6 = vld [vmem:[%s1502_s0 + $0x18] sm:$0xff]   ;;  %v808_v8 = vunpack.c.l.bf16 %v1090_v4  ;;  %v809_v9 = vunpack.c.h.bf16 %v1090_v4  ;;  %v1094_v33 = vld [vmem:[%s1502_s0 + $0x28] sm:$0xff]  }
   0x3   :  { %v1192_v7 = vld [vmem:[%s1504_s2] ss:$0 sm:$0xff]  ;;  %v812_v10 = vunpack.c.l.bf16 %v1091_v5  ;;  %v813_v11 = vunpack.c.h.bf16 %v1091_v5  ;;  %v816_v14 = vunpack.c.l.bf16 %v1092_v6  ;;  %v817_v15 = vunpack.c.h.bf16 %v1092_v6  ;;  %v1095_v38 = vld [vmem:[%s1502_s0 + $0x30] sm:$0xff]   ;;  %v1096_v43 = vld [vmem:[%s1502_s0 + $0x38] sm:$0xff]  }
   0x4   :  { %v149_v12 = vmul.f32 %v804_v2, %v1178_v1  ;;  %v150_v13 = vmul.f32 %v805_v3, %v1178_v1  ;;  %v151_v16 = vmul.f32 %v808_v8, %v1178_v1  ;;  %v152_v17 = vmul.f32 %v809_v9, %v1178_v1  ;;  %v1093_v28 = vld [vmem:[%s1502_s0 + $0x20] sm:$0xff]  }
   0x5   :  { %v153_v18 = vmul.f32 %v812_v10, %v1178_v1  ;;  %v154_v19 = vmul.f32 %v813_v11, %v1178_v1  ;;  %v155_v22 = vmul.f32 %v816_v14, %v1178_v1  ;;  %v156_v23 = vmul.f32 %v817_v15, %v1178_v1  ;;  %v1097_v0 = vld [vmem:[%s1502_s0 + $0x40] sm:$0xff]   ;;  %v1098_v11 = vld [vmem:[%s1502_s0 + $0x48] sm:$0xff]  }
   0x6   :  { %v220_v20 = vadd.f32 %v1192_v7, %v149_v12  ;;  %v221_v21 = vadd.f32 %v1192_v7, %v150_v13  ;;  %v222_v24 = vadd.f32 %v1192_v7, %v151_v16  ;;  %v223_v25 = vadd.f32 %v1192_v7, %v152_v17  ;;  %v1099_v16 = vld [vmem:[%s1502_s0 + $0x50] sm:$0xff]  }
   0x7   :  { %v224_v26 = vadd.f32 %v1192_v7, %v153_v18  ;;  %v225_v27 = vadd.f32 %v1192_v7, %v154_v19  ;;  %v226_v31 = vadd.f32 %v1192_v7, %v155_v22  ;;  %v227_v32 = vadd.f32 %v1192_v7, %v156_v23 }
   0x8   :  { %v284_v29 = vmax.f32 %v220_v20, 0.0  ;;  %v285_v30 = vmax.f32 %v221_v21, 0.0  ;;  %v286_v34 = vmax.f32 %v222_v24, 0.0  ;;  %v287_v35 = vmax.f32 %v223_v25, 0.0  ;;  %v1100_v25 = vld [vmem:[%s1502_s0 + $0x58] sm:$0xff]  }
   0x9   :  { %v288_v36 = vmax.f32 %v224_v26, 0.0  ;;  %v289_v37 = vmax.f32 %v225_v27, 0.0  ;;  %v290_v40 = vmax.f32 %v226_v31, 0.0  ;;  %v291_v41 = vmax.f32 %v227_v32, 0.0 }
   0xa   :  { %v933_v39 = vpack.c.bf16 %v285_v30, %v284_v29  ;;  %v820_v42 = vunpack.c.l.bf16 %v1093_v28  ;;  %v938_v44 = vpack.c.bf16 %v287_v35, %v286_v34  ;;  %v821_v46 = vunpack.c.h.bf16 %v1093_v28 }
   0xb   :  { %v943_v45 = vpack.c.bf16 %v289_v37, %v288_v36  ;;  %v824_v47 = vunpack.c.l.bf16 %v1094_v33  ;;  %v948_v48 = vpack.c.bf16 %v291_v41, %v290_v40  ;;  %v825_v50 = vunpack.c.h.bf16 %v1094_v33 }
   0xc   :  { %934 = vst [vmem:[%s1505_s3] sm:$0xff] %v933_v39   ;;  %v157_v49 = vmul.f32 %v820_v42, %v1178_v1  ;;  %v828_v51 = vunpack.c.l.bf16 %v1095_v38  ;;  %1121 = vst [vmem:[%s1505_s3 + $0x8] sm:$0xff] %v938_v44   ;;  %v158_v52 = vmul.f32 %v821_v46, %v1178_v1  ;;  %v829_v54 = vunpack.c.h.bf16 %v1095_v38  ;;  %v1101_v38 = vld [vmem:[%s1502_s0 + $0x60] sm:$0xff]  }
   0xd   :  { %1122 = vst [vmem:[%s1505_s3 + $0x10] sm:$0xff] %v943_v45   ;;  %v159_v53 = vmul.f32 %v824_v47, %v1178_v1  ;;  %v832_v55 = vunpack.c.l.bf16 %v1096_v43  ;;  %1123 = vst [vmem:[%s1505_s3 + $0x18] sm:$0xff] %v948_v48   ;;  %v160_v57 = vmul.f32 %v825_v50, %v1178_v1  ;;  %v833_v59 = vunpack.c.h.bf16 %v1096_v43 }
   0xe   :  { %v228_v56 = vadd.f32 %v1192_v7, %v157_v49  ;;  %v161_v58 = vmul.f32 %v828_v51, %v1178_v1  ;;  %v229_v60 = vadd.f32 %v1192_v7, %v158_v52  ;;  %v162_v62 = vmul.f32 %v829_v54, %v1178_v1  ;;  %v1102_v51 = vld [vmem:[%s1502_s0 + $0x68] sm:$0xff]  }
   0xf   :  { %v230_v61 = vadd.f32 %v1192_v7, %v159_v53  ;;  %v163_v63 = vmul.f32 %v832_v55, %v1178_v1  ;;  %v231_v3 = vadd.f32 %v1192_v7, %v160_v57  ;;  %v164_v5 = vmul.f32 %v833_v59, %v1178_v1 }
  0x10   :  { %v292_v2 = vmax.f32 %v228_v56, 0.0  ;;  %v232_v4 = vadd.f32 %v1192_v7, %v161_v58  ;;  %v293_v6 = vmax.f32 %v229_v60, 0.0  ;;  %v233_v9 = vadd.f32 %v1192_v7, %v162_v62  ;;  %v1103_v60 = vld [vmem:[%s1502_s0 + $0x70] sm:$0xff]  }
  0x11   :  { %v294_v8 = vmax.f32 %v230_v61, 0.0  ;;  %v234_v10 = vadd.f32 %v1192_v7, %v163_v63  ;;  %v295_v12 = vmax.f32 %v231_v3, 0.0  ;;  %v235_v14 = vadd.f32 %v1192_v7, %v164_v5 }
  0x12   :  { %v296_v13 = vmax.f32 %v232_v4, 0.0  ;;  %v836_v15 = vunpack.c.l.bf16 %v1097_v0  ;;  %v953_v17 = vpack.c.bf16 %v293_v6, %v292_v2  ;;  %v297_v18 = vmax.f32 %v233_v9, 0.0  ;;  %v1104_v2 = vld [vmem:[%s1502_s0 + $0x78] sm:$0xff]  }
  0x13   :  { %v298_v19 = vmax.f32 %v234_v10, 0.0  ;;  %v837_v20 = vunpack.c.h.bf16 %v1097_v0  ;;  %v958_v21 = vpack.c.bf16 %v295_v12, %v294_v8  ;;  %v299_v22 = vmax.f32 %v235_v14, 0.0  ;;  %v1105_v12 = vld [vmem:[%s1502_s0 + $0x80] sm:$0xff]  }
  0x14   :  { %v165_v23 = vmul.f32 %v836_v15, %v1178_v1  ;;  %v840_v24 = vunpack.c.l.bf16 %v1098_v11  ;;  %1124 = vst [vmem:[%s1505_s3 + $0x20] sm:$0xff] %v953_v17   ;;  %v963_v26 = vpack.c.bf16 %v297_v18, %v296_v13  ;;  %v841_v28 = vunpack.c.h.bf16 %v1098_v11 }
  0x15   :  { %v166_v27 = vmul.f32 %v837_v20, %v1178_v1  ;;  %v844_v29 = vunpack.c.l.bf16 %v1099_v16  ;;  %1125 = vst [vmem:[%s1505_s3 + $0x28] sm:$0xff] %v958_v21   ;;  %v968_v30 = vpack.c.bf16 %v299_v22, %v298_v19  ;;  %v845_v33 = vunpack.c.h.bf16 %v1099_v16 }
  0x16   :  { %v236_v31 = vadd.f32 %v1192_v7, %v165_v23  ;;  %v167_v32 = vmul.f32 %v840_v24, %v1178_v1  ;;  %1126 = vst [vmem:[%s1505_s3 + $0x30] sm:$0xff] %v963_v26   ;;  %v168_v35 = vmul.f32 %v841_v28, %v1178_v1  ;;  %v848_v37 = vunpack.c.l.bf16 %v1100_v25 }
  0x17   :  { %v237_v34 = vadd.f32 %v1192_v7, %v166_v27  ;;  %v169_v36 = vmul.f32 %v844_v29, %v1178_v1  ;;  %1127 = vst [vmem:[%s1505_s3 + $0x38] sm:$0xff] %v968_v30   ;;  %v170_v41 = vmul.f32 %v845_v33, %v1178_v1  ;;  %v849_v42 = vunpack.c.h.bf16 %v1100_v25  ;;  %v1106_v29 = vld [vmem:[%s1502_s0 + $0x88] sm:$0xff]  }
  0x18   :  { %v300_v39 = vmax.f32 %v236_v31, 0.0  ;;  %v238_v40 = vadd.f32 %v1192_v7, %v167_v32  ;;  %v239_v44 = vadd.f32 %v1192_v7, %v168_v35  ;;  %v171_v46 = vmul.f32 %v848_v37, %v1178_v1 }
  0x19   :  { %v301_v43 = vmax.f32 %v237_v34, 0.0  ;;  %v240_v45 = vadd.f32 %v1192_v7, %v169_v36  ;;  %v241_v48 = vadd.f32 %v1192_v7, %v170_v41  ;;  %v172_v49 = vmul.f32 %v849_v42, %v1178_v1  ;;  %v1107_v34 = vld [vmem:[%s1502_s0 + $0x90] sm:$0xff]  }
  0x1a   :  { %v302_v47 = vmax.f32 %v238_v40, 0.0  ;;  %v852_v50 = vunpack.c.l.bf16 %v1101_v38  ;;  %v303_v53 = vmax.f32 %v239_v44, 0.0  ;;  %v242_v55 = vadd.f32 %v1192_v7, %v171_v46 }
  0x1b   :  { %v973_v52 = vpack.c.bf16 %v301_v43, %v300_v39  ;;  %v304_v54 = vmax.f32 %v240_v45, 0.0  ;;  %v305_v56 = vmax.f32 %v241_v48, 0.0  ;;  %v243_v57 = vadd.f32 %v1192_v7, %v172_v49  ;;  %v1108_v43 = vld [vmem:[%s1502_s0 + $0x98] sm:$0xff]  }
  0x1c   :  { %v853_v58 = vunpack.c.h.bf16 %v1101_v38  ;;  %v173_v59 = vmul.f32 %v852_v50, %v1178_v1  ;;  %v978_v61 = vpack.c.bf16 %v303_v53, %v302_v47  ;;  %v306_v62 = vmax.f32 %v242_v55, 0.0 }
  0x1d   :  { %1128 = vst [vmem:[%s1505_s3 + $0x40] sm:$0xff] %v973_v52   ;;  %v856_v63 = vunpack.c.l.bf16 %v1102_v51  ;;  %v857_v0 = vunpack.c.h.bf16 %v1102_v51  ;;  %v983_v3 = vpack.c.bf16 %v305_v56, %v304_v54  ;;  %v307_v4 = vmax.f32 %v243_v57, 0.0  ;;  %v1109_v56 = vld [vmem:[%s1502_s0 + $0xa0] sm:$0xff]  }
  0x1e   :  { %v174_v5 = vmul.f32 %v853_v58, %v1178_v1  ;;  %v244_v6 = vadd.f32 %v1192_v7, %v173_v59  ;;  %1129 = vst [vmem:[%s1505_s3 + $0x48] sm:$0xff] %v978_v61   ;;  %v860_v10 = vunpack.c.l.bf16 %v1103_v60  ;;  %v861_v11 = vunpack.c.h.bf16 %v1103_v60 }
  0x1f   :  { %v175_v8 = vmul.f32 %v856_v63, %v1178_v1  ;;  %v176_v9 = vmul.f32 %v857_v0, %v1178_v1  ;;  %1130 = vst [vmem:[%s1505_s3 + $0x50] sm:$0xff] %v983_v3   ;;  %v988_v13 = vpack.c.bf16 %v307_v4, %v306_v62  ;;  %v864_v16 = vunpack.c.l.bf16 %v1104_v2 }
  0x20   :  { %v245_v14 = vadd.f32 %v1192_v7, %v174_v5  ;;  %v308_v15 = vmax.f32 %v244_v6, 0.0  ;;  %v177_v19 = vmul.f32 %v860_v10, %v1178_v1  ;;  %v178_v20 = vmul.f32 %v861_v11, %v1178_v1 }
  0x21   :  { %v246_v17 = vadd.f32 %v1192_v7, %v175_v8  ;;  %v247_v18 = vadd.f32 %v1192_v7, %v176_v9  ;;  %1131 = vst [vmem:[%s1505_s3 + $0x58] sm:$0xff] %v988_v13   ;;  %v865_v22 = vunpack.c.h.bf16 %v1104_v2  ;;  %v179_v23 = vmul.f32 %v864_v16, %v1178_v1  ;;  %v1110_v2 = vld [vmem:[%s1502_s0 + $0xa8] sm:$0xff]   ;;  %v1111_v16 = vld [vmem:[%s1502_s0 + $0xb0] sm:$0xff]  }
  0x22   :  { %v309_v21 = vmax.f32 %v245_v14, 0.0  ;;  %v868_v24 = vunpack.c.l.bf16 %v1105_v12  ;;  %v248_v27 = vadd.f32 %v1192_v7, %v177_v19  ;;  %v249_v28 = vadd.f32 %v1192_v7, %v178_v20 }
  0x23   :  { %v310_v25 = vmax.f32 %v246_v17, 0.0  ;;  %v311_v26 = vmax.f32 %v247_v18, 0.0  ;;  %v180_v31 = vmul.f32 %v865_v22, %v1178_v1  ;;  %v250_v32 = vadd.f32 %v1192_v7, %v179_v23 }
  0x24   :  { %v993_v30 = vpack.c.bf16 %v309_v21, %v308_v15  ;;  %v869_v33 = vunpack.c.h.bf16 %v1105_v12  ;;  %v312_v36 = vmax.f32 %v248_v27, 0.0  ;;  %v313_v37 = vmax.f32 %v249_v28, 0.0  ;;  %v1112_v21 = vld [vmem:[%s1502_s0 + $0xb8] sm:$0xff]  }
  0x25   :  { %v998_v35 = vpack.c.bf16 %v311_v26, %v310_v25  ;;  %v181_v38 = vmul.f32 %v868_v24, %v1178_v1  ;;  %v251_v39 = vadd.f32 %v1192_v7, %v180_v31  ;;  %v314_v40 = vmax.f32 %v250_v32, 0.0 }
  0x26   :  { %1132 = vst [vmem:[%s1505_s3 + $0x60] sm:$0xff] %v993_v30   ;;  %v182_v41 = vmul.f32 %v869_v33, %v1178_v1  ;;  %v872_v42 = vunpack.c.l.bf16 %v1106_v29  ;;  %v1003_v44 = vpack.c.bf16 %v313_v37, %v312_v36  ;;  %v873_v46 = vunpack.c.h.bf16 %v1106_v29 }
  0x27   :  { %1133 = vst [vmem:[%s1505_s3 + $0x68] sm:$0xff] %v998_v35   ;;  %v252_v45 = vadd.f32 %v1192_v7, %v181_v38  ;;  %v876_v47 = vunpack.c.l.bf16 %v1107_v34  ;;  %v315_v48 = vmax.f32 %v251_v39, 0.0  ;;  %v877_v51 = vunpack.c.h.bf16 %v1107_v34  ;;  %v1113_v34 = vld [vmem:[%s1502_s0 + $0xc0] sm:$0xff]  }
  0x28   :  { %v253_v49 = vadd.f32 %v1192_v7, %v182_v41  ;;  %v183_v50 = vmul.f32 %v872_v42, %v1178_v1  ;;  %1134 = vst [vmem:[%s1505_s3 + $0x70] sm:$0xff] %v1003_v44   ;;  %v184_v53 = vmul.f32 %v873_v46, %v1178_v1  ;;  %v880_v55 = vunpack.c.l.bf16 %v1108_v43 }
  0x29   :  { %v316_v52 = vmax.f32 %v252_v45, 0.0  ;;  %v185_v54 = vmul.f32 %v876_v47, %v1178_v1  ;;  %v1008_v57 = vpack.c.bf16 %v315_v48, %v314_v40  ;;  %v186_v60 = vmul.f32 %v877_v51, %v1178_v1  ;;  %v1114_v47 = vld [vmem:[%s1502_s0 + $0xc8] sm:$0xff]  }
  0x2a   :  { %v317_v58 = vmax.f32 %v253_v49, 0.0  ;;  %v254_v59 = vadd.f32 %v1192_v7, %v183_v50  ;;  %v255_v61 = vadd.f32 %v1192_v7, %v184_v53  ;;  %v881_v63 = vunpack.c.h.bf16 %v1108_v43 }
  0x2b   :  { %v256_v62 = vadd.f32 %v1192_v7, %v185_v54  ;;  %v187_v0 = vmul.f32 %v880_v55, %v1178_v1  ;;  %1135 = vst [vmem:[%s1505_s3 + $0x78] sm:$0xff] %v1008_v57   ;;  %v257_v5 = vadd.f32 %v1192_v7, %v186_v60  ;;  %v884_v6 = vunpack.c.l.bf16 %v1109_v56 }
  0x2c   :  { %v1013_v3 = vpack.c.bf16 %v317_v58, %v316_v52  ;;  %v318_v4 = vmax.f32 %v254_v59, 0.0  ;;  %v319_v8 = vmax.f32 %v255_v61, 0.0  ;;  %v188_v10 = vmul.f32 %v881_v63, %v1178_v1  ;;  %v1115_v52 = vld [vmem:[%s1502_s0 + $0xd0] sm:$0xff]   ;;  %v1116_v61 = vld [vmem:[%s1502_s0 + $0xd8] sm:$0xff]  }
  0x2d   :  { %v320_v9 = vmax.f32 %v256_v62, 0.0  ;;  %v258_v11 = vadd.f32 %v1192_v7, %v187_v0  ;;  %v321_v12 = vmax.f32 %v257_v5, 0.0  ;;  %v885_v13 = vunpack.c.h.bf16 %v1109_v56 }
  0x2e   :  { %1136 = vst [vmem:[%s1505_s3 + $0x80] sm:$0xff] %v1013_v3   ;;  %v189_v14 = vmul.f32 %v884_v6, %v1178_v1  ;;  %v888_v15 = vunpack.c.l.bf16 %v1110_v2  ;;  %v1018_v17 = vpack.c.bf16 %v319_v8, %v318_v4  ;;  %v259_v18 = vadd.f32 %v1192_v7, %v188_v10 }
  0x2f   :  { %v322_v19 = vmax.f32 %v258_v11, 0.0  ;;  %v889_v20 = vunpack.c.h.bf16 %v1110_v2  ;;  %v1023_v22 = vpack.c.bf16 %v321_v12, %v320_v9  ;;  %v190_v23 = vmul.f32 %v885_v13, %v1178_v1  ;;  %v1117_v12 = vld [vmem:[%s1502_s0 + $0xe0] sm:$0xff]  }
  0x30   :  { %v260_v24 = vadd.f32 %v1192_v7, %v189_v14  ;;  %v191_v25 = vmul.f32 %v888_v15, %v1178_v1  ;;  %1137 = vst [vmem:[%s1505_s3 + $0x88] sm:$0xff] %v1018_v17   ;;  %v323_v26 = vmax.f32 %v259_v18, 0.0  ;;  %v892_v28 = vunpack.c.l.bf16 %v1111_v16 }
  0x31   :  { %v192_v27 = vmul.f32 %v889_v20, %v1178_v1  ;;  %v893_v29 = vunpack.c.h.bf16 %v1111_v16  ;;  %1138 = vst [vmem:[%s1505_s3 + $0x90] sm:$0xff] %v1023_v22   ;;  %v261_v30 = vadd.f32 %v1192_v7, %v190_v23  ;;  %v896_v33 = vunpack.c.l.bf16 %v1112_v21 }
  0x32   :  { %v324_v31 = vmax.f32 %v260_v24, 0.0  ;;  %v262_v32 = vadd.f32 %v1192_v7, %v191_v25  ;;  %v1028_v35 = vpack.c.bf16 %v323_v26, %v322_v19  ;;  %v193_v37 = vmul.f32 %v892_v28, %v1178_v1 }
  0x33   :  { %v263_v36 = vadd.f32 %v1192_v7, %v192_v27  ;;  %v194_v38 = vmul.f32 %v893_v29, %v1178_v1  ;;  %v325_v39 = vmax.f32 %v261_v30, 0.0  ;;  %v897_v41 = vunpack.c.h.bf16 %v1112_v21  ;;  %v1118_v21 = vld [vmem:[%s1502_s0 + $0xe8] sm:$0xff]  }
  0x34   :  { %v326_v40 = vmax.f32 %v262_v32, 0.0  ;;  %v195_v42 = vmul.f32 %v896_v33, %v1178_v1  ;;  %1139 = vst [vmem:[%s1505_s3 + $0x98] sm:$0xff] %v1028_v35   ;;  %v264_v44 = vadd.f32 %v1192_v7, %v193_v37  ;;  %v900_v46 = vunpack.c.l.bf16 %v1113_v34 }
  0x35   :  { %v327_v43 = vmax.f32 %v263_v36, 0.0  ;;  %v265_v45 = vadd.f32 %v1192_v7, %v194_v38  ;;  %v1033_v48 = vpack.c.bf16 %v325_v39, %v324_v31  ;;  %v196_v49 = vmul.f32 %v897_v41, %v1178_v1  ;;  %v1120_v39 = vld [vmem:[%s1502_s0 + $0xf8] sm:$0xff]  }
  0x36   :  { %v266_v50 = vadd.f32 %v1192_v7, %v195_v42  ;;  %v901_v51 = vunpack.c.h.bf16 %v1113_v34  ;;  %v328_v54 = vmax.f32 %v264_v44, 0.0  ;;  %v197_v56 = vmul.f32 %v900_v46, %v1178_v1  ;;  %v1119_v34 = vld [vmem:[%s1502_s0 + $0xf0] sm:$0xff]  }
  0x37   :  { %v1038_v53 = vpack.c.bf16 %v327_v43, %v326_v40  ;;  %v329_v55 = vmax.f32 %v265_v45, 0.0  ;;  %1140 = vst [vmem:[%s1505_s3 + $0xa0] sm:$0xff] %v1033_v48   ;;  %v267_v57 = vadd.f32 %v1192_v7, %v196_v49  ;;  %v904_v60 = vunpack.c.l.bf16 %v1114_v47 }
  0x38   :  { %v330_v58 = vmax.f32 %v266_v50, 0.0  ;;  %v198_v59 = vmul.f32 %v901_v51, %v1178_v1  ;;  %v268_v63 = vadd.f32 %v1192_v7, %v197_v56  ;;  %v905_v0 = vunpack.c.h.bf16 %v1114_v47 }
  0x39   :  { %1141 = vst [vmem:[%s1505_s3 + $0xa8] sm:$0xff] %v1038_v53   ;;  %v1043_v62 = vpack.c.bf16 %v329_v55, %v328_v54  ;;  %v908_v2 = vunpack.c.l.bf16 %v1115_v52  ;;  %v331_v3 = vmax.f32 %v267_v57, 0.0  ;;  %v199_v5 = vmul.f32 %v904_v60, %v1178_v1 }
  0x3a   :  { %v269_v4 = vadd.f32 %v1192_v7, %v198_v59  ;;  %v909_v6 = vunpack.c.h.bf16 %v1115_v52  ;;  %v332_v8 = vmax.f32 %v268_v63, 0.0  ;;  %v200_v9 = vmul.f32 %v905_v0, %v1178_v1 }
  0x3b   :  { %1142 = vst [vmem:[%s1505_s3 + $0xb0] sm:$0xff] %v1043_v62   ;;  %v201_v10 = vmul.f32 %v908_v2, %v1178_v1  ;;  %v912_v11 = vunpack.c.l.bf16 %v1116_v61  ;;  %v1048_v13 = vpack.c.bf16 %v331_v3, %v330_v58  ;;  %v270_v15 = vadd.f32 %v1192_v7, %v199_v5 }
  0x3c   :  { %v333_v14 = vmax.f32 %v269_v4, 0.0  ;;  %v202_v16 = vmul.f32 %v909_v6, %v1178_v1  ;;  %v271_v17 = vadd.f32 %v1192_v7, %v200_v9  ;;  %v913_v19 = vunpack.c.h.bf16 %v1116_v61 }
  0x3d   :  { %v272_v18 = vadd.f32 %v1192_v7, %v201_v10  ;;  %v203_v20 = vmul.f32 %v912_v11, %v1178_v1  ;;  %1143 = vst [vmem:[%s1505_s3 + $0xb8] sm:$0xff] %v1048_v13   ;;  %v334_v23 = vmax.f32 %v270_v15, 0.0  ;;  %v916_v25 = vunpack.c.l.bf16 %v1117_v12 }
  0x3e   :  { %v1053_v22 = vpack.c.bf16 %v333_v14, %v332_v8  ;;  %v273_v24 = vadd.f32 %v1192_v7, %v202_v16  ;;  %v335_v26 = vmax.f32 %v271_v17, 0.0  ;;  %v204_v28 = vmul.f32 %v913_v19, %v1178_v1 }
  0x3f   :  { %v336_v27 = vmax.f32 %v272_v18, 0.0  ;;  %v274_v29 = vadd.f32 %v1192_v7, %v203_v20  ;;  %v917_v31 = vunpack.c.h.bf16 %v1117_v12  ;;  %v205_v32 = vmul.f32 %v916_v25, %v1178_v1 }
  0x40   :  { %1144 = vst [vmem:[%s1505_s3 + $0xc0] sm:$0xff] %v1053_v22   ;;  %v337_v30 = vmax.f32 %v273_v24, 0.0  ;;  %v920_v33 = vunpack.c.l.bf16 %v1118_v21  ;;  %v1058_v35 = vpack.c.bf16 %v335_v26, %v334_v23  ;;  %v275_v36 = vadd.f32 %v1192_v7, %v204_v28 }
  0x41   :  { %v338_v37 = vmax.f32 %v274_v29, 0.0  ;;  %v921_v38 = vunpack.c.h.bf16 %v1118_v21  ;;  %v206_v41 = vmul.f32 %v917_v31, %v1178_v1  ;;  %v276_v42 = vadd.f32 %v1192_v7, %v205_v32 }
  0x42   :  { %v1063_v40 = vpack.c.bf16 %v337_v30, %v336_v27  ;;  %v207_v43 = vmul.f32 %v920_v33, %v1178_v1  ;;  %1145 = vst [vmem:[%s1505_s3 + $0xc8] sm:$0xff] %v1058_v35   ;;  %v339_v44 = vmax.f32 %v275_v36, 0.0  ;;  %v924_v46 = vunpack.c.l.bf16 %v1119_v34 }
  0x43   :  { %v208_v45 = vmul.f32 %v921_v38, %v1178_v1  ;;  %v925_v47 = vunpack.c.h.bf16 %v1119_v34  ;;  %v277_v48 = vadd.f32 %v1192_v7, %v206_v41  ;;  %v340_v49 = vmax.f32 %v276_v42, 0.0 }
  0x44   :  { %1146 = vst [vmem:[%s1505_s3 + $0xd0] sm:$0xff] %v1063_v40   ;;  %v278_v50 = vadd.f32 %v1192_v7, %v207_v43  ;;  %v928_v51 = vunpack.c.l.bf16 %v1120_v39  ;;  %v1068_v52 = vpack.c.bf16 %v339_v44, %v338_v37  ;;  %v209_v54 = vmul.f32 %v924_v46, %v1178_v1 }
  0x45   :  { %v279_v53 = vadd.f32 %v1192_v7, %v208_v45  ;;  %v210_v55 = vmul.f32 %v925_v47, %v1178_v1  ;;  %v341_v56 = vmax.f32 %v277_v48, 0.0  ;;  %v929_v58 = vunpack.c.h.bf16 %v1120_v39 }
  0x46   :  { %v342_v57 = vmax.f32 %v278_v50, 0.0  ;;  %v211_v59 = vmul.f32 %v928_v51, %v1178_v1  ;;  %1147 = vst [vmem:[%s1505_s3 + $0xd8] sm:$0xff] %v1068_v52   ;;  %v280_v61 = vadd.f32 %v1192_v7, %v209_v54 }
  0x47   :  { %v343_v60 = vmax.f32 %v279_v53, 0.0  ;;  %v281_v62 = vadd.f32 %v1192_v7, %v210_v55  ;;  %v1073_v63 = vpack.c.bf16 %v341_v56, %v340_v49  ;;  %v212_v0 = vmul.f32 %v929_v58, %v1178_v1 }
  0x48   :  { %v282_v2 = vadd.f32 %v1192_v7, %v211_v59  ;;  %v344_v4 = vmax.f32 %v280_v61, 0.0 }
  0x49   :  { %v1078_v3 = vpack.c.bf16 %v343_v60, %v342_v57  ;;  %v345_v5 = vmax.f32 %v281_v62, 0.0  ;;  %1148 = vst [vmem:[%s1505_s3 + $0xe0] sm:$0xff] %v1073_v63   ;;  %v283_v6 = vadd.f32 %v1192_v7, %v212_v0 }
  0x4a   :  { %v346_v8 = vmax.f32 %v282_v2, 0.0 }
  0x4b   :  { %1149 = vst [vmem:[%s1505_s3 + $0xe8] sm:$0xff] %v1078_v3   ;;  %v1083_v9 = vpack.c.bf16 %v345_v5, %v344_v4  ;;  %v347_v10 = vmax.f32 %v283_v6, 0.0 }
  0x4d   :  { %1150 = vst [vmem:[%s1505_s3 + $0xf0] sm:$0xff] %v1083_v9   ;;  %v1088_v1 = vpack.c.bf16 %v347_v10, %v346_v8 }
  0x4f   :  { %1151 = vst [vmem:[%s1505_s3 + $0xf8] sm:$0xff] %v1088_v1  }

// kernel: _lambda_.18
= control target key start
LH: loop header
LB: loop body
LE: loop exit
PB: predicated region body
PF: predicated region fallthrough
CT: control target
= control target key end

     0   :  { %s6388_s0 = inlined_call_operand.vmem [shape: bf16[2,256,512], index: 0, kind: input, shape index: {}, may-alias: {0,1,2,3}]   ;;  %s6389_s1 = inlined_call_operand.vmem [shape: bf16[2,256,512], index: 1, kind: input, shape index: {}, may-alias: {0,1,2,3}]   ;;  %s6390_s2 = inlined_call_operand.vmem [shape: bf16[2,256,512], index: 2, kind: input, shape index: {}, may-alias: {0,1,2,3}]   ;;  %s6391_s3 = inlined_call_operand.vmem [shape: bf16[2,256,512], index: 3, kind: input, shape index: {}, may-alias: {0,1,2,3}]   ;;  %s6392_s4 = inlined_call_operand.<no memory space> [shape: f32[1,1], index: 4, kind: input, shape index: {}]   ;;  %s6393_s5 = inlined_call_operand.vmem [shape: bf16[2,256,128], index: 5, kind: output, shape index: {}]  }
   0x1   :  { %10 = sst [smem:[#allocation5]] %s6392_s4 }
   0x2   :  { %s4769_s20 = smov 0   ;;  %s4771_s21 = smov 0  }
   0x3   :  { %s4773_s22 = smov 0   ;;  %s4775_s23 = smov 0  }
   0x4   :  { %s4777_s24 = smov 0  }
   0x5 LB: > { %s35_s4 = sadd.s32 1, %s4727_s23  ;;  %p51_p1 = scmp.ne.s32.totalorder %s4719_s21, %s4715_s20  ;;  %s4731_s24 = sphi %s4777_s24, %s16_s24   ;;  %s4727_s23 = sphi %s4775_s23, %s6632_s23   ;;  %s4723_s22 = sphi %s4773_s22, %s6631_s22   ;;  %s4719_s21 = sphi %s4771_s21, %s6630_s21   ;;  %s4715_s20 = sphi %s4769_s20, %s6629_s20  }
   0x6   : > { %p37_p0 = scmp.ge.s32.totalorder %s35_s4, 2  ;;  %p52_p2 = scmp.eq.s32.totalorder %s4731_s24, 0 }
   0x7   : > { %s44_s27 = sadd.s32 1, %s4719_s21  ;;  %p3775_p5 = scmp.ge.s32.totalorder %s4731_s24, 2 }
   0x8   : > { %s6634_s4 = smov (%p37_p0, %s35_s4), 0  ;;  %p4800_p3 = por %p52_p2, %p51_p1 }
   0x9   : > { %s39_s26 = ssub.s32 %s4727_s23, %s6634_s4  ;;  %213 = sbr.rel (%p3775_p5) target bundleno = 116 (0x74), region = 20 }
   0xa   : > { %p42_p4 = scmp.eq.s32.totalorder %s39_s26, 0 }
   0xc   : > { %s4808_s28 = scalar_select %p42_p4, %s4719_s21, %s44_s27  }
  0x10   : > { %216 = sbr.rel (!%p4800_p3) target bundleno = 41 (0x29), region = 24  ;;  %s218_s29 = sand.u32 (%p4800_p3), 1, %s4719_s21  }
  0x11   : > { %s3973_s30 = sshll.u32 (%p4800_p3), %s4727_s23, 9  ;;  %s3776_s6 = sshll.u32 (%p4800_p3), %s218_s29, 7 }
  0x12   : > { %s4818_s9 = scalar_lea.vmem (%p4800_p3), %s6388_s0, %s3973_s30  ;;  %s4822_s10 = scalar_lea.vmem (%p4800_p3), [#allocation6], %s3776_s6 }
  0x13   : > { %v3779_v0 = vld [vmem:[%s4818_s9 + $0x4] sm:$0xf] (%p4800_p3)  ;;  %v3780_v1 = vld [vmem:[%s4818_s9 + $0x14] sm:$0xf] (%p4800_p3) }
  0x14   : > { %244 = vst [vmem:[%s4822_s10] sm:$0xf] (%p4800_p3), %v3779_v0  ;;  %246 = vst [vmem:[%s4822_s10 + $0x4] sm:$0xf] (%p4800_p3), %v3780_v1  ;;  %v3781_v2 = vld [vmem:[%s4818_s9 + $0x24] sm:$0xf] (%p4800_p3) }
  0x15   : > { %v3782_v3 = vld [vmem:[%s4818_s9 + $0x34] sm:$0xf] (%p4800_p3)  ;;  %v3783_v4 = vld [vmem:[%s4818_s9 + $0x44] sm:$0xf] (%p4800_p3)  ;;  %248 = vst [vmem:[%s4822_s10 + $0x8] sm:$0xf] (%p4800_p3), %v3781_v2 }
  0x16   : > { %250 = vst [vmem:[%s4822_s10 + $0xc] sm:$0xf] (%p4800_p3), %v3782_v3  ;;  %252 = vst [vmem:[%s4822_s10 + $0x10] sm:$0xf] (%p4800_p3), %v3783_v4  ;;  %v3784_v5 = vld [vmem:[%s4818_s9 + $0x54] sm:$0xf] (%p4800_p3) }
  0x17   : > { %v3785_v6 = vld [vmem:[%s4818_s9 + $0x64] sm:$0xf]  ;;  %v3786_v7 = vld [vmem:[%s4818_s9 + $0x74] sm:$0xf]  ;;  %254 = vst [vmem:[%s4822_s10 + $0x14] sm:$0xf] %v3784_v5 }
  0x18   : > { %256 = vst [vmem:[%s4822_s10 + $0x18] sm:$0xf] %v3785_v6  ;;  %258 = vst [vmem:[%s4822_s10 + $0x1c] sm:$0xf] %v3786_v7  ;;  %v3787_v8 = vld [vmem:[%s4818_s9 + $0x84] sm:$0xf] }
  0x19   : > { %v3788_v9 = vld [vmem:[%s4818_s9 + $0x94] sm:$0xf]  ;;  %v3789_v10 = vld [vmem:[%s4818_s9 + $0xa4] sm:$0xf]  ;;  %260 = vst [vmem:[%s4822_s10 + $0x20] sm:$0xf] %v3787_v8 }
  0x1a   : > { %262 = vst [vmem:[%s4822_s10 + $0x24] sm:$0xf] %v3788_v9  ;;  %264 = vst [vmem:[%s4822_s10 + $0x28] sm:$0xf] %v3789_v10  ;;  %v3790_v11 = vld [vmem:[%s4818_s9 + $0xb4] sm:$0xf] }
  0x1b   : > { %v3791_v12 = vld [vmem:[%s4818_s9 + $0xc4] sm:$0xf]  ;;  %v3792_v13 = vld [vmem:[%s4818_s9 + $0xd4] sm:$0xf]  ;;  %266 = vst [vmem:[%s4822_s10 + $0x2c] sm:$0xf] %v3790_v11 }
  0x1c   : > { %268 = vst [vmem:[%s4822_s10 + $0x30] sm:$0xf] %v3791_v12  ;;  %270 = vst [vmem:[%s4822_s10 + $0x34] sm:$0xf] %v3792_v13  ;;  %v3793_v14 = vld [vmem:[%s4818_s9 + $0xe4] sm:$0xf] }
  0x1d   : > { %v3794_v15 = vld [vmem:[%s4818_s9 + $0xf4] sm:$0xf]  ;;  %v3795_v16 = vld [vmem:[%s4818_s9 + $0x104] sm:$0xf]  ;;  %272 = vst [vmem:[%s4822_s10 + $0x38] sm:$0xf] %v3793_v14 }
  0x1e   : > { %274 = vst [vmem:[%s4822_s10 + $0x3c] sm:$0xf] %v3794_v15  ;;  %276 = vst [vmem:[%s4822_s10 + $0x40] sm:$0xf] %v3795_v16  ;;  %v3796_v17 = vld [vmem:[%s4818_s9 + $0x114] sm:$0xf] }
  0x1f   : > { %v3797_v18 = vld [vmem:[%s4818_s9 + $0x124] sm:$0xf]  ;;  %v3798_v19 = vld [vmem:[%s4818_s9 + $0x134] sm:$0xf]  ;;  %278 = vst [vmem:[%s4822_s10 + $0x44] sm:$0xf] %v3796_v17 }
  0x20   : > { %280 = vst [vmem:[%s4822_s10 + $0x48] sm:$0xf] %v3797_v18  ;;  %282 = vst [vmem:[%s4822_s10 + $0x4c] sm:$0xf] %v3798_v19  ;;  %v3799_v20 = vld [vmem:[%s4818_s9 + $0x144] sm:$0xf] }
  0x21   : > { %v3800_v21 = vld [vmem:[%s4818_s9 + $0x154] sm:$0xf]  ;;  %v3801_v22 = vld [vmem:[%s4818_s9 + $0x164] sm:$0xf]  ;;  %284 = vst [vmem:[%s4822_s10 + $0x50] sm:$0xf] %v3799_v20 }
  0x22   : > { %286 = vst [vmem:[%s4822_s10 + $0x54] sm:$0xf] %v3800_v21  ;;  %288 = vst [vmem:[%s4822_s10 + $0x58] sm:$0xf] %v3801_v22  ;;  %v3802_v23 = vld [vmem:[%s4818_s9 + $0x174] sm:$0xf] }
  0x23   : > { %v3803_v24 = vld [vmem:[%s4818_s9 + $0x184] sm:$0xf]  ;;  %v3804_v25 = vld [vmem:[%s4818_s9 + $0x194] sm:$0xf]  ;;  %290 = vst [vmem:[%s4822_s10 + $0x5c] sm:$0xf] %v3802_v23 }
  0x24   : > { %292 = vst [vmem:[%s4822_s10 + $0x60] sm:$0xf] %v3803_v24  ;;  %294 = vst [vmem:[%s4822_s10 + $0x64] sm:$0xf] %v3804_v25  ;;  %v3805_v26 = vld [vmem:[%s4818_s9 + $0x1a4] sm:$0xf] }
  0x25   : > { %v3806_v27 = vld [vmem:[%s4818_s9 + $0x1b4] sm:$0xf]  ;;  %v3807_v28 = vld [vmem:[%s4818_s9 + $0x1c4] sm:$0xf]  ;;  %296 = vst [vmem:[%s4822_s10 + $0x68] sm:$0xf] %v3805_v26 }
  0x26   : > { %298 = vst [vmem:[%s4822_s10 + $0x6c] sm:$0xf] %v3806_v27  ;;  %300 = vst [vmem:[%s4822_s10 + $0x70] sm:$0xf] %v3807_v28  ;;  %v3808_v29 = vld [vmem:[%s4818_s9 + $0x1d4] sm:$0xf] }
  0x27   : > { %v3809_v30 = vld [vmem:[%s4818_s9 + $0x1e4] sm:$0xf]  ;;  %v3810_v31 = vld [vmem:[%s4818_s9 + $0x1f4] sm:$0xf]  ;;  %302 = vst [vmem:[%s4822_s10 + $0x74] sm:$0xf] %v3808_v29 }
  0x28   : > { %304 = vst [vmem:[%s4822_s10 + $0x78] sm:$0xf] %v3809_v30  ;;  %306 = vst [vmem:[%s4822_s10 + $0x7c] sm:$0xf] %v3810_v31 }
  0x29 PF: > { %393 = sbr.rel (!%p4800_p3) target bundleno = 66 (0x42), region = 65  ;;  %s395_s11 = sand.u32 (%p4800_p3), 1, %s4719_s21  }
  0x2a   : > { %s3974_s12 = sshll.u32 (%p4800_p3), %s4727_s23, 9  ;;  %s3811_s13 = sshll.u32 (%p4800_p3), %s395_s11, 7 }
  0x2b   : > { %s4893_s16 = scalar_lea.vmem (%p4800_p3), %s6389_s1, %s3974_s12  ;;  %s4897_s17 = scalar_lea.vmem (%p4800_p3), [#allocation7], %s3811_s13 }
  0x2c   : > { %v3814_v32 = vld [vmem:[%s4893_s16 + $0x8] sm:$0xf] (%p4800_p3)  ;;  %v3815_v33 = vld [vmem:[%s4893_s16 + $0x18] sm:$0xf] (%p4800_p3) }
  0x2d   : > { %421 = vst [vmem:[%s4897_s17] sm:$0xf] (%p4800_p3), %v3814_v32  ;;  %423 = vst [vmem:[%s4897_s17 + $0x4] sm:$0xf] (%p4800_p3), %v3815_v33  ;;  %v3816_v34 = vld [vmem:[%s4893_s16 + $0x28] sm:$0xf] (%p4800_p3) }
  0x2e   : > { %v3817_v35 = vld [vmem:[%s4893_s16 + $0x38] sm:$0xf] (%p4800_p3)  ;;  %v3818_v36 = vld [vmem:[%s4893_s16 + $0x48] sm:$0xf] (%p4800_p3)  ;;  %425 = vst [vmem:[%s4897_s17 + $0x8] sm:$0xf] (%p4800_p3), %v3816_v34 }
  0x2f   : > { %427 = vst [vmem:[%s4897_s17 + $0xc] sm:$0xf] (%p4800_p3), %v3817_v35  ;;  %429 = vst [vmem:[%s4897_s17 + $0x10] sm:$0xf] (%p4800_p3), %v3818_v36  ;;  %v3819_v37 = vld [vmem:[%s4893_s16 + $0x58] sm:$0xf] (%p4800_p3) }
  0x30   : > { %v3820_v38 = vld [vmem:[%s4893_s16 + $0x68] sm:$0xf]  ;;  %v3821_v39 = vld [vmem:[%s4893_s16 + $0x78] sm:$0xf]  ;;  %431 = vst [vmem:[%s4897_s17 + $0x14] sm:$0xf] %v3819_v37 }
  0x31   : > { %433 = vst [vmem:[%s4897_s17 + $0x18] sm:$0xf] %v3820_v38  ;;  %435 = vst [vmem:[%s4897_s17 + $0x1c] sm:$0xf] %v3821_v39  ;;  %v3822_v40 = vld [vmem:[%s4893_s16 + $0x88] sm:$0xf] }
  0x32   : > { %v3823_v41 = vld [vmem:[%s4893_s16 + $0x98] sm:$0xf]  ;;  %v3824_v42 = vld [vmem:[%s4893_s16 + $0xa8] sm:$0xf]  ;;  %437 = vst [vmem:[%s4897_s17 + $0x20] sm:$0xf] %v3822_v40 }
  0x33   : > { %439 = vst [vmem:[%s4897_s17 + $0x24] sm:$0xf] %v3823_v41  ;;  %441 = vst [vmem:[%s4897_s17 + $0x28] sm:$0xf] %v3824_v42  ;;  %v3825_v43 = vld [vmem:[%s4893_s16 + $0xb8] sm:$0xf] }
  0x34   : > { %v3826_v44 = vld [vmem:[%s4893_s16 + $0xc8] sm:$0xf]  ;;  %v3827_v45 = vld [vmem:[%s4893_s16 + $0xd8] sm:$0xf]  ;;  %443 = vst [vmem:[%s4897_s17 + $0x2c] sm:$0xf] %v3825_v43 }
  0x35   : > { %445 = vst [vmem:[%s4897_s17 + $0x30] sm:$0xf] %v3826_v44  ;;  %447 = vst [vmem:[%s4897_s17 + $0x34] sm:$0xf] %v3827_v45  ;;  %v3828_v46 = vld [vmem:[%s4893_s16 + $0xe8] sm:$0xf] }
  0x36   : > { %v3829_v47 = vld [vmem:[%s4893_s16 + $0xf8] sm:$0xf]  ;;  %v3830_v48 = vld [vmem:[%s4893_s16 + $0x108] sm:$0xf]  ;;  %449 = vst [vmem:[%s4897_s17 + $0x38] sm:$0xf] %v3828_v46 }
  0x37   : > { %451 = vst [vmem:[%s4897_s17 + $0x3c] sm:$0xf] %v3829_v47  ;;  %453 = vst [vmem:[%s4897_s17 + $0x40] sm:$0xf] %v3830_v48  ;;  %v3831_v49 = vld [vmem:[%s4893_s16 + $0x118] sm:$0xf] }
  0x38   : > { %v3832_v50 = vld [vmem:[%s4893_s16 + $0x128] sm:$0xf]  ;;  %v3833_v51 = vld [vmem:[%s4893_s16 + $0x138] sm:$0xf]  ;;  %455 = vst [vmem:[%s4897_s17 + $0x44] sm:$0xf] %v3831_v49 }
  0x39   : > { %457 = vst [vmem:[%s4897_s17 + $0x48] sm:$0xf] %v3832_v50  ;;  %459 = vst [vmem:[%s4897_s17 + $0x4c] sm:$0xf] %v3833_v51  ;;  %v3834_v52 = vld [vmem:[%s4893_s16 + $0x148] sm:$0xf] }
  0x3a   : > { %v3835_v53 = vld [vmem:[%s4893_s16 + $0x158] sm:$0xf]  ;;  %v3836_v54 = vld [vmem:[%s4893_s16 + $0x168] sm:$0xf]  ;;  %461 = vst [vmem:[%s4897_s17 + $0x50] sm:$0xf] %v3834_v52 }
  0x3b   : > { %463 = vst [vmem:[%s4897_s17 + $0x54] sm:$0xf] %v3835_v53  ;;  %465 = vst [vmem:[%s4897_s17 + $0x58] sm:$0xf] %v3836_v54  ;;  %v3837_v55 = vld [vmem:[%s4893_s16 + $0x178] sm:$0xf] }
  0x3c   : > { %v3838_v56 = vld [vmem:[%s4893_s16 + $0x188] sm:$0xf]  ;;  %v3839_v57 = vld [vmem:[%s4893_s16 + $0x198] sm:$0xf]  ;;  %467 = vst [vmem:[%s4897_s17 + $0x5c] sm:$0xf] %v3837_v55 }
  0x3d   : > { %469 = vst [vmem:[%s4897_s17 + $0x60] sm:$0xf] %v3838_v56  ;;  %471 = vst [vmem:[%s4897_s17 + $0x64] sm:$0xf] %v3839_v57  ;;  %v3840_v58 = vld [vmem:[%s4893_s16 + $0x1a8] sm:$0xf] }
  0x3e   : > { %v3841_v59 = vld [vmem:[%s4893_s16 + $0x1b8] sm:$0xf]  ;;  %v3842_v60 = vld [vmem:[%s4893_s16 + $0x1c8] sm:$0xf]  ;;  %473 = vst [vmem:[%s4897_s17 + $0x68] sm:$0xf] %v3840_v58 }
  0x3f   : > { %475 = vst [vmem:[%s4897_s17 + $0x6c] sm:$0xf] %v3841_v59  ;;  %477 = vst [vmem:[%s4897_s17 + $0x70] sm:$0xf] %v3842_v60  ;;  %v3843_v61 = vld [vmem:[%s4893_s16 + $0x1d8] sm:$0xf] }
  0x40   : > { %v3844_v62 = vld [vmem:[%s4893_s16 + $0x1e8] sm:$0xf]  ;;  %v3845_v63 = vld [vmem:[%s4893_s16 + $0x1f8] sm:$0xf]  ;;  %479 = vst [vmem:[%s4897_s17 + $0x74] sm:$0xf] %v3843_v61 }
  0x41   : > { %481 = vst [vmem:[%s4897_s17 + $0x78] sm:$0xf] %v3844_v62  ;;  %483 = vst [vmem:[%s4897_s17 + $0x7c] sm:$0xf] %v3845_v63 }
  0x42 PF: > { %570 = sbr.rel (!%p4800_p3) target bundleno = 91 (0x5b), region = 106  ;;  %s572_s18 = sand.u32 (%p4800_p3), 1, %s4719_s21  }
  0x43   : > { %s3975_s19 = sshll.u32 (%p4800_p3), %s4727_s23, 9  ;;  %s3846_s26 = sshll.u32 (%p4800_p3), %s572_s18, 7 }
  0x44   : > { %s4968_s30 = scalar_lea.vmem (%p4800_p3), %s6390_s2, %s3975_s19  ;;  %s4972_s6 = scalar_lea.vmem (%p4800_p3), [#allocation8], %s3846_s26 }
  0x45   : > { %v3849_v0 = vld [vmem:[%s4968_s30 + $0xc] sm:$0xf] (%p4800_p3)  ;;  %v3850_v1 = vld [vmem:[%s4968_s30 + $0x1c] sm:$0xf] (%p4800_p3) }
  0x46   : > { %598 = vst [vmem:[%s4972_s6] sm:$0xf] (%p4800_p3), %v3849_v0  ;;  %600 = vst [vmem:[%s4972_s6 + $0x4] sm:$0xf] (%p4800_p3), %v3850_v1  ;;  %v3851_v2 = vld [vmem:[%s4968_s30 + $0x2c] sm:$0xf] (%p4800_p3) }
  0x47   : > { %v3852_v3 = vld [vmem:[%s4968_s30 + $0x3c] sm:$0xf] (%p4800_p3)  ;;  %v3853_v4 = vld [vmem:[%s4968_s30 + $0x4c] sm:$0xf] (%p4800_p3)  ;;  %602 = vst [vmem:[%s4972_s6 + $0x8] sm:$0xf] (%p4800_p3), %v3851_v2 }
  0x48   : > { %604 = vst [vmem:[%s4972_s6 + $0xc] sm:$0xf] (%p4800_p3), %v3852_v3  ;;  %606 = vst [vmem:[%s4972_s6 + $0x10] sm:$0xf] (%p4800_p3), %v3853_v4  ;;  %v3854_v5 = vld [vmem:[%s4968_s30 + $0x5c] sm:$0xf] (%p4800_p3) }
  0x49   : > { %v3855_v6 = vld [vmem:[%s4968_s30 + $0x6c] sm:$0xf]  ;;  %v3856_v7 = vld [vmem:[%s4968_s30 + $0x7c] sm:$0xf]  ;;  %608 = vst [vmem:[%s4972_s6 + $0x14] sm:$0xf] %v3854_v5 }
  0x4a   : > { %610 = vst [vmem:[%s4972_s6 + $0x18] sm:$0xf] %v3855_v6  ;;  %612 = vst [vmem:[%s4972_s6 + $0x1c] sm:$0xf] %v3856_v7  ;;  %v3857_v8 = vld [vmem:[%s4968_s30 + $0x8c] sm:$0xf] }
  0x4b   : > { %v3858_v9 = vld [vmem:[%s4968_s30 + $0x9c] sm:$0xf]  ;;  %v3859_v10 = vld [vmem:[%s4968_s30 + $0xac] sm:$0xf]  ;;  %614 = vst [vmem:[%s4972_s6 + $0x20] sm:$0xf] %v3857_v8 }
  0x4c   : > { %616 = vst [vmem:[%s4972_s6 + $0x24] sm:$0xf] %v3858_v9  ;;  %618 = vst [vmem:[%s4972_s6 + $0x28] sm:$0xf] %v3859_v10  ;;  %v3860_v11 = vld [vmem:[%s4968_s30 + $0xbc] sm:$0xf] }
  0x4d   : > { %v3861_v12 = vld [vmem:[%s4968_s30 + $0xcc] sm:$0xf]  ;;  %v3862_v13 = vld [vmem:[%s4968_s30 + $0xdc] sm:$0xf]  ;;  %620 = vst [vmem:[%s4972_s6 + $0x2c] sm:$0xf] %v3860_v11 }
  0x4e   : > { %622 = vst [vmem:[%s4972_s6 + $0x30] sm:$0xf] %v3861_v12  ;;  %624 = vst [vmem:[%s4972_s6 + $0x34] sm:$0xf] %v3862_v13  ;;  %v3863_v14 = vld [vmem:[%s4968_s30 + $0xec] sm:$0xf] }
  0x4f   : > { %v3864_v15 = vld [vmem:[%s4968_s30 + $0xfc] sm:$0xf]  ;;  %v3865_v16 = vld [vmem:[%s4968_s30 + $0x10c] sm:$0xf]  ;;  %626 = vst [vmem:[%s4972_s6 + $0x38] sm:$0xf] %v3863_v14 }
  0x50   : > { %628 = vst [vmem:[%s4972_s6 + $0x3c] sm:$0xf] %v3864_v15  ;;  %630 = vst [vmem:[%s4972_s6 + $0x40] sm:$0xf] %v3865_v16  ;;  %v3866_v17 = vld [vmem:[%s4968_s30 + $0x11c] sm:$0xf] }
  0x51   : > { %v3867_v18 = vld [vmem:[%s4968_s30 + $0x12c] sm:$0xf]  ;;  %v3868_v19 = vld [vmem:[%s4968_s30 + $0x13c] sm:$0xf]  ;;  %632 = vst [vmem:[%s4972_s6 + $0x44] sm:$0xf] %v3866_v17 }
  0x52   : > { %634 = vst [vmem:[%s4972_s6 + $0x48] sm:$0xf] %v3867_v18  ;;  %636 = vst [vmem:[%s4972_s6 + $0x4c] sm:$0xf] %v3868_v19  ;;  %v3869_v20 = vld [vmem:[%s4968_s30 + $0x14c] sm:$0xf] }
  0x53   : > { %v3870_v21 = vld [vmem:[%s4968_s30 + $0x15c] sm:$0xf]  ;;  %v3871_v22 = vld [vmem:[%s4968_s30 + $0x16c] sm:$0xf]  ;;  %638 = vst [vmem:[%s4972_s6 + $0x50] sm:$0xf] %v3869_v20 }
  0x54   : > { %640 = vst [vmem:[%s4972_s6 + $0x54] sm:$0xf] %v3870_v21  ;;  %642 = vst [vmem:[%s4972_s6 + $0x58] sm:$0xf] %v3871_v22  ;;  %v3872_v23 = vld [vmem:[%s4968_s30 + $0x17c] sm:$0xf] }
  0x55   : > { %v3873_v24 = vld [vmem:[%s4968_s30 + $0x18c] sm:$0xf]  ;;  %v3874_v25 = vld [vmem:[%s4968_s30 + $0x19c] sm:$0xf]  ;;  %644 = vst [vmem:[%s4972_s6 + $0x5c] sm:$0xf] %v3872_v23 }
  0x56   : > { %646 = vst [vmem:[%s4972_s6 + $0x60] sm:$0xf] %v3873_v24  ;;  %648 = vst [vmem:[%s4972_s6 + $0x64] sm:$0xf] %v3874_v25  ;;  %v3875_v26 = vld [vmem:[%s4968_s30 + $0x1ac] sm:$0xf] }
  0x57   : > { %v3876_v27 = vld [vmem:[%s4968_s30 + $0x1bc] sm:$0xf]  ;;  %v3877_v28 = vld [vmem:[%s4968_s30 + $0x1cc] sm:$0xf]  ;;  %650 = vst [vmem:[%s4972_s6 + $0x68] sm:$0xf] %v3875_v26 }
  0x58   : > { %652 = vst [vmem:[%s4972_s6 + $0x6c] sm:$0xf] %v3876_v27  ;;  %654 = vst [vmem:[%s4972_s6 + $0x70] sm:$0xf] %v3877_v28  ;;  %v3878_v29 = vld [vmem:[%s4968_s30 + $0x1dc] sm:$0xf] }
  0x59   : > { %v3879_v30 = vld [vmem:[%s4968_s30 + $0x1ec] sm:$0xf]  ;;  %v3880_v31 = vld [vmem:[%s4968_s30 + $0x1fc] sm:$0xf]  ;;  %656 = vst [vmem:[%s4972_s6 + $0x74] sm:$0xf] %v3878_v29 }
  0x5a   : > { %658 = vst [vmem:[%s4972_s6 + $0x78] sm:$0xf] %v3879_v30  ;;  %660 = vst [vmem:[%s4972_s6 + $0x7c] sm:$0xf] %v3880_v31 }
  0x5b PF: > { %747 = sbr.rel (!%p4800_p3) target bundleno = 116 (0x74), region = 147  ;;  %s749_s7 = sand.u32 (%p4800_p3), 1, %s4719_s21  }
  0x5c   : > { %s3976_s8 = sshll.u32 (%p4800_p3), %s4727_s23, 9  ;;  %s3881_s9 = sshll.u32 (%p4800_p3), %s749_s7, 7 }
  0x5d   : > { %s5043_s12 = scalar_lea.vmem (%p4800_p3), %s6391_s3, %s3976_s8  ;;  %s5047_s25 = scalar_lea.vmem (%p4800_p3), [#allocation9], %s3881_s9 }
  0x5e   : > { %v773_v32 = vld [vmem:[%s5043_s12] sm:$0xf] (%p4800_p3)  ;;  %v775_v33 = vld [vmem:[%s5043_s12 + $0x10] sm:$0xf] (%p4800_p3) }
  0x5f   : > { %774 = vst [vmem:[%s5047_s25] sm:$0xf] (%p4800_p3), %v773_v32  ;;  %776 = vst [vmem:[%s5047_s25 + $0x4] sm:$0xf] (%p4800_p3), %v775_v33  ;;  %v777_v34 = vld [vmem:[%s5043_s12 + $0x20] sm:$0xf] (%p4800_p3) }
  0x60   : > { %v779_v35 = vld [vmem:[%s5043_s12 + $0x30] sm:$0xf] (%p4800_p3)  ;;  %v781_v36 = vld [vmem:[%s5043_s12 + $0x40] sm:$0xf] (%p4800_p3)  ;;  %778 = vst [vmem:[%s5047_s25 + $0x8] sm:$0xf] (%p4800_p3), %v777_v34 }
  0x61   : > { %780 = vst [vmem:[%s5047_s25 + $0xc] sm:$0xf] (%p4800_p3), %v779_v35  ;;  %782 = vst [vmem:[%s5047_s25 + $0x10] sm:$0xf] (%p4800_p3), %v781_v36  ;;  %v783_v37 = vld [vmem:[%s5043_s12 + $0x50] sm:$0xf] (%p4800_p3) }
  0x62   : > { %v785_v38 = vld [vmem:[%s5043_s12 + $0x60] sm:$0xf]  ;;  %v787_v39 = vld [vmem:[%s5043_s12 + $0x70] sm:$0xf]  ;;  %784 = vst [vmem:[%s5047_s25 + $0x14] sm:$0xf] %v783_v37 }
  0x63   : > { %786 = vst [vmem:[%s5047_s25 + $0x18] sm:$0xf] %v785_v38  ;;  %788 = vst [vmem:[%s5047_s25 + $0x1c] sm:$0xf] %v787_v39  ;;  %v789_v40 = vld [vmem:[%s5043_s12 + $0x80] sm:$0xf] }
  0x64   : > { %v791_v41 = vld [vmem:[%s5043_s12 + $0x90] sm:$0xf]  ;;  %v793_v42 = vld [vmem:[%s5043_s12 + $0xa0] sm:$0xf]  ;;  %790 = vst [vmem:[%s5047_s25 + $0x20] sm:$0xf] %v789_v40 }
  0x65   : > { %792 = vst [vmem:[%s5047_s25 + $0x24] sm:$0xf] %v791_v41  ;;  %794 = vst [vmem:[%s5047_s25 + $0x28] sm:$0xf] %v793_v42  ;;  %v795_v43 = vld [vmem:[%s5043_s12 + $0xb0] sm:$0xf] }
  0x66   : > { %v797_v44 = vld [vmem:[%s5043_s12 + $0xc0] sm:$0xf]  ;;  %v799_v45 = vld [vmem:[%s5043_s12 + $0xd0] sm:$0xf]  ;;  %796 = vst [vmem:[%s5047_s25 + $0x2c] sm:$0xf] %v795_v43 }
  0x67   : > { %798 = vst [vmem:[%s5047_s25 + $0x30] sm:$0xf] %v797_v44  ;;  %800 = vst [vmem:[%s5047_s25 + $0x34] sm:$0xf] %v799_v45  ;;  %v801_v46 = vld [vmem:[%s5043_s12 + $0xe0] sm:$0xf] }
  0x68   : > { %v803_v47 = vld [vmem:[%s5043_s12 + $0xf0] sm:$0xf]  ;;  %v805_v48 = vld [vmem:[%s5043_s12 + $0x100] sm:$0xf]  ;;  %802 = vst [vmem:[%s5047_s25 + $0x38] sm:$0xf] %v801_v46 }
  0x69   : > { %804 = vst [vmem:[%s5047_s25 + $0x3c] sm:$0xf] %v803_v47  ;;  %806 = vst [vmem:[%s5047_s25 + $0x40] sm:$0xf] %v805_v48  ;;  %v807_v49 = vld [vmem:[%s5043_s12 + $0x110] sm:$0xf] }
  0x6a   : > { %v809_v50 = vld [vmem:[%s5043_s12 + $0x120] sm:$0xf]  ;;  %v811_v51 = vld [vmem:[%s5043_s12 + $0x130] sm:$0xf]  ;;  %808 = vst [vmem:[%s5047_s25 + $0x44] sm:$0xf] %v807_v49 }
  0x6b   : > { %810 = vst [vmem:[%s5047_s25 + $0x48] sm:$0xf] %v809_v50  ;;  %812 = vst [vmem:[%s5047_s25 + $0x4c] sm:$0xf] %v811_v51  ;;  %v813_v52 = vld [vmem:[%s5043_s12 + $0x140] sm:$0xf] }
  0x6c   : > { %v815_v53 = vld [vmem:[%s5043_s12 + $0x150] sm:$0xf]  ;;  %v817_v54 = vld [vmem:[%s5043_s12 + $0x160] sm:$0xf]  ;;  %814 = vst [vmem:[%s5047_s25 + $0x50] sm:$0xf] %v813_v52 }
  0x6d   : > { %816 = vst [vmem:[%s5047_s25 + $0x54] sm:$0xf] %v815_v53  ;;  %818 = vst [vmem:[%s5047_s25 + $0x58] sm:$0xf] %v817_v54  ;;  %v819_v55 = vld [vmem:[%s5043_s12 + $0x170] sm:$0xf] }
  0x6e   : > { %v821_v56 = vld [vmem:[%s5043_s12 + $0x180] sm:$0xf]  ;;  %v823_v57 = vld [vmem:[%s5043_s12 + $0x190] sm:$0xf]  ;;  %820 = vst [vmem:[%s5047_s25 + $0x5c] sm:$0xf] %v819_v55 }
  0x6f   : > { %822 = vst [vmem:[%s5047_s25 + $0x60] sm:$0xf] %v821_v56  ;;  %824 = vst [vmem:[%s5047_s25 + $0x64] sm:$0xf] %v823_v57  ;;  %v825_v58 = vld [vmem:[%s5043_s12 + $0x1a0] sm:$0xf] }
  0x70   : > { %v827_v59 = vld [vmem:[%s5043_s12 + $0x1b0] sm:$0xf]  ;;  %v829_v60 = vld [vmem:[%s5043_s12 + $0x1c0] sm:$0xf]  ;;  %826 = vst [vmem:[%s5047_s25 + $0x68] sm:$0xf] %v825_v58 }
  0x71   : > { %828 = vst [vmem:[%s5047_s25 + $0x6c] sm:$0xf] %v827_v59  ;;  %830 = vst [vmem:[%s5047_s25 + $0x70] sm:$0xf] %v829_v60  ;;  %v831_v61 = vld [vmem:[%s5043_s12 + $0x1d0] sm:$0xf] }
  0x72   : > { %v833_v62 = vld [vmem:[%s5043_s12 + $0x1e0] sm:$0xf]  ;;  %v835_v63 = vld [vmem:[%s5043_s12 + $0x1f0] sm:$0xf]  ;;  %832 = vst [vmem:[%s5047_s25 + $0x74] sm:$0xf] %v831_v61 }
  0x73   : > { %834 = vst [vmem:[%s5047_s25 + $0x78] sm:$0xf] %v833_v62  ;;  %836 = vst [vmem:[%s5047_s25 + $0x7c] sm:$0xf] %v835_v63 }
  0x74 PF: > { %p3884_p6 = scmp.ge.s32.totalorder %s4731_s24, 1  ;;  %p922_p7 = scmp.lt.s32.totalorder %s4731_s24, 3 }
  0x76   : > { %p923_p8 = pnand %p3884_p6, %p922_p7 }
  0x78   : > { %926 = sbr.rel (%p923_p8) target bundleno = 1127 (0x467), region = 188 }
  0x7f   : > { %s929_s13 = sand.u32 1, %s4715_s20   ;;  %vm1012_vm0 = vcmask 7168   ;;  %v4733_v32 = vmov -inf   ;;  %v4734_v50 = vmov 0   ;;  %v4735_v58 = vmov 0.0   ;;  %s3323_s17 = sld [smem:[#allocation5]] }
  0x80   : > { %s5114_s14 = sshll.u32 %s929_s13, 7  ;;  %1013 = vst.msk [vmem:[#allocation2] sm:$0xff] %vm1012_vm0, %v4733_v32  ;;  %1014 = vst.msk [vmem:[#allocation2 + $0x8] sm:$0xff] %vm1012_vm0, %v4733_v32  ;;  %4387 = vset.pattern.permute.xlu0 %v4734_v50  ;;  %4388 = vset.pattern.permute.xlu1 %v4734_v50  ;;  %p998_p9 = scmp.lt.s32.totalorder %s4723_s22, 1 }
  0x81   : > { %s5117_s15 = scalar_lea.vmem [#allocation8], %s5114_s14  ;;  %s5127_s20 = scalar_lea.vmem [#allocation7], %s5114_s14  ;;  %1015 = vst.msk [vmem:[#allocation2 + $0x10] sm:$0xff] %vm1012_vm0, %v4733_v32  ;;  %1016 = vst.msk [vmem:[#allocation2 + $0x18] sm:$0xff] %vm1012_vm0, %v4733_v32 }
  0x82   : > { %v4389_v0 = vld [vmem:[%s5117_s15 + $0x40] sm:$0xff]   ;;  %v4391_v2 = vld [vmem:[%s5117_s15 + $0x48] sm:$0xff]   ;;  %v4393_v4 = vld [vmem:[%s5117_s15 + $0x50] sm:$0xff]   ;;  %1017 = vst.msk [vmem:[#allocation2 + $0x20] sm:$0xff] %vm1012_vm0, %v4733_v32  ;;  %s5411_s16 = scalar_lea.vmem [#allocation9], %s5114_s14  ;;  %s6270_s18 = scalar_lea.vmem [#allocation6], %s5114_s14 }
  0x83   : > { %v4390_v1 = vld [vmem:[%s5117_s15] sm:$0xff]   ;;  %4184 = vmatprep.subr.bf16.mxu0 %v4389_v0  ;;  %v4392_v3 = vld [vmem:[%s5117_s15 + $0x8] sm:$0xff]   ;;  %v4394_v5 = vld [vmem:[%s5117_s15 + $0x10] sm:$0xff]   ;;  %1018 = vst.msk [vmem:[#allocation2 + $0x28] sm:$0xff] %vm1012_vm0, %v4733_v32  ;;  %s6636_s22 = smov (!%p998_p9, %s4723_s22), 1 }
  0x84   : > { %4185 = vmatpush3.bf16.xpose.msra.mxu0 %v4390_v1  ;;  %v4395_v6 = vld [vmem:[%s5117_s15 + $0x58] sm:$0xff]   ;;  %v4405_v7 = vld [vmem:[%s5127_s20] sm:$0xff]   ;;  %v4399_v11 = vld [vmem:[%s5117_s15 + $0x68] sm:$0xff]   ;;  %1019 = vst.msk [vmem:[#allocation2 + $0x30] sm:$0xff] %vm1012_vm0, %v4733_v32  ;;  %s3977_s19 = sshll.u32 %s6636_s22, 7 }
  0x85   : > { %4186 = vmatprep.subr.bf16.mxu0 %v4391_v2  ;;  %4200 = vmatprep.mubr.bf16.mxu0 %v4405_v7  ;;  %v4396_v8 = vld [vmem:[%s5117_s15 + $0x18] sm:$0xff]   ;;  %v4397_v9 = vld [vmem:[%s5117_s15 + $0x60] sm:$0xff]   ;;  %v4400_v12 = vld [vmem:[%s5117_s15 + $0x28] sm:$0xff]   ;;  %1020 = vst.msk [vmem:[#allocation2 + $0x38] sm:$0xff] %vm1012_vm0, %v4733_v32  ;;  %s6282_s29 = scalar_lea.vmem %s6393_s5, %s3977_s19 }
  0x86   : > { %v4398_v10 = vld [vmem:[%s5117_s15 + $0x20] sm:$0xff]   ;;  %v4401_v13 = vld [vmem:[%s5117_s15 + $0x70] sm:$0xff]   ;;  %v4403_v15 = vld [vmem:[%s5117_s15 + $0x78] sm:$0xff]   ;;  %1021 = vst.msk [vmem:[#allocation2 + $0x40] sm:$0xff] %vm1012_vm0, %v4733_v32 }
  0x87   : > { %v4402_v14 = vld [vmem:[%s5117_s15 + $0x30] sm:$0xff]   ;;  %v4404_v16 = vld [vmem:[%s5117_s15 + $0x38] sm:$0xff]   ;;  %v4406_v17 = vld [vmem:[%s5127_s20 + $0x8] sm:$0xff]   ;;  %1022 = vst.msk [vmem:[#allocation2 + $0x48] sm:$0xff] %vm1012_vm0, %v4733_v32 }
  0x88   : > { %v4407_v18 = vld [vmem:[%s5127_s20 + $0x10] sm:$0xff]   ;;  %v4408_v19 = vld [vmem:[%s5127_s20 + $0x18] sm:$0xff]   ;;  %v4409_v20 = vld [vmem:[%s5127_s20 + $0x20] sm:$0xff]   ;;  %1023 = vst.msk [vmem:[#allocation2 + $0x50] sm:$0xff] %vm1012_vm0, %v4733_v32 }
  0x89   : > { %v4410_v21 = vld [vmem:[%s5127_s20 + $0x28] sm:$0xff]   ;;  %v4411_v22 = vld [vmem:[%s5127_s20 + $0x30] sm:$0xff]   ;;  %v4412_v23 = vld [vmem:[%s5127_s20 + $0x38] sm:$0xff]   ;;  %1024 = vst.msk [vmem:[#allocation2 + $0x58] sm:$0xff] %vm1012_vm0, %v4733_v32 }
  0x8a   : > { %v4413_v24 = vld [vmem:[%s5127_s20 + $0x40] sm:$0xff]   ;;  %v4414_v25 = vld [vmem:[%s5127_s20 + $0x48] sm:$0xff]   ;;  %v4415_v26 = vld [vmem:[%s5127_s20 + $0x50] sm:$0xff]   ;;  %1025 = vst.msk [vmem:[#allocation2 + $0x60] sm:$0xff] %vm1012_vm0, %v4733_v32 }
  0x8b   : > { %v4416_v27 = vld [vmem:[%s5127_s20 + $0x58] sm:$0xff]   ;;  %v4417_v28 = vld [vmem:[%s5127_s20 + $0x60] sm:$0xff]   ;;  %v4418_v29 = vld [vmem:[%s5127_s20 + $0x68] sm:$0xff]   ;;  %1026 = vst.msk [vmem:[#allocation2 + $0x68] sm:$0xff] %vm1012_vm0, %v4733_v32 }
  0x8c   : > { %4187 = vmatpush3.bf16.xpose.msra.mxu0 %v4392_v3  ;;  %v4419_v30 = vld [vmem:[%s5127_s20 + $0x70] sm:$0xff]   ;;  %v4420_v31 = vld [vmem:[%s5127_s20 + $0x78] sm:$0xff]   ;;  %1027 = vst.msk [vmem:[#allocation2 + $0x70] sm:$0xff] %vm1012_vm0, %v4733_v32  ;;  %1028 = vst.msk [vmem:[#allocation2 + $0x78] sm:$0xff] %vm1012_vm0, %v4733_v32 }
  0x8d   : > { %4188 = vmatprep.subr.bf16.mxu0 %v4393_v4  ;;  %1029 = vst.msk [vmem:[#allocation2 + $0x80] sm:$0xff] %vm1012_vm0, %v4733_v32  ;;  %1030 = vst.msk [vmem:[#allocation2 + $0x88] sm:$0xff] %vm1012_vm0, %v4733_v32 }
  0x8e   : > { %1031 = vst.msk [vmem:[#allocation2 + $0x90] sm:$0xff] %vm1012_vm0, %v4733_v32  ;;  %1032 = vst.msk [vmem:[#allocation2 + $0x98] sm:$0xff] %vm1012_vm0, %v4733_v32 }
  0x8f   : > { %1033 = vst.msk [vmem:[#allocation2 + $0xa0] sm:$0xff] %vm1012_vm0, %v4733_v32  ;;  %1034 = vst.msk [vmem:[#allocation2 + $0xa8] sm:$0xff] %vm1012_vm0, %v4733_v32 }
  0x90   : > { %1035 = vst.msk [vmem:[#allocation2 + $0xb0] sm:$0xff] %vm1012_vm0, %v4733_v32  ;;  %1036 = vst.msk [vmem:[#allocation2 + $0xb8] sm:$0xff] %vm1012_vm0, %v4733_v32 }
  0x91   : > { %1037 = vst.msk [vmem:[#allocation2 + $0xc0] sm:$0xff] %vm1012_vm0, %v4733_v32  ;;  %1038 = vst.msk [vmem:[#allocation2 + $0xc8] sm:$0xff] %vm1012_vm0, %v4733_v32 }
  0x92   : > { %1039 = vst.msk [vmem:[#allocation2 + $0xd0] sm:$0xff] %vm1012_vm0, %v4733_v32  ;;  %1040 = vst.msk [vmem:[#allocation2 + $0xd8] sm:$0xff] %vm1012_vm0, %v4733_v32 }
  0x93   : > { %1041 = vst.msk [vmem:[#allocation2 + $0xe0] sm:$0xff] %vm1012_vm0, %v4733_v32  ;;  %1042 = vst.msk [vmem:[#allocation2 + $0xe8] sm:$0xff] %vm1012_vm0, %v4733_v32 }
  0x94   : > { %4189 = vmatpush3.bf16.xpose.msra.mxu0 %v4394_v5  ;;  %1043 = vst.msk [vmem:[#allocation2 + $0xf0] sm:$0xff] %vm1012_vm0, %v4733_v32  ;;  %1044 = vst.msk [vmem:[#allocation2 + $0xf8] sm:$0xff] %vm1012_vm0, %v4733_v32 }
  0x95   : > { %4190 = vmatprep.subr.bf16.mxu0 %v4395_v6  ;;  %1046 = vst.msk [vmem:[#allocation3 + $0x8] sm:$0xff] %vm1012_vm0, %v4735_v58  ;;  %1045 = vst.msk [vmem:[#allocation3] sm:$0xff] %vm1012_vm0, %v4735_v58 }
  0x96   : > { %1047 = vst.msk [vmem:[#allocation3 + $0x10] sm:$0xff] %vm1012_vm0, %v4735_v58  ;;  %1048 = vst.msk [vmem:[#allocation3 + $0x18] sm:$0xff] %vm1012_vm0, %v4735_v58 }
  0x97   : > { %1049 = vst.msk [vmem:[#allocation3 + $0x20] sm:$0xff] %vm1012_vm0, %v4735_v58  ;;  %1050 = vst.msk [vmem:[#allocation3 + $0x28] sm:$0xff] %vm1012_vm0, %v4735_v58 }
  0x98   : > { %1051 = vst.msk [vmem:[#allocation3 + $0x30] sm:$0xff] %vm1012_vm0, %v4735_v58  ;;  %1052 = vst.msk [vmem:[#allocation3 + $0x38] sm:$0xff] %vm1012_vm0, %v4735_v58 }
  0x99   : > { %1053 = vst.msk [vmem:[#allocation3 + $0x40] sm:$0xff] %vm1012_vm0, %v4735_v58  ;;  %1054 = vst.msk [vmem:[#allocation3 + $0x48] sm:$0xff] %vm1012_vm0, %v4735_v58 }
  0x9a   : > { %1055 = vst.msk [vmem:[#allocation3 + $0x50] sm:$0xff] %vm1012_vm0, %v4735_v58  ;;  %1056 = vst.msk [vmem:[#allocation3 + $0x58] sm:$0xff] %vm1012_vm0, %v4735_v58 }
  0x9b   : > { %1057 = vst.msk [vmem:[#allocation3 + $0x60] sm:$0xff] %vm1012_vm0, %v4735_v58  ;;  %1058 = vst.msk [vmem:[#allocation3 + $0x68] sm:$0xff] %vm1012_vm0, %v4735_v58 }
  0x9c   : > { %4191 = vmatpush3.bf16.xpose.msra.mxu0 %v4396_v8  ;;  %1059 = vst.msk [vmem:[#allocation3 + $0x70] sm:$0xff] %vm1012_vm0, %v4735_v58  ;;  %1060 = vst.msk [vmem:[#allocation3 + $0x78] sm:$0xff] %vm1012_vm0, %v4735_v58 }
  0x9d   : > { %4192 = vmatprep.subr.bf16.mxu0 %v4397_v9  ;;  %1061 = vst.msk [vmem:[#allocation3 + $0x80] sm:$0xff] %vm1012_vm0, %v4735_v58  ;;  %1062 = vst.msk [vmem:[#allocation3 + $0x88] sm:$0xff] %vm1012_vm0, %v4735_v58 }
  0x9e   : > { %1063 = vst.msk [vmem:[#allocation3 + $0x90] sm:$0xff] %vm1012_vm0, %v4735_v58  ;;  %1064 = vst.msk [vmem:[#allocation3 + $0x98] sm:$0xff] %vm1012_vm0, %v4735_v58 }
  0x9f   : > { %1065 = vst.msk [vmem:[#allocation3 + $0xa0] sm:$0xff] %vm1012_vm0, %v4735_v58  ;;  %1066 = vst.msk [vmem:[#allocation3 + $0xa8] sm:$0xff] %vm1012_vm0, %v4735_v58 }
  0xa0   : > { %1067 = vst.msk [vmem:[#allocation3 + $0xb0] sm:$0xff] %vm1012_vm0, %v4735_v58  ;;  %1068 = vst.msk [vmem:[#allocation3 + $0xb8] sm:$0xff] %vm1012_vm0, %v4735_v58 }
  0xa1   : > { %1069 = vst.msk [vmem:[#allocation3 + $0xc0] sm:$0xff] %vm1012_vm0, %v4735_v58  ;;  %1070 = vst.msk [vmem:[#allocation3 + $0xc8] sm:$0xff] %vm1012_vm0, %v4735_v58 }
  0xa2   : > { %1071 = vst.msk [vmem:[#allocation3 + $0xd0] sm:$0xff] %vm1012_vm0, %v4735_v58  ;;  %1072 = vst.msk [vmem:[#allocation3 + $0xd8] sm:$0xff] %vm1012_vm0, %v4735_v58 }
  0xa3   : > { %1073 = vst.msk [vmem:[#allocation3 + $0xe0] sm:$0xff] %vm1012_vm0, %v4735_v58  ;;  %1074 = vst.msk [vmem:[#allocation3 + $0xe8] sm:$0xff] %vm1012_vm0, %v4735_v58 }
  0xa4   : > { %4193 = vmatpush3.bf16.xpose.msra.mxu0 %v4398_v10  ;;  %1075 = vst.msk [vmem:[#allocation3 + $0xf0] sm:$0xff] %vm1012_vm0, %v4735_v58  ;;  %1076 = vst.msk [vmem:[#allocation3 + $0xf8] sm:$0xff] %vm1012_vm0, %v4735_v58 }
  0xa5   : > { %4194 = vmatprep.subr.bf16.mxu0 %v4399_v11 }
  0xac   : > { %4195 = vmatpush3.bf16.xpose.msra.mxu0 %v4400_v12 }
  0xad   : > { %4196 = vmatprep.subr.bf16.mxu0 %v4401_v13 }
  0xb4   : > { %4197 = vmatpush3.bf16.xpose.msra.mxu0 %v4402_v14 }
  0xb5   : > { %4198 = vmatprep.subr.bf16.mxu0 %v4403_v15 }
  0xbc   : > { %4199 = vmatpush3.bf16.xpose.msra.mxu0 %v4404_v16 }
  0xc3   : > { %4201 = vmatmul.mubr.bf16.vlgmr.msra.gmra.mrb[0].mxu0 %v4405_v7 }
  0xc4   : > { %4202 = vmatprep.mubr.bf16.mxu0 %v4406_v17 }
  0xcb   : > { %4203 = vmatmul.mubr.bf16.gmra.mrb[4].mxu0 %v4406_v17 }
  0xcc   : > { %4204 = vmatprep.mubr.bf16.mxu0 %v4407_v18 }
  0xd3   : > { %4205 = vmatmul.mubr.bf16.gmra.mrb[8].mxu0 %v4407_v18 }
  0xd4   : > { %4206 = vmatprep.mubr.bf16.mxu0 %v4408_v19 }
  0xdb   : > { %4207 = vmatmul.mubr.bf16.gmra.mrb[12].mxu0 %v4408_v19 }
  0xdc   : > { %4208 = vmatprep.mubr.bf16.mxu0 %v4409_v20 }
  0xe3   : > { %4209 = vmatmul.mubr.bf16.gmra.mrb[16].mxu0 %v4409_v20 }
  0xe4   : > { %4210 = vmatprep.mubr.bf16.mxu0 %v4410_v21 }
  0xeb   : > { %4211 = vmatmul.mubr.bf16.gmra.mrb[20].mxu0 %v4410_v21 }
  0xec   : > { %4212 = vmatprep.mubr.bf16.mxu0 %v4411_v22 }
  0xf3   : > { %4213 = vmatmul.mubr.bf16.gmra.mrb[24].mxu0 %v4411_v22 }
  0xf4   : > { %4214 = vmatprep.mubr.bf16.mxu0 %v4412_v23 }
  0xfb   : > { %4215 = vmatmul.mubr.bf16.gmra.mrb[28].mxu0 %v4412_v23 }
  0xfc   : > { %4216 = vmatprep.mubr.bf16.mxu0 %v4413_v24 }
 0x103   : > { %4217 = vmatmul.mubr.bf16.gmra.mrb[32].mxu0 %v4413_v24 }
 0x104   : > { %4218 = vmatprep.mubr.bf16.mxu0 %v4414_v25 }
 0x10b   : > { %4219 = vmatmul.mubr.bf16.gmra.mrb[36].mxu0 %v4414_v25 }
 0x10c   : > { %4220 = vmatprep.mubr.bf16.mxu0 %v4415_v26 }
 0x113   : > { %4221 = vmatmul.mubr.bf16.gmra.mrb[40].mxu0 %v4415_v26 }
 0x114   : > { %4222 = vmatprep.mubr.bf16.mxu0 %v4416_v27 }
 0x11b   : > { %4223 = vmatmul.mubr.bf16.gmra.mrb[44].mxu0 %v4416_v27 }
 0x11c   : > { %4224 = vmatprep.mubr.bf16.mxu0 %v4417_v28 }
 0x123   : > { %4225 = vmatmul.mubr.bf16.gmra.mrb[48].mxu0 %v4417_v28 }
 0x124   : > { %4226 = vmatprep.mubr.bf16.mxu0 %v4418_v29 }
 0x12b   : > { %4227 = vmatmul.mubr.bf16.gmra.mrb[52].mxu0 %v4418_v29 }
 0x12c   : > { %4228 = vmatprep.mubr.bf16.mxu0 %v4419_v30 }
 0x133   : > { %4229 = vmatmul.mubr.bf16.gmra.mrb[56].mxu0 %v4419_v30 }
 0x134   : > { %4230 = vmatprep.mubr.bf16.mxu0 %v4420_v31 }
 0x13b   : > { %4231 = vmatmul.mubr.bf16.gmra.mrb[60].mxu0 %v4420_v31 }
 0x196   : > { %v5186_v33 = vpop.f32.mrb[0].mxu0 }
 0x197   : > { %v5188_v34 = vpop.f32.mrb[1].mxu0 }
 0x198   : > { %v5190_v35 = vpop.f32.mrb[2].mxu0  ;;  %v1622_v36 = vmax.f32 %v5186_v33, %v5188_v34 }
 0x199   : > { %v5194_v37 = vpop.f32.mrb[3].mxu0 }
 0x19a   : > { %1623 = vmax.xlane.f32.xlu0 %v1622_v36  ;;  %v1625_v38 = vmax.f32 %v5190_v35, %v5194_v37 }
 0x19e   : > { %1626 = vmax.xlane.f32.xlu0 %v1625_v38  ;;  %v5198_v39 = vpop.f32.mrb[4].mxu0 }
 0x19f   : > { %v5200_v40 = vpop.f32.mrb[5].mxu0 }
 0x1a0   : > { %v5202_v41 = vpop.f32.mrb[6].mxu0  ;;  %v1628_v42 = vmax.f32 %v5198_v39, %v5200_v40 }
 0x1a1   : > { %6459 = vst [vmem:[#allocation10_spill] sm:$0xff] %v5202_v41  ;;  %v5206_v43 = vpop.f32.mrb[7].mxu0 }
 0x1a2   : > { %6460 = vst [vmem:[#allocation11_spill] sm:$0xff] %v5206_v43  ;;  %1629 = vmax.xlane.f32.xlu1 %v1628_v42  ;;  %v1631_v44 = vmax.f32 %v5202_v41, %v5206_v43 }
 0x1a6   : > { %1632 = vmax.xlane.f32.xlu1 %v1631_v44  ;;  %v5210_v45 = vpop.f32.mrb[8].mxu0 }
 0x1a7   : > { %6461 = vst [vmem:[#allocation12_spill] sm:$0xff] %v5210_v45  ;;  %v5212_v46 = vpop.f32.mrb[9].mxu0 }
 0x1a8   : > { %6462 = vst [vmem:[#allocation13_spill] sm:$0xff] %v5212_v46  ;;  %v5214_v47 = vpop.f32.mrb[10].mxu0  ;;  %v1634_v48 = vmax.f32 %v5210_v45, %v5212_v46 }
 0x1a9   : > { %6463 = vst [vmem:[#allocation14_spill] sm:$0xff] %v5214_v47  ;;  %v5218_v49 = vpop.f32.mrb[11].mxu0 }
 0x1aa   : > { %6464 = vst [vmem:[#allocation15_spill] sm:$0xff] %v5218_v49  ;;  %1635 = vmax.xlane.f32.xlu0 %v1634_v48  ;;  %v1637_v51 = vmax.f32 %v5214_v47, %v5218_v49  ;;  %v5666_v47 = vld [vmem:[#allocation2 + $0xc8] sm:$0xff] }
 0x1ac   : > { %1638 = vmax.xlane.f32.xlu1 %v1637_v51 }
 0x1ae   : > { %v5222_v52 = vpop.f32.mrb[12].mxu0 }
 0x1af   : > { %6465 = vst [vmem:[#allocation16_spill] sm:$0xff] %v5222_v52  ;;  %v5224_v53 = vpop.f32.mrb[13].mxu0 }
 0x1b0   : > { %6466 = vst [vmem:[#allocation17_spill] sm:$0xff] %v5224_v53  ;;  %v5226_v54 = vpop.f32.mrb[14].mxu0  ;;  %v1640_v55 = vmax.f32 %v5222_v52, %v5224_v53  ;;  %v5661_v53 = vld [vmem:[#allocation2 + $0xc0] sm:$0xff] }
 0x1b1   : > { %6467 = vst [vmem:[#allocation18_spill] sm:$0xff] %v5226_v54  ;;  %v5230_v56 = vpop.f32.mrb[15].mxu0 }
 0x1b2   : > { %6468 = vst [vmem:[#allocation19_spill] sm:$0xff] %v5230_v56  ;;  %1641 = vmax.xlane.f32.xlu0 %v1640_v55  ;;  %v1643_v57 = vmax.f32 %v5226_v54, %v5230_v56  ;;  %v5647_v56 = vld [vmem:[#allocation2 + $0xb8] sm:$0xff] }
 0x1b4   : > { %1644 = vmax.xlane.f32.xlu1 %v1643_v57 }
 0x1b6   : > { %v5266_v59 = vpop.f32.mrb[16].mxu0 }
 0x1b7   : > { %6469 = vst [vmem:[#allocation20_spill] sm:$0xff] %v5266_v59  ;;  %v5268_v60 = vpop.f32.mrb[17].mxu0 }
 0x1b8   : > { %6470 = vst [vmem:[#allocation21_spill] sm:$0xff] %v5268_v60  ;;  %v5270_v61 = vpop.f32.mrb[18].mxu0  ;;  %v1646_v62 = vmax.f32 %v5266_v59, %v5268_v60 }
 0x1b9   : > { %6471 = vst [vmem:[#allocation22_spill] sm:$0xff] %v5270_v61  ;;  %v5274_v63 = vpop.f32.mrb[19].mxu0 }
 0x1ba   : > { %6472 = vst [vmem:[#allocation23_spill] sm:$0xff] %v5274_v63  ;;  %1647 = vmax.xlane.f32.xlu0 %v1646_v62  ;;  %v1649_v0 = vmax.f32 %v5270_v61, %v5274_v63 }
 0x1bc   : > { %1650 = vmax.xlane.f32.xlu1 %v1649_v0 }
 0x1be   : > { %v5278_v1 = vpop.f32.mrb[20].mxu0 }
 0x1bf   : > { %6473 = vst [vmem:[#allocation24_spill] sm:$0xff] %v5278_v1  ;;  %v5280_v2 = vpop.f32.mrb[21].mxu0 }
 0x1c0   : > { %6474 = vst [vmem:[#allocation25_spill] sm:$0xff] %v5280_v2  ;;  %v5282_v3 = vpop.f32.mrb[22].mxu0  ;;  %v1652_v4 = vmax.f32 %v5278_v1, %v5280_v2  ;;  %v5631_v2 = vld [vmem:[#allocation2 + $0xa8] sm:$0xff]  ;;  %v5645_v1 = vld [vmem:[#allocation2 + $0xb0] sm:$0xff] }
 0x1c1   : > { %6475 = vst [vmem:[#allocation26_spill] sm:$0xff] %v5282_v3  ;;  %v5286_v5 = vpop.f32.mrb[23].mxu0 }
 0x1c2   : > { %6476 = vst [vmem:[#allocation27_spill] sm:$0xff] %v5286_v5  ;;  %1653 = vmax.xlane.f32.xlu0 %v1652_v4  ;;  %v1655_v6 = vmax.f32 %v5282_v3, %v5286_v5 }
 0x1c4   : > { %1656 = vmax.xlane.f32.xlu1 %v1655_v6 }
 0x1c6   : > { %v5290_v7 = vpop.f32.mrb[24].mxu0 }
 0x1c7   : > { %6477 = vst [vmem:[#allocation28_spill] sm:$0xff] %v5290_v7  ;;  %v5292_v8 = vpop.f32.mrb[25].mxu0 }
 0x1c8   : > { %6478 = vst [vmem:[#allocation29_spill] sm:$0xff] %v5292_v8  ;;  %v5294_v9 = vpop.f32.mrb[26].mxu0  ;;  %v1658_v10 = vmax.f32 %v5290_v7, %v5292_v8  ;;  %v5611_v8 = vld [vmem:[#allocation2 + $0x98] sm:$0xff] }
 0x1c9   : > { %6479 = vst [vmem:[#allocation30_spill] sm:$0xff] %v5294_v9  ;;  %v5298_v11 = vpop.f32.mrb[27].mxu0 }
 0x1ca   : > { %6480 = vst [vmem:[#allocation31_spill] sm:$0xff] %v5298_v11  ;;  %1659 = vmax.xlane.f32.xlu0 %v1658_v10  ;;  %v1661_v12 = vmax.f32 %v5294_v9, %v5298_v11 }
 0x1cc   : > { %1662 = vmax.xlane.f32.xlu1 %v1661_v12 }
 0x1ce   : > { %v5302_v13 = vpop.f32.mrb[28].mxu0 }
 0x1cf   : > { %6481 = vst [vmem:[#allocation32_spill] sm:$0xff] %v5302_v13  ;;  %v5304_v14 = vpop.f32.mrb[29].mxu0 }
 0x1d0   : > { %6482 = vst [vmem:[#allocation33_spill] sm:$0xff] %v5304_v14  ;;  %v5306_v15 = vpop.f32.mrb[30].mxu0  ;;  %v1664_v16 = vmax.f32 %v5302_v13, %v5304_v14  ;;  %v5591_v14 = vld [vmem:[#allocation2 + $0x88] sm:$0xff] }
 0x1d1   : > { %6483 = vst [vmem:[#allocation34_spill] sm:$0xff] %v5306_v15  ;;  %v5310_v17 = vpop.f32.mrb[31].mxu0 }
 0x1d2   : > { %6484 = vst [vmem:[#allocation35_spill] sm:$0xff] %v5310_v17  ;;  %1665 = vmax.xlane.f32.xlu0 %v1664_v16  ;;  %v1667_v18 = vmax.f32 %v5306_v15, %v5310_v17 }
 0x1d4   : > { %1668 = vmax.xlane.f32.xlu1 %v1667_v18 }
 0x1d6   : > { %v5314_v19 = vpop.f32.mrb[32].mxu0 }
 0x1d7   : > { %6485 = vst [vmem:[#allocation36_spill] sm:$0xff] %v5314_v19  ;;  %v5316_v20 = vpop.f32.mrb[33].mxu0 }
 0x1d8   : > { %6486 = vst [vmem:[#allocation37_spill] sm:$0xff] %v5316_v20  ;;  %v5318_v21 = vpop.f32.mrb[34].mxu0  ;;  %v1670_v22 = vmax.f32 %v5314_v19, %v5316_v20  ;;  %v5571_v20 = vld [vmem:[#allocation2 + $0x78] sm:$0xff] }
 0x1d9   : > { %6487 = vst [vmem:[#allocation38_spill] sm:$0xff] %v5318_v21  ;;  %v5322_v23 = vpop.f32.mrb[35].mxu0 }
 0x1da   : > { %6488 = vst [vmem:[#allocation39_spill] sm:$0xff] %v5322_v23  ;;  %1671 = vmax.xlane.f32.xlu0 %v1670_v22  ;;  %v1673_v24 = vmax.f32 %v5318_v21, %v5322_v23 }
 0x1dc   : > { %1674 = vmax.xlane.f32.xlu1 %v1673_v24 }
 0x1de   : > { %v5326_v25 = vpop.f32.mrb[36].mxu0 }
 0x1df   : > { %6489 = vst [vmem:[#allocation40_spill] sm:$0xff] %v5326_v25  ;;  %v5328_v26 = vpop.f32.mrb[37].mxu0 }
 0x1e0   : > { %6490 = vst [vmem:[#allocation41_spill] sm:$0xff] %v5328_v26  ;;  %v5330_v27 = vpop.f32.mrb[38].mxu0  ;;  %v1676_v28 = vmax.f32 %v5326_v25, %v5328_v26  ;;  %v5551_v26 = vld [vmem:[#allocation2 + $0x68] sm:$0xff] }
 0x1e1   : > { %6491 = vst [vmem:[#allocation42_spill] sm:$0xff] %v5330_v27  ;;  %v5334_v29 = vpop.f32.mrb[39].mxu0 }
 0x1e2   : > { %6492 = vst [vmem:[#allocation43_spill] sm:$0xff] %v5334_v29  ;;  %1677 = vmax.xlane.f32.xlu0 %v1676_v28  ;;  %v1679_v30 = vmax.f32 %v5330_v27, %v5334_v29 }
 0x1e4   : > { %1680 = vmax.xlane.f32.xlu1 %v1679_v30 }
 0x1e6   : > { %v5338_v31 = vpop.f32.mrb[40].mxu0 }
 0x1e7   : > { %6493 = vst [vmem:[#allocation44_spill] sm:$0xff] %v5338_v31  ;;  %v5340_v32 = vpop.f32.mrb[41].mxu0 }
 0x1e8   : > { %6494 = vst [vmem:[#allocation45_spill] sm:$0xff] %v5340_v32  ;;  %v5342_v36 = vpop.f32.mrb[42].mxu0  ;;  %v1682_v38 = vmax.f32 %v5338_v31, %v5340_v32  ;;  %v5531_v32 = vld [vmem:[#allocation2 + $0x58] sm:$0xff] }
 0x1e9   : > { %6495 = vst [vmem:[#allocation46_spill] sm:$0xff] %v5342_v36  ;;  %v5346_v42 = vpop.f32.mrb[43].mxu0 }
 0x1ea   : > { %6496 = vst [vmem:[#allocation47_spill] sm:$0xff] %v5346_v42  ;;  %1683 = vmax.xlane.f32.xlu0 %v1682_v38  ;;  %v1685_v44 = vmax.f32 %v5342_v36, %v5346_v42 }
 0x1ec   : > { %1686 = vmax.xlane.f32.xlu1 %v1685_v44 }
 0x1ee   : > { %v5350_v48 = vpop.f32.mrb[44].mxu0 }
 0x1ef   : > { %6497 = vst [vmem:[#allocation48_spill] sm:$0xff] %v5350_v48  ;;  %v5352_v50 = vpop.f32.mrb[45].mxu0 }
 0x1f0   : > { %6498 = vst [vmem:[#allocation49_spill] sm:$0xff] %v5352_v50  ;;  %v5354_v51 = vpop.f32.mrb[46].mxu0  ;;  %v1688_v55 = vmax.f32 %v5350_v48, %v5352_v50  ;;  %v5488_v50 = vld [vmem:[#allocation2 + $0x30] sm:$0xff] }
 0x1f1   : > { %6499 = vst [vmem:[#allocation50_spill] sm:$0xff] %v5354_v51  ;;  %v5358_v57 = vpop.f32.mrb[47].mxu0 }
 0x1f2   : > { %6500 = vst [vmem:[#allocation51_spill] sm:$0xff] %v5358_v57  ;;  %1689 = vmax.xlane.f32.xlu0 %v1688_v55  ;;  %v1691_v58 = vmax.f32 %v5354_v51, %v5358_v57  ;;  %v4434_v57 = vld [vmem:[%s5411_s16 + $0x30] sm:$0xff]  }
 0x1f4   : > { %1692 = vmax.xlane.f32.xlu1 %v1691_v58 }
 0x1f6   : > { %v5362_v62 = vpop.f32.mrb[48].mxu0 }
 0x1f7   : > { %6501 = vst [vmem:[#allocation52_spill] sm:$0xff] %v5362_v62  ;;  %v5364_v0 = vpop.f32.mrb[49].mxu0 }
 0x1f8   : > { %6502 = vst [vmem:[#allocation53_spill] sm:$0xff] %v5364_v0  ;;  %v5366_v4 = vpop.f32.mrb[50].mxu0  ;;  %v1694_v6 = vmax.f32 %v5362_v62, %v5364_v0  ;;  %v5460_v0 = vld [vmem:[#allocation2 + $0x20] sm:$0xff] }
 0x1f9   : > { %6503 = vst [vmem:[#allocation54_spill] sm:$0xff] %v5366_v4  ;;  %v5370_v10 = vpop.f32.mrb[51].mxu0 }
 0x1fa   : > { %6504 = vst [vmem:[#allocation55_spill] sm:$0xff] %v5370_v10  ;;  %1695 = vmax.xlane.f32.xlu0 %v1694_v6  ;;  %v1697_v12 = vmax.f32 %v5366_v4, %v5370_v10  ;;  %v5448_v10 = vld [vmem:[#allocation2 + $0x18] sm:$0xff]  ;;  %v4432_v4 = vld [vmem:[%s5411_s16 + $0x28] sm:$0xff]  }
 0x1fc   : > { %1698 = vmax.xlane.f32.xlu1 %v1697_v12 }
 0x1fe   : > { %v5374_v16 = vpop.f32.mrb[52].mxu0 }
 0x1ff   : > { %6505 = vst [vmem:[#allocation56_spill] sm:$0xff] %v5374_v16  ;;  %v5376_v18 = vpop.f32.mrb[53].mxu0 }
 0x200   : > { %6506 = vst [vmem:[#allocation57_spill] sm:$0xff] %v5376_v18  ;;  %v5378_v22 = vpop.f32.mrb[54].mxu0  ;;  %v1700_v24 = vmax.f32 %v5374_v16, %v5376_v18  ;;  %v4430_v16 = vld [vmem:[%s5411_s16 + $0x20] sm:$0xff]  }
 0x201   : > { %6507 = vst [vmem:[#allocation58_spill] sm:$0xff] %v5378_v22  ;;  %v5382_v28 = vpop.f32.mrb[55].mxu0 }
 0x202   : > { %6508 = vst [vmem:[#allocation59_spill] sm:$0xff] %v5382_v28  ;;  %1701 = vmax.xlane.f32.xlu0 %v1700_v24  ;;  %v1703_v30 = vmax.f32 %v5378_v22, %v5382_v28 }
 0x204   : > { %1704 = vmax.xlane.f32.xlu1 %v1703_v30 }
 0x206   : > { %v5386_v38 = vpop.f32.mrb[56].mxu0 }
 0x207   : > { %6509 = vst [vmem:[#allocation60_spill] sm:$0xff] %v5386_v38  ;;  %v5388_v44 = vpop.f32.mrb[57].mxu0 }
 0x208   : > { %6510 = vst [vmem:[#allocation61_spill] sm:$0xff] %v5388_v44  ;;  %v5390_v55 = vpop.f32.mrb[58].mxu0  ;;  %v1706_v58 = vmax.f32 %v5386_v38, %v5388_v44  ;;  %v4428_v38 = vld [vmem:[%s5411_s16 + $0x18] sm:$0xff]  }
 0x209   : > { %6511 = vst [vmem:[#allocation62_spill] sm:$0xff] %v5390_v55  ;;  %v5394_v6 = vpop.f32.mrb[59].mxu0 }
 0x20a   : > { %6512 = vst [vmem:[#allocation63_spill] sm:$0xff] %v5394_v6  ;;  %1707 = vmax.xlane.f32.xlu0 %v1706_v58  ;;  %v1709_v12 = vmax.f32 %v5390_v55, %v5394_v6  ;;  %v4421_v58 = vld [vmem:[%s5411_s16 + $0x40] sm:$0xff]   ;;  %v4424_v6 = vld [vmem:[%s5411_s16 + $0x8] sm:$0xff]  }
 0x20b   : > { %4232 = vmatprep.subr.bf16.mxu1 %v4421_v58  ;;  %v4429_v58 = vld [vmem:[%s5411_s16 + $0x60] sm:$0xff]  }
 0x20c   : > { %1710 = vmax.xlane.f32.xlu1 %v1709_v12  ;;  %v4422_v12 = vld [vmem:[%s5411_s16] sm:$0xff]  }
 0x20d   : > { %4233 = vmatpush3.bf16.msra.mxu1 %v4422_v12 }
 0x20e   : > { %v5398_v24 = vpop.f32.mrb[60].mxu0 }
 0x20f   : > { %6513 = vst [vmem:[#allocation64_spill] sm:$0xff] %v5398_v24  ;;  %v5400_v30 = vpop.f32.mrb[61].mxu0 }
 0x210   : > { %6514 = vst [vmem:[#allocation65_spill] sm:$0xff] %v5400_v30  ;;  %v5402_v28 = vpop.f32.mrb[62].mxu0  ;;  %v1712_v22 = vmax.f32 %v5398_v24, %v5400_v30  ;;  %v4423_v30 = vld [vmem:[%s5411_s16 + $0x48] sm:$0xff]   ;;  %v5416_v24 = vld [vmem:[#allocation2] sm:$0xff] }
 0x211   : > { %6515 = vst [vmem:[#allocation66_spill] sm:$0xff] %v5402_v28  ;;  %v5406_v18 = vpop.f32.mrb[63].mxu0  ;;  %4234 = vmatprep.subr.bf16.mxu1 %v4423_v30  ;;  %v4427_v30 = vld [vmem:[%s5411_s16 + $0x58] sm:$0xff]  }
 0x212   : > { %6516 = vst [vmem:[#allocation67_spill] sm:$0xff] %v5406_v18  ;;  %v1715_v44 = vmax.f32 %v5402_v28, %v5406_v18  ;;  %1713 = vmax.xlane.f32.xlu0 %v1712_v22  ;;  %4235 = vmatpush3.bf16.msra.mxu1 %v4424_v6  ;;  %v4425_v22 = vld [vmem:[%s5411_s16 + $0x50] sm:$0xff]   ;;  %v5420_v18 = vld [vmem:[#allocation2 + $0x8] sm:$0xff] }
 0x213   : > { %v4426_v28 = vld [vmem:[%s5411_s16 + $0x10] sm:$0xff]   ;;  %4236 = vmatprep.subr.bf16.mxu1 %v4425_v22  ;;  %v4431_v22 = vld [vmem:[%s5411_s16 + $0x68] sm:$0xff]  }
 0x214   : > { %1716 = vmax.xlane.f32.xlu1 %v1715_v44 }
 0x216   : > { %4237 = vmatpush3.bf16.msra.mxu1 %v4426_v28 }
 0x217   : > { %4238 = vmatprep.subr.bf16.mxu1 %v4427_v30  ;;  %v5467_v30 = vld [vmem:[#allocation2 + $0x28] sm:$0xff] }
 0x21a   : > { %4239 = vmatpush3.bf16.msra.mxu1 %v4428_v38 }
 0x21b   : > { %4240 = vmatprep.subr.bf16.mxu1 %v4429_v58 }
 0x21e   : > { %4241 = vmatpush3.bf16.msra.mxu1 %v4430_v16 }
 0x21f   : > { %4242 = vmatprep.subr.bf16.mxu1 %v4431_v22 }
 0x222   : > { %4243 = vmatpush3.bf16.msra.mxu1 %v4432_v4  ;;  %v4435_v4 = vld [vmem:[%s5411_s16 + $0x78] sm:$0xff]  }
 0x227   : > { %v1624_v44 = vpop.xlane.xlu0 %1623 }
 0x228   : > { %v5424_v55 = vmax.f32 %v5416_v24, %v1624_v44  ;;  %v5436_v44 = vld [vmem:[#allocation2 + $0x10] sm:$0xff] }
 0x22a   : > { %3000 = vst.msk [vmem:[#allocation2] sm:$0xff] %vm1012_vm0, %v5424_v55  ;;  %1848 = vperm.xlu0 %4387, %v5424_v55  }
 0x22b   : > { %v1627_v6 = vpop.xlane.xlu0 %1626 }
 0x22c   : > { %v5433_v12 = vmax.f32 %v5420_v18, %v1627_v6 }
 0x22e   : > { %3001 = vst.msk [vmem:[#allocation2 + $0x8] sm:$0xff] %vm1012_vm0, %v5433_v12  ;;  %1853 = vperm.xlu1 %4388, %v5433_v12  }
 0x22f   : > { %v1630_v28 = vpop.xlane.xlu1 %1629 }
 0x230   : > { %v5445_v6 = vmax.f32 %v5436_v44, %v1630_v28 }
 0x232   : > { %3002 = vst.msk [vmem:[#allocation2 + $0x10] sm:$0xff] %vm1012_vm0, %v5445_v6  ;;  %1858 = vperm.xlu1 %4388, %v5445_v6  }
 0x233   : > { %v1633_v38 = vpop.xlane.xlu1 %1632 }
 0x234   : > { %v5457_v28 = vmax.f32 %v5448_v10, %v1633_v38  ;;  %v4433_v38 = vld [vmem:[%s5411_s16 + $0x70] sm:$0xff]  }
 0x235   : > { %4244 = vmatprep.subr.bf16.mxu1 %v4433_v38  ;;  %v4436_v38 = vld [vmem:[%s5411_s16 + $0x38] sm:$0xff]  }
 0x236   : > { %3003 = vst.msk [vmem:[#allocation2 + $0x18] sm:$0xff] %vm1012_vm0, %v5457_v28  ;;  %1863 = vperm.xlu1 %4388, %v5457_v28   ;;  %4245 = vmatpush3.bf16.msra.mxu1 %v4434_v57 }
 0x237   : > { %v1636_v16 = vpop.xlane.xlu0 %1635  ;;  %4246 = vmatprep.subr.bf16.mxu1 %v4435_v4 }
 0x238   : > { %v5471_v62 = vmax.f32 %v5460_v0, %v1636_v16  ;;  %v5511_v16 = vld [vmem:[#allocation2 + $0x48] sm:$0xff] }
 0x239   : > { %v1639_v22 = vpop.xlane.xlu1 %1638 }
 0x23a   : > { %3004 = vst.msk [vmem:[#allocation2 + $0x20] sm:$0xff] %vm1012_vm0, %v5471_v62  ;;  %v5479_v51 = vmax.f32 %v5467_v30, %v1639_v22  ;;  %1868 = vperm.xlu1 %4388, %v5471_v62   ;;  %4247 = vmatpush3.bf16.msra.mxu1 %v4436_v38  ;;  %v5491_v22 = vld [vmem:[#allocation2 + $0x38] sm:$0xff] }
 0x23c   : > { %3005 = vst.msk [vmem:[#allocation2 + $0x28] sm:$0xff] %vm1012_vm0, %v5479_v51 }
 0x23e   : > { %1873 = vperm.xlu1 %4388, %v5479_v51  }
 0x23f   : > { %v1642_v58 = vpop.xlane.xlu0 %1641 }
 0x240   : > { %v5494_v48 = vmax.f32 %v5488_v50, %v1642_v58  ;;  %v5508_v58 = vld [vmem:[#allocation2 + $0x40] sm:$0xff] }
 0x241   : > { %v1645_v57 = vpop.xlane.xlu1 %1644 }
 0x242   : > { %3006 = vst.msk [vmem:[#allocation2 + $0x30] sm:$0xff] %vm1012_vm0, %v5494_v48  ;;  %v5501_v42 = vmax.f32 %v5491_v22, %v1645_v57  ;;  %1878 = vperm.xlu1 %4388, %v5494_v48  }
 0x244   : > { %3007 = vst.msk [vmem:[#allocation2 + $0x38] sm:$0xff] %vm1012_vm0, %v5501_v42 }
 0x246   : > { %1883 = vperm.xlu1 %4388, %v5501_v42  }
 0x247   : > { %v1648_v38 = vpop.xlane.xlu0 %1647 }
 0x248   : > { %v5514_v36 = vmax.f32 %v5508_v58, %v1648_v38  ;;  %v5529_v38 = vld [vmem:[#allocation2 + $0x50] sm:$0xff] }
 0x249   : > { %v1651_v57 = vpop.xlane.xlu1 %1650 }
 0x24a   : > { %3008 = vst.msk [vmem:[#allocation2 + $0x40] sm:$0xff] %vm1012_vm0, %v5514_v36  ;;  %v5521_v4 = vmax.f32 %v5511_v16, %v1651_v57  ;;  %1888 = vperm.xlu1 %4388, %v5514_v36  }
 0x24c   : > { %3009 = vst.msk [vmem:[#allocation2 + $0x48] sm:$0xff] %vm1012_vm0, %v5521_v4  ;;  %1893 = vperm.xlu0 %4387, %v5521_v4  }
 0x24f   : > { %v1654_v29 = vpop.xlane.xlu0 %1653 }
 0x250   : > { %v5534_v27 = vmax.f32 %v5529_v38, %v1654_v29  ;;  %v5549_v29 = vld [vmem:[#allocation2 + $0x60] sm:$0xff] }
 0x251   : > { %v1657_v57 = vpop.xlane.xlu1 %1656 }
 0x252   : > { %3010 = vst.msk [vmem:[#allocation2 + $0x50] sm:$0xff] %vm1012_vm0, %v5534_v27  ;;  %v5541_v31 = vmax.f32 %v5531_v32, %v1657_v57  ;;  %1898 = vperm.xlu1 %4388, %v5534_v27  }
 0x254   : > { %3011 = vst.msk [vmem:[#allocation2 + $0x58] sm:$0xff] %vm1012_vm0, %v5541_v31  ;;  %1903 = vperm.xlu0 %4387, %v5541_v31  }
 0x257   : > { %v1660_v23 = vpop.xlane.xlu0 %1659 }
 0x258   : > { %v5554_v21 = vmax.f32 %v5549_v29, %v1660_v23  ;;  %v5569_v23 = vld [vmem:[#allocation2 + $0x70] sm:$0xff] }
 0x259   : > { %v1663_v57 = vpop.xlane.xlu1 %1662 }
 0x25a   : > { %3012 = vst.msk [vmem:[#allocation2 + $0x60] sm:$0xff] %vm1012_vm0, %v5554_v21  ;;  %v5561_v25 = vmax.f32 %v5551_v26, %v1663_v57  ;;  %1908 = vperm.xlu1 %4388, %v5554_v21  }
 0x25c   : > { %3013 = vst.msk [vmem:[#allocation2 + $0x68] sm:$0xff] %vm1012_vm0, %v5561_v25  ;;  %1913 = vperm.xlu0 %4387, %v5561_v25  }
 0x25f   : > { %v1666_v17 = vpop.xlane.xlu0 %1665 }
 0x260   : > { %v5574_v15 = vmax.f32 %v5569_v23, %v1666_v17  ;;  %v5589_v17 = vld [vmem:[#allocation2 + $0x80] sm:$0xff] }
 0x261   : > { %v1669_v57 = vpop.xlane.xlu1 %1668 }
 0x262   : > { %3014 = vst.msk [vmem:[#allocation2 + $0x70] sm:$0xff] %vm1012_vm0, %v5574_v15  ;;  %v5581_v19 = vmax.f32 %v5571_v20, %v1669_v57  ;;  %1918 = vperm.xlu1 %4388, %v5574_v15  }
 0x264   : > { %3015 = vst.msk [vmem:[#allocation2 + $0x78] sm:$0xff] %vm1012_vm0, %v5581_v19  ;;  %1923 = vperm.xlu0 %4387, %v5581_v19  }
 0x267   : > { %v1672_v11 = vpop.xlane.xlu0 %1671 }
 0x268   : > { %v5594_v9 = vmax.f32 %v5589_v17, %v1672_v11  ;;  %v5609_v11 = vld [vmem:[#allocation2 + $0x90] sm:$0xff] }
 0x269   : > { %v1675_v57 = vpop.xlane.xlu1 %1674 }
 0x26a   : > { %3016 = vst.msk [vmem:[#allocation2 + $0x80] sm:$0xff] %vm1012_vm0, %v5594_v9  ;;  %v5601_v13 = vmax.f32 %v5591_v14, %v1675_v57  ;;  %1928 = vperm.xlu1 %4388, %v5594_v9  }
 0x26c   : > { %3017 = vst.msk [vmem:[#allocation2 + $0x88] sm:$0xff] %vm1012_vm0, %v5601_v13  ;;  %1933 = vperm.xlu0 %4387, %v5601_v13  }
 0x26f   : > { %v1678_v5 = vpop.xlane.xlu0 %1677 }
 0x270   : > { %v5614_v3 = vmax.f32 %v5609_v11, %v1678_v5  ;;  %v5629_v5 = vld [vmem:[#allocation2 + $0xa0] sm:$0xff] }
 0x271   : > { %v1681_v57 = vpop.xlane.xlu1 %1680 }
 0x272   : > { %3018 = vst.msk [vmem:[#allocation2 + $0x90] sm:$0xff] %vm1012_vm0, %v5614_v3  ;;  %v5621_v7 = vmax.f32 %v5611_v8, %v1681_v57  ;;  %1938 = vperm.xlu1 %4388, %v5614_v3  }
 0x274   : > { %3019 = vst.msk [vmem:[#allocation2 + $0x98] sm:$0xff] %vm1012_vm0, %v5621_v7  ;;  %1943 = vperm.xlu0 %4387, %v5621_v7  }
 0x277   : > { %v1684_v63 = vpop.xlane.xlu0 %1683 }
 0x278   : > { %v5634_v61 = vmax.f32 %v5629_v5, %v1684_v63 }
 0x279   : > { %v1687_v57 = vpop.xlane.xlu1 %1686 }
 0x27a   : > { %3020 = vst.msk [vmem:[#allocation2 + $0xa0] sm:$0xff] %vm1012_vm0, %v5634_v61  ;;  %v5639_v60 = vmax.f32 %v5631_v2, %v1687_v57  ;;  %1948 = vperm.xlu1 %4388, %v5634_v61  }
 0x27c   : > { %3021 = vst.msk [vmem:[#allocation2 + $0xa8] sm:$0xff] %vm1012_vm0, %v5639_v60  ;;  %1953 = vperm.xlu0 %4387, %v5639_v60  }
 0x27f   : > { %v1690_v59 = vpop.xlane.xlu0 %1689 }
 0x280   : > { %v5650_v63 = vmax.f32 %v5645_v1, %v1690_v59  ;;  %v6517_v59 = vsub.f32 %v5420_v18, %v5433_v12  ;;  %v6519_v18 = vsub.f32 %v5436_v44, %v5445_v6  ;;  %v5688_v12 = vld [vmem:[#allocation2 + $0xd8] sm:$0xff] }
 0x281   : > { %v1693_v54 = vpop.xlane.xlu1 %1692  ;;  %6520 = vst [vmem:[#allocation68_spill] sm:$0xff] %v5688_v12 }
 0x282   : > { %3022 = vst.msk [vmem:[#allocation2 + $0xb0] sm:$0xff] %vm1012_vm0, %v5650_v63  ;;  %v5655_v57 = vmax.f32 %v5647_v56, %v1693_v54  ;;  %1958 = vperm.xlu1 %4388, %v5650_v63   ;;  %v1784_v52 = vmul.f32 1.442695, %v6517_v59  ;;  %v6518_v54 = vsub.f32 %v5416_v24, %v5424_v55  ;;  %v1786_v55 = vmul.f32 1.442695, %v6519_v18 }
 0x284   : > { %3023 = vst.msk [vmem:[#allocation2 + $0xb8] sm:$0xff] %vm1012_vm0, %v5655_v57  ;;  %1963 = vperm.xlu0 %4387, %v5655_v57   ;;  %v1782_v45 = vmul.f32 1.442695, %v6518_v54  ;;  %4437 = vpow2.f32 %v1784_v52  ;;  %v6521_v52 = vsub.f32 %v5448_v10, %v5457_v28  ;;  %v5707_v10 = vld [vmem:[#allocation2 + $0xe0] sm:$0xff]  ;;  %v6523_v28 = vsub.f32 %v5460_v0, %v5471_v62 }
 0x285   : > { %v6525_v62 = vsub.f32 %v5488_v50, %v5494_v48  ;;  %v6527_v48 = vsub.f32 %v5508_v58, %v5514_v36  ;;  %v6530_v36 = vsub.f32 %v5531_v32, %v5541_v31  ;;  %v6533_v32 = vsub.f32 %v5569_v23, %v5574_v15 }
 0x286   : > { %4439 = vpow2.f32 %v1782_v45  ;;  %v1788_v59 = vmul.f32 1.442695, %v6521_v52  ;;  %v1790_v18 = vmul.f32 1.442695, %v6523_v28  ;;  %v5741_v28 = vld [vmem:[#allocation2 + $0xf0] sm:$0xff] }
 0x287   : > { %v1696_v49 = vpop.xlane.xlu0 %1695  ;;  %4441 = vpow2.f32 %v1786_v55  ;;  %v5715_v55 = vld [vmem:[#allocation2 + $0xe8] sm:$0xff]  ;;  %v1794_v0 = vmul.f32 1.442695, %v6525_v62  ;;  %v1798_v50 = vmul.f32 1.442695, %v6527_v48 }
 0x288   : > { %v5669_v46 = vmax.f32 %v5661_v53, %v1696_v49  ;;  %v5683_v49 = vld [vmem:[#allocation2 + $0xd0] sm:$0xff]  ;;  %4443 = vpow2.f32 %v1788_v59  ;;  %v6524_v59 = vsub.f32 %v5467_v30, %v5479_v51  ;;  %v6526_v30 = vsub.f32 %v5491_v22, %v5501_v42 }
 0x289   : > { %v1699_v43 = vpop.xlane.xlu1 %1698  ;;  %4445 = vpow2.f32 %v1790_v18  ;;  %v6529_v22 = vsub.f32 %v5529_v38, %v5534_v27  ;;  %v1804_v58 = vmul.f32 1.442695, %v6530_v36  ;;  %v6532_v27 = vsub.f32 %v5551_v26, %v5561_v25 }
 0x28a   : > { %3024 = vst.msk [vmem:[#allocation2 + $0xc0] sm:$0xff] %vm1012_vm0, %v5669_v46  ;;  %v5677_v41 = vmax.f32 %v5666_v47, %v1699_v43  ;;  %1968 = vperm.xlu1 %4388, %v5669_v46   ;;  %v1810_v48 = vmul.f32 1.442695, %v6533_v32  ;;  %v6535_v26 = vsub.f32 %v5589_v17, %v5594_v9 }
 0x28b   : > { %v1808_v38 = vmul.f32 1.442695, %v6532_v27 }
 0x28c   : > { %3025 = vst.msk [vmem:[#allocation2 + $0xc8] sm:$0xff] %vm1012_vm0, %v5677_v41  ;;  %1973 = vperm.xlu0 %4387, %v5677_v41  }
 0x28e   : > { %v5705_v44 = vpop.eup %4437 }
 0x28f   : > { %v1702_v24 = vpop.xlane.xlu0 %1701  ;;  %6522 = vst [vmem:[#allocation69_spill] sm:$0xff] %v5705_v44 }
 0x290   : > { %v5691_v43 = vmax.f32 %v5683_v49, %v1702_v24  ;;  %v5710_v6 = vpop.eup %4439 }
 0x291   : > { %v1705_v54 = vpop.xlane.xlu1 %1704  ;;  %v5736_v51 = vpop.eup %4441 }
 0x292   : > { %3026 = vst.msk [vmem:[#allocation2 + $0xd0] sm:$0xff] %vm1012_vm0, %v5691_v43  ;;  %v5699_v45 = vmax.f32 %v5688_v12, %v1705_v54  ;;  %1978 = vperm.xlu1 %4388, %v5691_v43   ;;  %v1792_v54 = vmul.f32 1.442695, %v6524_v59  ;;  %v5744_v18 = vpop.eup %4443  ;;  %v5749_v59 = vld [vmem:[#allocation2 + $0xf8] sm:$0xff] }
 0x293   : > { %v5779_v31 = vpop.eup %4445 }
 0x294   : > { %3027 = vst.msk [vmem:[#allocation2 + $0xd8] sm:$0xff] %vm1012_vm0, %v5699_v45  ;;  %1983 = vperm.xlu0 %4387, %v5699_v45   ;;  %4447 = vpow2.f32 %v1792_v54  ;;  %v6528_v54 = vsub.f32 %v5511_v16, %v5521_v4  ;;  %v6531_v4 = vsub.f32 %v5549_v29, %v5554_v21  ;;  %v6534_v21 = vsub.f32 %v5571_v20, %v5581_v19 }
 0x295   : > { %4449 = vpow2.f32 %v1794_v0  ;;  %v1802_v0 = vmul.f32 1.442695, %v6529_v22  ;;  %v6537_v19 = vsub.f32 %v5609_v11, %v5614_v3 }
 0x296   : > { %2462 = vperm.xlu1 %4388, %v5705_v44   ;;  %v1800_v62 = vmul.f32 1.442695, %v6528_v54  ;;  %v1812_v29 = vmul.f32 1.442695, %v6534_v21  ;;  %v1770_v54 = vsub.f32 %v5629_v5, %v5634_v61  ;;  %v1774_v21 = vsub.f32 %v5661_v53, %v5669_v46 }
 0x297   : > { %v1708_v24 = vpop.xlane.xlu0 %1707  ;;  %v1818_v20 = vmul.f32 1.442695, %v6537_v19  ;;  %v6540_v19 = vld [vmem:[#allocation11_spill] sm:$0xff] }
 0x298   : > { %v5718_v52 = vmax.f32 %v5707_v10, %v1708_v24  ;;  %2457 = vperm.xlu0 %4387, %v5710_v6  }
 0x299   : > { %v1711_v12 = vpop.xlane.xlu1 %1710 }
 0x29a   : > { %3028 = vst.msk [vmem:[#allocation2 + $0xe0] sm:$0xff] %vm1012_vm0, %v5718_v52  ;;  %v5727_v44 = vmax.f32 %v5715_v55, %v1711_v12  ;;  %1988 = vperm.xlu1 %4388, %v5718_v52   ;;  %v1796_v12 = vmul.f32 1.442695, %v6526_v30 }
 0x29c   : > { %3029 = vst.msk [vmem:[#allocation2 + $0xe8] sm:$0xff] %vm1012_vm0, %v5727_v44  ;;  %1993 = vperm.xlu0 %4387, %v5727_v44   ;;  %4451 = vpow2.f32 %v1796_v12  ;;  %v1806_v12 = vmul.f32 1.442695, %v6531_v4 }
 0x29d   : > { %4453 = vpow2.f32 %v1798_v50  ;;  %v1814_v50 = vmul.f32 1.442695, %v6535_v26 }
 0x29e   : > { %2467 = vperm.xlu1 %4388, %v5736_v51   ;;  %4455 = vpow2.f32 %v1800_v62  ;;  %v5788_v25 = vpop.eup %4447 }
 0x29f   : > { %v1714_v24 = vpop.xlane.xlu0 %1713  ;;  %4457 = vpow2.f32 %v1802_v0  ;;  %v5797_v23 = vpop.eup %4449 }
 0x2a0   : > { %v5755_v42 = vmax.f32 %v5741_v28, %v1714_v24  ;;  %2472 = vperm.xlu0 %4387, %v5744_v18   ;;  %4459 = vpow2.f32 %v1804_v58  ;;  %v6536_v24 = vsub.f32 %v5591_v14, %v5601_v13  ;;  %v6538_v14 = vsub.f32 %v5611_v8, %v5621_v7 }
 0x2a1   : > { %v1717_v30 = vpop.xlane.xlu1 %1716  ;;  %4461 = vpow2.f32 %v1806_v12  ;;  %v1772_v58 = vsub.f32 %v5645_v1, %v5650_v63 }
 0x2a2   : > { %3030 = vst.msk [vmem:[#allocation2 + $0xf0] sm:$0xff] %vm1012_vm0, %v5755_v42  ;;  %v5767_v16 = vmax.f32 %v5749_v59, %v1717_v30  ;;  %1998 = vperm.xlu1 %4388, %v5755_v42   ;;  %4463 = vpow2.f32 %v1808_v38  ;;  %v1816_v15 = vmul.f32 1.442695, %v6536_v24  ;;  %v1820_v3 = vmul.f32 1.442695, %v6538_v14  ;;  %v6539_v24 = vld [vmem:[#allocation10_spill] sm:$0xff] }
 0x2a3   : > { %4465 = vpow2.f32 %v1810_v48  ;;  %v1826_v48 = vmul.f32 1.442695, %v1772_v58  ;;  %v6543_v58 = vld [vmem:[#allocation68_spill] sm:$0xff] }
 0x2a4   : > { %3031 = vst.msk [vmem:[#allocation2 + $0xf8] sm:$0xff] %vm1012_vm0, %v5767_v16  ;;  %2003 = vperm.xlu0 %4387, %v5767_v16   ;;  %4467 = vpow2.f32 %v1812_v29 }
 0x2a5   : > { %4469 = vpow2.f32 %v1814_v50 }
 0x2a6   : > { %2477 = vperm.xlu1 %4388, %v5779_v31   ;;  %v5807_v13 = vpop.eup %4451  ;;  %4471 = vpow2.f32 %v1816_v15 }
 0x2a7   : > { %v5813_v61 = vpop.eup %4453  ;;  %4473 = vpow2.f32 %v1818_v20 }
 0x2a8   : > { %2482 = vperm.xlu0 %4387, %v5788_v25   ;;  %v5817_v0 = vpop.eup %4455 }
 0x2a9   : > { %v1849_v62 = vpop.permute.xlu0 %1848  ;;  %v5822_v8 = vpop.eup %4457 }
 0x2aa   : > { %v2006_v9 = vsub.f32 %v5186_v33, %v1849_v62  ;;  %v2007_v17 = vsub.f32 %v5188_v34, %v1849_v62  ;;  %2487 = vperm.xlu1 %4388, %v5797_v23   ;;  %v1822_v33 = vmul.f32 1.442695, %v1770_v54  ;;  %v1771_v34 = vsub.f32 %v5631_v2, %v5639_v60  ;;  %v5824_v36 = vpop.eup %4459 }
 0x2ab   : > { %v5829_v4 = vpop.eup %4461  ;;  %v1830_v54 = vmul.f32 1.442695, %v1774_v21  ;;  %v6545_v21 = vld [vmem:[#allocation15_spill] sm:$0xff] }
 0x2ac   : > { %v2070_v11 = vmul.f32 1.442695, %v2006_v9  ;;  %v2072_v22 = vmul.f32 1.442695, %v2007_v17  ;;  %2492 = vperm.xlu0 %4387, %v5807_v13   ;;  %v5833_v27 = vpop.eup %4463  ;;  %v1776_v17 = vsub.f32 %v5683_v49, %v5691_v43  ;;  %v1777_v49 = vsub.f32 %v6543_v58, %v5699_v45 }
 0x2ad   : > { %v1854_v5 = vpop.permute.xlu1 %1853  ;;  %v5838_v1 = vpop.eup %4465 }
 0x2ae   : > { %4475 = vpow2.f32 %v2070_v11  ;;  %v2008_v30 = vsub.f32 %v5190_v35, %v1854_v5  ;;  %v2009_v7 = vsub.f32 %v5194_v37, %v1854_v5  ;;  %2497 = vperm.xlu1 %4388, %v5813_v61   ;;  %v1824_v35 = vmul.f32 1.442695, %v1771_v34  ;;  %v5840_v63 = vpop.eup %4467  ;;  %v6541_v11 = vld [vmem:[#allocation12_spill] sm:$0xff] }
 0x2af   : > { %4477 = vpow2.f32 %v2072_v22  ;;  %v1773_v37 = vsub.f32 %v5647_v56, %v5655_v57  ;;  %v5845_v29 = vpop.eup %4469 }
 0x2b0   : > { %4479 = vpow2.f32 %v1820_v3  ;;  %v2074_v60 = vmul.f32 1.442695, %v2008_v30  ;;  %v2076_v2 = vmul.f32 1.442695, %v2009_v7  ;;  %2502 = vperm.xlu0 %4387, %v5817_v0   ;;  %v5849_v50 = vpop.eup %4471 }
 0x2b1   : > { %4481 = vpow2.f32 %v1822_v33  ;;  %v1859_v12 = vpop.permute.xlu1 %1858  ;;  %v5854_v46 = vpop.eup %4473  ;;  %v6542_v33 = vld [vmem:[#allocation13_spill] sm:$0xff] }
 0x2b2   : > { %4483 = vpow2.f32 %v2074_v60  ;;  %v2010_v38 = vsub.f32 %v5198_v39, %v1859_v12  ;;  %v2011_v32 = vsub.f32 %v5200_v40, %v1859_v12  ;;  %2507 = vperm.xlu1 %4388, %v5822_v8   ;;  %v1828_v39 = vmul.f32 1.442695, %v1773_v37 }
 0x2b3   : > { %4485 = vpow2.f32 %v2076_v2  ;;  %v1775_v40 = vsub.f32 %v5666_v47, %v5677_v41  ;;  %v1778_v37 = vsub.f32 %v5707_v10, %v5718_v52  ;;  %v1779_v10 = vsub.f32 %v5715_v55, %v5727_v44 }
 0x2b4   : > { %v2078_v56 = vmul.f32 1.442695, %v2010_v38  ;;  %v2080_v57 = vmul.f32 1.442695, %v2011_v32  ;;  %2512 = vperm.xlu0 %4387, %v5824_v36   ;;  %4487 = vpow2.f32 %v1824_v35  ;;  %v1834_v35 = vmul.f32 1.442695, %v1776_v17 }
 0x2b5   : > { %v1864_v26 = vpop.permute.xlu1 %1863  ;;  %v1832_v47 = vmul.f32 1.442695, %v1775_v40  ;;  %v6544_v32 = vld [vmem:[#allocation14_spill] sm:$0xff] }
 0x2b6   : > { %4489 = vpow2.f32 %v2078_v56  ;;  %v2012_v15 = vsub.f32 %v6539_v24, %v1864_v26  ;;  %v2013_v20 = vsub.f32 %v6540_v19, %v1864_v26  ;;  %2517 = vperm.xlu1 %4388, %v5829_v4   ;;  %v1836_v26 = vmul.f32 1.442695, %v1777_v49  ;;  %v6548_v49 = vld [vmem:[#allocation18_spill] sm:$0xff] }
 0x2b7   : > { %4491 = vpow2.f32 %v2080_v57  ;;  %v1838_v19 = vmul.f32 1.442695, %v1778_v37 }
 0x2b8   : > { %v4476_v53 = vpop.eup %4475  ;;  %4493 = vpow2.f32 %v1826_v48  ;;  %v2082_v62 = vmul.f32 1.442695, %v2012_v15  ;;  %v2084_v9 = vmul.f32 1.442695, %v2013_v20  ;;  %2522 = vperm.xlu0 %4387, %v5833_v27   ;;  %v1780_v20 = vsub.f32 %v5741_v28, %v5755_v42 }
 0x2b9   : > { %v4478_v41 = vpop.eup %4477  ;;  %4495 = vpow2.f32 %v1828_v39  ;;  %v1869_v14 = vpop.permute.xlu1 %1868 }
 0x2ba   : > { %v5859_v3 = vpop.eup %4479  ;;  %4497 = vpow2.f32 %v2082_v62  ;;  %v2014_v22 = vsub.f32 %v6541_v11, %v1869_v14  ;;  %v2015_v34 = vsub.f32 %v6542_v33, %v1869_v14  ;;  %2527 = vperm.xlu1 %4388, %v5838_v1   ;;  %v5864_v5 = vadd.f32 %v4478_v41, %v4476_v53  ;;  %v6546_v62 = vld [vmem:[#allocation16_spill] sm:$0xff] }
 0x2bb   : > { %v5866_v30 = vpop.eup %4481  ;;  %4499 = vpow2.f32 %v2084_v9  ;;  %v1840_v14 = vmul.f32 1.442695, %v1779_v10  ;;  %v1781_v33 = vsub.f32 %v5749_v59, %v5767_v16 }
 0x2bc   : > { %v4484_v7 = vpop.eup %4483  ;;  %4501 = vpow2.f32 %v1830_v54  ;;  %v2086_v43 = vmul.f32 1.442695, %v2014_v22  ;;  %v2088_v60 = vmul.f32 1.442695, %v2015_v34  ;;  %2532 = vperm.xlu0 %4387, %v5840_v63   ;;  %v1842_v22 = vmul.f32 1.442695, %v1780_v20 }
 0x2bd   : > { %v4486_v2 = vpop.eup %4485  ;;  %4503 = vpow2.f32 %v1832_v47  ;;  %v1874_v12 = vpop.permute.xlu1 %1873  ;;  %v2647_v38 = vpack.c.bf16 %v4484_v7, %v4476_v53 }
 0x2be   : > { %4505 = vpow2.f32 %v2086_v43  ;;  %v2016_v48 = vsub.f32 %v6544_v32, %v1874_v12  ;;  %v2017_v56 = vsub.f32 %v6545_v21, %v1874_v12  ;;  %2537 = vperm.xlu1 %4388, %v5845_v29   ;;  %v2648_v45 = vpack.c.bf16 %v4486_v2, %v4478_v41  ;;  %v5876_v57 = vpop.eup %4487  ;;  %v6547_v41 = vld [vmem:[#allocation17_spill] sm:$0xff] }
 0x2bf   : > { %4507 = vpow2.f32 %v2088_v60  ;;  %v5878_v39 = vadd.f32 %v4486_v2, %v4484_v7  ;;  %v6549_v60 = vld [vmem:[#allocation19_spill] sm:$0xff] }
 0x2c0   : > { %v4490_v40 = vpop.eup %4489  ;;  %v2090_v52 = vmul.f32 1.442695, %v2016_v48  ;;  %v2092_v24 = vmul.f32 1.442695, %v2017_v56  ;;  %2807 = vmatprep.mubr.bf16.mxu1 %v2648_v45  ;;  %2542 = vperm.xlu0 %4387, %v5849_v50   ;;  %4509 = vpow2.f32 %v1834_v35  ;;  %v1844_v48 = vmul.f32 1.442695, %v1781_v33 }
 0x2c1   : > { %v4492_v15 = vpop.eup %4491  ;;  %2808 = vmatmul.mubr.bf16.vlgmr.msra.gmra.mrb[0].mxu1 %v2647_v38  ;;  %v1879_v53 = vpop.permute.xlu1 %1878  ;;  %v6550_v56 = vld [vmem:[#allocation20_spill] sm:$0xff] }
 0x2c2   : > { %v5885_v54 = vpop.eup %4493  ;;  %4511 = vpow2.f32 %v2090_v52  ;;  %v2018_v9 = vsub.f32 %v6546_v62, %v1879_v53  ;;  %v2019_v44 = vsub.f32 %v6547_v41, %v1879_v53  ;;  %2547 = vperm.xlu1 %4388, %v5854_v46   ;;  %v5890_v55 = vadd.f32 %v4492_v15, %v4490_v40  ;;  %v6552_v53 = vld [vmem:[#allocation22_spill] sm:$0xff] }
 0x2c3   : > { %v5892_v47 = vpop.eup %4495  ;;  %4513 = vpow2.f32 %v2092_v24 }
 0x2c4   : > { %v4498_v17 = vpop.eup %4497  ;;  %4515 = vpow2.f32 %v1836_v26  ;;  %v2094_v28 = vmul.f32 1.442695, %v2018_v9  ;;  %v2096_v42 = vmul.f32 1.442695, %v2019_v44  ;;  %2552 = vperm.xlu0 %4387, %v5859_v3   ;;  %v6553_v9 = vld [vmem:[#allocation23_spill] sm:$0xff] }
 0x2c5   : > { %v4500_v11 = vpop.eup %4499  ;;  %4517 = vpow2.f32 %v1838_v19  ;;  %v1884_v34 = vpop.permute.xlu1 %1883  ;;  %v2649_v7 = vpack.c.bf16 %v4498_v17, %v4490_v40  ;;  %v6551_v40 = vld [vmem:[#allocation21_spill] sm:$0xff] }
 0x2c6   : > { %v5897_v58 = vpop.eup %4501  ;;  %4519 = vpow2.f32 %v2094_v28  ;;  %v2020_v43 = vsub.f32 %v6548_v49, %v1884_v34  ;;  %v2021_v2 = vsub.f32 %v6549_v60, %v1884_v34  ;;  %2557 = vperm.xlu1 %4388, %v5866_v30   ;;  %v2650_v35 = vpack.c.bf16 %v4500_v11, %v4492_v15  ;;  %v6556_v60 = vld [vmem:[#allocation24_spill] sm:$0xff] }
 0x2c7   : > { %v5902_v37 = vpop.eup %4503  ;;  %4521 = vpow2.f32 %v2096_v42  ;;  %v5904_v12 = vadd.f32 %v4500_v11, %v4498_v17 }
 0x2c8   : > { %v4506_v38 = vpop.eup %4505  ;;  %4523 = vpow2.f32 %v1840_v14  ;;  %v2098_v59 = vmul.f32 1.442695, %v2020_v43  ;;  %v2100_v16 = vmul.f32 1.442695, %v2021_v2  ;;  %2815 = vmatprep.mubr.bf16.mxu1 %v2650_v35  ;;  %2562 = vperm.xlu0 %4387, %v5876_v57   ;;  %v6557_v35 = vld [vmem:[#allocation25_spill] sm:$0xff] }
 0x2c9   : > { %v4508_v32 = vpop.eup %4507  ;;  %4525 = vpow2.f32 %v1842_v22  ;;  %2816 = vmatmul.mubr.bf16.gmra.mrb[4].mxu1 %v2649_v7  ;;  %v1889_v21 = vpop.permute.xlu1 %1888 }
 0x2ca   : > { %4527 = vpow2.f32 %v2098_v59  ;;  %v2022_v45 = vsub.f32 %v6550_v56, %v1889_v21  ;;  %v2023_v26 = vsub.f32 %v6551_v40, %v1889_v21  ;;  %2567 = vperm.xlu1 %4388, %v5885_v54   ;;  %v5910_v10 = vadd.f32 %v4508_v32, %v4506_v38  ;;  %v5912_v52 = vpop.eup %4509 }
 0x2cb   : > { %4529 = vpow2.f32 %v2100_v16  ;;  %v1894_v24 = vpop.permute.xlu0 %1893 }
 0x2cc   : > { %v4512_v15 = vpop.eup %4511  ;;  %v2102_v19 = vmul.f32 1.442695, %v2022_v45  ;;  %v2104_v20 = vmul.f32 1.442695, %v2023_v26  ;;  %v2024_v62 = vsub.f32 %v6552_v53, %v1894_v24  ;;  %v2025_v41 = vsub.f32 %v6553_v9, %v1894_v24  ;;  %2572 = vperm.xlu0 %4387, %v5892_v47   ;;  %v6559_v45 = vld [vmem:[#allocation26_spill] sm:$0xff]  ;;  %v6560_v26 = vld [vmem:[#allocation27_spill] sm:$0xff] }
 0x2cd   : > { %v4514_v44 = vpop.eup %4513  ;;  %4531 = vpow2.f32 %v1844_v48  ;;  %v2651_v17 = vpack.c.bf16 %v4512_v15, %v4506_v38 }
 0x2ce   : > { %v5917_v14 = vpop.eup %4515  ;;  %4533 = vpow2.f32 %v2102_v19  ;;  %v2106_v28 = vmul.f32 1.442695, %v2024_v62  ;;  %v2108_v42 = vmul.f32 1.442695, %v2025_v41  ;;  %2577 = vperm.xlu1 %4388, %v5897_v58   ;;  %v2652_v11 = vpack.c.bf16 %v4514_v44, %v4508_v32 }
 0x2cf   : > { %v5920_v22 = vpop.eup %4517  ;;  %4535 = vpow2.f32 %v2104_v20  ;;  %v5922_v33 = vadd.f32 %v4514_v44, %v4512_v15 }
 0x2d0   : > { %6554 = vst [vmem:[#allocation10_spill] sm:$0xff] %v5920_v22  ;;  %v4520_v34 = vpop.eup %4519  ;;  %4537 = vpow2.f32 %v2106_v28  ;;  %2823 = vmatprep.mubr.bf16.mxu1 %v2652_v11  ;;  %2582 = vperm.xlu0 %4387, %v5902_v37   ;;  %v6562_v11 = vld [vmem:[#allocation28_spill] sm:$0xff] }
 0x2d1   : > { %v4522_v7 = vpop.eup %4521  ;;  %4539 = vpow2.f32 %v2108_v42  ;;  %2824 = vmatmul.mubr.bf16.gmra.mrb[8].mxu1 %v2651_v17  ;;  %v1899_v49 = vpop.permute.xlu1 %1898 }
 0x2d2   : > { %v5925_v43 = vpop.eup %4523  ;;  %v2026_v2 = vsub.f32 %v6556_v60, %v1899_v49  ;;  %v2027_v38 = vsub.f32 %v6557_v35, %v1899_v49  ;;  %2587 = vperm.xlu1 %4388, %v5912_v52   ;;  %v5930_v59 = vadd.f32 %v4522_v7, %v4520_v34  ;;  %v6563_v49 = vld [vmem:[#allocation29_spill] sm:$0xff] }
 0x2d3   : > { %6555 = vst [vmem:[#allocation11_spill] sm:$0xff] %v5925_v43  ;;  %v5932_v16 = vpop.eup %4525  ;;  %v1904_v32 = vpop.permute.xlu0 %1903 }
 0x2d4   : > { %6558 = vst [vmem:[#allocation12_spill] sm:$0xff] %v5932_v16  ;;  %v4528_v48 = vpop.eup %4527  ;;  %v2110_v21 = vmul.f32 1.442695, %v2026_v2  ;;  %v2112_v56 = vmul.f32 1.442695, %v2027_v38  ;;  %v2028_v40 = vsub.f32 %v6559_v45, %v1904_v32  ;;  %v2029_v24 = vsub.f32 %v6560_v26, %v1904_v32  ;;  %2592 = vperm.xlu0 %4387, %v5917_v14   ;;  %v6565_v45 = vld [vmem:[#allocation31_spill] sm:$0xff] }
 0x2d5   : > { %v4530_v15 = vpop.eup %4529  ;;  %v2653_v19 = vpack.c.bf16 %v4528_v48, %v4520_v34 }
 0x2d6   : > { %4541 = vpow2.f32 %v2110_v21  ;;  %v2114_v20 = vmul.f32 1.442695, %v2028_v40  ;;  %v2116_v53 = vmul.f32 1.442695, %v2029_v24  ;;  %2597 = vperm.xlu1 %4388, %v5920_v22   ;;  %v2654_v62 = vpack.c.bf16 %v4530_v15, %v4522_v7  ;;  %v6564_v21 = vld [vmem:[#allocation30_spill] sm:$0xff] }
 0x2d7   : > { %v5938_v9 = vpop.eup %4531  ;;  %4543 = vpow2.f32 %v2112_v56  ;;  %v5940_v41 = vadd.f32 %v4530_v15, %v4528_v48 }
 0x2d8   : > { %6561 = vst [vmem:[#allocation13_spill] sm:$0xff] %v5938_v9  ;;  %v4534_v44 = vpop.eup %4533  ;;  %4545 = vpow2.f32 %v2114_v20  ;;  %2831 = vmatprep.mubr.bf16.mxu1 %v2654_v62  ;;  %2602 = vperm.xlu0 %4387, %v5925_v43  }
 0x2d9   : > { %v4536_v17 = vpop.eup %4535  ;;  %4547 = vpow2.f32 %v2116_v53  ;;  %2832 = vmatmul.mubr.bf16.gmra.mrb[12].mxu1 %v2653_v19  ;;  %v1909_v28 = vpop.permute.xlu1 %1908 }
 0x2da   : > { %v4538_v42 = vpop.eup %4537  ;;  %v2030_v34 = vsub.f32 %v6562_v11, %v1909_v28  ;;  %v2031_v60 = vsub.f32 %v6563_v49, %v1909_v28  ;;  %2607 = vperm.xlu1 %4388, %v5932_v16   ;;  %v5946_v7 = vadd.f32 %v4536_v17, %v4534_v44  ;;  %v6566_v28 = vld [vmem:[#allocation32_spill] sm:$0xff] }
 0x2db   : > { %v4540_v2 = vpop.eup %4539  ;;  %v1914_v35 = vpop.permute.xlu0 %1913  ;;  %v2655_v38 = vpack.c.bf16 %v4538_v42, %v4534_v44 }
 0x2dc   : > { %v2118_v32 = vmul.f32 1.442695, %v2030_v34  ;;  %v2120_v48 = vmul.f32 1.442695, %v2031_v60  ;;  %v2032_v56 = vsub.f32 %v6564_v21, %v1914_v35  ;;  %v2033_v40 = vsub.f32 %v6565_v45, %v1914_v35  ;;  %2612 = vperm.xlu0 %4387, %v5938_v9   ;;  %v6567_v34 = vld [vmem:[#allocation33_spill] sm:$0xff] }
 0x2dd   : > { %v2656_v26 = vpack.c.bf16 %v4540_v2, %v4536_v17  ;;  %v5951_v24 = vadd.f32 %v4540_v2, %v4538_v42 }
 0x2de   : > { %4549 = vpow2.f32 %v2118_v32  ;;  %v2122_v15 = vmul.f32 1.442695, %v2032_v56  ;;  %v2124_v19 = vmul.f32 1.442695, %v2033_v40  ;;  %v6569_v56 = vld [vmem:[#allocation35_spill] sm:$0xff] }
 0x2df   : > { %4551 = vpow2.f32 %v2120_v48  ;;  %2839 = vmatprep.mubr.bf16.mxu1 %v2656_v26  ;;  %v6568_v48 = vld [vmem:[#allocation34_spill] sm:$0xff] }
 0x2e0   : > { %v4542_v20 = vpop.eup %4541  ;;  %4553 = vpow2.f32 %v2122_v15 }
 0x2e1   : > { %v4544_v53 = vpop.eup %4543  ;;  %4555 = vpow2.f32 %v2124_v19  ;;  %2840 = vmatmul.mubr.bf16.gmra.mrb[16].mxu1 %v2655_v38  ;;  %v1919_v62 = vpop.permute.xlu1 %1918 }
 0x2e2   : > { %v4546_v44 = vpop.eup %4545  ;;  %v2034_v11 = vsub.f32 %v6566_v28, %v1919_v62  ;;  %v2035_v49 = vsub.f32 %v6567_v34, %v1919_v62  ;;  %v5955_v60 = vadd.f32 %v4544_v53, %v4542_v20 }
 0x2e3   : > { %v4548_v17 = vpop.eup %4547  ;;  %v1924_v42 = vpop.permute.xlu0 %1923  ;;  %v2657_v2 = vpack.c.bf16 %v4546_v44, %v4542_v20 }
 0x2e4   : > { %v2126_v35 = vmul.f32 1.442695, %v2034_v11  ;;  %v2128_v32 = vmul.f32 1.442695, %v2035_v49  ;;  %v2036_v21 = vsub.f32 %v6568_v48, %v1924_v42  ;;  %v2037_v45 = vsub.f32 %v6569_v56, %v1924_v42  ;;  %v6570_v11 = vld [vmem:[#allocation36_spill] sm:$0xff]  ;;  %v6571_v49 = vld [vmem:[#allocation37_spill] sm:$0xff] }
 0x2e5   : > { %v2658_v40 = vpack.c.bf16 %v4548_v17, %v4544_v53  ;;  %v5959_v26 = vadd.f32 %v4548_v17, %v4546_v44 }
 0x2e6   : > { %4557 = vpow2.f32 %v2126_v35  ;;  %v2130_v38 = vmul.f32 1.442695, %v2036_v21  ;;  %v2132_v15 = vmul.f32 1.442695, %v2037_v45  ;;  %v6573_v45 = vld [vmem:[#allocation39_spill] sm:$0xff] }
 0x2e7   : > { %4559 = vpow2.f32 %v2128_v32  ;;  %2847 = vmatprep.mubr.bf16.mxu1 %v2658_v40  ;;  %v6572_v32 = vld [vmem:[#allocation38_spill] sm:$0xff] }
 0x2e8   : > { %v4550_v19 = vpop.eup %4549  ;;  %4561 = vpow2.f32 %v2130_v38 }
 0x2e9   : > { %v4552_v62 = vpop.eup %4551  ;;  %4563 = vpow2.f32 %v2132_v15  ;;  %2848 = vmatmul.mubr.bf16.gmra.mrb[20].mxu1 %v2657_v2  ;;  %v1929_v20 = vpop.permute.xlu1 %1928 }
 0x2ea   : > { %v4554_v28 = vpop.eup %4553  ;;  %v2038_v34 = vsub.f32 %v6570_v11, %v1929_v20  ;;  %v2039_v48 = vsub.f32 %v6571_v49, %v1929_v20  ;;  %v5963_v42 = vadd.f32 %v4552_v62, %v4550_v19  ;;  %v6574_v49 = vld [vmem:[#allocation40_spill] sm:$0xff] }
 0x2eb   : > { %v4556_v53 = vpop.eup %4555  ;;  %v1934_v44 = vpop.permute.xlu0 %1933  ;;  %v2659_v17 = vpack.c.bf16 %v4554_v28, %v4550_v19 }
 0x2ec   : > { %v2134_v35 = vmul.f32 1.442695, %v2038_v34  ;;  %v2136_v21 = vmul.f32 1.442695, %v2039_v48  ;;  %v2040_v56 = vsub.f32 %v6572_v32, %v1934_v44  ;;  %v2041_v40 = vsub.f32 %v6573_v45, %v1934_v44  ;;  %v6575_v32 = vld [vmem:[#allocation41_spill] sm:$0xff] }
 0x2ed   : > { %v2660_v38 = vpack.c.bf16 %v4556_v53, %v4552_v62  ;;  %v5967_v15 = vadd.f32 %v4556_v53, %v4554_v28 }
 0x2ee   : > { %4565 = vpow2.f32 %v2134_v35  ;;  %v2138_v2 = vmul.f32 1.442695, %v2040_v56  ;;  %v2140_v9 = vmul.f32 1.442695, %v2041_v40  ;;  %v6577_v40 = vld [vmem:[#allocation43_spill] sm:$0xff] }
 0x2ef   : > { %4567 = vpow2.f32 %v2136_v21  ;;  %2855 = vmatprep.mubr.bf16.mxu1 %v2660_v38  ;;  %v6576_v21 = vld [vmem:[#allocation42_spill] sm:$0xff] }
 0x2f0   : > { %v4558_v20 = vpop.eup %4557  ;;  %4569 = vpow2.f32 %v2138_v2 }
 0x2f1   : > { %v4560_v11 = vpop.eup %4559  ;;  %4571 = vpow2.f32 %v2140_v9  ;;  %2856 = vmatmul.mubr.bf16.gmra.mrb[24].mxu1 %v2659_v17  ;;  %v1939_v19 = vpop.permute.xlu1 %1938 }
 0x2f2   : > { %v4562_v34 = vpop.eup %4561  ;;  %v2042_v48 = vsub.f32 %v6574_v49, %v1939_v19  ;;  %v2043_v16 = vsub.f32 %v6575_v32, %v1939_v19  ;;  %v5971_v44 = vadd.f32 %v4560_v11, %v4558_v20 }
 0x2f3   : > { %v4564_v62 = vpop.eup %4563  ;;  %v1944_v28 = vpop.permute.xlu0 %1943  ;;  %v2661_v53 = vpack.c.bf16 %v4562_v34, %v4558_v20 }
 0x2f4   : > { %v2142_v35 = vmul.f32 1.442695, %v2042_v48  ;;  %v2144_v56 = vmul.f32 1.442695, %v2043_v16  ;;  %v2044_v45 = vsub.f32 %v6576_v21, %v1944_v28  ;;  %v2045_v38 = vsub.f32 %v6577_v40, %v1944_v28  ;;  %v6578_v16 = vld [vmem:[#allocation44_spill] sm:$0xff]  ;;  %v6579_v21 = vld [vmem:[#allocation45_spill] sm:$0xff] }
 0x2f5   : > { %v2662_v2 = vpack.c.bf16 %v4564_v62, %v4560_v11  ;;  %v5975_v9 = vadd.f32 %v4564_v62, %v4562_v34 }
 0x2f6   : > { %4573 = vpow2.f32 %v2142_v35  ;;  %v2146_v17 = vmul.f32 1.442695, %v2044_v45  ;;  %v2148_v43 = vmul.f32 1.442695, %v2045_v38  ;;  %v6580_v45 = vld [vmem:[#allocation46_spill] sm:$0xff]  ;;  %v6581_v38 = vld [vmem:[#allocation47_spill] sm:$0xff] }
 0x2f7   : > { %4575 = vpow2.f32 %v2144_v56  ;;  %2863 = vmatprep.mubr.bf16.mxu1 %v2662_v2 }
 0x2f8   : > { %v4566_v19 = vpop.eup %4565  ;;  %4577 = vpow2.f32 %v2146_v17 }
 0x2f9   : > { %v4568_v49 = vpop.eup %4567  ;;  %4579 = vpow2.f32 %v2148_v43  ;;  %2864 = vmatmul.mubr.bf16.gmra.mrb[28].mxu1 %v2661_v53  ;;  %v1949_v20 = vpop.permute.xlu1 %1948 }
 0x2fa   : > { %v4570_v48 = vpop.eup %4569  ;;  %v2046_v32 = vsub.f32 %v6578_v16, %v1949_v20  ;;  %v2047_v22 = vsub.f32 %v6579_v21, %v1949_v20  ;;  %v5979_v28 = vadd.f32 %v4568_v49, %v4566_v19 }
 0x2fb   : > { %v4572_v11 = vpop.eup %4571  ;;  %v1954_v34 = vpop.permute.xlu0 %1953  ;;  %2266 = vadd.xlane.f32.xlu0 %v5878_v39  ;;  %v2663_v62 = vpack.c.bf16 %v4570_v48, %v4566_v19 }
 0x2fc   : > { %v2150_v35 = vmul.f32 1.442695, %v2046_v32  ;;  %v2152_v56 = vmul.f32 1.442695, %v2047_v22  ;;  %v2048_v40 = vsub.f32 %v6580_v45, %v1954_v34  ;;  %v2049_v43 = vsub.f32 %v6581_v38, %v1954_v34  ;;  %v6582_v32 = vld [vmem:[#allocation48_spill] sm:$0xff]  ;;  %v6584_v45 = vld [vmem:[#allocation50_spill] sm:$0xff] }
 0x2fd   : > { %v2664_v53 = vpack.c.bf16 %v4572_v11, %v4568_v49  ;;  %v5984_v2 = vadd.f32 %v4572_v11, %v4570_v48  ;;  %v6583_v48 = vld [vmem:[#allocation49_spill] sm:$0xff] }
 0x2fe   : > { %4581 = vpow2.f32 %v2150_v35  ;;  %v2154_v17 = vmul.f32 1.442695, %v2048_v40  ;;  %v2156_v16 = vmul.f32 1.442695, %v2049_v43  ;;  %2263 = vadd.xlane.f32.xlu1 %v5864_v5 }
 0x2ff   : > { %4583 = vpow2.f32 %v2152_v56  ;;  %2871 = vmatprep.mubr.bf16.mxu1 %v2664_v53  ;;  %2269 = vadd.xlane.f32.xlu0 %v5890_v55 }
 0x300   : > { %v4574_v39 = vpop.eup %4573  ;;  %4585 = vpow2.f32 %v2154_v17 }
 0x301   : > { %v4576_v19 = vpop.eup %4575  ;;  %4587 = vpow2.f32 %v2156_v16  ;;  %2872 = vmatmul.mubr.bf16.gmra.mrb[32].mxu1 %v2663_v62  ;;  %v1959_v22 = vpop.permute.xlu1 %1958  ;;  %v6585_v62 = vld [vmem:[#allocation51_spill] sm:$0xff] }
 0x302   : > { %v4578_v20 = vpop.eup %4577  ;;  %v2050_v49 = vsub.f32 %v6582_v32, %v1959_v22  ;;  %v2051_v21 = vsub.f32 %v6583_v48, %v1959_v22  ;;  %2272 = vadd.xlane.f32.xlu1 %v5904_v12  ;;  %v5991_v11 = vadd.f32 %v4576_v19, %v4574_v39  ;;  %v6586_v32 = vld [vmem:[#allocation52_spill] sm:$0xff] }
 0x303   : > { %v4580_v5 = vpop.eup %4579  ;;  %v1964_v34 = vpop.permute.xlu0 %1963  ;;  %2275 = vadd.xlane.f32.xlu0 %v5910_v10  ;;  %v2665_v55 = vpack.c.bf16 %v4578_v20, %v4574_v39 }
 0x304   : > { %v2158_v35 = vmul.f32 1.442695, %v2050_v49  ;;  %v2160_v56 = vmul.f32 1.442695, %v2051_v21  ;;  %v2052_v40 = vsub.f32 %v6584_v45, %v1964_v34  ;;  %v2053_v38 = vsub.f32 %v6585_v62, %v1964_v34 }
 0x305   : > { %v2666_v43 = vpack.c.bf16 %v4580_v5, %v4576_v19  ;;  %v5996_v53 = vadd.f32 %v4580_v5, %v4578_v20  ;;  %v6587_v20 = vld [vmem:[#allocation53_spill] sm:$0xff] }
 0x306   : > { %4589 = vpow2.f32 %v2158_v35  ;;  %v2162_v17 = vmul.f32 1.442695, %v2052_v40  ;;  %v2164_v16 = vmul.f32 1.442695, %v2053_v38  ;;  %2278 = vadd.xlane.f32.xlu1 %v5922_v33  ;;  %v6588_v35 = vld [vmem:[#allocation54_spill] sm:$0xff] }
 0x307   : > { %4591 = vpow2.f32 %v2160_v56  ;;  %2879 = vmatprep.mubr.bf16.mxu1 %v2666_v43  ;;  %2281 = vadd.xlane.f32.xlu0 %v5930_v59 }
 0x308   : > { %v4582_v12 = vpop.eup %4581  ;;  %4593 = vpow2.f32 %v2162_v17 }
 0x309   : > { %v4584_v10 = vpop.eup %4583  ;;  %4595 = vpow2.f32 %v2164_v16  ;;  %2880 = vmatmul.mubr.bf16.gmra.mrb[36].mxu1 %v2665_v55  ;;  %v1969_v39 = vpop.permute.xlu1 %1968  ;;  %v6589_v55 = vld [vmem:[#allocation55_spill] sm:$0xff] }
 0x30a   : > { %v4586_v22 = vpop.eup %4585  ;;  %v2054_v19 = vsub.f32 %v6586_v32, %v1969_v39  ;;  %v2055_v49 = vsub.f32 %v6587_v20, %v1969_v39  ;;  %2284 = vadd.xlane.f32.xlu1 %v5940_v41  ;;  %v6003_v48 = vadd.f32 %v4584_v10, %v4582_v12  ;;  %v6591_v39 = vld [vmem:[#allocation57_spill] sm:$0xff] }
 0x30b   : > { %v4588_v33 = vpop.eup %4587  ;;  %v1974_v21 = vpop.permute.xlu0 %1973  ;;  %2287 = vadd.xlane.f32.xlu0 %v5946_v7  ;;  %v2667_v59 = vpack.c.bf16 %v4586_v22, %v4582_v12  ;;  %v6590_v12 = vld [vmem:[#allocation56_spill] sm:$0xff] }
 0x30c   : > { %v2166_v5 = vmul.f32 1.442695, %v2054_v19  ;;  %v2168_v34 = vmul.f32 1.442695, %v2055_v49  ;;  %v2056_v56 = vsub.f32 %v6588_v35, %v1974_v21  ;;  %v2057_v45 = vsub.f32 %v6589_v55, %v1974_v21 }
 0x30d   : > { %v2668_v40 = vpack.c.bf16 %v4588_v33, %v4584_v10  ;;  %v6008_v62 = vadd.f32 %v4588_v33, %v4586_v22  ;;  %v6592_v33 = vld [vmem:[#allocation58_spill] sm:$0xff] }
 0x30e   : > { %4597 = vpow2.f32 %v2166_v5  ;;  %v2170_v38 = vmul.f32 1.442695, %v2056_v56  ;;  %v2172_v43 = vmul.f32 1.442695, %v2057_v45  ;;  %2290 = vadd.xlane.f32.xlu1 %v5951_v24 }
 0x30f   : > { %4599 = vpow2.f32 %v2168_v34  ;;  %2887 = vmatprep.mubr.bf16.mxu1 %v2668_v40  ;;  %2293 = vadd.xlane.f32.xlu0 %v5955_v60 }
 0x310   : > { %v4590_v41 = vpop.eup %4589  ;;  %4601 = vpow2.f32 %v2170_v38 }
 0x311   : > { %v4592_v7 = vpop.eup %4591  ;;  %4603 = vpow2.f32 %v2172_v43  ;;  %2888 = vmatmul.mubr.bf16.gmra.mrb[40].mxu1 %v2667_v59  ;;  %v1979_v17 = vpop.permute.xlu1 %1978  ;;  %v6593_v59 = vld [vmem:[#allocation59_spill] sm:$0xff] }
 0x312   : > { %v4594_v16 = vpop.eup %4593  ;;  %v2058_v10 = vsub.f32 %v6590_v12, %v1979_v17  ;;  %v2059_v22 = vsub.f32 %v6591_v39, %v1979_v17  ;;  %2296 = vadd.xlane.f32.xlu1 %v5959_v26  ;;  %v6015_v32 = vadd.f32 %v4592_v7, %v4590_v41  ;;  %v6597_v17 = vld [vmem:[#allocation61_spill] sm:$0xff] }
 0x313   : > { %v4596_v24 = vpop.eup %4595  ;;  %v1984_v19 = vpop.permute.xlu0 %1983  ;;  %2299 = vadd.xlane.f32.xlu0 %v5963_v42  ;;  %v2669_v60 = vpack.c.bf16 %v4594_v16, %v4590_v41  ;;  %v6596_v41 = vld [vmem:[#allocation60_spill] sm:$0xff] }
 0x314   : > { %v2174_v20 = vmul.f32 1.442695, %v2058_v10  ;;  %v2176_v49 = vmul.f32 1.442695, %v2059_v22  ;;  %v2060_v21 = vsub.f32 %v6592_v33, %v1984_v19  ;;  %v2061_v5 = vsub.f32 %v6593_v59, %v1984_v19 }
 0x315   : > { %v2670_v34 = vpack.c.bf16 %v4596_v24, %v4592_v7  ;;  %v6020_v35 = vpop.permute.xlu1 %2462  ;;  %v6022_v56 = vadd.f32 %v4596_v24, %v4594_v16  ;;  %v6598_v24 = vld [vmem:[#allocation62_spill] sm:$0xff] }
 0x316   : > { %6594 = vst [vmem:[#allocation68_spill] sm:$0xff] %v6020_v35  ;;  %4605 = vpow2.f32 %v2174_v20  ;;  %v2178_v26 = vmul.f32 1.442695, %v2060_v21  ;;  %v2180_v55 = vmul.f32 1.442695, %v2061_v5  ;;  %2302 = vadd.xlane.f32.xlu1 %v5967_v15  ;;  %v6599_v20 = vld [vmem:[#allocation63_spill] sm:$0xff] }
 0x317   : > { %4607 = vpow2.f32 %v2176_v49  ;;  %2895 = vmatprep.mubr.bf16.mxu1 %v2670_v34  ;;  %v6025_v42 = vpop.permute.xlu0 %2457  ;;  %2305 = vadd.xlane.f32.xlu0 %v5971_v44 }
 0x318   : > { %6595 = vst [vmem:[#allocation14_spill] sm:$0xff] %v6025_v42  ;;  %v4598_v45 = vpop.eup %4597  ;;  %4609 = vpow2.f32 %v2178_v26  ;;  %v2200_v42 = vld [vmem:[#allocation3 + $0x10] sm:$0xff] }
 0x319   : > { %v4600_v40 = vpop.eup %4599  ;;  %4611 = vpow2.f32 %v2180_v55  ;;  %2896 = vmatmul.mubr.bf16.gmra.mrb[44].mxu1 %v2669_v60  ;;  %v1989_v38 = vpop.permute.xlu1 %1988 }
 0x31a   : > { %v4602_v43 = vpop.eup %4601  ;;  %v2062_v7 = vsub.f32 %v6596_v41, %v1989_v38  ;;  %v2063_v16 = vsub.f32 %v6597_v17, %v1989_v38  ;;  %2308 = vadd.xlane.f32.xlu1 %v5975_v9  ;;  %v2334_v15 = vadd.f32 %v4600_v40, %v4598_v45  ;;  %v6601_v38 = vld [vmem:[#allocation65_spill] sm:$0xff] }
 0x31b   : > { %v4604_v12 = vpop.eup %4603  ;;  %v1994_v10 = vpop.permute.xlu0 %1993  ;;  %2311 = vadd.xlane.f32.xlu0 %v5979_v28  ;;  %v2671_v39 = vpack.c.bf16 %v4602_v43, %v4598_v45  ;;  %v6600_v45 = vld [vmem:[#allocation64_spill] sm:$0xff] }
 0x31c   : > { %v2182_v44 = vmul.f32 1.442695, %v2062_v7  ;;  %v2184_v22 = vmul.f32 1.442695, %v2063_v16  ;;  %v2064_v19 = vsub.f32 %v6598_v24, %v1994_v10  ;;  %v2065_v60 = vsub.f32 %v6599_v20, %v1994_v10 }
 0x31d   : > { %v2672_v49 = vpack.c.bf16 %v4604_v12, %v4600_v40  ;;  %v6034_v33 = vpop.permute.xlu1 %2467  ;;  %v2337_v21 = vadd.f32 %v4604_v12, %v4602_v43  ;;  %v6602_v12 = vld [vmem:[#allocation66_spill] sm:$0xff] }
 0x31e   : > { %4613 = vpow2.f32 %v2182_v44  ;;  %v2186_v59 = vmul.f32 1.442695, %v2064_v19  ;;  %v2188_v5 = vmul.f32 1.442695, %v2065_v60  ;;  %2314 = vadd.xlane.f32.xlu1 %v5984_v2  ;;  %v6603_v44 = vld [vmem:[#allocation67_spill] sm:$0xff] }
 0x31f   : > { %4615 = vpow2.f32 %v2184_v22  ;;  %2903 = vmatprep.mubr.bf16.mxu1 %v2672_v49  ;;  %v6037_v9 = vpop.permute.xlu0 %2472  ;;  %2317 = vadd.xlane.f32.xlu0 %v5991_v11 }
 0x320   : > { %v4606_v28 = vpop.eup %4605  ;;  %4617 = vpow2.f32 %v2186_v59 }
 0x321   : > { %v4608_v34 = vpop.eup %4607  ;;  %4619 = vpow2.f32 %v2188_v5  ;;  %2904 = vmatmul.mubr.bf16.gmra.mrb[48].mxu1 %v2671_v39  ;;  %v1999_v26 = vpop.permute.xlu1 %1998 }
 0x322   : > { %v4610_v55 = vpop.eup %4609  ;;  %v2066_v40 = vsub.f32 %v6600_v45, %v1999_v26  ;;  %v2067_v43 = vsub.f32 %v6601_v38, %v1999_v26  ;;  %2320 = vadd.xlane.f32.xlu1 %v5996_v53  ;;  %v2340_v2 = vadd.f32 %v4608_v34, %v4606_v28 }
 0x323   : > { %v4612_v41 = vpop.eup %4611  ;;  %v2004_v7 = vpop.permute.xlu0 %2003  ;;  %2323 = vadd.xlane.f32.xlu0 %v6003_v48  ;;  %v2673_v17 = vpack.c.bf16 %v4610_v55, %v4606_v28 }
 0x324   : > { %v2190_v11 = vmul.f32 1.442695, %v2066_v40  ;;  %v2192_v16 = vmul.f32 1.442695, %v2067_v43  ;;  %v2068_v10 = vsub.f32 %v6602_v12, %v2004_v7  ;;  %v2069_v39 = vsub.f32 %v6603_v44, %v2004_v7 }
 0x325   : > { %v2674_v22 = vpack.c.bf16 %v4612_v41, %v4608_v34  ;;  %v2343_v24 = vadd.f32 %v4612_v41, %v4610_v55 }
 0x326   : > { %4621 = vpow2.f32 %v2190_v11  ;;  %v2194_v19 = vmul.f32 1.442695, %v2068_v10  ;;  %v2196_v20 = vmul.f32 1.442695, %v2069_v39  ;;  %2326 = vadd.xlane.f32.xlu1 %v6008_v62 }
 0x327   : > { %4623 = vpow2.f32 %v2192_v16  ;;  %2911 = vmatprep.mubr.bf16.mxu1 %v2674_v22  ;;  %2329 = vadd.xlane.f32.xlu0 %v6015_v32  ;;  %v6049_v43 = vpop.permute.xlu0 %2482 }
 0x328   : > { %v4614_v53 = vpop.eup %4613  ;;  %4625 = vpow2.f32 %v2194_v19 }
 0x329   : > { %v4616_v48 = vpop.eup %4615  ;;  %4627 = vpow2.f32 %v2196_v20  ;;  %2912 = vmatmul.mubr.bf16.gmra.mrb[52].mxu1 %v2673_v17 }
 0x32a   : > { %v4618_v60 = vpop.eup %4617  ;;  %2332 = vadd.xlane.f32.xlu1 %v6022_v56  ;;  %v2346_v49 = vadd.f32 %v4616_v48, %v4614_v53 }
 0x32b   : > { %v4620_v59 = vpop.eup %4619  ;;  %2335 = vadd.xlane.f32.xlu0 %v2334_v15  ;;  %v2675_v5 = vpack.c.bf16 %v4618_v60, %v4614_v53  ;;  %v6051_v15 = vpop.permute.xlu1 %2477 }
 0x32c   : > { %v2676_v28 = vpack.c.bf16 %v4620_v59, %v4616_v48  ;;  %v2349_v34 = vadd.f32 %v4620_v59, %v4618_v60 }
 0x32e   : > { %2919 = vmatprep.mubr.bf16.mxu1 %v2676_v28  ;;  %2338 = vadd.xlane.f32.xlu1 %v2337_v21  ;;  %v6053_v21 = vpop.permute.xlu0 %2492 }
 0x32f   : > { %2341 = vadd.xlane.f32.xlu0 %v2340_v2  ;;  %v6055_v2 = vpop.permute.xlu1 %2487 }
 0x330   : > { %v4622_v62 = vpop.eup %4621 }
 0x331   : > { %v4624_v26 = vpop.eup %4623  ;;  %2920 = vmatmul.mubr.bf16.gmra.mrb[56].mxu1 %v2675_v5 }
 0x332   : > { %v4626_v32 = vpop.eup %4625  ;;  %2344 = vadd.xlane.f32.xlu1 %v2343_v24  ;;  %v2352_v55 = vadd.f32 %v4624_v26, %v4622_v62  ;;  %v6057_v41 = vpop.permute.xlu0 %2502 }
 0x333   : > { %v4628_v45 = vpop.eup %4627  ;;  %2347 = vadd.xlane.f32.xlu0 %v2346_v49  ;;  %v2677_v40 = vpack.c.bf16 %v4626_v32, %v4622_v62  ;;  %v6059_v7 = vpop.permute.xlu1 %2497 }
 0x334   : > { %v2678_v38 = vpack.c.bf16 %v4628_v45, %v4624_v26  ;;  %v2355_v56 = vadd.f32 %v4628_v45, %v4626_v32  ;;  %v2199_v32 = vld [vmem:[#allocation3 + $0x8] sm:$0xff]  ;;  %v6613_v45 = vld [vmem:[#allocation69_spill] sm:$0xff] }
 0x336   : > { %2927 = vmatprep.mubr.bf16.mxu1 %v2678_v38  ;;  %2350 = vadd.xlane.f32.xlu1 %v2349_v34  ;;  %v6061_v17 = vpop.permute.xlu0 %2512  ;;  %v2198_v38 = vld [vmem:[#allocation3] sm:$0xff] }
 0x337   : > { %2353 = vadd.xlane.f32.xlu0 %v2352_v55  ;;  %v6063_v11 = vpop.permute.xlu1 %2507 }
 0x339   : > { %2928 = vmatmul.mubr.bf16.gmra.mrb[60].mxu1 %v2677_v40  ;;  %v2231_v40 = vmul.f32 %v6613_v45, %v2199_v32 }
 0x33a   : > { %2356 = vadd.xlane.f32.xlu1 %v2355_v56  ;;  %v6065_v16 = vpop.permute.xlu0 %2522 }
 0x33b   : > { %v6067_v12 = vpop.permute.xlu1 %2517 }
 0x33e   : > { %v6069_v10 = vpop.permute.xlu0 %2532 }
 0x33f   : > { %v6071_v44 = vpop.permute.xlu1 %2527 }
 0x342   : > { %v6073_v39 = vpop.permute.xlu0 %2542 }
 0x343   : > { %v6075_v22 = vpop.permute.xlu1 %2537 }
 0x346   : > { %v6077_v24 = vpop.permute.xlu0 %2552 }
 0x347   : > { %v6079_v19 = vpop.permute.xlu1 %2547 }
 0x34a   : > { %v6081_v20 = vpop.permute.xlu0 %2562 }
 0x34b   : > { %v6083_v53 = vpop.permute.xlu1 %2557 }
 0x34e   : > { %v6085_v48 = vpop.permute.xlu0 %2572 }
 0x34f   : > { %6604 = vst [vmem:[#allocation15_spill] sm:$0xff] %v6085_v48  ;;  %v6087_v60 = vpop.permute.xlu1 %2567 }
 0x352   : > { %v6089_v49 = vpop.permute.xlu0 %2582 }
 0x353   : > { %6605 = vst [vmem:[#allocation16_spill] sm:$0xff] %v6089_v49  ;;  %v6091_v59 = vpop.permute.xlu1 %2577  ;;  %v2230_v49 = vmul.f32 %v5710_v6, %v2198_v38  ;;  %v2203_v6 = vld [vmem:[#allocation3 + $0x28] sm:$0xff] }
 0x354   : > { %6606 = vst [vmem:[#allocation17_spill] sm:$0xff] %v6091_v59 }
 0x356   : > { %v6093_v5 = vpop.permute.xlu0 %2592 }
 0x357   : > { %6607 = vst [vmem:[#allocation18_spill] sm:$0xff] %v6093_v5  ;;  %v6095_v28 = vpop.permute.xlu1 %2587 }
 0x358   : > { %6608 = vst [vmem:[#allocation19_spill] sm:$0xff] %v6095_v28  ;;  %v2201_v28 = vld [vmem:[#allocation3 + $0x18] sm:$0xff] }
 0x359   : > { %v2233_v32 = vmul.f32 %v5744_v18, %v2201_v28  ;;  %v2206_v28 = vld [vmem:[#allocation3 + $0x40] sm:$0xff] }
 0x35a   : > { %v6097_v34 = vpop.permute.xlu0 %2602 }
 0x35b   : > { %6609 = vst [vmem:[#allocation20_spill] sm:$0xff] %v6097_v34  ;;  %v6099_v62 = vpop.permute.xlu1 %2597  ;;  %v2232_v34 = vmul.f32 %v5736_v51, %v2200_v42  ;;  %v2235_v42 = vmul.f32 %v5788_v25, %v2203_v6  ;;  %v2207_v6 = vld [vmem:[#allocation3 + $0x48] sm:$0xff] }
 0x35c   : > { %6610 = vst [vmem:[#allocation21_spill] sm:$0xff] %v6099_v62 }
 0x35e   : > { %v6101_v26 = vpop.permute.xlu0 %2612 }
 0x35f   : > { %6611 = vst [vmem:[#allocation22_spill] sm:$0xff] %v6101_v26  ;;  %v6103_v55 = vpop.permute.xlu1 %2607  ;;  %v2202_v26 = vld [vmem:[#allocation3 + $0x20] sm:$0xff] }
 0x360   : > { %6612 = vst [vmem:[#allocation23_spill] sm:$0xff] %v6103_v55 }
 0x388   : > { %v2267_v56 = vpop.xlane.xlu0 %2266 }
 0x389   : > { %v2359_v35 = vadd.f32 %v2267_v56, %v2231_v40  ;;  %v2234_v40 = vmul.f32 %v5779_v31, %v2202_v26  ;;  %v2204_v56 = vld [vmem:[#allocation3 + $0x30] sm:$0xff] }
 0x38a   : > { %v2236_v18 = vmul.f32 %v5797_v23, %v2204_v56 }
 0x38b   : > { %2392 = vst.msk [vmem:[#allocation3 + $0x8] sm:$0xff] %vm1012_vm0, %v2359_v35  ;;  %v2264_v5 = vpop.xlane.xlu1 %2263 }
 0x38c   : > { %v2358_v62 = vadd.f32 %v2264_v5, %v2230_v49  ;;  %v2270_v59 = vpop.xlane.xlu0 %2269 }
 0x38d   : > { %v2360_v48 = vadd.f32 %v2270_v59, %v2232_v34 }
 0x38e   : > { %2391 = vst.msk [vmem:[#allocation3] sm:$0xff] %vm1012_vm0, %v2358_v62 }
 0x38f   : > { %2393 = vst.msk [vmem:[#allocation3 + $0x10] sm:$0xff] %vm1012_vm0, %v2360_v48  ;;  %v2273_v45 = vpop.xlane.xlu1 %2272  ;;  %v2205_v48 = vld [vmem:[#allocation3 + $0x38] sm:$0xff] }
 0x390   : > { %v2361_v38 = vadd.f32 %v2273_v45, %v2233_v32  ;;  %v2276_v35 = vpop.xlane.xlu0 %2275  ;;  %v2237_v25 = vmul.f32 %v5807_v13, %v2205_v48  ;;  %v2239_v13 = vmul.f32 %v5817_v0, %v2207_v6 }
 0x391   : > { %v2362_v55 = vadd.f32 %v2276_v35, %v2234_v40  ;;  %v2238_v40 = vmul.f32 %v5813_v61, %v2206_v28 }
 0x392   : > { %2394 = vst.msk [vmem:[#allocation3 + $0x18] sm:$0xff] %vm1012_vm0, %v2361_v38  ;;  %v3068_v51 = vld [vmem:[#allocation3 + $0x8] sm:$0xff] }
 0x393   : > { %2395 = vst.msk [vmem:[#allocation3 + $0x20] sm:$0xff] %vm1012_vm0, %v2362_v55  ;;  %3106 = vperm.xlu0 %4387, %v3068_v51   ;;  %v2279_v49 = vpop.xlane.xlu1 %2278  ;;  %v2208_v51 = vld [vmem:[#allocation3 + $0x50] sm:$0xff] }
 0x394   : > { %v4248_v59 = vpop.f32.mrb[0].mxu1  ;;  %v2363_v5 = vadd.f32 %v2279_v49, %v2235_v42  ;;  %v2282_v31 = vpop.xlane.xlu0 %2281  ;;  %v2240_v61 = vmul.f32 %v5822_v8, %v2208_v51  ;;  %v2618_v51 = vmul.f32 0.0, %v6037_v9 }
 0x395   : > { %v4249_v34 = vpop.f32.mrb[1].mxu1  ;;  %v2364_v62 = vadd.f32 %v2282_v31, %v2236_v18  ;;  %v3067_v26 = vld [vmem:[#allocation3] sm:$0xff] }
 0x396   : > { %2396 = vst.msk [vmem:[#allocation3 + $0x28] sm:$0xff] %vm1012_vm0, %v2363_v5  ;;  %v6118_v32 = vadd.f32 %v4249_v34, %v4248_v59  ;;  %v4251_v45 = vpop.f32.mrb[2].mxu1  ;;  %3101 = vperm.xlu1 %4388, %v3067_v26   ;;  %v3069_v49 = vld [vmem:[#allocation3 + $0x10] sm:$0xff]  ;;  %v2209_v59 = vld [vmem:[#allocation3 + $0x58] sm:$0xff]  ;;  %v2210_v34 = vld [vmem:[#allocation3 + $0x60] sm:$0xff] }
 0x397   : > { %2397 = vst.msk [vmem:[#allocation3 + $0x30] sm:$0xff] %vm1012_vm0, %v2364_v62  ;;  %v4252_v55 = vpop.f32.mrb[3].mxu1  ;;  %v2285_v23 = vpop.xlane.xlu1 %2284 }
 0x398   : > { %v6123_v38 = vadd.f32 %v4252_v55, %v4251_v45  ;;  %v2365_v35 = vadd.f32 %v2285_v23, %v2237_v25  ;;  %v2288_v56 = vpop.xlane.xlu0 %2287  ;;  %v2617_v55 = vmul.f32 0.0, %v6034_v33 }
 0x399   : > { %v2366_v42 = vadd.f32 %v2288_v56, %v2238_v40  ;;  %v3070_v18 = vld [vmem:[#allocation3 + $0x18] sm:$0xff]  ;;  %v2241_v40 = vmul.f32 %v5824_v36, %v2209_v59  ;;  %v2211_v56 = vld [vmem:[#allocation3 + $0x68] sm:$0xff] }
 0x39a   : > { %2398 = vst.msk [vmem:[#allocation3 + $0x38] sm:$0xff] %vm1012_vm0, %v2365_v35  ;;  %3111 = vperm.xlu1 %4388, %v3069_v49   ;;  %3116 = vperm.xlu0 %4387, %v3070_v18   ;;  %v3071_v45 = vld [vmem:[#allocation3 + $0x20] sm:$0xff]  ;;  %v2242_v35 = vmul.f32 %v5829_v4, %v2210_v34  ;;  %v2243_v36 = vmul.f32 %v5833_v27, %v2211_v56  ;;  %v2213_v59 = vld [vmem:[#allocation3 + $0x78] sm:$0xff]  ;;  %v2215_v56 = vld [vmem:[#allocation3 + $0x88] sm:$0xff] }
 0x39b   : > { %2399 = vst.msk [vmem:[#allocation3 + $0x40] sm:$0xff] %vm1012_vm0, %v2366_v42  ;;  %v2291_v48 = vpop.xlane.xlu1 %2290 }
 0x39c   : > { %v4254_v5 = vpop.f32.mrb[4].mxu1  ;;  %v2367_v31 = vadd.f32 %v2291_v48, %v2239_v13  ;;  %v2294_v28 = vpop.xlane.xlu0 %2293  ;;  %v2212_v13 = vld [vmem:[#allocation3 + $0x70] sm:$0xff] }
 0x39d   : > { %v4255_v62 = vpop.f32.mrb[5].mxu1  ;;  %v2368_v26 = vadd.f32 %v2294_v28, %v2240_v61  ;;  %v3072_v25 = vld [vmem:[#allocation3 + $0x28] sm:$0xff]  ;;  %v2244_v9 = vmul.f32 %v5838_v1, %v2212_v13  ;;  %v2216_v13 = vld [vmem:[#allocation3 + $0x90] sm:$0xff] }
 0x39e   : > { %2400 = vst.msk [vmem:[#allocation3 + $0x48] sm:$0xff] %vm1012_vm0, %v2367_v31  ;;  %v4256_v23 = vadd.f32 %v4255_v62, %v4254_v5  ;;  %v4257_v0 = vpop.f32.mrb[6].mxu1  ;;  %3121 = vperm.xlu1 %4388, %v3071_v45   ;;  %3126 = vperm.xlu0 %4387, %v3072_v25   ;;  %v3073_v61 = vld [vmem:[#allocation3 + $0x30] sm:$0xff] }
 0x39f   : > { %2401 = vst.msk [vmem:[#allocation3 + $0x50] sm:$0xff] %vm1012_vm0, %v2368_v26  ;;  %v4258_v8 = vpop.f32.mrb[7].mxu1  ;;  %v2297_v6 = vpop.xlane.xlu1 %2296  ;;  %v2214_v26 = vld [vmem:[#allocation3 + $0x80] sm:$0xff] }
 0x3a0   : > { %v6135_v42 = vadd.f32 %v4256_v23, %v2617_v55  ;;  %v4259_v33 = vadd.f32 %v4258_v8, %v4257_v0  ;;  %v2369_v49 = vadd.f32 %v2297_v6, %v2241_v40  ;;  %v2300_v18 = vpop.xlane.xlu0 %2299  ;;  %v2619_v0 = vmul.f32 0.0, %v6051_v15 }
 0x3a1   : > { %v2370_v48 = vadd.f32 %v2300_v18, %v2242_v35  ;;  %v3074_v5 = vld [vmem:[#allocation3 + $0x38] sm:$0xff]  ;;  %v2245_v8 = vmul.f32 %v5840_v63, %v2213_v59  ;;  %v2246_v35 = vmul.f32 %v5845_v29, %v2214_v26  ;;  %v2247_v63 = vmul.f32 %v5849_v50, %v2215_v56 }
 0x3a2   : > { %v6137_v31 = vadd.f32 %v4259_v33, %v2618_v51  ;;  %2402 = vst.msk [vmem:[#allocation3 + $0x58] sm:$0xff] %vm1012_vm0, %v2369_v49  ;;  %3131 = vperm.xlu1 %4388, %v3073_v61   ;;  %3136 = vperm.xlu0 %4387, %v3074_v5   ;;  %v3075_v55 = vld [vmem:[#allocation3 + $0x40] sm:$0xff]  ;;  %v2620_v51 = vmul.f32 0.0, %v6049_v43  ;;  %v2248_v43 = vmul.f32 %v5854_v46, %v2216_v13 }
 0x3a3   : > { %2403 = vst.msk [vmem:[#allocation3 + $0x60] sm:$0xff] %vm1012_vm0, %v2370_v48  ;;  %v2303_v4 = vpop.xlane.xlu1 %2302 }
 0x3a4   : > { %v4260_v28 = vpop.f32.mrb[8].mxu1  ;;  %v2371_v34 = vadd.f32 %v2303_v4, %v2243_v36  ;;  %v2306_v62 = vpop.xlane.xlu0 %2305  ;;  %v2217_v4 = vld [vmem:[#allocation3 + $0x98] sm:$0xff] }
 0x3a5   : > { %v4261_v45 = vpop.f32.mrb[9].mxu1  ;;  %v2372_v25 = vadd.f32 %v2306_v62, %v2244_v9  ;;  %v3076_v23 = vld [vmem:[#allocation3 + $0x48] sm:$0xff] }
 0x3a6   : > { %2404 = vst.msk [vmem:[#allocation3 + $0x68] sm:$0xff] %vm1012_vm0, %v2371_v34  ;;  %v4262_v40 = vadd.f32 %v4261_v45, %v4260_v28  ;;  %v4263_v27 = vpop.f32.mrb[10].mxu1  ;;  %3141 = vperm.xlu1 %4388, %v3075_v55   ;;  %3146 = vperm.xlu0 %4387, %v3076_v23   ;;  %v3077_v61 = vld [vmem:[#allocation3 + $0x50] sm:$0xff]  ;;  %v2218_v34 = vld [vmem:[#allocation3 + $0xa0] sm:$0xff]  ;;  %v2621_v55 = vmul.f32 0.0, %v6055_v2 }
 0x3a7   : > { %2405 = vst.msk [vmem:[#allocation3 + $0x70] sm:$0xff] %vm1012_vm0, %v2372_v25  ;;  %v4264_v1 = vpop.f32.mrb[11].mxu1  ;;  %v2309_v6 = vpop.xlane.xlu1 %2308 }
 0x3a8   : > { %v6149_v33 = vadd.f32 %v4262_v40, %v2619_v0  ;;  %v4265_v15 = vadd.f32 %v4264_v1, %v4263_v27  ;;  %v2373_v49 = vadd.f32 %v2309_v6, %v2245_v8  ;;  %v2312_v18 = vpop.xlane.xlu0 %2311  ;;  %v2249_v0 = vmul.f32 %v5859_v3, %v2217_v4  ;;  %v2219_v8 = vld [vmem:[#allocation3 + $0xa8] sm:$0xff] }
 0x3a9   : > { %v2374_v48 = vadd.f32 %v2312_v18, %v2246_v35  ;;  %v3078_v5 = vld [vmem:[#allocation3 + $0x58] sm:$0xff]  ;;  %v2250_v27 = vmul.f32 %v5866_v30, %v2218_v34  ;;  %v2622_v1 = vmul.f32 0.0, %v6053_v21  ;;  %v2251_v3 = vmul.f32 %v5876_v57, %v2219_v8 }
 0x3aa   : > { %v6151_v36 = vadd.f32 %v4265_v15, %v2620_v51  ;;  %2406 = vst.msk [vmem:[#allocation3 + $0x78] sm:$0xff] %vm1012_vm0, %v2373_v49  ;;  %3151 = vperm.xlu1 %4388, %v3077_v61   ;;  %3156 = vperm.xlu0 %4387, %v3078_v5   ;;  %v3079_v45 = vld [vmem:[#allocation3 + $0x60] sm:$0xff]  ;;  %v2220_v51 = vld [vmem:[#allocation3 + $0xb0] sm:$0xff] }
 0x3ab   : > { %2407 = vst.msk [vmem:[#allocation3 + $0x80] sm:$0xff] %vm1012_vm0, %v2374_v48  ;;  %v2315_v29 = vpop.xlane.xlu1 %2314  ;;  %v2252_v21 = vmul.f32 %v5885_v54, %v2220_v51  ;;  %v2221_v48 = vld [vmem:[#allocation3 + $0xb8] sm:$0xff] }
 0x3ac   : > { %v4266_v9 = vpop.f32.mrb[12].mxu1  ;;  %v2375_v59 = vadd.f32 %v2315_v29, %v2247_v63  ;;  %v2318_v28 = vpop.xlane.xlu0 %2317  ;;  %v2222_v29 = vld [vmem:[#allocation3 + $0xc0] sm:$0xff] }
 0x3ad   : > { %v4267_v62 = vpop.f32.mrb[13].mxu1  ;;  %v2376_v26 = vadd.f32 %v2318_v28, %v2248_v43  ;;  %v3080_v25 = vld [vmem:[#allocation3 + $0x68] sm:$0xff]  ;;  %v2623_v28 = vmul.f32 0.0, %v6059_v7 }
 0x3ae   : > { %2408 = vst.msk [vmem:[#allocation3 + $0x88] sm:$0xff] %vm1012_vm0, %v2375_v59  ;;  %v4268_v23 = vadd.f32 %v4267_v62, %v4266_v9  ;;  %v4269_v50 = vpop.f32.mrb[14].mxu1  ;;  %3161 = vperm.xlu1 %4388, %v3079_v45   ;;  %3166 = vperm.xlu0 %4387, %v3080_v25   ;;  %v3081_v49 = vld [vmem:[#allocation3 + $0x70] sm:$0xff]  ;;  %v2253_v62 = vmul.f32 %v5892_v47, %v2221_v48  ;;  %v2223_v25 = vld [vmem:[#allocation3 + $0xc8] sm:$0xff] }
 0x3af   : > { %2409 = vst.msk [vmem:[#allocation3 + $0x90] sm:$0xff] %vm1012_vm0, %v2376_v26  ;;  %v4270_v46 = vpop.f32.mrb[15].mxu1  ;;  %v2321_v40 = vpop.xlane.xlu1 %2320  ;;  %v2254_v45 = vmul.f32 %v5897_v58, %v2222_v29  ;;  %v2255_v47 = vmul.f32 %v5902_v37, %v2223_v25  ;;  %v6616_v25 = vld [vmem:[#allocation12_spill] sm:$0xff] }
 0x3b0   : > { %v6163_v6 = vadd.f32 %v4268_v23, %v2621_v55  ;;  %v4271_v2 = vadd.f32 %v4270_v46, %v4269_v50  ;;  %v2377_v35 = vadd.f32 %v2321_v40, %v2249_v0  ;;  %v2324_v56 = vpop.xlane.xlu0 %2323  ;;  %v2624_v55 = vmul.f32 0.0, %v6057_v41  ;;  %v2224_v46 = vld [vmem:[#allocation3 + $0xd0] sm:$0xff] }
 0x3b1   : > { %v2378_v15 = vadd.f32 %v2324_v56, %v2250_v27  ;;  %v3082_v18 = vld [vmem:[#allocation3 + $0x78] sm:$0xff]  ;;  %v2256_v41 = vmul.f32 %v5912_v52, %v2224_v46 }
 0x3b2   : > { %v6165_v13 = vadd.f32 %v4271_v2, %v2622_v1  ;;  %2410 = vst.msk [vmem:[#allocation3 + $0x98] sm:$0xff] %vm1012_vm0, %v2377_v35  ;;  %3171 = vperm.xlu1 %4388, %v3081_v49   ;;  %3176 = vperm.xlu0 %4387, %v3082_v18   ;;  %v3083_v9 = vld [vmem:[#allocation3 + $0x80] sm:$0xff]  ;;  %v2225_v2 = vld [vmem:[#allocation3 + $0xd8] sm:$0xff] }
 0x3b3   : > { %2411 = vst.msk [vmem:[#allocation3 + $0xa0] sm:$0xff] %vm1012_vm0, %v2378_v15  ;;  %v2327_v30 = vpop.xlane.xlu1 %2326  ;;  %v2226_v15 = vld [vmem:[#allocation3 + $0xe0] sm:$0xff] }
 0x3b4   : > { %v4272_v61 = vpop.f32.mrb[16].mxu1  ;;  %v2379_v5 = vadd.f32 %v2327_v30, %v2251_v3  ;;  %v2330_v63 = vpop.xlane.xlu0 %2329 }
 0x3b5   : > { %v4273_v43 = vpop.f32.mrb[17].mxu1  ;;  %v2380_v4 = vadd.f32 %v2330_v63, %v2252_v21  ;;  %v3084_v59 = vld [vmem:[#allocation3 + $0x88] sm:$0xff]  ;;  %v2625_v21 = vmul.f32 0.0, %v6063_v11  ;;  %v6614_v63 = vld [vmem:[#allocation10_spill] sm:$0xff] }
 0x3b6   : > { %2412 = vst.msk [vmem:[#allocation3 + $0xa8] sm:$0xff] %vm1012_vm0, %v2379_v5  ;;  %v4274_v34 = vadd.f32 %v4273_v43, %v4272_v61  ;;  %v4275_v57 = vpop.f32.mrb[18].mxu1  ;;  %3181 = vperm.xlu1 %4388, %v3083_v9   ;;  %3186 = vperm.xlu0 %4387, %v3084_v59   ;;  %v3085_v27 = vld [vmem:[#allocation3 + $0x90] sm:$0xff]  ;;  %v2257_v61 = vmul.f32 %v5917_v14, %v2225_v2  ;;  %v2227_v43 = vld [vmem:[#allocation3 + $0xe8] sm:$0xff] }
 0x3b7   : > { %2413 = vst.msk [vmem:[#allocation3 + $0xb0] sm:$0xff] %vm1012_vm0, %v2380_v4  ;;  %v4276_v54 = vpop.f32.mrb[19].mxu1  ;;  %v2333_v26 = vpop.xlane.xlu1 %2332  ;;  %v2258_v29 = vmul.f32 %v6614_v63, %v2226_v15  ;;  %v2626_v4 = vmul.f32 0.0, %v6061_v17  ;;  %v6615_v14 = vld [vmem:[#allocation11_spill] sm:$0xff]  ;;  %v2629_v63 = vmul.f32 0.0, %v6071_v44  ;;  %v2631_v44 = vmul.f32 0.0, %v6075_v22 }
 0x3b8   : > { %v6177_v23 = vadd.f32 %v4274_v34, %v2623_v28  ;;  %v4277_v7 = vadd.f32 %v4276_v54, %v4275_v57  ;;  %v2381_v50 = vadd.f32 %v2333_v26, %v2253_v62  ;;  %v2336_v0 = vpop.xlane.xlu0 %2335  ;;  %v2228_v34 = vld [vmem:[#allocation3 + $0xf0] sm:$0xff] }
 0x3b9   : > { %v2382_v40 = vadd.f32 %v2336_v0, %v2254_v45  ;;  %v3086_v8 = vld [vmem:[#allocation3 + $0x98] sm:$0xff]  ;;  %v2259_v45 = vmul.f32 %v6615_v14, %v2227_v43 }
 0x3ba   : > { %v6179_v1 = vadd.f32 %v4277_v7, %v2624_v55  ;;  %2414 = vst.msk [vmem:[#allocation3 + $0xb8] sm:$0xff] %vm1012_vm0, %v2381_v50  ;;  %3191 = vperm.xlu1 %4388, %v3085_v27   ;;  %3196 = vperm.xlu0 %4387, %v3086_v8   ;;  %v3087_v3 = vld [vmem:[#allocation3 + $0xa0] sm:$0xff]  ;;  %v2260_v55 = vmul.f32 %v6616_v25, %v2228_v34  ;;  %v2229_v7 = vld [vmem:[#allocation3 + $0xf8] sm:$0xff]  ;;  %v2632_v25 = vmul.f32 0.0, %v6073_v39 }
 0x3bb   : > { %2415 = vst.msk [vmem:[#allocation3 + $0xc0] sm:$0xff] %vm1012_vm0, %v2382_v40  ;;  %v2339_v58 = vpop.xlane.xlu1 %2338 }
 0x3bc   : > { %v4278_v35 = vpop.f32.mrb[20].mxu1  ;;  %v2383_v56 = vadd.f32 %v2339_v58, %v2255_v47  ;;  %v2342_v51 = vpop.xlane.xlu0 %2341  ;;  %v2627_v58 = vmul.f32 0.0, %v6067_v12 }
 0x3bd   : > { %v4279_v49 = vpop.f32.mrb[21].mxu1  ;;  %v2384_v18 = vadd.f32 %v2342_v51, %v2256_v41  ;;  %v3088_v30 = vld [vmem:[#allocation3 + $0xa8] sm:$0xff] }
 0x3be   : > { %2416 = vst.msk [vmem:[#allocation3 + $0xc8] sm:$0xff] %vm1012_vm0, %v2383_v56  ;;  %v4280_v48 = vadd.f32 %v4279_v49, %v4278_v35  ;;  %v4281_v37 = vpop.f32.mrb[22].mxu1  ;;  %3201 = vperm.xlu1 %4388, %v3087_v3   ;;  %3206 = vperm.xlu0 %4387, %v3088_v30   ;;  %v3089_v62 = vld [vmem:[#allocation3 + $0xb0] sm:$0xff]  ;;  %v6617_v35 = vld [vmem:[#allocation13_spill] sm:$0xff]  ;;  %v2628_v49 = vmul.f32 0.0, %v6065_v16 }
 0x3bf   : > { %2417 = vst.msk [vmem:[#allocation3 + $0xd0] sm:$0xff] %vm1012_vm0, %v2384_v18  ;;  %v4282_v52 = vpop.f32.mrb[23].mxu1  ;;  %v2345_v5 = vpop.xlane.xlu1 %2344  ;;  %v2261_v56 = vmul.f32 %v6617_v35, %v2229_v7  ;;  %v2635_v35 = vmul.f32 0.0, %v6083_v53 }
 0x3c0   : > { %v6191_v9 = vadd.f32 %v4280_v48, %v2625_v21  ;;  %v4283_v11 = vadd.f32 %v4282_v52, %v4281_v37  ;;  %v2385_v59 = vadd.f32 %v2345_v5, %v2257_v61  ;;  %v2348_v28 = vpop.xlane.xlu0 %2347 }
 0x3c1   : > { %v2386_v57 = vadd.f32 %v2348_v28, %v2258_v29  ;;  %v3090_v54 = vld [vmem:[#allocation3 + $0xb8] sm:$0xff] }
 0x3c2   : > { %v6193_v26 = vadd.f32 %v4283_v11, %v2626_v4  ;;  %2418 = vst.msk [vmem:[#allocation3 + $0xd8] sm:$0xff] %vm1012_vm0, %v2385_v59  ;;  %3211 = vperm.xlu1 %4388, %v3089_v62   ;;  %3216 = vperm.xlu0 %4387, %v3090_v54   ;;  %v3091_v8 = vld [vmem:[#allocation3 + $0xc0] sm:$0xff]  ;;  %v2630_v4 = vmul.f32 0.0, %v6069_v10 }
 0x3c3   : > { %2419 = vst.msk [vmem:[#allocation3 + $0xe0] sm:$0xff] %vm1012_vm0, %v2386_v57  ;;  %v2351_v17 = vpop.xlane.xlu1 %2350 }
 0x3c4   : > { %v4284_v50 = vpop.f32.mrb[24].mxu1  ;;  %v2387_v0 = vadd.f32 %v2351_v17, %v2259_v45  ;;  %v2354_v46 = vpop.xlane.xlu0 %2353 }
 0x3c5   : > { %v4285_v40 = vpop.f32.mrb[25].mxu1  ;;  %v2388_v27 = vadd.f32 %v2354_v46, %v2260_v55  ;;  %v3092_v47 = vld [vmem:[#allocation3 + $0xc8] sm:$0xff]  ;;  %v2633_v46 = vmul.f32 0.0, %v6079_v19 }
 0x3c6   : > { %2420 = vst.msk [vmem:[#allocation3 + $0xe8] sm:$0xff] %vm1012_vm0, %v2387_v0  ;;  %v4286_v41 = vadd.f32 %v4285_v40, %v4284_v50  ;;  %v4287_v2 = vpop.f32.mrb[26].mxu1  ;;  %3221 = vperm.xlu1 %4388, %v3091_v8   ;;  %3226 = vperm.xlu0 %4387, %v3092_v47   ;;  %v3093_v21 = vld [vmem:[#allocation3 + $0xd0] sm:$0xff]  ;;  %v2634_v47 = vmul.f32 0.0, %v6077_v24 }
 0x3c7   : > { %2421 = vst.msk [vmem:[#allocation3 + $0xf0] sm:$0xff] %vm1012_vm0, %v2388_v27  ;;  %v4288_v51 = vpop.f32.mrb[27].mxu1  ;;  %v2357_v15 = vpop.xlane.xlu1 %2356 }
 0x3c8   : > { %v6204_v18 = vadd.f32 %v4286_v41, %v2627_v58  ;;  %v4289_v3 = vadd.f32 %v4288_v51, %v4287_v2  ;;  %v2389_v30 = vadd.f32 %v2357_v15, %v2261_v56 }
 0x3c9   : > { %v3094_v12 = vld [vmem:[#allocation3 + $0xd8] sm:$0xff] }
 0x3ca   : > { %v6206_v48 = vadd.f32 %v4289_v3, %v2628_v49  ;;  %2422 = vst.msk [vmem:[#allocation3 + $0xf8] sm:$0xff] %vm1012_vm0, %v2389_v30  ;;  %3231 = vperm.xlu1 %4388, %v3093_v21   ;;  %3236 = vperm.xlu0 %4387, %v3094_v12   ;;  %v3095_v52 = vld [vmem:[#allocation3 + $0xe0] sm:$0xff]  ;;  %v2636_v49 = vmul.f32 0.0, %v6081_v20  ;;  %v2637_v12 = vmul.f32 0.0, %v6087_v60 }
 0x3cc   : > { %v4290_v37 = vpop.f32.mrb[28].mxu1 }
 0x3cd   : > { %v4291_v61 = vpop.f32.mrb[29].mxu1  ;;  %v3096_v5 = vld [vmem:[#allocation3 + $0xe8] sm:$0xff] }
 0x3ce   : > { %v4292_v29 = vadd.f32 %v4291_v61, %v4290_v37  ;;  %v4293_v16 = vpop.f32.mrb[30].mxu1  ;;  %3241 = vperm.xlu1 %4388, %v3095_v52   ;;  %3246 = vperm.xlu0 %4387, %v3096_v5   ;;  %v3097_v28 = vld [vmem:[#allocation3 + $0xf0] sm:$0xff]  ;;  %v6618_v5 = vld [vmem:[#allocation15_spill] sm:$0xff] }
 0x3cf   : > { %v4294_v43 = vpop.f32.mrb[31].mxu1 }
 0x3d0   : > { %v6211_v11 = vadd.f32 %v4292_v29, %v2629_v63  ;;  %v4295_v59 = vadd.f32 %v4294_v43, %v4293_v16  ;;  %v2638_v63 = vmul.f32 0.0, %v6618_v5 }
 0x3d1   : > { %v3098_v34 = vld [vmem:[#allocation3 + $0xf8] sm:$0xff] }
 0x3d2   : > { %v6213_v57 = vadd.f32 %v4295_v59, %v2630_v4  ;;  %3251 = vperm.xlu1 %4388, %v3097_v28   ;;  %3256 = vperm.xlu0 %4387, %v3098_v34   ;;  %v6619_v4 = vld [vmem:[#allocation17_spill] sm:$0xff] }
 0x3d3   : > { %v2639_v59 = vmul.f32 0.0, %v6619_v4 }
 0x3d4   : > { %v4296_v62 = vpop.f32.mrb[32].mxu1 }
 0x3d5   : > { %v4297_v54 = vpop.f32.mrb[33].mxu1 }
 0x3d6   : > { %v4298_v14 = vadd.f32 %v4297_v54, %v4296_v62  ;;  %v4299_v45 = vpop.f32.mrb[34].mxu1  ;;  %v6620_v54 = vld [vmem:[#allocation16_spill] sm:$0xff] }
 0x3d7   : > { %v4300_v17 = vpop.f32.mrb[35].mxu1 }
 0x3d8   : > { %v6217_v55 = vadd.f32 %v4298_v14, %v2631_v44  ;;  %v4301_v10 = vadd.f32 %v4300_v17, %v4299_v45  ;;  %v2640_v44 = vmul.f32 0.0, %v6620_v54 }
 0x3da   : > { %v6219_v7 = vadd.f32 %v4301_v10, %v2632_v25  ;;  %v6621_v10 = vld [vmem:[#allocation19_spill] sm:$0xff] }
 0x3dc   : > { %v4302_v50 = vpop.f32.mrb[36].mxu1 }
 0x3dd   : > { %v4303_v0 = vpop.f32.mrb[37].mxu1 }
 0x3de   : > { %v4304_v40 = vadd.f32 %v4303_v0, %v4302_v50  ;;  %v4305_v27 = vpop.f32.mrb[38].mxu1  ;;  %v2641_v50 = vmul.f32 0.0, %v6621_v10  ;;  %v6627_v10 = vld [vmem:[#allocation68_spill] sm:$0xff] }
 0x3df   : > { %v4306_v8 = vpop.f32.mrb[39].mxu1 }
 0x3e0   : > { %v6223_v22 = vadd.f32 %v4304_v40, %v2633_v46  ;;  %v4307_v58 = vadd.f32 %v4306_v8, %v4305_v27  ;;  %v6622_v27 = vld [vmem:[#allocation18_spill] sm:$0xff] }
 0x3e1   : > { %v2642_v8 = vmul.f32 0.0, %v6622_v27 }
 0x3e2   : > { %v6225_v41 = vadd.f32 %v4307_v58, %v2634_v47 }
 0x3e4   : > { %v4308_v39 = vpop.f32.mrb[40].mxu1 }
 0x3e5   : > { %v4309_v2 = vpop.f32.mrb[41].mxu1 }
 0x3e6   : > { %v4310_v56 = vadd.f32 %v4309_v2, %v4308_v39  ;;  %v4311_v51 = vpop.f32.mrb[42].mxu1 }
 0x3e7   : > { %v4312_v15 = vpop.f32.mrb[43].mxu1 }
 0x3e8   : > { %v6229_v19 = vadd.f32 %v4310_v56, %v2635_v35  ;;  %v4313_v3 = vadd.f32 %v4312_v15, %v4311_v51  ;;  %v6623_v56 = vld [vmem:[#allocation21_spill] sm:$0xff] }
 0x3e9   : > { %v2643_v51 = vmul.f32 0.0, %v6623_v56  ;;  %v4011_v56 = vld [vmem:[%s6270_s18] sm:$0xff]  }
 0x3ea   : > { %v6231_v30 = vadd.f32 %v4313_v3, %v2636_v49 }
 0x3ec   : > { %v4314_v24 = vpop.f32.mrb[44].mxu1 }
 0x3ed   : > { %v4315_v21 = vpop.f32.mrb[45].mxu1 }
 0x3ee   : > { %v4316_v37 = vadd.f32 %v4315_v21, %v4314_v24  ;;  %v4317_v61 = vpop.f32.mrb[46].mxu1  ;;  %v6624_v24 = vld [vmem:[#allocation20_spill] sm:$0xff] }
 0x3ef   : > { %v4318_v52 = vpop.f32.mrb[47].mxu1  ;;  %v2644_v21 = vmul.f32 0.0, %v6624_v24  ;;  %v4012_v24 = vunpack.c.l.bf16 %v4011_v56 }
 0x3f0   : > { %v6235_v53 = vadd.f32 %v4316_v37, %v2637_v12  ;;  %v4319_v29 = vadd.f32 %v4318_v52, %v4317_v61 }
 0x3f2   : > { %v6237_v16 = vadd.f32 %v4319_v29, %v2638_v63  ;;  %v6625_v63 = vld [vmem:[#allocation23_spill] sm:$0xff] }
 0x3f3   : > { %v2645_v29 = vmul.f32 0.0, %v6625_v63 }
 0x3f4   : > { %v4320_v20 = vpop.f32.mrb[48].mxu1 }
 0x3f5   : > { %v4321_v43 = vpop.f32.mrb[49].mxu1 }
 0x3f6   : > { %v4322_v28 = vadd.f32 %v4321_v43, %v4320_v20  ;;  %v4323_v34 = vpop.f32.mrb[50].mxu1 }
 0x3f7   : > { %v4324_v62 = vpop.f32.mrb[51].mxu1 }
 0x3f8   : > { %v6241_v60 = vadd.f32 %v4322_v28, %v2639_v59  ;;  %v4325_v14 = vadd.f32 %v4324_v62, %v4323_v34  ;;  %v6626_v59 = vld [vmem:[#allocation22_spill] sm:$0xff] }
 0x3f9   : > { %v2646_v28 = vmul.f32 0.0, %v6626_v59 }
 0x3fa   : > { %v6243_v45 = vadd.f32 %v4325_v14, %v2640_v44 }
 0x3fc   : > { %v4326_v17 = vpop.f32.mrb[52].mxu1 }
 0x3fd   : > { %v4327_v25 = vpop.f32.mrb[53].mxu1 }
 0x3fe   : > { %v4328_v0 = vadd.f32 %v4327_v25, %v4326_v17  ;;  %v4329_v46 = vpop.f32.mrb[54].mxu1 }
 0x3ff   : > { %v4330_v40 = vpop.f32.mrb[55].mxu1 }
 0x400   : > { %v6247_v47 = vadd.f32 %v4328_v0, %v2641_v50  ;;  %v4331_v58 = vadd.f32 %v4330_v40, %v4329_v46  ;;  %v2616_v50 = vmul.f32 0.0, %v6627_v10  ;;  %v6628_v40 = vld [vmem:[#allocation14_spill] sm:$0xff] }
 0x401   : > { %v2615_v27 = vmul.f32 0.0, %v6628_v40 }
 0x402   : > { %v6249_v39 = vadd.f32 %v4331_v58, %v2642_v8  ;;  %v2937_v0 = vadd.f32 %v6123_v38, %v2616_v50 }
 0x404   : > { %v4332_v2 = vpop.f32.mrb[56].mxu1 }
 0x405   : > { %v4333_v35 = vpop.f32.mrb[57].mxu1 }
 0x406   : > { %v4334_v15 = vadd.f32 %v4333_v35, %v4332_v2  ;;  %v4335_v49 = vpop.f32.mrb[58].mxu1  ;;  %v6267_v2 = vstv %s3323_s17 }
 0x407   : > { %v4336_v3 = vpop.f32.mrb[59].mxu1 }
 0x408   : > { %v6253_v12 = vadd.f32 %v4334_v15, %v2643_v51  ;;  %v4337_v37 = vadd.f32 %v4336_v3, %v4335_v49  ;;  %v2936_v51 = vadd.f32 %v6118_v32, %v2615_v27  ;;  %v4013_v49 = vunpack.c.h.bf16 %v4011_v56  ;;  %v4156_v56 = vld [vmem:[%s6270_s18 + $0x18] sm:$0xff]  }
 0x40a   : > { %v6255_v61 = vadd.f32 %v4337_v37, %v2644_v21 }
 0x40c   : > { %v4338_v52 = vpop.f32.mrb[60].mxu1 }
 0x40d   : > { %v4339_v5 = vpop.f32.mrb[61].mxu1 }
 0x40e   : > { %v4340_v20 = vadd.f32 %v4339_v5, %v4338_v52  ;;  %v4341_v43 = vpop.f32.mrb[62].mxu1  ;;  %v4154_v52 = vld [vmem:[%s6270_s18 + $0x8] sm:$0xff]  }
 0x40f   : > { %v4342_v4 = vpop.f32.mrb[63].mxu1 }
 0x410   : > { %v6259_v34 = vadd.f32 %v4340_v20, %v2645_v29  ;;  %v4343_v62 = vadd.f32 %v4342_v4, %v4341_v43  ;;  %v4017_v4 = vunpack.c.h.bf16 %v4154_v52 }
 0x412   : > { %v6261_v54 = vadd.f32 %v4343_v62, %v2646_v28  ;;  %v3107_v44 = vpop.permute.xlu0 %3106 }
 0x413   : > { %4629 = vrcp.f32 %v3107_v44  ;;  %v4016_v44 = vunpack.c.l.bf16 %v4154_v52 }
 0x415   : > { %v3102_v14 = vpop.permute.xlu1 %3101 }
 0x416   : > { %4631 = vrcp.f32 %v3102_v14  ;;  %v4155_v14 = vld [vmem:[%s6270_s18 + $0x10] sm:$0xff]  }
 0x417   : > { %v4021_v40 = vunpack.c.h.bf16 %v4155_v14 }
 0x419   : > { %v3117_v17 = vpop.permute.xlu0 %3116  ;;  %v3112_v25 = vpop.permute.xlu1 %3111 }
 0x41a   : > { %4633 = vrcp.f32 %v3117_v17 }
 0x41b   : > { %4635 = vrcp.f32 %v3112_v25 }
 0x41d   : > { %v4630_v46 = vpop.eup %4629  ;;  %v3127_v8 = vpop.permute.xlu0 %3126 }
 0x41e   : > { %v3122_v58 = vpop.permute.xlu1 %3121  ;;  %v3262_v35 = vmul.f32 %v4630_v46, %v2937_v0  ;;  %4637 = vrcp.f32 %v3127_v8 }
 0x41f   : > { %4639 = vrcp.f32 %v3122_v58 }
 0x420   : > { %v4632_v15 = vpop.eup %4631  ;;  %v3326_v38 = vmul.f32 %v6267_v2, %v3262_v35  ;;  %v4020_v35 = vunpack.c.l.bf16 %v4155_v14 }
 0x421   : > { %v3260_v3 = vmul.f32 %v4632_v15, %v2936_v51  ;;  %v3137_v21 = vpop.permute.xlu0 %3136 }
 0x422   : > { %v3132_v37 = vpop.permute.xlu1 %3131  ;;  %4641 = vrcp.f32 %v3137_v21  ;;  %v3422_v32 = vadd.f32 %v4013_v49, %v3326_v38  ;;  %v4025_v21 = vunpack.c.h.bf16 %v4156_v56 }
 0x423   : > { %v3325_v5 = vmul.f32 %v6267_v2, %v3260_v3  ;;  %4643 = vrcp.f32 %v3132_v37 }
 0x424   : > { %v4634_v63 = vpop.eup %4633 }
 0x425   : > { %v4636_v29 = vpop.eup %4635  ;;  %v3421_v20 = vadd.f32 %v4012_v24, %v3325_v5  ;;  %v3266_v43 = vmul.f32 %v4634_v63, %v6137_v31  ;;  %v3147_v59 = vpop.permute.xlu0 %3146  ;;  %v4024_v63 = vunpack.c.l.bf16 %v4156_v56 }
 0x426   : > { %v3142_v28 = vpop.permute.xlu1 %3141  ;;  %v3264_v62 = vmul.f32 %v4636_v29, %v6135_v42  ;;  %4645 = vrcp.f32 %v3147_v59  ;;  %v4157_v29 = vld [vmem:[%s6270_s18 + $0x20] sm:$0xff]  }
 0x427   : > { %v4077_v17 = vpack.c.bf16 %v3422_v32, %v3421_v20  ;;  %v3328_v25 = vmul.f32 %v6267_v2, %v3266_v43  ;;  %4647 = vrcp.f32 %v3142_v28 }
 0x428   : > { %v4638_v31 = vpop.eup %4637  ;;  %v3327_v10 = vmul.f32 %v6267_v2, %v3264_v62  ;;  %v4029_v62 = vunpack.c.h.bf16 %v4157_v29 }
 0x429   : > { %v4640_v50 = vpop.eup %4639  ;;  %4078 = vst [vmem:[%s6282_s29] sm:$0xff] %v4077_v17   ;;  %v3424_v0 = vadd.f32 %v4017_v4, %v3328_v25  ;;  %v3270_v46 = vmul.f32 %v4638_v31, %v6151_v36  ;;  %v3157_v27 = vpop.permute.xlu0 %3156  ;;  %v4028_v25 = vunpack.c.l.bf16 %v4157_v29  ;;  %v4158_v31 = vld [vmem:[%s6270_s18 + $0x28] sm:$0xff]  }
 0x42a   : > { %v3152_v8 = vpop.permute.xlu1 %3151  ;;  %v3423_v42 = vadd.f32 %v4016_v44, %v3327_v10  ;;  %v3268_v58 = vmul.f32 %v4640_v50, %v6149_v33  ;;  %4649 = vrcp.f32 %v3157_v27  ;;  %v4032_v56 = vunpack.c.l.bf16 %v4158_v31 }
 0x42b   : > { %v3330_v51 = vmul.f32 %v6267_v2, %v3270_v46  ;;  %4651 = vrcp.f32 %v3152_v8  ;;  %v4033_v8 = vunpack.c.h.bf16 %v4158_v31 }
 0x42c   : > { %v4642_v15 = vpop.eup %4641  ;;  %v4082_v38 = vpack.c.bf16 %v3424_v0, %v3423_v42  ;;  %v3329_v49 = vmul.f32 %v6267_v2, %v3268_v58 }
 0x42d   : > { %v4644_v3 = vpop.eup %4643  ;;  %v3426_v36 = vadd.f32 %v4021_v40, %v3330_v51  ;;  %v3274_v24 = vmul.f32 %v4642_v15, %v6165_v13  ;;  %v3167_v37 = vpop.permute.xlu0 %3166  ;;  %v4159_v51 = vld [vmem:[%s6270_s18 + $0x30] sm:$0xff]  }
 0x42e   : > { %v3162_v52 = vpop.permute.xlu1 %3161  ;;  %4169 = vst [vmem:[%s6282_s29 + $0x8] sm:$0xff] %v4082_v38   ;;  %v3425_v33 = vadd.f32 %v4020_v35, %v3329_v49  ;;  %v3272_v5 = vmul.f32 %v4644_v3, %v6163_v6  ;;  %4653 = vrcp.f32 %v3167_v37 }
 0x42f   : > { %v3332_v32 = vmul.f32 %v6267_v2, %v3274_v24  ;;  %4655 = vrcp.f32 %v3162_v52 }
 0x430   : > { %v4646_v20 = vpop.eup %4645  ;;  %v4087_v43 = vpack.c.bf16 %v3426_v36, %v3425_v33  ;;  %v3331_v4 = vmul.f32 %v6267_v2, %v3272_v5  ;;  %v4036_v5 = vunpack.c.l.bf16 %v4159_v51 }
 0x431   : > { %v4648_v13 = vpop.eup %4647  ;;  %v3428_v59 = vadd.f32 %v4025_v21, %v3332_v32  ;;  %v3278_v28 = vmul.f32 %v4646_v20, %v6179_v1  ;;  %v3177_v44 = vpop.permute.xlu0 %3176  ;;  %v4037_v21 = vunpack.c.h.bf16 %v4159_v51 }
 0x432   : > { %v3172_v14 = vpop.permute.xlu1 %3171  ;;  %4170 = vst [vmem:[%s6282_s29 + $0x10] sm:$0xff] %v4087_v43   ;;  %v3427_v6 = vadd.f32 %v4024_v63, %v3331_v4  ;;  %v3276_v17 = vmul.f32 %v4648_v13, %v6177_v23  ;;  %4657 = vrcp.f32 %v3177_v44  ;;  %v4160_v63 = vld [vmem:[%s6270_s18 + $0x38] sm:$0xff]  }
 0x433   : > { %v3334_v10 = vmul.f32 %v6267_v2, %v3278_v28  ;;  %4659 = vrcp.f32 %v3172_v14  ;;  %v4040_v14 = vunpack.c.l.bf16 %v4160_v63 }
 0x434   : > { %v4650_v50 = vpop.eup %4649  ;;  %v4092_v0 = vpack.c.bf16 %v3428_v59, %v3427_v6  ;;  %v3333_v46 = vmul.f32 %v6267_v2, %v3276_v17  ;;  %v4041_v59 = vunpack.c.h.bf16 %v4160_v63  ;;  %v4161_v6 = vld [vmem:[%s6270_s18 + $0x40] sm:$0xff]  }
 0x435   : > { %v4652_v1 = vpop.eup %4651  ;;  %v3430_v40 = vadd.f32 %v4029_v62, %v3334_v10  ;;  %v3282_v27 = vmul.f32 %v4650_v50, %v6193_v26  ;;  %v3187_v42 = vpop.permute.xlu0 %3186 }
 0x436   : > { %v3182_v58 = vpop.permute.xlu1 %3181  ;;  %4171 = vst [vmem:[%s6282_s29 + $0x18] sm:$0xff] %v4092_v0   ;;  %v3429_v23 = vadd.f32 %v4028_v25, %v3333_v46  ;;  %v3280_v35 = vmul.f32 %v4652_v1, %v6191_v9  ;;  %4661 = vrcp.f32 %v3187_v42  ;;  %v4045_v46 = vunpack.c.h.bf16 %v4161_v6  ;;  %v4162_v42 = vld [vmem:[%s6270_s18 + $0x48] sm:$0xff]  }
 0x437   : > { %v3336_v15 = vmul.f32 %v6267_v2, %v3282_v27  ;;  %4663 = vrcp.f32 %v3182_v58 }
 0x438   : > { %v4654_v38 = vpop.eup %4653  ;;  %v4097_v49 = vpack.c.bf16 %v3430_v40, %v3429_v23  ;;  %v3335_v3 = vmul.f32 %v6267_v2, %v3280_v35 }
 0x439   : > { %v4656_v26 = vpop.eup %4655  ;;  %v3432_v36 = vadd.f32 %v4033_v8, %v3336_v15  ;;  %v3286_v24 = vmul.f32 %v4654_v38, %v6206_v48  ;;  %v3197_v37 = vpop.permute.xlu0 %3196  ;;  %v4044_v8 = vunpack.c.l.bf16 %v4161_v6  ;;  %v4049_v38 = vunpack.c.h.bf16 %v4162_v42 }
 0x43a   : > { %v3192_v52 = vpop.permute.xlu1 %3191  ;;  %4172 = vst [vmem:[%s6282_s29 + $0x20] sm:$0xff] %v4097_v49   ;;  %v3431_v9 = vadd.f32 %v4032_v56, %v3335_v3  ;;  %v3284_v33 = vmul.f32 %v4656_v26, %v6204_v18  ;;  %4665 = vrcp.f32 %v3197_v37 }
 0x43b   : > { %v3338_v29 = vmul.f32 %v6267_v2, %v3286_v24  ;;  %4667 = vrcp.f32 %v3192_v52  ;;  %v4163_v24 = vld [vmem:[%s6270_s18 + $0x50] sm:$0xff]  }
 0x43c   : > { %v4658_v32 = vpop.eup %4657  ;;  %v4102_v20 = vpack.c.bf16 %v3432_v36, %v3431_v9  ;;  %v3337_v43 = vmul.f32 %v6267_v2, %v3284_v33  ;;  %v4048_v36 = vunpack.c.l.bf16 %v4162_v42  ;;  %v4053_v63 = vunpack.c.h.bf16 %v4163_v24 }
 0x43d   : > { %v4660_v48 = vpop.eup %4659  ;;  %v3434_v4 = vadd.f32 %v4037_v21, %v3338_v29  ;;  %v3290_v13 = vmul.f32 %v4658_v32, %v6213_v57  ;;  %v3207_v28 = vpop.permute.xlu0 %3206 }
 0x43e   : > { %v3202_v62 = vpop.permute.xlu1 %3201  ;;  %4173 = vst [vmem:[%s6282_s29 + $0x28] sm:$0xff] %v4102_v20   ;;  %v3433_v18 = vadd.f32 %v4036_v5, %v3337_v43  ;;  %v3288_v44 = vmul.f32 %v4660_v48, %v6211_v11  ;;  %4669 = vrcp.f32 %v3207_v28  ;;  %v4052_v43 = vunpack.c.l.bf16 %v4163_v24  ;;  %v4164_v48 = vld [vmem:[%s6270_s18 + $0x58] sm:$0xff]  }
 0x43f   : > { %v3340_v17 = vmul.f32 %v6267_v2, %v3290_v13  ;;  %4671 = vrcp.f32 %v3202_v62 }
 0x440   : > { %v4662_v25 = vpop.eup %4661  ;;  %v4107_v31 = vpack.c.bf16 %v3434_v4, %v3433_v18  ;;  %v3339_v10 = vmul.f32 %v6267_v2, %v3288_v44  ;;  %v4057_v44 = vunpack.c.h.bf16 %v4164_v48 }
 0x441   : > { %v4664_v57 = vpop.eup %4663  ;;  %v3436_v50 = vadd.f32 %v4041_v59, %v3340_v17  ;;  %v3294_v0 = vmul.f32 %v4662_v25, %v6219_v7  ;;  %v3217_v1 = vpop.permute.xlu0 %3216  ;;  %v4056_v25 = vunpack.c.l.bf16 %v4164_v48 }
 0x442   : > { %v3212_v40 = vpop.permute.xlu1 %3211  ;;  %4174 = vst [vmem:[%s6282_s29 + $0x30] sm:$0xff] %v4107_v31   ;;  %v3435_v11 = vadd.f32 %v4040_v14, %v3339_v10  ;;  %v3292_v27 = vmul.f32 %v4664_v57, %v6217_v55  ;;  %4673 = vrcp.f32 %v3217_v1  ;;  %v4165_v31 = vld [vmem:[%s6270_s18 + $0x60] sm:$0xff]  }
 0x443   : > { %v3342_v58 = vmul.f32 %v6267_v2, %v3294_v0  ;;  %4675 = vrcp.f32 %v3212_v40  ;;  %v4061_v40 = vunpack.c.h.bf16 %v4165_v31  ;;  %v4060_v42 = vunpack.c.l.bf16 %v4165_v31 }
 0x444   : > { %v4666_v23 = vpop.eup %4665  ;;  %v4112_v35 = vpack.c.bf16 %v3436_v50, %v3435_v11  ;;  %v3341_v56 = vmul.f32 %v6267_v2, %v3292_v27 }
 0x445   : > { %v4668_v7 = vpop.eup %4667  ;;  %v3438_v51 = vadd.f32 %v4045_v46, %v3342_v58  ;;  %v3298_v15 = vmul.f32 %v4666_v23, %v6225_v41  ;;  %v3227_v49 = vpop.permute.xlu0 %3226  ;;  %v4166_v58 = vld [vmem:[%s6270_s18 + $0x68] sm:$0xff]  }
 0x446   : > { %v3222_v3 = vpop.permute.xlu1 %3221  ;;  %4175 = vst [vmem:[%s6282_s29 + $0x38] sm:$0xff] %v4112_v35   ;;  %v3437_v55 = vadd.f32 %v4044_v8, %v3341_v56  ;;  %v3296_v26 = vmul.f32 %v4668_v7, %v6223_v22  ;;  %4677 = vrcp.f32 %v3227_v49 }
 0x447   : > { %v3344_v21 = vmul.f32 %v6267_v2, %v3298_v15  ;;  %4679 = vrcp.f32 %v3222_v3  ;;  %v4064_v3 = vunpack.c.l.bf16 %v4166_v58 }
 0x448   : > { %v4670_v37 = vpop.eup %4669  ;;  %v4117_v52 = vpack.c.bf16 %v3438_v51, %v3437_v55  ;;  %v3343_v9 = vmul.f32 %v6267_v2, %v3296_v26  ;;  %v4167_v55 = vld [vmem:[%s6270_s18 + $0x70] sm:$0xff]  }
 0x449   : > { %v4672_v41 = vpop.eup %4671  ;;  %v3440_v33 = vadd.f32 %v4049_v38, %v3344_v21  ;;  %v3302_v5 = vmul.f32 %v4670_v37, %v6231_v30  ;;  %v3237_v29 = vpop.permute.xlu0 %3236  ;;  %v4065_v38 = vunpack.c.h.bf16 %v4166_v58 }
 0x44a   : > { %v3232_v32 = vpop.permute.xlu1 %3231  ;;  %4176 = vst [vmem:[%s6282_s29 + $0x40] sm:$0xff] %v4117_v52   ;;  %v3439_v22 = vadd.f32 %v4048_v36, %v3343_v9  ;;  %v3300_v20 = vmul.f32 %v4672_v41, %v6229_v19  ;;  %4681 = vrcp.f32 %v3237_v29 }
 0x44b   : > { %v3346_v4 = vmul.f32 %v6267_v2, %v3302_v5  ;;  %4683 = vrcp.f32 %v3232_v32  ;;  %v4068_v5 = vunpack.c.l.bf16 %v4167_v55 }
 0x44c   : > { %v4674_v13 = vpop.eup %4673  ;;  %v4122_v59 = vpack.c.bf16 %v3440_v33, %v3439_v22  ;;  %v3345_v28 = vmul.f32 %v6267_v2, %v3300_v20 }
 0x44d   : > { %v4676_v30 = vpop.eup %4675  ;;  %v3442_v62 = vadd.f32 %v4053_v63, %v3346_v4  ;;  %v3306_v18 = vmul.f32 %v4674_v13, %v6237_v16  ;;  %v3247_v14 = vpop.permute.xlu0 %3246 }
 0x44e   : > { %v3242_v6 = vpop.permute.xlu1 %3241  ;;  %4177 = vst [vmem:[%s6282_s29 + $0x48] sm:$0xff] %v4122_v59   ;;  %v3441_v19 = vadd.f32 %v4052_v43, %v3345_v28  ;;  %v3304_v17 = vmul.f32 %v4676_v30, %v6235_v53  ;;  %4685 = vrcp.f32 %v3247_v14 }
 0x44f   : > { %v3348_v10 = vmul.f32 %v6267_v2, %v3306_v18  ;;  %4687 = vrcp.f32 %v3242_v6 }
 0x450   : > { %v4678_v57 = vpop.eup %4677  ;;  %v4127_v50 = vpack.c.bf16 %v3442_v62, %v3441_v19  ;;  %v3347_v0 = vmul.f32 %v6267_v2, %v3304_v17 }
 0x451   : > { %v4680_v16 = vpop.eup %4679  ;;  %v3444_v46 = vadd.f32 %v4057_v44, %v3348_v10  ;;  %v3310_v1 = vmul.f32 %v4678_v57, %v6243_v45  ;;  %v3257_v11 = vpop.permute.xlu0 %3256 }
 0x452   : > { %v3252_v27 = vpop.permute.xlu1 %3251  ;;  %4178 = vst [vmem:[%s6282_s29 + $0x50] sm:$0xff] %v4127_v50   ;;  %v3443_v53 = vadd.f32 %v4056_v25, %v3347_v0  ;;  %v3308_v8 = vmul.f32 %v4680_v16, %v6241_v60  ;;  %4689 = vrcp.f32 %v3257_v11 }
 0x453   : > { %v3350_v23 = vmul.f32 %v6267_v2, %v3310_v1  ;;  %4691 = vrcp.f32 %v3252_v27 }
 0x454   : > { %v4682_v35 = vpop.eup %4681  ;;  %v4132_v56 = vpack.c.bf16 %v3444_v46, %v3443_v53  ;;  %v3349_v7 = vmul.f32 %v6267_v2, %v3308_v8 }
 0x455   : > { %v4684_v45 = vpop.eup %4683  ;;  %v3446_v51 = vadd.f32 %v4061_v40, %v3350_v23  ;;  %v3314_v15 = vmul.f32 %v4682_v35, %v6249_v39  ;;  %v4069_v39 = vunpack.c.h.bf16 %v4167_v55 }
 0x456   : > { %4179 = vst [vmem:[%s6282_s29 + $0x58] sm:$0xff] %v4132_v56   ;;  %v3445_v49 = vadd.f32 %v4060_v42, %v3349_v7  ;;  %v3312_v60 = vmul.f32 %v4684_v45, %v6247_v47  ;;  %v4168_v47 = vld [vmem:[%s6270_s18 + $0x78] sm:$0xff]  }
 0x457   : > { %v3352_v26 = vmul.f32 %v6267_v2, %v3314_v15 }
 0x458   : > { %v4686_v36 = vpop.eup %4685  ;;  %v4137_v24 = vpack.c.bf16 %v3446_v51, %v3445_v49  ;;  %v3351_v21 = vmul.f32 %v6267_v2, %v3312_v60 }
 0x459   : > { %v4688_v37 = vpop.eup %4687  ;;  %v3448_v52 = vadd.f32 %v4065_v38, %v3352_v26  ;;  %v3318_v9 = vmul.f32 %v4686_v36, %v6255_v61  ;;  %v4073_v61 = vunpack.c.h.bf16 %v4168_v47 }
 0x45a   : > { %4180 = vst [vmem:[%s6282_s29 + $0x60] sm:$0xff] %v4137_v24   ;;  %v3447_v41 = vadd.f32 %v4064_v3, %v3351_v21  ;;  %v3316_v33 = vmul.f32 %v4688_v37, %v6253_v12  ;;  %v4072_v12 = vunpack.c.l.bf16 %v4168_v47 }
 0x45b   : > { %v3354_v63 = vmul.f32 %v6267_v2, %v3318_v9 }
 0x45c   : > { %v4690_v29 = vpop.eup %4689  ;;  %v4142_v32 = vpack.c.bf16 %v3448_v52, %v3447_v41  ;;  %v3353_v22 = vmul.f32 %v6267_v2, %v3316_v33 }
 0x45d   : > { %v4692_v20 = vpop.eup %4691  ;;  %v3450_v43 = vadd.f32 %v4069_v39, %v3354_v63  ;;  %v3322_v48 = vmul.f32 %v4690_v29, %v6261_v54 }
 0x45e   : > { %4181 = vst [vmem:[%s6282_s29 + $0x68] sm:$0xff] %v4142_v32   ;;  %v3449_v4 = vadd.f32 %v4068_v5, %v3353_v22  ;;  %v3320_v13 = vmul.f32 %v4692_v20, %v6259_v34 }
 0x45f   : > { %v3356_v59 = vmul.f32 %v6267_v2, %v3322_v48 }
 0x460   : > { %v4147_v28 = vpack.c.bf16 %v3450_v43, %v3449_v4  ;;  %v3355_v30 = vmul.f32 %v6267_v2, %v3320_v13 }
 0x461   : > { %v3452_v62 = vadd.f32 %v4073_v61, %v3356_v59 }
 0x462   : > { %4182 = vst [vmem:[%s6282_s29 + $0x70] sm:$0xff] %v4147_v28   ;;  %v3451_v18 = vadd.f32 %v4072_v12, %v3355_v30 }
 0x464   : > { %v4152_v44 = vpack.c.bf16 %v3452_v62, %v3451_v18 }
 0x466   : > { %4183 = vst [vmem:[%s6282_s29 + $0x78] sm:$0xff] %v4152_v44  }
 0x467 PF: > { %s16_s24 = sadd.s32 1, %s4731_s24   ;;  %s6629_s20 = smov %s4719_s21 }
 0x468   : > { %p13_p10 = scmp.ge.s32.totalorder %s16_s24, 4   ;;  %s6630_s21 = smov %s4808_s28 }
 0x469   : > { %s6631_s22 = smov %s4727_s23  ;;  %s6632_s23 = smov %s6634_s4 }
 0x46a   :  { %15 = sbr.rel (!%p13_p10) target bundleno = 5 (0x5), region = 271 }

// kernel: _lambda_.17
= control target key start
LH: loop header
LB: loop body
LE: loop exit
PB: predicated region body
PF: predicated region fallthrough
CT: control target
= control target key end

     0   :  { %vm864_vm0 = vcmask 1043456   ;;  %v3927_v2 = vmov 0   ;;  %vm767_vm1 = vcmask 64512   ;;  %v2356_v35 = vlaneseq  ;;  %s4829_s1 = inlined_call_operand.vmem [shape: bf16[1,8,512], index: 1, kind: input, shape index: {}]   ;;  %s4830_s0 = inlined_call_operand.vmem [shape: bf16[1,512,8], index: 0, kind: input, shape index: {}]   ;;  %s4831_s2 = inlined_call_operand.vmem [shape: f32[1,512], index: 2, kind: input, shape index: {}]   ;;  %s4832_s3 = inlined_call_operand.vmem [shape: bf16[1,512,512], index: 3, kind: output, shape index: {}]  }
   0x1   :  { %v595_v0 = vld [vmem:[%s4829_s1] sm:$0xff]  ;;  %v596_v1 = vld [vmem:[%s4829_s1 + $0x8] sm:$0xff]  ;;  %909 = vmatprep.mubr.bf16.mxu0 %v3927_v2  ;;  %1262 = vmatprep.mubr.bf16.mxu1 %v3927_v2  ;;  %v3897_v11 = vld [vmem:[%s4830_s0 + $0x10] sm:$0xff]  }
   0x2   :  { %v3565_v3 = vcombine.high %v595_v0, %v595_v0  ;;  %v3567_v4 = vcombine.high %v596_v1, %v596_v1  ;;  %v3564_v5 = vcombine.low %v595_v0, %v595_v0  ;;  %v3566_v6 = vcombine.low %v596_v1, %v596_v1  ;;  %v3895_v9 = vld [vmem:[%s4830_s0] sm:$0xff]   ;;  %v3896_v10 = vld [vmem:[%s4830_s0 + $0x8] sm:$0xff]   ;;  %v3898_v12 = vld [vmem:[%s4830_s0 + $0x18] sm:$0xff]  }
   0x3   :  { %v3899_v13 = vld [vmem:[%s4830_s0 + $0x20] sm:$0xff]   ;;  %v3900_v14 = vld [vmem:[%s4830_s0 + $0x28] sm:$0xff]   ;;  %v3901_v15 = vld [vmem:[%s4830_s0 + $0x30] sm:$0xff]   ;;  %v2357_v36 = vshrl.u32 %v2356_v35, 7 }
   0x4   :  { %3568 = vmatprep.subr.msk.bf16.mxu0 %vm864_vm0, %v3565_v3  ;;  %3601 = vmatprep.subr.msk.bf16.mxu1 %vm864_vm0, %v3567_v4  ;;  %v866_v7 = vsel %vm864_vm0, %v3564_v5, 0  ;;  %v872_v8 = vsel %vm864_vm0, %v3566_v6, 0  ;;  %v3902_v16 = vld [vmem:[%s4830_s0 + $0x38] sm:$0xff]   ;;  %v3903_v17 = vld [vmem:[%s4830_s0 + $0x40] sm:$0xff]   ;;  %v3904_v18 = vld [vmem:[%s4830_s0 + $0x48] sm:$0xff]  }
   0x5   :  { %878 = vmatpush1.bf16.msra.mxu0 %v866_v7  ;;  %1231 = vmatpush1.bf16.msra.mxu1 %v872_v8  ;;  %v3905_v19 = vld [vmem:[%s4830_s0 + $0x50] sm:$0xff]   ;;  %v3906_v20 = vld [vmem:[%s4830_s0 + $0x58] sm:$0xff]   ;;  %v3907_v21 = vld [vmem:[%s4830_s0 + $0x60] sm:$0xff]   ;;  %v2358_v38 = vsub.s32 0, %v2357_v36  ;;  %v2366_v39 = vsub.s32 2, %v2357_v36  ;;  %v2362_v41 = vsub.s32 1, %v2357_v36 }
   0x6   :  { %v3908_v22 = vld [vmem:[%s4830_s0 + $0x68] sm:$0xff]   ;;  %v3909_v23 = vld [vmem:[%s4830_s0 + $0x70] sm:$0xff]   ;;  %v3910_v24 = vld [vmem:[%s4830_s0 + $0x78] sm:$0xff]   ;;  %v2370_v42 = vsub.s32 3, %v2357_v36 }
   0x7   :  { %v3911_v25 = vld [vmem:[%s4830_s0 + $0x80] sm:$0xff]   ;;  %v3912_v26 = vld [vmem:[%s4830_s0 + $0x88] sm:$0xff]   ;;  %v3913_v27 = vld [vmem:[%s4830_s0 + $0x90] sm:$0xff]  }
   0x8   :  { %3569 = vmatmul.mubr.msk.bf16.vlgmr.msra.gmra.mrb[0].mxu0 %vm767_vm1, %v3895_v9  ;;  %3602 = vmatmul.mubr.msk.bf16.vlgmr.msra.gmra.mrb[0].mxu1 %vm767_vm1, %v3895_v9  ;;  %v3914_v28 = vld [vmem:[%s4830_s0 + $0x98] sm:$0xff]   ;;  %v3915_v29 = vld [vmem:[%s4830_s0 + $0xa0] sm:$0xff]   ;;  %v3916_v30 = vld [vmem:[%s4830_s0 + $0xa8] sm:$0xff]  }
   0x9   :  { %919 = vmatprep.mubr.bf16.mxu0 %v3927_v2  ;;  %1272 = vmatprep.mubr.bf16.mxu1 %v3927_v2  ;;  %v3917_v31 = vld [vmem:[%s4830_s0 + $0xb0] sm:$0xff]   ;;  %v3918_v32 = vld [vmem:[%s4830_s0 + $0xb8] sm:$0xff]   ;;  %v3919_v33 = vld [vmem:[%s4830_s0 + $0xc0] sm:$0xff]  }
   0xa   :  { %v3920_v34 = vld [vmem:[%s4830_s0 + $0xc8] sm:$0xff]   ;;  %v3921_v37 = vld [vmem:[%s4830_s0 + $0xd0] sm:$0xff]   ;;  %v2354_v40 = vld [vmem:[%s4831_s2] sm:$0xf] }
   0xb   :  { %v4146_v43 = vrot.slane %v2354_v40, %v2358_v38  ;;  %v4148_v44 = vrot.slane %v2354_v40, %v2366_v39  ;;  %v4150_v45 = vrot.slane %v2354_v40, %v2362_v41  ;;  %v4152_v46 = vrot.slane %v2354_v40, %v2370_v42  ;;  %v3922_v53 = vld [vmem:[%s4830_s0 + $0xd8] sm:$0xff]  }
  0x10   :  { %3570 = vmatmul.mubr.msk.bf16.gmra.mrb[4].mxu0 %vm767_vm1, %v3896_v10  ;;  %3603 = vmatmul.mubr.msk.bf16.gmra.mrb[4].mxu1 %vm767_vm1, %v3896_v10 }
  0x11   :  { %929 = vmatprep.mubr.bf16.mxu0 %v3927_v2  ;;  %1282 = vmatprep.mubr.bf16.mxu1 %v3927_v2 }
  0x18   :  { %3571 = vmatmul.mubr.msk.bf16.gmra.mrb[8].mxu0 %vm767_vm1, %v3897_v11  ;;  %3604 = vmatmul.mubr.msk.bf16.gmra.mrb[8].mxu1 %vm767_vm1, %v3897_v11  ;;  %v3923_v11 = vld [vmem:[%s4830_s0 + $0xe0] sm:$0xff]  }
  0x19   :  { %939 = vmatprep.mubr.bf16.mxu0 %v3927_v2  ;;  %1292 = vmatprep.mubr.bf16.mxu1 %v3927_v2 }
  0x20   :  { %3572 = vmatmul.mubr.msk.bf16.gmra.mrb[12].mxu0 %vm767_vm1, %v3898_v12  ;;  %3605 = vmatmul.mubr.msk.bf16.gmra.mrb[12].mxu1 %vm767_vm1, %v3898_v12 }
  0x21   :  { %949 = vmatprep.mubr.bf16.mxu0 %v3927_v2  ;;  %1302 = vmatprep.mubr.bf16.mxu1 %v3927_v2 }
  0x28   :  { %3573 = vmatmul.mubr.msk.bf16.gmra.mrb[16].mxu0 %vm767_vm1, %v3899_v13  ;;  %3606 = vmatmul.mubr.msk.bf16.gmra.mrb[16].mxu1 %vm767_vm1, %v3899_v13 }
  0x29   :  { %959 = vmatprep.mubr.bf16.mxu0 %v3927_v2  ;;  %1312 = vmatprep.mubr.bf16.mxu1 %v3927_v2 }
  0x30   :  { %3574 = vmatmul.mubr.msk.bf16.gmra.mrb[20].mxu0 %vm767_vm1, %v3900_v14  ;;  %3607 = vmatmul.mubr.msk.bf16.gmra.mrb[20].mxu1 %vm767_vm1, %v3900_v14 }
  0x31   :  { %969 = vmatprep.mubr.bf16.mxu0 %v3927_v2  ;;  %1322 = vmatprep.mubr.bf16.mxu1 %v3927_v2 }
  0x38   :  { %3575 = vmatmul.mubr.msk.bf16.gmra.mrb[24].mxu0 %vm767_vm1, %v3901_v15  ;;  %3608 = vmatmul.mubr.msk.bf16.gmra.mrb[24].mxu1 %vm767_vm1, %v3901_v15 }
  0x39   :  { %979 = vmatprep.mubr.bf16.mxu0 %v3927_v2  ;;  %1332 = vmatprep.mubr.bf16.mxu1 %v3927_v2 }
  0x40   :  { %3576 = vmatmul.mubr.msk.bf16.gmra.mrb[28].mxu0 %vm767_vm1, %v3902_v16  ;;  %3609 = vmatmul.mubr.msk.bf16.gmra.mrb[28].mxu1 %vm767_vm1, %v3902_v16 }
  0x41   :  { %989 = vmatprep.mubr.bf16.mxu0 %v3927_v2  ;;  %1342 = vmatprep.mubr.bf16.mxu1 %v3927_v2 }
  0x48   :  { %3577 = vmatmul.mubr.msk.bf16.gmra.mrb[32].mxu0 %vm767_vm1, %v3903_v17  ;;  %3610 = vmatmul.mubr.msk.bf16.gmra.mrb[32].mxu1 %vm767_vm1, %v3903_v17 }
  0x49   :  { %999 = vmatprep.mubr.bf16.mxu0 %v3927_v2  ;;  %1352 = vmatprep.mubr.bf16.mxu1 %v3927_v2 }
  0x50   :  { %3578 = vmatmul.mubr.msk.bf16.gmra.mrb[36].mxu0 %vm767_vm1, %v3904_v18  ;;  %3611 = vmatmul.mubr.msk.bf16.gmra.mrb[36].mxu1 %vm767_vm1, %v3904_v18 }
  0x51   :  { %1009 = vmatprep.mubr.bf16.mxu0 %v3927_v2  ;;  %1362 = vmatprep.mubr.bf16.mxu1 %v3927_v2 }
  0x58   :  { %3579 = vmatmul.mubr.msk.bf16.gmra.mrb[40].mxu0 %vm767_vm1, %v3905_v19  ;;  %3612 = vmatmul.mubr.msk.bf16.gmra.mrb[40].mxu1 %vm767_vm1, %v3905_v19 }
  0x59   :  { %1019 = vmatprep.mubr.bf16.mxu0 %v3927_v2  ;;  %1372 = vmatprep.mubr.bf16.mxu1 %v3927_v2 }
  0x60   :  { %3580 = vmatmul.mubr.msk.bf16.gmra.mrb[44].mxu0 %vm767_vm1, %v3906_v20  ;;  %3613 = vmatmul.mubr.msk.bf16.gmra.mrb[44].mxu1 %vm767_vm1, %v3906_v20 }
  0x61   :  { %1029 = vmatprep.mubr.bf16.mxu0 %v3927_v2  ;;  %1382 = vmatprep.mubr.bf16.mxu1 %v3927_v2 }
  0x68   :  { %3581 = vmatmul.mubr.msk.bf16.gmra.mrb[48].mxu0 %vm767_vm1, %v3907_v21  ;;  %3614 = vmatmul.mubr.msk.bf16.gmra.mrb[48].mxu1 %vm767_vm1, %v3907_v21 }
  0x69   :  { %1039 = vmatprep.mubr.bf16.mxu0 %v3927_v2  ;;  %1392 = vmatprep.mubr.bf16.mxu1 %v3927_v2 }
  0x70   :  { %3582 = vmatmul.mubr.msk.bf16.gmra.mrb[52].mxu0 %vm767_vm1, %v3908_v22  ;;  %3615 = vmatmul.mubr.msk.bf16.gmra.mrb[52].mxu1 %vm767_vm1, %v3908_v22 }
  0x71   :  { %1049 = vmatprep.mubr.bf16.mxu0 %v3927_v2  ;;  %1402 = vmatprep.mubr.bf16.mxu1 %v3927_v2 }
  0x78   :  { %3583 = vmatmul.mubr.msk.bf16.gmra.mrb[56].mxu0 %vm767_vm1, %v3909_v23  ;;  %3616 = vmatmul.mubr.msk.bf16.gmra.mrb[56].mxu1 %vm767_vm1, %v3909_v23 }
  0x79   :  { %1059 = vmatprep.mubr.bf16.mxu0 %v3927_v2  ;;  %1412 = vmatprep.mubr.bf16.mxu1 %v3927_v2 }
  0x80   :  { %3584 = vmatmul.mubr.msk.bf16.gmra.mrb[60].mxu0 %vm767_vm1, %v3910_v24  ;;  %3617 = vmatmul.mubr.msk.bf16.gmra.mrb[60].mxu1 %vm767_vm1, %v3910_v24 }
  0x81   :  { %1069 = vmatprep.mubr.bf16.mxu0 %v3927_v2  ;;  %1422 = vmatprep.mubr.bf16.mxu1 %v3927_v2 }
  0x88   :  { %3585 = vmatmul.mubr.msk.bf16.gmra.mrb[64].mxu0 %vm767_vm1, %v3911_v25  ;;  %3618 = vmatmul.mubr.msk.bf16.gmra.mrb[64].mxu1 %vm767_vm1, %v3911_v25 }
  0x89   :  { %1079 = vmatprep.mubr.bf16.mxu0 %v3927_v2  ;;  %1432 = vmatprep.mubr.bf16.mxu1 %v3927_v2 }
  0x90   :  { %3586 = vmatmul.mubr.msk.bf16.gmra.mrb[68].mxu0 %vm767_vm1, %v3912_v26  ;;  %3619 = vmatmul.mubr.msk.bf16.gmra.mrb[68].mxu1 %vm767_vm1, %v3912_v26 }
  0x91   :  { %1089 = vmatprep.mubr.bf16.mxu0 %v3927_v2  ;;  %1442 = vmatprep.mubr.bf16.mxu1 %v3927_v2 }
  0x98   :  { %3587 = vmatmul.mubr.msk.bf16.gmra.mrb[72].mxu0 %vm767_vm1, %v3913_v27  ;;  %3620 = vmatmul.mubr.msk.bf16.gmra.mrb[72].mxu1 %vm767_vm1, %v3913_v27 }
  0x99   :  { %1099 = vmatprep.mubr.bf16.mxu0 %v3927_v2  ;;  %1452 = vmatprep.mubr.bf16.mxu1 %v3927_v2 }
  0xa0   :  { %3588 = vmatmul.mubr.msk.bf16.gmra.mrb[76].mxu0 %vm767_vm1, %v3914_v28  ;;  %3621 = vmatmul.mubr.msk.bf16.gmra.mrb[76].mxu1 %vm767_vm1, %v3914_v28 }
  0xa1   :  { %1109 = vmatprep.mubr.bf16.mxu0 %v3927_v2  ;;  %1462 = vmatprep.mubr.bf16.mxu1 %v3927_v2 }
  0xa8   :  { %3589 = vmatmul.mubr.msk.bf16.gmra.mrb[80].mxu0 %vm767_vm1, %v3915_v29  ;;  %3622 = vmatmul.mubr.msk.bf16.gmra.mrb[80].mxu1 %vm767_vm1, %v3915_v29 }
  0xa9   :  { %1119 = vmatprep.mubr.bf16.mxu0 %v3927_v2  ;;  %1472 = vmatprep.mubr.bf16.mxu1 %v3927_v2 }
  0xb0   :  { %3590 = vmatmul.mubr.msk.bf16.gmra.mrb[84].mxu0 %vm767_vm1, %v3916_v30  ;;  %3623 = vmatmul.mubr.msk.bf16.gmra.mrb[84].mxu1 %vm767_vm1, %v3916_v30 }
  0xb1   :  { %1129 = vmatprep.mubr.bf16.mxu0 %v3927_v2  ;;  %1482 = vmatprep.mubr.bf16.mxu1 %v3927_v2 }
  0xb8   :  { %3591 = vmatmul.mubr.msk.bf16.gmra.mrb[88].mxu0 %vm767_vm1, %v3917_v31  ;;  %3624 = vmatmul.mubr.msk.bf16.gmra.mrb[88].mxu1 %vm767_vm1, %v3917_v31 }
  0xb9   :  { %1139 = vmatprep.mubr.bf16.mxu0 %v3927_v2  ;;  %1492 = vmatprep.mubr.bf16.mxu1 %v3927_v2 }
  0xc0   :  { %3592 = vmatmul.mubr.msk.bf16.gmra.mrb[92].mxu0 %vm767_vm1, %v3918_v32  ;;  %3625 = vmatmul.mubr.msk.bf16.gmra.mrb[92].mxu1 %vm767_vm1, %v3918_v32  ;;  %v3924_v32 = vld [vmem:[%s4830_s0 + $0xe8] sm:$0xff]  }
  0xc1   :  { %1149 = vmatprep.mubr.bf16.mxu0 %v3927_v2  ;;  %1502 = vmatprep.mubr.bf16.mxu1 %v3927_v2 }
  0xc8   :  { %3593 = vmatmul.mubr.msk.bf16.gmra.mrb[96].mxu0 %vm767_vm1, %v3919_v33  ;;  %3626 = vmatmul.mubr.msk.bf16.gmra.mrb[96].mxu1 %vm767_vm1, %v3919_v33 }
  0xc9   :  { %1159 = vmatprep.mubr.bf16.mxu0 %v3927_v2  ;;  %1512 = vmatprep.mubr.bf16.mxu1 %v3927_v2 }
  0xd0   :  { %3594 = vmatmul.mubr.msk.bf16.gmra.mrb[100].mxu0 %vm767_vm1, %v3920_v34  ;;  %3627 = vmatmul.mubr.msk.bf16.gmra.mrb[100].mxu1 %vm767_vm1, %v3920_v34 }
  0xd1   :  { %1169 = vmatprep.mubr.bf16.mxu0 %v3927_v2  ;;  %1522 = vmatprep.mubr.bf16.mxu1 %v3927_v2 }
  0xd8   :  { %3595 = vmatmul.mubr.msk.bf16.gmra.mrb[104].mxu0 %vm767_vm1, %v3921_v37  ;;  %3628 = vmatmul.mubr.msk.bf16.gmra.mrb[104].mxu1 %vm767_vm1, %v3921_v37 }
  0xd9   :  { %1179 = vmatprep.mubr.bf16.mxu0 %v3927_v2  ;;  %1532 = vmatprep.mubr.bf16.mxu1 %v3927_v2 }
  0xdb   :  { %v911_v47 = vpop.f32.mrb[0].mxu0  ;;  %v1264_v48 = vpop.f32.mrb[0].mxu1 }
  0xdc   :  { %v2376_v49 = vadd.f32 %v4146_v43, %v911_v47  ;;  %v2378_v50 = vadd.f32 %v4148_v44, %v1264_v48  ;;  %v913_v51 = vpop.f32.mrb[1].mxu0  ;;  %v1266_v52 = vpop.f32.mrb[1].mxu1 }
  0xdd   :  { %v2377_v54 = vadd.f32 %v4150_v45, %v913_v51  ;;  %v2379_v55 = vadd.f32 %v4152_v46, %v1266_v52  ;;  %v915_v56 = vpop.f32.mrb[2].mxu0  ;;  %v1268_v57 = vpop.f32.mrb[2].mxu1 }
  0xde   :  { %v2380_v58 = vadd.f32 %v4146_v43, %v915_v56  ;;  %v2382_v59 = vadd.f32 %v4148_v44, %v1268_v57  ;;  %v917_v60 = vpop.f32.mrb[3].mxu0  ;;  %v1270_v61 = vpop.f32.mrb[3].mxu1  ;;  %v3925_v57 = vld [vmem:[%s4830_s0 + $0xf0] sm:$0xff]  }
  0xdf   :  { %v3762_v62 = vpack.c.bf16 %v2377_v54, %v2376_v49  ;;  %v3763_v63 = vpack.c.bf16 %v2379_v55, %v2378_v50  ;;  %v2381_v0 = vadd.f32 %v4150_v45, %v917_v60  ;;  %v2383_v1 = vadd.f32 %v4152_v46, %v1270_v61 }
  0xe0   :  { %3596 = vmatmul.mubr.msk.bf16.gmra.mrb[108].mxu0 %vm767_vm1, %v3922_v53  ;;  %3629 = vmatmul.mubr.msk.bf16.gmra.mrb[108].mxu1 %vm767_vm1, %v3922_v53 }
  0xe1   :  { %3400 = vst [vmem:[%s4832_s3] sm:$0xff] %v3762_v62  ;;  %3401 = vst [vmem:[%s4832_s3 + $0x8] sm:$0xff] %v3763_v63  ;;  %v3764_v3 = vpack.c.bf16 %v2381_v0, %v2380_v58  ;;  %v3765_v4 = vpack.c.bf16 %v2383_v1, %v2382_v59  ;;  %1189 = vmatprep.mubr.bf16.mxu0 %v3927_v2  ;;  %1542 = vmatprep.mubr.bf16.mxu1 %v3927_v2 }
  0xe3   :  { %3402 = vst [vmem:[%s4832_s3 + $0x10] sm:$0xff] %v3764_v3  ;;  %3403 = vst [vmem:[%s4832_s3 + $0x18] sm:$0xff] %v3765_v4  ;;  %v921_v5 = vpop.f32.mrb[4].mxu0  ;;  %v1274_v6 = vpop.f32.mrb[4].mxu1 }
  0xe4   :  { %v2384_v7 = vadd.f32 %v4146_v43, %v921_v5  ;;  %v2386_v8 = vadd.f32 %v4148_v44, %v1274_v6  ;;  %v923_v9 = vpop.f32.mrb[5].mxu0  ;;  %v1276_v10 = vpop.f32.mrb[5].mxu1 }
  0xe5   :  { %v2385_v12 = vadd.f32 %v4150_v45, %v923_v9  ;;  %v2387_v13 = vadd.f32 %v4152_v46, %v1276_v10  ;;  %v925_v14 = vpop.f32.mrb[6].mxu0  ;;  %v1278_v15 = vpop.f32.mrb[6].mxu1 }
  0xe6   :  { %v2388_v16 = vadd.f32 %v4146_v43, %v925_v14  ;;  %v2390_v17 = vadd.f32 %v4148_v44, %v1278_v15  ;;  %v927_v18 = vpop.f32.mrb[7].mxu0  ;;  %v1280_v19 = vpop.f32.mrb[7].mxu1 }
  0xe7   :  { %v3766_v20 = vpack.c.bf16 %v2385_v12, %v2384_v7  ;;  %v3767_v21 = vpack.c.bf16 %v2387_v13, %v2386_v8  ;;  %v2389_v22 = vadd.f32 %v4150_v45, %v927_v18  ;;  %v2391_v23 = vadd.f32 %v4152_v46, %v1280_v19 }
  0xe8   :  { %3597 = vmatmul.mubr.msk.bf16.gmra.mrb[112].mxu0 %vm767_vm1, %v3923_v11  ;;  %3630 = vmatmul.mubr.msk.bf16.gmra.mrb[112].mxu1 %vm767_vm1, %v3923_v11 }
  0xe9   :  { %3404 = vst [vmem:[%s4832_s3 + $0x20] sm:$0xff] %v3766_v20  ;;  %3405 = vst [vmem:[%s4832_s3 + $0x28] sm:$0xff] %v3767_v21  ;;  %v3768_v24 = vpack.c.bf16 %v2389_v22, %v2388_v16  ;;  %v3769_v25 = vpack.c.bf16 %v2391_v23, %v2390_v17  ;;  %1199 = vmatprep.mubr.bf16.mxu0 %v3927_v2  ;;  %1552 = vmatprep.mubr.bf16.mxu1 %v3927_v2 }
  0xeb   :  { %3406 = vst [vmem:[%s4832_s3 + $0x30] sm:$0xff] %v3768_v24  ;;  %3407 = vst [vmem:[%s4832_s3 + $0x38] sm:$0xff] %v3769_v25  ;;  %v931_v26 = vpop.f32.mrb[8].mxu0  ;;  %v1284_v27 = vpop.f32.mrb[8].mxu1 }
  0xec   :  { %v2392_v28 = vadd.f32 %v4146_v43, %v931_v26  ;;  %v2394_v29 = vadd.f32 %v4148_v44, %v1284_v27  ;;  %v933_v30 = vpop.f32.mrb[9].mxu0  ;;  %v1286_v31 = vpop.f32.mrb[9].mxu1 }
  0xed   :  { %v2393_v33 = vadd.f32 %v4150_v45, %v933_v30  ;;  %v2395_v34 = vadd.f32 %v4152_v46, %v1286_v31  ;;  %v935_v35 = vpop.f32.mrb[10].mxu0  ;;  %v1288_v36 = vpop.f32.mrb[10].mxu1 }
  0xee   :  { %v2396_v37 = vadd.f32 %v4146_v43, %v935_v35  ;;  %v2398_v38 = vadd.f32 %v4148_v44, %v1288_v36  ;;  %v937_v39 = vpop.f32.mrb[11].mxu0  ;;  %v1290_v40 = vpop.f32.mrb[11].mxu1 }
  0xef   :  { %v3770_v41 = vpack.c.bf16 %v2393_v33, %v2392_v28  ;;  %v3771_v42 = vpack.c.bf16 %v2395_v34, %v2394_v29  ;;  %v2397_v47 = vadd.f32 %v4150_v45, %v937_v39  ;;  %v2399_v48 = vadd.f32 %v4152_v46, %v1290_v40 }
  0xf0   :  { %3598 = vmatmul.mubr.msk.bf16.gmra.mrb[116].mxu0 %vm767_vm1, %v3924_v32  ;;  %3631 = vmatmul.mubr.msk.bf16.gmra.mrb[116].mxu1 %vm767_vm1, %v3924_v32 }
  0xf1   :  { %3408 = vst [vmem:[%s4832_s3 + $0x40] sm:$0xff] %v3770_v41  ;;  %3409 = vst [vmem:[%s4832_s3 + $0x48] sm:$0xff] %v3771_v42  ;;  %v3772_v49 = vpack.c.bf16 %v2397_v47, %v2396_v37  ;;  %v3773_v50 = vpack.c.bf16 %v2399_v48, %v2398_v38  ;;  %1209 = vmatprep.mubr.bf16.mxu0 %v3927_v2  ;;  %1562 = vmatprep.mubr.bf16.mxu1 %v3927_v2 }
  0xf3   :  { %3410 = vst [vmem:[%s4832_s3 + $0x50] sm:$0xff] %v3772_v49  ;;  %3411 = vst [vmem:[%s4832_s3 + $0x58] sm:$0xff] %v3773_v50  ;;  %v941_v51 = vpop.f32.mrb[12].mxu0  ;;  %v1294_v52 = vpop.f32.mrb[12].mxu1 }
  0xf4   :  { %v2400_v53 = vadd.f32 %v4146_v43, %v941_v51  ;;  %v2402_v54 = vadd.f32 %v4148_v44, %v1294_v52  ;;  %v943_v55 = vpop.f32.mrb[13].mxu0  ;;  %v1296_v56 = vpop.f32.mrb[13].mxu1 }
  0xf5   :  { %v2401_v58 = vadd.f32 %v4150_v45, %v943_v55  ;;  %v2403_v59 = vadd.f32 %v4152_v46, %v1296_v56  ;;  %v945_v60 = vpop.f32.mrb[14].mxu0  ;;  %v1298_v61 = vpop.f32.mrb[14].mxu1 }
  0xf6   :  { %v2404_v62 = vadd.f32 %v4146_v43, %v945_v60  ;;  %v2406_v63 = vadd.f32 %v4148_v44, %v1298_v61  ;;  %v947_v0 = vpop.f32.mrb[15].mxu0  ;;  %v1300_v1 = vpop.f32.mrb[15].mxu1 }
  0xf7   :  { %v3774_v3 = vpack.c.bf16 %v2401_v58, %v2400_v53  ;;  %v3775_v4 = vpack.c.bf16 %v2403_v59, %v2402_v54  ;;  %v2405_v5 = vadd.f32 %v4150_v45, %v947_v0  ;;  %v2407_v6 = vadd.f32 %v4152_v46, %v1300_v1 }
  0xf8   :  { %3599 = vmatmul.mubr.msk.bf16.gmra.mrb[120].mxu0 %vm767_vm1, %v3925_v57  ;;  %3632 = vmatmul.mubr.msk.bf16.gmra.mrb[120].mxu1 %vm767_vm1, %v3925_v57 }
  0xf9   :  { %3412 = vst [vmem:[%s4832_s3 + $0x60] sm:$0xff] %v3774_v3  ;;  %3413 = vst [vmem:[%s4832_s3 + $0x68] sm:$0xff] %v3775_v4  ;;  %v3776_v7 = vpack.c.bf16 %v2405_v5, %v2404_v62  ;;  %v3777_v8 = vpack.c.bf16 %v2407_v6, %v2406_v63  ;;  %1219 = vmatprep.mubr.bf16.mxu0 %v3927_v2  ;;  %1572 = vmatprep.mubr.bf16.mxu1 %v3927_v2  ;;  %v3926_v2 = vld [vmem:[%s4830_s0 + $0xf8] sm:$0xff]  }
  0xfb   :  { %3414 = vst [vmem:[%s4832_s3 + $0x70] sm:$0xff] %v3776_v7  ;;  %3415 = vst [vmem:[%s4832_s3 + $0x78] sm:$0xff] %v3777_v8  ;;  %v951_v9 = vpop.f32.mrb[16].mxu0  ;;  %v1304_v10 = vpop.f32.mrb[16].mxu1 }
  0xfc   :  { %v2408_v11 = vadd.f32 %v4146_v43, %v951_v9  ;;  %v2410_v12 = vadd.f32 %v4148_v44, %v1304_v10  ;;  %v953_v13 = vpop.f32.mrb[17].mxu0  ;;  %v1306_v14 = vpop.f32.mrb[17].mxu1 }
  0xfd   :  { %v2409_v15 = vadd.f32 %v4150_v45, %v953_v13  ;;  %v2411_v16 = vadd.f32 %v4152_v46, %v1306_v14  ;;  %v955_v17 = vpop.f32.mrb[18].mxu0  ;;  %v1308_v18 = vpop.f32.mrb[18].mxu1 }
  0xfe   :  { %v2412_v19 = vadd.f32 %v4146_v43, %v955_v17  ;;  %v2414_v20 = vadd.f32 %v4148_v44, %v1308_v18  ;;  %v957_v21 = vpop.f32.mrb[19].mxu0  ;;  %v1310_v22 = vpop.f32.mrb[19].mxu1 }
  0xff   :  { %v3778_v23 = vpack.c.bf16 %v2409_v15, %v2408_v11  ;;  %v3779_v24 = vpack.c.bf16 %v2411_v16, %v2410_v12  ;;  %v2413_v25 = vadd.f32 %v4150_v45, %v957_v21  ;;  %v2415_v26 = vadd.f32 %v4152_v46, %v1310_v22 }
 0x100   :  { %3600 = vmatmul.mubr.msk.bf16.gmra.mrb[124].mxu0 %vm767_vm1, %v3926_v2  ;;  %3633 = vmatmul.mubr.msk.bf16.gmra.mrb[124].mxu1 %vm767_vm1, %v3926_v2 }
 0x101   :  { %3416 = vst [vmem:[%s4832_s3 + $0x80] sm:$0xff] %v3778_v23  ;;  %3417 = vst [vmem:[%s4832_s3 + $0x88] sm:$0xff] %v3779_v24  ;;  %v3780_v27 = vpack.c.bf16 %v2413_v25, %v2412_v19  ;;  %v3781_v28 = vpack.c.bf16 %v2415_v26, %v2414_v20 }
 0x103   :  { %3418 = vst [vmem:[%s4832_s3 + $0x90] sm:$0xff] %v3780_v27  ;;  %3419 = vst [vmem:[%s4832_s3 + $0x98] sm:$0xff] %v3781_v28  ;;  %v961_v29 = vpop.f32.mrb[20].mxu0  ;;  %v1314_v30 = vpop.f32.mrb[20].mxu1 }
 0x104   :  { %v2416_v31 = vadd.f32 %v4146_v43, %v961_v29  ;;  %v2418_v32 = vadd.f32 %v4148_v44, %v1314_v30  ;;  %v963_v33 = vpop.f32.mrb[21].mxu0  ;;  %v1316_v34 = vpop.f32.mrb[21].mxu1 }
 0x105   :  { %v2417_v35 = vadd.f32 %v4150_v45, %v963_v33  ;;  %v2419_v36 = vadd.f32 %v4152_v46, %v1316_v34  ;;  %v965_v37 = vpop.f32.mrb[22].mxu0  ;;  %v1318_v38 = vpop.f32.mrb[22].mxu1 }
 0x106   :  { %v2420_v39 = vadd.f32 %v4146_v43, %v965_v37  ;;  %v2422_v40 = vadd.f32 %v4148_v44, %v1318_v38  ;;  %v967_v41 = vpop.f32.mrb[23].mxu0  ;;  %v1320_v42 = vpop.f32.mrb[23].mxu1 }
 0x107   :  { %v3782_v47 = vpack.c.bf16 %v2417_v35, %v2416_v31  ;;  %v3783_v48 = vpack.c.bf16 %v2419_v36, %v2418_v32  ;;  %v2421_v49 = vadd.f32 %v4150_v45, %v967_v41  ;;  %v2423_v50 = vadd.f32 %v4152_v46, %v1320_v42 }
 0x109   :  { %3420 = vst [vmem:[%s4832_s3 + $0xa0] sm:$0xff] %v3782_v47  ;;  %3421 = vst [vmem:[%s4832_s3 + $0xa8] sm:$0xff] %v3783_v48  ;;  %v3784_v51 = vpack.c.bf16 %v2421_v49, %v2420_v39  ;;  %v3785_v52 = vpack.c.bf16 %v2423_v50, %v2422_v40 }
 0x10b   :  { %3422 = vst [vmem:[%s4832_s3 + $0xb0] sm:$0xff] %v3784_v51  ;;  %3423 = vst [vmem:[%s4832_s3 + $0xb8] sm:$0xff] %v3785_v52  ;;  %v971_v53 = vpop.f32.mrb[24].mxu0  ;;  %v1324_v54 = vpop.f32.mrb[24].mxu1 }
 0x10c   :  { %v2424_v55 = vadd.f32 %v4146_v43, %v971_v53  ;;  %v2426_v56 = vadd.f32 %v4148_v44, %v1324_v54  ;;  %v973_v57 = vpop.f32.mrb[25].mxu0  ;;  %v1326_v58 = vpop.f32.mrb[25].mxu1 }
 0x10d   :  { %v2425_v59 = vadd.f32 %v4150_v45, %v973_v57  ;;  %v2427_v60 = vadd.f32 %v4152_v46, %v1326_v58  ;;  %v975_v61 = vpop.f32.mrb[26].mxu0  ;;  %v1328_v62 = vpop.f32.mrb[26].mxu1 }
 0x10e   :  { %v2428_v63 = vadd.f32 %v4146_v43, %v975_v61  ;;  %v2430_v0 = vadd.f32 %v4148_v44, %v1328_v62  ;;  %v977_v1 = vpop.f32.mrb[27].mxu0  ;;  %v1330_v3 = vpop.f32.mrb[27].mxu1 }
 0x10f   :  { %v3786_v4 = vpack.c.bf16 %v2425_v59, %v2424_v55  ;;  %v3787_v5 = vpack.c.bf16 %v2427_v60, %v2426_v56  ;;  %v2429_v6 = vadd.f32 %v4150_v45, %v977_v1  ;;  %v2431_v7 = vadd.f32 %v4152_v46, %v1330_v3 }
 0x111   :  { %3424 = vst [vmem:[%s4832_s3 + $0xc0] sm:$0xff] %v3786_v4  ;;  %3425 = vst [vmem:[%s4832_s3 + $0xc8] sm:$0xff] %v3787_v5  ;;  %v3788_v8 = vpack.c.bf16 %v2429_v6, %v2428_v63  ;;  %v3789_v9 = vpack.c.bf16 %v2431_v7, %v2430_v0 }
 0x113   :  { %3426 = vst [vmem:[%s4832_s3 + $0xd0] sm:$0xff] %v3788_v8  ;;  %3427 = vst [vmem:[%s4832_s3 + $0xd8] sm:$0xff] %v3789_v9  ;;  %v981_v10 = vpop.f32.mrb[28].mxu0  ;;  %v1334_v11 = vpop.f32.mrb[28].mxu1 }
 0x114   :  { %v2432_v12 = vadd.f32 %v4146_v43, %v981_v10  ;;  %v2434_v13 = vadd.f32 %v4148_v44, %v1334_v11  ;;  %v983_v14 = vpop.f32.mrb[29].mxu0  ;;  %v1336_v2 = vpop.f32.mrb[29].mxu1 }
 0x115   :  { %v2433_v15 = vadd.f32 %v4150_v45, %v983_v14  ;;  %v2435_v16 = vadd.f32 %v4152_v46, %v1336_v2  ;;  %v985_v17 = vpop.f32.mrb[30].mxu0  ;;  %v1338_v18 = vpop.f32.mrb[30].mxu1 }
 0x116   :  { %v2436_v19 = vadd.f32 %v4146_v43, %v985_v17  ;;  %v2438_v20 = vadd.f32 %v4148_v44, %v1338_v18  ;;  %v987_v21 = vpop.f32.mrb[31].mxu0  ;;  %v1340_v22 = vpop.f32.mrb[31].mxu1 }
 0x117   :  { %v3790_v23 = vpack.c.bf16 %v2433_v15, %v2432_v12  ;;  %v3791_v24 = vpack.c.bf16 %v2435_v16, %v2434_v13  ;;  %v2437_v25 = vadd.f32 %v4150_v45, %v987_v21  ;;  %v2439_v26 = vadd.f32 %v4152_v46, %v1340_v22 }
 0x119   :  { %3428 = vst [vmem:[%s4832_s3 + $0xe0] sm:$0xff] %v3790_v23  ;;  %3429 = vst [vmem:[%s4832_s3 + $0xe8] sm:$0xff] %v3791_v24  ;;  %v3792_v27 = vpack.c.bf16 %v2437_v25, %v2436_v19  ;;  %v3793_v28 = vpack.c.bf16 %v2439_v26, %v2438_v20 }
 0x11b   :  { %3430 = vst [vmem:[%s4832_s3 + $0xf0] sm:$0xff] %v3792_v27  ;;  %3431 = vst [vmem:[%s4832_s3 + $0xf8] sm:$0xff] %v3793_v28  ;;  %v991_v29 = vpop.f32.mrb[32].mxu0  ;;  %v1344_v30 = vpop.f32.mrb[32].mxu1 }
 0x11c   :  { %v2440_v31 = vadd.f32 %v4146_v43, %v991_v29  ;;  %v2442_v32 = vadd.f32 %v4148_v44, %v1344_v30  ;;  %v993_v33 = vpop.f32.mrb[33].mxu0  ;;  %v1346_v34 = vpop.f32.mrb[33].mxu1 }
 0x11d   :  { %v2441_v35 = vadd.f32 %v4150_v45, %v993_v33  ;;  %v2443_v36 = vadd.f32 %v4152_v46, %v1346_v34  ;;  %v995_v37 = vpop.f32.mrb[34].mxu0  ;;  %v1348_v38 = vpop.f32.mrb[34].mxu1 }
 0x11e   :  { %v2444_v39 = vadd.f32 %v4146_v43, %v995_v37  ;;  %v2446_v40 = vadd.f32 %v4148_v44, %v1348_v38  ;;  %v997_v41 = vpop.f32.mrb[35].mxu0  ;;  %v1350_v42 = vpop.f32.mrb[35].mxu1 }
 0x11f   :  { %v3794_v47 = vpack.c.bf16 %v2441_v35, %v2440_v31  ;;  %v3795_v48 = vpack.c.bf16 %v2443_v36, %v2442_v32  ;;  %v2445_v49 = vadd.f32 %v4150_v45, %v997_v41  ;;  %v2447_v50 = vadd.f32 %v4152_v46, %v1350_v42 }
 0x121   :  { %3432 = vst [vmem:[%s4832_s3 + $0x100] sm:$0xff] %v3794_v47  ;;  %3433 = vst [vmem:[%s4832_s3 + $0x108] sm:$0xff] %v3795_v48  ;;  %v3796_v51 = vpack.c.bf16 %v2445_v49, %v2444_v39  ;;  %v3797_v52 = vpack.c.bf16 %v2447_v50, %v2446_v40 }
 0x123   :  { %3434 = vst [vmem:[%s4832_s3 + $0x110] sm:$0xff] %v3796_v51  ;;  %3435 = vst [vmem:[%s4832_s3 + $0x118] sm:$0xff] %v3797_v52  ;;  %v1001_v53 = vpop.f32.mrb[36].mxu0  ;;  %v1354_v54 = vpop.f32.mrb[36].mxu1 }
 0x124   :  { %v2448_v55 = vadd.f32 %v4146_v43, %v1001_v53  ;;  %v2450_v56 = vadd.f32 %v4148_v44, %v1354_v54  ;;  %v1003_v57 = vpop.f32.mrb[37].mxu0  ;;  %v1356_v58 = vpop.f32.mrb[37].mxu1 }
 0x125   :  { %v2449_v59 = vadd.f32 %v4150_v45, %v1003_v57  ;;  %v2451_v60 = vadd.f32 %v4152_v46, %v1356_v58  ;;  %v1005_v61 = vpop.f32.mrb[38].mxu0  ;;  %v1358_v62 = vpop.f32.mrb[38].mxu1 }
 0x126   :  { %v2452_v63 = vadd.f32 %v4146_v43, %v1005_v61  ;;  %v2454_v0 = vadd.f32 %v4148_v44, %v1358_v62  ;;  %v1007_v1 = vpop.f32.mrb[39].mxu0  ;;  %v1360_v3 = vpop.f32.mrb[39].mxu1 }
 0x127   :  { %v3798_v4 = vpack.c.bf16 %v2449_v59, %v2448_v55  ;;  %v3799_v5 = vpack.c.bf16 %v2451_v60, %v2450_v56  ;;  %v2453_v6 = vadd.f32 %v4150_v45, %v1007_v1  ;;  %v2455_v7 = vadd.f32 %v4152_v46, %v1360_v3 }
 0x129   :  { %3436 = vst [vmem:[%s4832_s3 + $0x120] sm:$0xff] %v3798_v4  ;;  %3437 = vst [vmem:[%s4832_s3 + $0x128] sm:$0xff] %v3799_v5  ;;  %v3800_v8 = vpack.c.bf16 %v2453_v6, %v2452_v63  ;;  %v3801_v9 = vpack.c.bf16 %v2455_v7, %v2454_v0 }
 0x12b   :  { %3438 = vst [vmem:[%s4832_s3 + $0x130] sm:$0xff] %v3800_v8  ;;  %3439 = vst [vmem:[%s4832_s3 + $0x138] sm:$0xff] %v3801_v9  ;;  %v1011_v10 = vpop.f32.mrb[40].mxu0  ;;  %v1364_v11 = vpop.f32.mrb[40].mxu1 }
 0x12c   :  { %v2456_v12 = vadd.f32 %v4146_v43, %v1011_v10  ;;  %v2458_v13 = vadd.f32 %v4148_v44, %v1364_v11  ;;  %v1013_v14 = vpop.f32.mrb[41].mxu0  ;;  %v1366_v2 = vpop.f32.mrb[41].mxu1 }
 0x12d   :  { %v2457_v15 = vadd.f32 %v4150_v45, %v1013_v14  ;;  %v2459_v16 = vadd.f32 %v4152_v46, %v1366_v2  ;;  %v1015_v17 = vpop.f32.mrb[42].mxu0  ;;  %v1368_v18 = vpop.f32.mrb[42].mxu1 }
 0x12e   :  { %v2460_v19 = vadd.f32 %v4146_v43, %v1015_v17  ;;  %v2462_v20 = vadd.f32 %v4148_v44, %v1368_v18  ;;  %v1017_v21 = vpop.f32.mrb[43].mxu0  ;;  %v1370_v22 = vpop.f32.mrb[43].mxu1 }
 0x12f   :  { %v3802_v23 = vpack.c.bf16 %v2457_v15, %v2456_v12  ;;  %v3803_v24 = vpack.c.bf16 %v2459_v16, %v2458_v13  ;;  %v2461_v25 = vadd.f32 %v4150_v45, %v1017_v21  ;;  %v2463_v26 = vadd.f32 %v4152_v46, %v1370_v22 }
 0x131   :  { %3440 = vst [vmem:[%s4832_s3 + $0x140] sm:$0xff] %v3802_v23  ;;  %3441 = vst [vmem:[%s4832_s3 + $0x148] sm:$0xff] %v3803_v24  ;;  %v3804_v27 = vpack.c.bf16 %v2461_v25, %v2460_v19  ;;  %v3805_v28 = vpack.c.bf16 %v2463_v26, %v2462_v20 }
 0x133   :  { %3442 = vst [vmem:[%s4832_s3 + $0x150] sm:$0xff] %v3804_v27  ;;  %3443 = vst [vmem:[%s4832_s3 + $0x158] sm:$0xff] %v3805_v28  ;;  %v1021_v29 = vpop.f32.mrb[44].mxu0  ;;  %v1374_v30 = vpop.f32.mrb[44].mxu1 }
 0x134   :  { %v2464_v31 = vadd.f32 %v4146_v43, %v1021_v29  ;;  %v2466_v32 = vadd.f32 %v4148_v44, %v1374_v30  ;;  %v1023_v33 = vpop.f32.mrb[45].mxu0  ;;  %v1376_v34 = vpop.f32.mrb[45].mxu1 }
 0x135   :  { %v2465_v35 = vadd.f32 %v4150_v45, %v1023_v33  ;;  %v2467_v36 = vadd.f32 %v4152_v46, %v1376_v34  ;;  %v1025_v37 = vpop.f32.mrb[46].mxu0  ;;  %v1378_v38 = vpop.f32.mrb[46].mxu1 }
 0x136   :  { %v2468_v39 = vadd.f32 %v4146_v43, %v1025_v37  ;;  %v2470_v40 = vadd.f32 %v4148_v44, %v1378_v38  ;;  %v1027_v41 = vpop.f32.mrb[47].mxu0  ;;  %v1380_v42 = vpop.f32.mrb[47].mxu1 }
 0x137   :  { %v3806_v47 = vpack.c.bf16 %v2465_v35, %v2464_v31  ;;  %v3807_v48 = vpack.c.bf16 %v2467_v36, %v2466_v32  ;;  %v2469_v49 = vadd.f32 %v4150_v45, %v1027_v41  ;;  %v2471_v50 = vadd.f32 %v4152_v46, %v1380_v42 }
 0x139   :  { %3444 = vst [vmem:[%s4832_s3 + $0x160] sm:$0xff] %v3806_v47  ;;  %3445 = vst [vmem:[%s4832_s3 + $0x168] sm:$0xff] %v3807_v48  ;;  %v3808_v51 = vpack.c.bf16 %v2469_v49, %v2468_v39  ;;  %v3809_v52 = vpack.c.bf16 %v2471_v50, %v2470_v40 }
 0x13b   :  { %3446 = vst [vmem:[%s4832_s3 + $0x170] sm:$0xff] %v3808_v51  ;;  %3447 = vst [vmem:[%s4832_s3 + $0x178] sm:$0xff] %v3809_v52  ;;  %v1031_v53 = vpop.f32.mrb[48].mxu0  ;;  %v1384_v54 = vpop.f32.mrb[48].mxu1 }
 0x13c   :  { %v2472_v55 = vadd.f32 %v4146_v43, %v1031_v53  ;;  %v2474_v56 = vadd.f32 %v4148_v44, %v1384_v54  ;;  %v1033_v57 = vpop.f32.mrb[49].mxu0  ;;  %v1386_v58 = vpop.f32.mrb[49].mxu1 }
 0x13d   :  { %v2473_v59 = vadd.f32 %v4150_v45, %v1033_v57  ;;  %v2475_v60 = vadd.f32 %v4152_v46, %v1386_v58  ;;  %v1035_v61 = vpop.f32.mrb[50].mxu0  ;;  %v1388_v62 = vpop.f32.mrb[50].mxu1 }
 0x13e   :  { %v2476_v63 = vadd.f32 %v4146_v43, %v1035_v61  ;;  %v2478_v0 = vadd.f32 %v4148_v44, %v1388_v62  ;;  %v1037_v1 = vpop.f32.mrb[51].mxu0  ;;  %v1390_v3 = vpop.f32.mrb[51].mxu1 }
 0x13f   :  { %v3810_v4 = vpack.c.bf16 %v2473_v59, %v2472_v55  ;;  %v3811_v5 = vpack.c.bf16 %v2475_v60, %v2474_v56  ;;  %v2477_v6 = vadd.f32 %v4150_v45, %v1037_v1  ;;  %v2479_v7 = vadd.f32 %v4152_v46, %v1390_v3 }
 0x141   :  { %3448 = vst [vmem:[%s4832_s3 + $0x180] sm:$0xff] %v3810_v4  ;;  %3449 = vst [vmem:[%s4832_s3 + $0x188] sm:$0xff] %v3811_v5  ;;  %v3812_v8 = vpack.c.bf16 %v2477_v6, %v2476_v63  ;;  %v3813_v9 = vpack.c.bf16 %v2479_v7, %v2478_v0 }
 0x143   :  { %3450 = vst [vmem:[%s4832_s3 + $0x190] sm:$0xff] %v3812_v8  ;;  %3451 = vst [vmem:[%s4832_s3 + $0x198] sm:$0xff] %v3813_v9  ;;  %v1041_v10 = vpop.f32.mrb[52].mxu0  ;;  %v1394_v11 = vpop.f32.mrb[52].mxu1 }
 0x144   :  { %v2480_v12 = vadd.f32 %v4146_v43, %v1041_v10  ;;  %v2482_v13 = vadd.f32 %v4148_v44, %v1394_v11  ;;  %v1043_v14 = vpop.f32.mrb[53].mxu0  ;;  %v1396_v2 = vpop.f32.mrb[53].mxu1 }
 0x145   :  { %v2481_v15 = vadd.f32 %v4150_v45, %v1043_v14  ;;  %v2483_v16 = vadd.f32 %v4152_v46, %v1396_v2  ;;  %v1045_v17 = vpop.f32.mrb[54].mxu0  ;;  %v1398_v18 = vpop.f32.mrb[54].mxu1 }
 0x146   :  { %v2484_v19 = vadd.f32 %v4146_v43, %v1045_v17  ;;  %v2486_v20 = vadd.f32 %v4148_v44, %v1398_v18  ;;  %v1047_v21 = vpop.f32.mrb[55].mxu0  ;;  %v1400_v22 = vpop.f32.mrb[55].mxu1 }
 0x147   :  { %v3814_v23 = vpack.c.bf16 %v2481_v15, %v2480_v12  ;;  %v3815_v24 = vpack.c.bf16 %v2483_v16, %v2482_v13  ;;  %v2485_v25 = vadd.f32 %v4150_v45, %v1047_v21  ;;  %v2487_v26 = vadd.f32 %v4152_v46, %v1400_v22 }
 0x149   :  { %3452 = vst [vmem:[%s4832_s3 + $0x1a0] sm:$0xff] %v3814_v23  ;;  %3453 = vst [vmem:[%s4832_s3 + $0x1a8] sm:$0xff] %v3815_v24  ;;  %v3816_v27 = vpack.c.bf16 %v2485_v25, %v2484_v19  ;;  %v3817_v28 = vpack.c.bf16 %v2487_v26, %v2486_v20 }
 0x14b   :  { %3454 = vst [vmem:[%s4832_s3 + $0x1b0] sm:$0xff] %v3816_v27  ;;  %3455 = vst [vmem:[%s4832_s3 + $0x1b8] sm:$0xff] %v3817_v28  ;;  %v1051_v29 = vpop.f32.mrb[56].mxu0  ;;  %v1404_v30 = vpop.f32.mrb[56].mxu1 }
 0x14c   :  { %v2488_v31 = vadd.f32 %v4146_v43, %v1051_v29  ;;  %v2490_v32 = vadd.f32 %v4148_v44, %v1404_v30  ;;  %v1053_v33 = vpop.f32.mrb[57].mxu0  ;;  %v1406_v34 = vpop.f32.mrb[57].mxu1 }
 0x14d   :  { %v2489_v35 = vadd.f32 %v4150_v45, %v1053_v33  ;;  %v2491_v36 = vadd.f32 %v4152_v46, %v1406_v34  ;;  %v1055_v37 = vpop.f32.mrb[58].mxu0  ;;  %v1408_v38 = vpop.f32.mrb[58].mxu1 }
 0x14e   :  { %v2492_v39 = vadd.f32 %v4146_v43, %v1055_v37  ;;  %v2494_v40 = vadd.f32 %v4148_v44, %v1408_v38  ;;  %v1057_v41 = vpop.f32.mrb[59].mxu0  ;;  %v1410_v42 = vpop.f32.mrb[59].mxu1 }
 0x14f   :  { %v3818_v47 = vpack.c.bf16 %v2489_v35, %v2488_v31  ;;  %v3819_v48 = vpack.c.bf16 %v2491_v36, %v2490_v32  ;;  %v2493_v49 = vadd.f32 %v4150_v45, %v1057_v41  ;;  %v2495_v50 = vadd.f32 %v4152_v46, %v1410_v42 }
 0x151   :  { %3456 = vst [vmem:[%s4832_s3 + $0x1c0] sm:$0xff] %v3818_v47  ;;  %3457 = vst [vmem:[%s4832_s3 + $0x1c8] sm:$0xff] %v3819_v48  ;;  %v3820_v51 = vpack.c.bf16 %v2493_v49, %v2492_v39  ;;  %v3821_v52 = vpack.c.bf16 %v2495_v50, %v2494_v40 }
 0x153   :  { %3458 = vst [vmem:[%s4832_s3 + $0x1d0] sm:$0xff] %v3820_v51  ;;  %3459 = vst [vmem:[%s4832_s3 + $0x1d8] sm:$0xff] %v3821_v52  ;;  %v1061_v53 = vpop.f32.mrb[60].mxu0  ;;  %v1414_v54 = vpop.f32.mrb[60].mxu1 }
 0x154   :  { %v2496_v55 = vadd.f32 %v4146_v43, %v1061_v53  ;;  %v2498_v56 = vadd.f32 %v4148_v44, %v1414_v54  ;;  %v1063_v57 = vpop.f32.mrb[61].mxu0  ;;  %v1416_v58 = vpop.f32.mrb[61].mxu1 }
 0x155   :  { %v2497_v59 = vadd.f32 %v4150_v45, %v1063_v57  ;;  %v2499_v60 = vadd.f32 %v4152_v46, %v1416_v58  ;;  %v1065_v61 = vpop.f32.mrb[62].mxu0  ;;  %v1418_v62 = vpop.f32.mrb[62].mxu1 }
 0x156   :  { %v2500_v63 = vadd.f32 %v4146_v43, %v1065_v61  ;;  %v2502_v0 = vadd.f32 %v4148_v44, %v1418_v62  ;;  %v1067_v1 = vpop.f32.mrb[63].mxu0  ;;  %v1420_v3 = vpop.f32.mrb[63].mxu1 }
 0x157   :  { %v3822_v4 = vpack.c.bf16 %v2497_v59, %v2496_v55  ;;  %v3823_v5 = vpack.c.bf16 %v2499_v60, %v2498_v56  ;;  %v2501_v6 = vadd.f32 %v4150_v45, %v1067_v1  ;;  %v2503_v7 = vadd.f32 %v4152_v46, %v1420_v3 }
 0x159   :  { %3460 = vst [vmem:[%s4832_s3 + $0x1e0] sm:$0xff] %v3822_v4  ;;  %3461 = vst [vmem:[%s4832_s3 + $0x1e8] sm:$0xff] %v3823_v5  ;;  %v3824_v8 = vpack.c.bf16 %v2501_v6, %v2500_v63  ;;  %v3825_v9 = vpack.c.bf16 %v2503_v7, %v2502_v0 }
 0x15b   :  { %3462 = vst [vmem:[%s4832_s3 + $0x1f0] sm:$0xff] %v3824_v8  ;;  %3463 = vst [vmem:[%s4832_s3 + $0x1f8] sm:$0xff] %v3825_v9  ;;  %v1071_v10 = vpop.f32.mrb[64].mxu0  ;;  %v1424_v11 = vpop.f32.mrb[64].mxu1 }
 0x15c   :  { %v2504_v12 = vadd.f32 %v4146_v43, %v1071_v10  ;;  %v2506_v13 = vadd.f32 %v4148_v44, %v1424_v11  ;;  %v1073_v14 = vpop.f32.mrb[65].mxu0  ;;  %v1426_v2 = vpop.f32.mrb[65].mxu1 }
 0x15d   :  { %v2505_v15 = vadd.f32 %v4150_v45, %v1073_v14  ;;  %v2507_v16 = vadd.f32 %v4152_v46, %v1426_v2  ;;  %v1075_v17 = vpop.f32.mrb[66].mxu0  ;;  %v1428_v18 = vpop.f32.mrb[66].mxu1 }
 0x15e   :  { %v2508_v19 = vadd.f32 %v4146_v43, %v1075_v17  ;;  %v2510_v20 = vadd.f32 %v4148_v44, %v1428_v18  ;;  %v1077_v21 = vpop.f32.mrb[67].mxu0  ;;  %v1430_v22 = vpop.f32.mrb[67].mxu1 }
 0x15f   :  { %v3826_v23 = vpack.c.bf16 %v2505_v15, %v2504_v12  ;;  %v3827_v24 = vpack.c.bf16 %v2507_v16, %v2506_v13  ;;  %v2509_v25 = vadd.f32 %v4150_v45, %v1077_v21  ;;  %v2511_v26 = vadd.f32 %v4152_v46, %v1430_v22 }
 0x161   :  { %3464 = vst [vmem:[%s4832_s3 + $0x200] sm:$0xff] %v3826_v23  ;;  %3465 = vst [vmem:[%s4832_s3 + $0x208] sm:$0xff] %v3827_v24  ;;  %v3828_v27 = vpack.c.bf16 %v2509_v25, %v2508_v19  ;;  %v3829_v28 = vpack.c.bf16 %v2511_v26, %v2510_v20 }
 0x163   :  { %3466 = vst [vmem:[%s4832_s3 + $0x210] sm:$0xff] %v3828_v27  ;;  %3467 = vst [vmem:[%s4832_s3 + $0x218] sm:$0xff] %v3829_v28  ;;  %v1081_v29 = vpop.f32.mrb[68].mxu0  ;;  %v1434_v30 = vpop.f32.mrb[68].mxu1 }
 0x164   :  { %v2512_v31 = vadd.f32 %v4146_v43, %v1081_v29  ;;  %v2514_v32 = vadd.f32 %v4148_v44, %v1434_v30  ;;  %v1083_v33 = vpop.f32.mrb[69].mxu0  ;;  %v1436_v34 = vpop.f32.mrb[69].mxu1 }
 0x165   :  { %v2513_v35 = vadd.f32 %v4150_v45, %v1083_v33  ;;  %v2515_v36 = vadd.f32 %v4152_v46, %v1436_v34  ;;  %v1085_v37 = vpop.f32.mrb[70].mxu0  ;;  %v1438_v38 = vpop.f32.mrb[70].mxu1 }
 0x166   :  { %v2516_v39 = vadd.f32 %v4146_v43, %v1085_v37  ;;  %v2518_v40 = vadd.f32 %v4148_v44, %v1438_v38  ;;  %v1087_v41 = vpop.f32.mrb[71].mxu0  ;;  %v1440_v42 = vpop.f32.mrb[71].mxu1 }
 0x167   :  { %v3830_v47 = vpack.c.bf16 %v2513_v35, %v2512_v31  ;;  %v3831_v48 = vpack.c.bf16 %v2515_v36, %v2514_v32  ;;  %v2517_v49 = vadd.f32 %v4150_v45, %v1087_v41  ;;  %v2519_v50 = vadd.f32 %v4152_v46, %v1440_v42 }
 0x169   :  { %3468 = vst [vmem:[%s4832_s3 + $0x220] sm:$0xff] %v3830_v47  ;;  %3469 = vst [vmem:[%s4832_s3 + $0x228] sm:$0xff] %v3831_v48  ;;  %v3832_v51 = vpack.c.bf16 %v2517_v49, %v2516_v39  ;;  %v3833_v52 = vpack.c.bf16 %v2519_v50, %v2518_v40 }
 0x16b   :  { %3470 = vst [vmem:[%s4832_s3 + $0x230] sm:$0xff] %v3832_v51  ;;  %3471 = vst [vmem:[%s4832_s3 + $0x238] sm:$0xff] %v3833_v52  ;;  %v1091_v53 = vpop.f32.mrb[72].mxu0  ;;  %v1444_v54 = vpop.f32.mrb[72].mxu1 }
 0x16c   :  { %v2520_v55 = vadd.f32 %v4146_v43, %v1091_v53  ;;  %v2522_v56 = vadd.f32 %v4148_v44, %v1444_v54  ;;  %v1093_v57 = vpop.f32.mrb[73].mxu0  ;;  %v1446_v58 = vpop.f32.mrb[73].mxu1 }
 0x16d   :  { %v2521_v59 = vadd.f32 %v4150_v45, %v1093_v57  ;;  %v2523_v60 = vadd.f32 %v4152_v46, %v1446_v58  ;;  %v1095_v61 = vpop.f32.mrb[74].mxu0  ;;  %v1448_v62 = vpop.f32.mrb[74].mxu1 }
 0x16e   :  { %v2524_v63 = vadd.f32 %v4146_v43, %v1095_v61  ;;  %v2526_v0 = vadd.f32 %v4148_v44, %v1448_v62  ;;  %v1097_v1 = vpop.f32.mrb[75].mxu0  ;;  %v1450_v3 = vpop.f32.mrb[75].mxu1 }
 0x16f   :  { %v3834_v4 = vpack.c.bf16 %v2521_v59, %v2520_v55  ;;  %v3835_v5 = vpack.c.bf16 %v2523_v60, %v2522_v56  ;;  %v2525_v6 = vadd.f32 %v4150_v45, %v1097_v1  ;;  %v2527_v7 = vadd.f32 %v4152_v46, %v1450_v3 }
 0x171   :  { %3472 = vst [vmem:[%s4832_s3 + $0x240] sm:$0xff] %v3834_v4  ;;  %3473 = vst [vmem:[%s4832_s3 + $0x248] sm:$0xff] %v3835_v5  ;;  %v3836_v8 = vpack.c.bf16 %v2525_v6, %v2524_v63  ;;  %v3837_v9 = vpack.c.bf16 %v2527_v7, %v2526_v0 }
 0x173   :  { %3474 = vst [vmem:[%s4832_s3 + $0x250] sm:$0xff] %v3836_v8  ;;  %3475 = vst [vmem:[%s4832_s3 + $0x258] sm:$0xff] %v3837_v9  ;;  %v1101_v10 = vpop.f32.mrb[76].mxu0  ;;  %v1454_v11 = vpop.f32.mrb[76].mxu1 }
 0x174   :  { %v2528_v12 = vadd.f32 %v4146_v43, %v1101_v10  ;;  %v2530_v13 = vadd.f32 %v4148_v44, %v1454_v11  ;;  %v1103_v14 = vpop.f32.mrb[77].mxu0  ;;  %v1456_v2 = vpop.f32.mrb[77].mxu1 }
 0x175   :  { %v2529_v15 = vadd.f32 %v4150_v45, %v1103_v14  ;;  %v2531_v16 = vadd.f32 %v4152_v46, %v1456_v2  ;;  %v1105_v17 = vpop.f32.mrb[78].mxu0  ;;  %v1458_v18 = vpop.f32.mrb[78].mxu1 }
 0x176   :  { %v2532_v19 = vadd.f32 %v4146_v43, %v1105_v17  ;;  %v2534_v20 = vadd.f32 %v4148_v44, %v1458_v18  ;;  %v1107_v21 = vpop.f32.mrb[79].mxu0  ;;  %v1460_v22 = vpop.f32.mrb[79].mxu1 }
 0x177   :  { %v3838_v23 = vpack.c.bf16 %v2529_v15, %v2528_v12  ;;  %v3839_v24 = vpack.c.bf16 %v2531_v16, %v2530_v13  ;;  %v2533_v25 = vadd.f32 %v4150_v45, %v1107_v21  ;;  %v2535_v26 = vadd.f32 %v4152_v46, %v1460_v22 }
 0x179   :  { %3476 = vst [vmem:[%s4832_s3 + $0x260] sm:$0xff] %v3838_v23  ;;  %3477 = vst [vmem:[%s4832_s3 + $0x268] sm:$0xff] %v3839_v24  ;;  %v3840_v27 = vpack.c.bf16 %v2533_v25, %v2532_v19  ;;  %v3841_v28 = vpack.c.bf16 %v2535_v26, %v2534_v20 }
 0x17b   :  { %3478 = vst [vmem:[%s4832_s3 + $0x270] sm:$0xff] %v3840_v27  ;;  %3479 = vst [vmem:[%s4832_s3 + $0x278] sm:$0xff] %v3841_v28  ;;  %v1111_v29 = vpop.f32.mrb[80].mxu0  ;;  %v1464_v30 = vpop.f32.mrb[80].mxu1 }
 0x17c   :  { %v2536_v31 = vadd.f32 %v4146_v43, %v1111_v29  ;;  %v2538_v32 = vadd.f32 %v4148_v44, %v1464_v30  ;;  %v1113_v33 = vpop.f32.mrb[81].mxu0  ;;  %v1466_v34 = vpop.f32.mrb[81].mxu1 }
 0x17d   :  { %v2537_v35 = vadd.f32 %v4150_v45, %v1113_v33  ;;  %v2539_v36 = vadd.f32 %v4152_v46, %v1466_v34  ;;  %v1115_v37 = vpop.f32.mrb[82].mxu0  ;;  %v1468_v38 = vpop.f32.mrb[82].mxu1 }
 0x17e   :  { %v2540_v39 = vadd.f32 %v4146_v43, %v1115_v37  ;;  %v2542_v40 = vadd.f32 %v4148_v44, %v1468_v38  ;;  %v1117_v41 = vpop.f32.mrb[83].mxu0  ;;  %v1470_v42 = vpop.f32.mrb[83].mxu1 }
 0x17f   :  { %v3842_v47 = vpack.c.bf16 %v2537_v35, %v2536_v31  ;;  %v3843_v48 = vpack.c.bf16 %v2539_v36, %v2538_v32  ;;  %v2541_v49 = vadd.f32 %v4150_v45, %v1117_v41  ;;  %v2543_v50 = vadd.f32 %v4152_v46, %v1470_v42 }
 0x181   :  { %3480 = vst [vmem:[%s4832_s3 + $0x280] sm:$0xff] %v3842_v47  ;;  %3481 = vst [vmem:[%s4832_s3 + $0x288] sm:$0xff] %v3843_v48  ;;  %v3844_v51 = vpack.c.bf16 %v2541_v49, %v2540_v39  ;;  %v3845_v52 = vpack.c.bf16 %v2543_v50, %v2542_v40 }
 0x183   :  { %3482 = vst [vmem:[%s4832_s3 + $0x290] sm:$0xff] %v3844_v51  ;;  %3483 = vst [vmem:[%s4832_s3 + $0x298] sm:$0xff] %v3845_v52  ;;  %v1121_v53 = vpop.f32.mrb[84].mxu0  ;;  %v1474_v54 = vpop.f32.mrb[84].mxu1 }
 0x184   :  { %v2544_v55 = vadd.f32 %v4146_v43, %v1121_v53  ;;  %v2546_v56 = vadd.f32 %v4148_v44, %v1474_v54  ;;  %v1123_v57 = vpop.f32.mrb[85].mxu0  ;;  %v1476_v58 = vpop.f32.mrb[85].mxu1 }
 0x185   :  { %v2545_v59 = vadd.f32 %v4150_v45, %v1123_v57  ;;  %v2547_v60 = vadd.f32 %v4152_v46, %v1476_v58  ;;  %v1125_v61 = vpop.f32.mrb[86].mxu0  ;;  %v1478_v62 = vpop.f32.mrb[86].mxu1 }
 0x186   :  { %v2548_v63 = vadd.f32 %v4146_v43, %v1125_v61  ;;  %v2550_v0 = vadd.f32 %v4148_v44, %v1478_v62  ;;  %v1127_v1 = vpop.f32.mrb[87].mxu0  ;;  %v1480_v3 = vpop.f32.mrb[87].mxu1 }
 0x187   :  { %v3846_v4 = vpack.c.bf16 %v2545_v59, %v2544_v55  ;;  %v3847_v5 = vpack.c.bf16 %v2547_v60, %v2546_v56  ;;  %v2549_v6 = vadd.f32 %v4150_v45, %v1127_v1  ;;  %v2551_v7 = vadd.f32 %v4152_v46, %v1480_v3 }
 0x189   :  { %3484 = vst [vmem:[%s4832_s3 + $0x2a0] sm:$0xff] %v3846_v4  ;;  %3485 = vst [vmem:[%s4832_s3 + $0x2a8] sm:$0xff] %v3847_v5  ;;  %v3848_v8 = vpack.c.bf16 %v2549_v6, %v2548_v63  ;;  %v3849_v9 = vpack.c.bf16 %v2551_v7, %v2550_v0 }
 0x18b   :  { %3486 = vst [vmem:[%s4832_s3 + $0x2b0] sm:$0xff] %v3848_v8  ;;  %3487 = vst [vmem:[%s4832_s3 + $0x2b8] sm:$0xff] %v3849_v9  ;;  %v1131_v10 = vpop.f32.mrb[88].mxu0  ;;  %v1484_v11 = vpop.f32.mrb[88].mxu1 }
 0x18c   :  { %v2552_v12 = vadd.f32 %v4146_v43, %v1131_v10  ;;  %v2554_v13 = vadd.f32 %v4148_v44, %v1484_v11  ;;  %v1133_v14 = vpop.f32.mrb[89].mxu0  ;;  %v1486_v2 = vpop.f32.mrb[89].mxu1 }
 0x18d   :  { %v2553_v15 = vadd.f32 %v4150_v45, %v1133_v14  ;;  %v2555_v16 = vadd.f32 %v4152_v46, %v1486_v2  ;;  %v1135_v17 = vpop.f32.mrb[90].mxu0  ;;  %v1488_v18 = vpop.f32.mrb[90].mxu1 }
 0x18e   :  { %v2556_v19 = vadd.f32 %v4146_v43, %v1135_v17  ;;  %v2558_v20 = vadd.f32 %v4148_v44, %v1488_v18  ;;  %v1137_v21 = vpop.f32.mrb[91].mxu0  ;;  %v1490_v22 = vpop.f32.mrb[91].mxu1 }
 0x18f   :  { %v3850_v23 = vpack.c.bf16 %v2553_v15, %v2552_v12  ;;  %v3851_v24 = vpack.c.bf16 %v2555_v16, %v2554_v13  ;;  %v2557_v25 = vadd.f32 %v4150_v45, %v1137_v21  ;;  %v2559_v26 = vadd.f32 %v4152_v46, %v1490_v22 }
 0x191   :  { %3488 = vst [vmem:[%s4832_s3 + $0x2c0] sm:$0xff] %v3850_v23  ;;  %3489 = vst [vmem:[%s4832_s3 + $0x2c8] sm:$0xff] %v3851_v24  ;;  %v3852_v27 = vpack.c.bf16 %v2557_v25, %v2556_v19  ;;  %v3853_v28 = vpack.c.bf16 %v2559_v26, %v2558_v20 }
 0x193   :  { %3490 = vst [vmem:[%s4832_s3 + $0x2d0] sm:$0xff] %v3852_v27  ;;  %3491 = vst [vmem:[%s4832_s3 + $0x2d8] sm:$0xff] %v3853_v28  ;;  %v1141_v29 = vpop.f32.mrb[92].mxu0  ;;  %v1494_v30 = vpop.f32.mrb[92].mxu1 }
 0x194   :  { %v2560_v31 = vadd.f32 %v4146_v43, %v1141_v29  ;;  %v2562_v32 = vadd.f32 %v4148_v44, %v1494_v30  ;;  %v1143_v33 = vpop.f32.mrb[93].mxu0  ;;  %v1496_v34 = vpop.f32.mrb[93].mxu1 }
 0x195   :  { %v2561_v35 = vadd.f32 %v4150_v45, %v1143_v33  ;;  %v2563_v36 = vadd.f32 %v4152_v46, %v1496_v34  ;;  %v1145_v37 = vpop.f32.mrb[94].mxu0  ;;  %v1498_v38 = vpop.f32.mrb[94].mxu1 }
 0x196   :  { %v2564_v39 = vadd.f32 %v4146_v43, %v1145_v37  ;;  %v2566_v40 = vadd.f32 %v4148_v44, %v1498_v38  ;;  %v1147_v41 = vpop.f32.mrb[95].mxu0  ;;  %v1500_v42 = vpop.f32.mrb[95].mxu1 }
 0x197   :  { %v3854_v47 = vpack.c.bf16 %v2561_v35, %v2560_v31  ;;  %v3855_v48 = vpack.c.bf16 %v2563_v36, %v2562_v32  ;;  %v2565_v49 = vadd.f32 %v4150_v45, %v1147_v41  ;;  %v2567_v50 = vadd.f32 %v4152_v46, %v1500_v42 }
 0x199   :  { %3492 = vst [vmem:[%s4832_s3 + $0x2e0] sm:$0xff] %v3854_v47  ;;  %3493 = vst [vmem:[%s4832_s3 + $0x2e8] sm:$0xff] %v3855_v48  ;;  %v3856_v51 = vpack.c.bf16 %v2565_v49, %v2564_v39  ;;  %v3857_v52 = vpack.c.bf16 %v2567_v50, %v2566_v40 }
 0x19b   :  { %3494 = vst [vmem:[%s4832_s3 + $0x2f0] sm:$0xff] %v3856_v51  ;;  %3495 = vst [vmem:[%s4832_s3 + $0x2f8] sm:$0xff] %v3857_v52  ;;  %v1151_v53 = vpop.f32.mrb[96].mxu0  ;;  %v1504_v54 = vpop.f32.mrb[96].mxu1 }
 0x19c   :  { %v2568_v55 = vadd.f32 %v4146_v43, %v1151_v53  ;;  %v2570_v56 = vadd.f32 %v4148_v44, %v1504_v54  ;;  %v1153_v57 = vpop.f32.mrb[97].mxu0  ;;  %v1506_v58 = vpop.f32.mrb[97].mxu1 }
 0x19d   :  { %v2569_v59 = vadd.f32 %v4150_v45, %v1153_v57  ;;  %v2571_v60 = vadd.f32 %v4152_v46, %v1506_v58  ;;  %v1155_v61 = vpop.f32.mrb[98].mxu0  ;;  %v1508_v62 = vpop.f32.mrb[98].mxu1 }
 0x19e   :  { %v2572_v63 = vadd.f32 %v4146_v43, %v1155_v61  ;;  %v2574_v0 = vadd.f32 %v4148_v44, %v1508_v62  ;;  %v1157_v1 = vpop.f32.mrb[99].mxu0  ;;  %v1510_v3 = vpop.f32.mrb[99].mxu1 }
 0x19f   :  { %v3858_v4 = vpack.c.bf16 %v2569_v59, %v2568_v55  ;;  %v3859_v5 = vpack.c.bf16 %v2571_v60, %v2570_v56  ;;  %v2573_v6 = vadd.f32 %v4150_v45, %v1157_v1  ;;  %v2575_v7 = vadd.f32 %v4152_v46, %v1510_v3 }
 0x1a1   :  { %3496 = vst [vmem:[%s4832_s3 + $0x300] sm:$0xff] %v3858_v4  ;;  %3497 = vst [vmem:[%s4832_s3 + $0x308] sm:$0xff] %v3859_v5  ;;  %v3860_v8 = vpack.c.bf16 %v2573_v6, %v2572_v63  ;;  %v3861_v9 = vpack.c.bf16 %v2575_v7, %v2574_v0 }
 0x1a3   :  { %3498 = vst [vmem:[%s4832_s3 + $0x310] sm:$0xff] %v3860_v8  ;;  %3499 = vst [vmem:[%s4832_s3 + $0x318] sm:$0xff] %v3861_v9  ;;  %v1161_v10 = vpop.f32.mrb[100].mxu0  ;;  %v1514_v11 = vpop.f32.mrb[100].mxu1 }
 0x1a4   :  { %v2576_v12 = vadd.f32 %v4146_v43, %v1161_v10  ;;  %v2578_v13 = vadd.f32 %v4148_v44, %v1514_v11  ;;  %v1163_v14 = vpop.f32.mrb[101].mxu0  ;;  %v1516_v2 = vpop.f32.mrb[101].mxu1 }
 0x1a5   :  { %v2577_v15 = vadd.f32 %v4150_v45, %v1163_v14  ;;  %v2579_v16 = vadd.f32 %v4152_v46, %v1516_v2  ;;  %v1165_v17 = vpop.f32.mrb[102].mxu0  ;;  %v1518_v18 = vpop.f32.mrb[102].mxu1 }
 0x1a6   :  { %v2580_v19 = vadd.f32 %v4146_v43, %v1165_v17  ;;  %v2582_v20 = vadd.f32 %v4148_v44, %v1518_v18  ;;  %v1167_v21 = vpop.f32.mrb[103].mxu0  ;;  %v1520_v22 = vpop.f32.mrb[103].mxu1 }
 0x1a7   :  { %v3862_v23 = vpack.c.bf16 %v2577_v15, %v2576_v12  ;;  %v3863_v24 = vpack.c.bf16 %v2579_v16, %v2578_v13  ;;  %v2581_v25 = vadd.f32 %v4150_v45, %v1167_v21  ;;  %v2583_v26 = vadd.f32 %v4152_v46, %v1520_v22 }
 0x1a9   :  { %3500 = vst [vmem:[%s4832_s3 + $0x320] sm:$0xff] %v3862_v23  ;;  %3501 = vst [vmem:[%s4832_s3 + $0x328] sm:$0xff] %v3863_v24  ;;  %v3864_v27 = vpack.c.bf16 %v2581_v25, %v2580_v19  ;;  %v3865_v28 = vpack.c.bf16 %v2583_v26, %v2582_v20 }
 0x1ab   :  { %3502 = vst [vmem:[%s4832_s3 + $0x330] sm:$0xff] %v3864_v27  ;;  %3503 = vst [vmem:[%s4832_s3 + $0x338] sm:$0xff] %v3865_v28  ;;  %v1171_v29 = vpop.f32.mrb[104].mxu0  ;;  %v1524_v30 = vpop.f32.mrb[104].mxu1 }
 0x1ac   :  { %v2584_v31 = vadd.f32 %v4146_v43, %v1171_v29  ;;  %v2586_v32 = vadd.f32 %v4148_v44, %v1524_v30  ;;  %v1173_v33 = vpop.f32.mrb[105].mxu0  ;;  %v1526_v34 = vpop.f32.mrb[105].mxu1 }
 0x1ad   :  { %v2585_v35 = vadd.f32 %v4150_v45, %v1173_v33  ;;  %v2587_v36 = vadd.f32 %v4152_v46, %v1526_v34  ;;  %v1175_v37 = vpop.f32.mrb[106].mxu0  ;;  %v1528_v38 = vpop.f32.mrb[106].mxu1 }
 0x1ae   :  { %v2588_v39 = vadd.f32 %v4146_v43, %v1175_v37  ;;  %v2590_v40 = vadd.f32 %v4148_v44, %v1528_v38  ;;  %v1177_v41 = vpop.f32.mrb[107].mxu0  ;;  %v1530_v42 = vpop.f32.mrb[107].mxu1 }
 0x1af   :  { %v3866_v47 = vpack.c.bf16 %v2585_v35, %v2584_v31  ;;  %v3867_v48 = vpack.c.bf16 %v2587_v36, %v2586_v32  ;;  %v2589_v49 = vadd.f32 %v4150_v45, %v1177_v41  ;;  %v2591_v50 = vadd.f32 %v4152_v46, %v1530_v42 }
 0x1b1   :  { %3504 = vst [vmem:[%s4832_s3 + $0x340] sm:$0xff] %v3866_v47  ;;  %3505 = vst [vmem:[%s4832_s3 + $0x348] sm:$0xff] %v3867_v48  ;;  %v3868_v51 = vpack.c.bf16 %v2589_v49, %v2588_v39  ;;  %v3869_v52 = vpack.c.bf16 %v2591_v50, %v2590_v40 }
 0x1b3   :  { %3506 = vst [vmem:[%s4832_s3 + $0x350] sm:$0xff] %v3868_v51  ;;  %3507 = vst [vmem:[%s4832_s3 + $0x358] sm:$0xff] %v3869_v52  ;;  %v1181_v53 = vpop.f32.mrb[108].mxu0  ;;  %v1534_v54 = vpop.f32.mrb[108].mxu1 }
 0x1b4   :  { %v2592_v55 = vadd.f32 %v4146_v43, %v1181_v53  ;;  %v2594_v56 = vadd.f32 %v4148_v44, %v1534_v54  ;;  %v1183_v57 = vpop.f32.mrb[109].mxu0  ;;  %v1536_v58 = vpop.f32.mrb[109].mxu1 }
 0x1b5   :  { %v2593_v59 = vadd.f32 %v4150_v45, %v1183_v57  ;;  %v2595_v60 = vadd.f32 %v4152_v46, %v1536_v58  ;;  %v1185_v61 = vpop.f32.mrb[110].mxu0  ;;  %v1538_v62 = vpop.f32.mrb[110].mxu1 }
 0x1b6   :  { %v2596_v63 = vadd.f32 %v4146_v43, %v1185_v61  ;;  %v2598_v0 = vadd.f32 %v4148_v44, %v1538_v62  ;;  %v1187_v1 = vpop.f32.mrb[111].mxu0  ;;  %v1540_v3 = vpop.f32.mrb[111].mxu1 }
 0x1b7   :  { %v3870_v4 = vpack.c.bf16 %v2593_v59, %v2592_v55  ;;  %v3871_v5 = vpack.c.bf16 %v2595_v60, %v2594_v56  ;;  %v2597_v6 = vadd.f32 %v4150_v45, %v1187_v1  ;;  %v2599_v7 = vadd.f32 %v4152_v46, %v1540_v3 }
 0x1b9   :  { %3508 = vst [vmem:[%s4832_s3 + $0x360] sm:$0xff] %v3870_v4  ;;  %3509 = vst [vmem:[%s4832_s3 + $0x368] sm:$0xff] %v3871_v5  ;;  %v3872_v8 = vpack.c.bf16 %v2597_v6, %v2596_v63  ;;  %v3873_v9 = vpack.c.bf16 %v2599_v7, %v2598_v0 }
 0x1bb   :  { %3510 = vst [vmem:[%s4832_s3 + $0x370] sm:$0xff] %v3872_v8  ;;  %3511 = vst [vmem:[%s4832_s3 + $0x378] sm:$0xff] %v3873_v9  ;;  %v1191_v10 = vpop.f32.mrb[112].mxu0  ;;  %v1544_v11 = vpop.f32.mrb[112].mxu1 }
 0x1bc   :  { %v2600_v12 = vadd.f32 %v4146_v43, %v1191_v10  ;;  %v2602_v13 = vadd.f32 %v4148_v44, %v1544_v11  ;;  %v1193_v14 = vpop.f32.mrb[113].mxu0  ;;  %v1546_v2 = vpop.f32.mrb[113].mxu1 }
 0x1bd   :  { %v2601_v15 = vadd.f32 %v4150_v45, %v1193_v14  ;;  %v2603_v16 = vadd.f32 %v4152_v46, %v1546_v2  ;;  %v1195_v17 = vpop.f32.mrb[114].mxu0  ;;  %v1548_v18 = vpop.f32.mrb[114].mxu1 }
 0x1be   :  { %v2604_v19 = vadd.f32 %v4146_v43, %v1195_v17  ;;  %v2606_v20 = vadd.f32 %v4148_v44, %v1548_v18  ;;  %v1197_v21 = vpop.f32.mrb[115].mxu0  ;;  %v1550_v22 = vpop.f32.mrb[115].mxu1 }
 0x1bf   :  { %v3874_v23 = vpack.c.bf16 %v2601_v15, %v2600_v12  ;;  %v3875_v24 = vpack.c.bf16 %v2603_v16, %v2602_v13  ;;  %v2605_v25 = vadd.f32 %v4150_v45, %v1197_v21  ;;  %v2607_v26 = vadd.f32 %v4152_v46, %v1550_v22 }
 0x1c1   :  { %3512 = vst [vmem:[%s4832_s3 + $0x380] sm:$0xff] %v3874_v23  ;;  %3513 = vst [vmem:[%s4832_s3 + $0x388] sm:$0xff] %v3875_v24  ;;  %v3876_v27 = vpack.c.bf16 %v2605_v25, %v2604_v19  ;;  %v3877_v28 = vpack.c.bf16 %v2607_v26, %v2606_v20 }
 0x1c3   :  { %3514 = vst [vmem:[%s4832_s3 + $0x390] sm:$0xff] %v3876_v27  ;;  %3515 = vst [vmem:[%s4832_s3 + $0x398] sm:$0xff] %v3877_v28  ;;  %v1201_v29 = vpop.f32.mrb[116].mxu0  ;;  %v1554_v30 = vpop.f32.mrb[116].mxu1 }
 0x1c4   :  { %v2608_v31 = vadd.f32 %v4146_v43, %v1201_v29  ;;  %v2610_v32 = vadd.f32 %v4148_v44, %v1554_v30  ;;  %v1203_v33 = vpop.f32.mrb[117].mxu0  ;;  %v1556_v34 = vpop.f32.mrb[117].mxu1 }
 0x1c5   :  { %v2609_v35 = vadd.f32 %v4150_v45, %v1203_v33  ;;  %v2611_v36 = vadd.f32 %v4152_v46, %v1556_v34  ;;  %v1205_v37 = vpop.f32.mrb[118].mxu0  ;;  %v1558_v38 = vpop.f32.mrb[118].mxu1 }
 0x1c6   :  { %v2612_v39 = vadd.f32 %v4146_v43, %v1205_v37  ;;  %v2614_v40 = vadd.f32 %v4148_v44, %v1558_v38  ;;  %v1207_v41 = vpop.f32.mrb[119].mxu0  ;;  %v1560_v42 = vpop.f32.mrb[119].mxu1 }
 0x1c7   :  { %v3878_v47 = vpack.c.bf16 %v2609_v35, %v2608_v31  ;;  %v3879_v48 = vpack.c.bf16 %v2611_v36, %v2610_v32  ;;  %v2613_v49 = vadd.f32 %v4150_v45, %v1207_v41  ;;  %v2615_v50 = vadd.f32 %v4152_v46, %v1560_v42 }
 0x1c9   :  { %3516 = vst [vmem:[%s4832_s3 + $0x3a0] sm:$0xff] %v3878_v47  ;;  %3517 = vst [vmem:[%s4832_s3 + $0x3a8] sm:$0xff] %v3879_v48  ;;  %v3880_v51 = vpack.c.bf16 %v2613_v49, %v2612_v39  ;;  %v3881_v52 = vpack.c.bf16 %v2615_v50, %v2614_v40 }
 0x1cb   :  { %3518 = vst [vmem:[%s4832_s3 + $0x3b0] sm:$0xff] %v3880_v51  ;;  %3519 = vst [vmem:[%s4832_s3 + $0x3b8] sm:$0xff] %v3881_v52  ;;  %v1211_v53 = vpop.f32.mrb[120].mxu0  ;;  %v1564_v54 = vpop.f32.mrb[120].mxu1 }
 0x1cc   :  { %v2616_v55 = vadd.f32 %v4146_v43, %v1211_v53  ;;  %v2618_v56 = vadd.f32 %v4148_v44, %v1564_v54  ;;  %v1213_v57 = vpop.f32.mrb[121].mxu0  ;;  %v1566_v58 = vpop.f32.mrb[121].mxu1 }
 0x1cd   :  { %v2617_v59 = vadd.f32 %v4150_v45, %v1213_v57  ;;  %v2619_v60 = vadd.f32 %v4152_v46, %v1566_v58  ;;  %v1215_v61 = vpop.f32.mrb[122].mxu0  ;;  %v1568_v62 = vpop.f32.mrb[122].mxu1 }
 0x1ce   :  { %v2620_v63 = vadd.f32 %v4146_v43, %v1215_v61  ;;  %v2622_v0 = vadd.f32 %v4148_v44, %v1568_v62  ;;  %v1217_v1 = vpop.f32.mrb[123].mxu0  ;;  %v1570_v3 = vpop.f32.mrb[123].mxu1 }
 0x1cf   :  { %v3882_v4 = vpack.c.bf16 %v2617_v59, %v2616_v55  ;;  %v3883_v5 = vpack.c.bf16 %v2619_v60, %v2618_v56  ;;  %v2621_v6 = vadd.f32 %v4150_v45, %v1217_v1  ;;  %v2623_v7 = vadd.f32 %v4152_v46, %v1570_v3 }
 0x1d1   :  { %3520 = vst [vmem:[%s4832_s3 + $0x3c0] sm:$0xff] %v3882_v4  ;;  %3521 = vst [vmem:[%s4832_s3 + $0x3c8] sm:$0xff] %v3883_v5  ;;  %v3884_v8 = vpack.c.bf16 %v2621_v6, %v2620_v63  ;;  %v3885_v9 = vpack.c.bf16 %v2623_v7, %v2622_v0 }
 0x1d3   :  { %3522 = vst [vmem:[%s4832_s3 + $0x3d0] sm:$0xff] %v3884_v8  ;;  %3523 = vst [vmem:[%s4832_s3 + $0x3d8] sm:$0xff] %v3885_v9  ;;  %v1221_v10 = vpop.f32.mrb[124].mxu0  ;;  %v1574_v11 = vpop.f32.mrb[124].mxu1 }
 0x1d4   :  { %v2624_v12 = vadd.f32 %v4146_v43, %v1221_v10  ;;  %v2626_v13 = vadd.f32 %v4148_v44, %v1574_v11  ;;  %v1223_v14 = vpop.f32.mrb[125].mxu0  ;;  %v1576_v2 = vpop.f32.mrb[125].mxu1 }
 0x1d5   :  { %v2625_v15 = vadd.f32 %v4150_v45, %v1223_v14  ;;  %v2627_v16 = vadd.f32 %v4152_v46, %v1576_v2  ;;  %v1225_v17 = vpop.f32.mrb[126].mxu0  ;;  %v1578_v18 = vpop.f32.mrb[126].mxu1 }
 0x1d6   :  { %v2628_v19 = vadd.f32 %v4146_v43, %v1225_v17  ;;  %v2630_v20 = vadd.f32 %v4148_v44, %v1578_v18  ;;  %v1227_v21 = vpop.f32.mrb[127].mxu0  ;;  %v1580_v22 = vpop.f32.mrb[127].mxu1 }
 0x1d7   :  { %v3886_v23 = vpack.c.bf16 %v2625_v15, %v2624_v12  ;;  %v3887_v24 = vpack.c.bf16 %v2627_v16, %v2626_v13  ;;  %v2629_v25 = vadd.f32 %v4150_v45, %v1227_v21  ;;  %v2631_v26 = vadd.f32 %v4152_v46, %v1580_v22 }
 0x1d9   :  { %3524 = vst [vmem:[%s4832_s3 + $0x3e0] sm:$0xff] %v3886_v23  ;;  %3525 = vst [vmem:[%s4832_s3 + $0x3e8] sm:$0xff] %v3887_v24  ;;  %v3888_v27 = vpack.c.bf16 %v2629_v25, %v2628_v19  ;;  %v3889_v43 = vpack.c.bf16 %v2631_v26, %v2630_v20 }
 0x1db   :  { %3526 = vst [vmem:[%s4832_s3 + $0x3f0] sm:$0xff] %v3888_v27  ;;  %3527 = vst [vmem:[%s4832_s3 + $0x3f8] sm:$0xff] %v3889_v43 }

// kernel: _lambda_.19
= control target key start
LH: loop header
LB: loop body
LE: loop exit
PB: predicated region body
PF: predicated region fallthrough
CT: control target
= control target key end

     0   :  { %v4035_v1 = vmov 0   ;;  %v2458_v59 = vlaneseq  ;;  %s4963_s1 = inlined_call_operand.vmem [shape: bf16[1,128,512], index: 1, kind: input, shape index: {}]   ;;  %s4964_s0 = inlined_call_operand.vmem [shape: bf16[1,512,128], index: 0, kind: input, shape index: {}]   ;;  %s4965_s2 = inlined_call_operand.vmem [shape: f32[1,512], index: 2, kind: input, shape index: {}]   ;;  %s4966_s3 = inlined_call_operand.vmem [shape: bf16[1,512,512], index: 3, kind: output, shape index: {}]  }
   0x1   :  { %v3955_v0 = vld [vmem:[%s4963_s1 + $0x4] ss:$16 sps:$4 sm:$0xff]   ;;  %1011 = vmatprep.mubr.bf16.mxu0 %v4035_v1  ;;  %1364 = vmatprep.mubr.bf16.mxu1 %v4035_v1  ;;  %v3957_v2 = vld [vmem:[%s4963_s1 + $0xc] ss:$16 sps:$4 sm:$0xff]   ;;  %v3959_v3 = vld [vmem:[%s4963_s1] ss:$16 sps:$4 sm:$0xff]  }
   0x2   :  { %979 = vmatprep.subr.bf16.mxu0 %v3955_v0  ;;  %v3960_v4 = vld [vmem:[%s4963_s1 + $0x8] ss:$16 sps:$4 sm:$0xff]   ;;  %1332 = vmatprep.subr.bf16.mxu1 %v3957_v2  ;;  %v3961_v5 = vld [vmem:[%s4963_s1 + $0x24] ss:$16 sps:$4 sm:$0xff]   ;;  %v3963_v6 = vld [vmem:[%s4963_s1 + $0x2c] ss:$16 sps:$4 sm:$0xff]  }
   0x3   :  { %980 = vmatpush1.bf16.msra.mxu0 %v3959_v3  ;;  %1333 = vmatpush1.bf16.msra.mxu1 %v3960_v4  ;;  %v3965_v7 = vld [vmem:[%s4963_s1 + $0x20] ss:$16 sps:$4 sm:$0xff]   ;;  %v3966_v8 = vld [vmem:[%s4963_s1 + $0x28] ss:$16 sps:$4 sm:$0xff]   ;;  %v3967_v9 = vld [vmem:[%s4963_s1 + $0x44] ss:$16 sps:$4 sm:$0xff]  }
   0x4   :  { %981 = vmatprep.subr.bf16.mxu0 %v3961_v5  ;;  %1334 = vmatprep.subr.bf16.mxu1 %v3963_v6  ;;  %v3969_v10 = vld [vmem:[%s4963_s1 + $0x4c] ss:$16 sps:$4 sm:$0xff]   ;;  %v3971_v11 = vld [vmem:[%s4963_s1 + $0x40] ss:$16 sps:$4 sm:$0xff]   ;;  %v3972_v12 = vld [vmem:[%s4963_s1 + $0x48] ss:$16 sps:$4 sm:$0xff]  }
   0x5   :  { %v3973_v13 = vld [vmem:[%s4963_s1 + $0x64] ss:$16 sps:$4 sm:$0xff]   ;;  %v3975_v14 = vld [vmem:[%s4963_s1 + $0x6c] ss:$16 sps:$4 sm:$0xff]   ;;  %v3977_v15 = vld [vmem:[%s4963_s1 + $0x60] ss:$16 sps:$4 sm:$0xff]  }
   0x6   :  { %v3978_v16 = vld [vmem:[%s4963_s1 + $0x68] ss:$16 sps:$4 sm:$0xff]   ;;  %v3979_v17 = vld [vmem:[%s4963_s1 + $0x84] ss:$16 sps:$4 sm:$0xff]   ;;  %v3981_v18 = vld [vmem:[%s4963_s1 + $0x8c] ss:$16 sps:$4 sm:$0xff]  }
   0x7   :  { %982 = vmatpush1.bf16.msra.mxu0 %v3965_v7  ;;  %1335 = vmatpush1.bf16.msra.mxu1 %v3966_v8  ;;  %v3983_v19 = vld [vmem:[%s4963_s1 + $0x80] ss:$16 sps:$4 sm:$0xff]   ;;  %v3984_v20 = vld [vmem:[%s4963_s1 + $0x88] ss:$16 sps:$4 sm:$0xff]   ;;  %v3985_v21 = vld [vmem:[%s4963_s1 + $0xa4] ss:$16 sps:$4 sm:$0xff]  }
   0x8   :  { %983 = vmatprep.subr.bf16.mxu0 %v3967_v9  ;;  %1336 = vmatprep.subr.bf16.mxu1 %v3969_v10  ;;  %v3987_v22 = vld [vmem:[%s4963_s1 + $0xac] ss:$16 sps:$4 sm:$0xff]   ;;  %v3989_v23 = vld [vmem:[%s4963_s1 + $0xa0] ss:$16 sps:$4 sm:$0xff]   ;;  %v3990_v24 = vld [vmem:[%s4963_s1 + $0xa8] ss:$16 sps:$4 sm:$0xff]  }
   0x9   :  { %v3991_v25 = vld [vmem:[%s4963_s1 + $0xc4] ss:$16 sps:$4 sm:$0xff]   ;;  %v3993_v26 = vld [vmem:[%s4963_s1 + $0xcc] ss:$16 sps:$4 sm:$0xff]   ;;  %v3995_v27 = vld [vmem:[%s4963_s1 + $0xc0] ss:$16 sps:$4 sm:$0xff]  }
   0xa   :  { %v3996_v28 = vld [vmem:[%s4963_s1 + $0xc8] ss:$16 sps:$4 sm:$0xff]   ;;  %v3997_v29 = vld [vmem:[%s4963_s1 + $0xe4] ss:$16 sps:$4 sm:$0xff]   ;;  %v3999_v30 = vld [vmem:[%s4963_s1 + $0xec] ss:$16 sps:$4 sm:$0xff]  }
   0xb   :  { %984 = vmatpush1.bf16.msra.mxu0 %v3971_v11  ;;  %1337 = vmatpush1.bf16.msra.mxu1 %v3972_v12  ;;  %v4001_v31 = vld [vmem:[%s4963_s1 + $0xe0] ss:$16 sps:$4 sm:$0xff]   ;;  %v4002_v32 = vld [vmem:[%s4963_s1 + $0xe8] ss:$16 sps:$4 sm:$0xff]   ;;  %v2459_v60 = vshrl.u32 %v2458_v59, 7 }
   0xc   :  { %985 = vmatprep.subr.bf16.mxu0 %v3973_v13  ;;  %1338 = vmatprep.subr.bf16.mxu1 %v3975_v14  ;;  %v4003_v33 = vld [vmem:[%s4964_s0] sm:$0xff]   ;;  %v4004_v34 = vld [vmem:[%s4964_s0 + $0x8] sm:$0xff]   ;;  %v4005_v35 = vld [vmem:[%s4964_s0 + $0x10] sm:$0xff]  }
   0xd   :  { %v4006_v36 = vld [vmem:[%s4964_s0 + $0x18] sm:$0xff]   ;;  %v4007_v37 = vld [vmem:[%s4964_s0 + $0x20] sm:$0xff]   ;;  %v4008_v38 = vld [vmem:[%s4964_s0 + $0x28] sm:$0xff]   ;;  %v2460_v62 = vsub.s32 0, %v2459_v60  ;;  %v2468_v63 = vsub.s32 2, %v2459_v60  ;;  %v2464_v2 = vsub.s32 1, %v2459_v60 }
   0xe   :  { %v4009_v39 = vld [vmem:[%s4964_s0 + $0x30] sm:$0xff]   ;;  %v4010_v40 = vld [vmem:[%s4964_s0 + $0x38] sm:$0xff]   ;;  %v4011_v41 = vld [vmem:[%s4964_s0 + $0x40] sm:$0xff]   ;;  %v2472_v3 = vsub.s32 3, %v2459_v60 }
   0xf   :  { %986 = vmatpush1.bf16.msra.mxu0 %v3977_v15  ;;  %1339 = vmatpush1.bf16.msra.mxu1 %v3978_v16  ;;  %v4012_v42 = vld [vmem:[%s4964_s0 + $0x48] sm:$0xff]   ;;  %v4013_v43 = vld [vmem:[%s4964_s0 + $0x50] sm:$0xff]   ;;  %v4014_v44 = vld [vmem:[%s4964_s0 + $0x58] sm:$0xff]  }
  0x10   :  { %987 = vmatprep.subr.bf16.mxu0 %v3979_v17  ;;  %1340 = vmatprep.subr.bf16.mxu1 %v3981_v18  ;;  %v4015_v45 = vld [vmem:[%s4964_s0 + $0x60] sm:$0xff]   ;;  %v4016_v46 = vld [vmem:[%s4964_s0 + $0x68] sm:$0xff]   ;;  %v4017_v47 = vld [vmem:[%s4964_s0 + $0x70] sm:$0xff]  }
  0x11   :  { %v4018_v48 = vld [vmem:[%s4964_s0 + $0x78] sm:$0xff]   ;;  %v4019_v49 = vld [vmem:[%s4964_s0 + $0x80] sm:$0xff]   ;;  %v4020_v50 = vld [vmem:[%s4964_s0 + $0x88] sm:$0xff]  }
  0x12   :  { %v4021_v51 = vld [vmem:[%s4964_s0 + $0x90] sm:$0xff]   ;;  %v4022_v52 = vld [vmem:[%s4964_s0 + $0x98] sm:$0xff]   ;;  %v4023_v53 = vld [vmem:[%s4964_s0 + $0xa0] sm:$0xff]  }
  0x13   :  { %988 = vmatpush1.bf16.msra.mxu0 %v3983_v19  ;;  %1341 = vmatpush1.bf16.msra.mxu1 %v3984_v20  ;;  %v4024_v54 = vld [vmem:[%s4964_s0 + $0xa8] sm:$0xff]   ;;  %v4025_v55 = vld [vmem:[%s4964_s0 + $0xb0] sm:$0xff]   ;;  %v4026_v56 = vld [vmem:[%s4964_s0 + $0xb8] sm:$0xff]  }
  0x14   :  { %989 = vmatprep.subr.bf16.mxu0 %v3985_v21  ;;  %1342 = vmatprep.subr.bf16.mxu1 %v3987_v22  ;;  %v4027_v57 = vld [vmem:[%s4964_s0 + $0xc0] sm:$0xff]   ;;  %v4028_v58 = vld [vmem:[%s4964_s0 + $0xc8] sm:$0xff]   ;;  %v4029_v61 = vld [vmem:[%s4964_s0 + $0xd0] sm:$0xff]  }
  0x15   :  { %v2456_v0 = vld [vmem:[%s4965_s2] sm:$0xf]  ;;  %v4030_v14 = vld [vmem:[%s4964_s0 + $0xd8] sm:$0xff]  }
  0x16   :  { %v4290_v4 = vrot.slane %v2456_v0, %v2460_v62  ;;  %v4292_v5 = vrot.slane %v2456_v0, %v2468_v63  ;;  %v4294_v6 = vrot.slane %v2456_v0, %v2464_v2  ;;  %v4296_v7 = vrot.slane %v2456_v0, %v2472_v3 }
  0x17   :  { %990 = vmatpush1.bf16.msra.mxu0 %v3989_v23  ;;  %1343 = vmatpush1.bf16.msra.mxu1 %v3990_v24 }
  0x18   :  { %991 = vmatprep.subr.bf16.mxu0 %v3991_v25  ;;  %1344 = vmatprep.subr.bf16.mxu1 %v3993_v26 }
  0x1b   :  { %992 = vmatpush1.bf16.msra.mxu0 %v3995_v27  ;;  %1345 = vmatpush1.bf16.msra.mxu1 %v3996_v28 }
  0x1c   :  { %993 = vmatprep.subr.bf16.mxu0 %v3997_v29  ;;  %1346 = vmatprep.subr.bf16.mxu1 %v3999_v30 }
  0x1f   :  { %994 = vmatpush1.bf16.msra.mxu0 %v4001_v31  ;;  %1347 = vmatpush1.bf16.msra.mxu1 %v4002_v32 }
  0x22   :  { %1012 = vmatmul.mubr.bf16.vlgmr.msra.gmra.mrb[0].mxu0 %v4003_v33  ;;  %1365 = vmatmul.mubr.bf16.vlgmr.msra.gmra.mrb[0].mxu1 %v4003_v33 }
  0x23   :  { %1021 = vmatprep.mubr.bf16.mxu0 %v4035_v1  ;;  %1374 = vmatprep.mubr.bf16.mxu1 %v4035_v1 }
  0x2a   :  { %1022 = vmatmul.mubr.bf16.gmra.mrb[4].mxu0 %v4004_v34  ;;  %1375 = vmatmul.mubr.bf16.gmra.mrb[4].mxu1 %v4004_v34 }
  0x2b   :  { %1031 = vmatprep.mubr.bf16.mxu0 %v4035_v1  ;;  %1384 = vmatprep.mubr.bf16.mxu1 %v4035_v1 }
  0x32   :  { %1032 = vmatmul.mubr.bf16.gmra.mrb[8].mxu0 %v4005_v35  ;;  %1385 = vmatmul.mubr.bf16.gmra.mrb[8].mxu1 %v4005_v35  ;;  %v4031_v35 = vld [vmem:[%s4964_s0 + $0xe0] sm:$0xff]  }
  0x33   :  { %1041 = vmatprep.mubr.bf16.mxu0 %v4035_v1  ;;  %1394 = vmatprep.mubr.bf16.mxu1 %v4035_v1 }
  0x3a   :  { %1042 = vmatmul.mubr.bf16.gmra.mrb[12].mxu0 %v4006_v36  ;;  %1395 = vmatmul.mubr.bf16.gmra.mrb[12].mxu1 %v4006_v36 }
  0x3b   :  { %1051 = vmatprep.mubr.bf16.mxu0 %v4035_v1  ;;  %1404 = vmatprep.mubr.bf16.mxu1 %v4035_v1 }
  0x42   :  { %1052 = vmatmul.mubr.bf16.gmra.mrb[16].mxu0 %v4007_v37  ;;  %1405 = vmatmul.mubr.bf16.gmra.mrb[16].mxu1 %v4007_v37 }
  0x43   :  { %1061 = vmatprep.mubr.bf16.mxu0 %v4035_v1  ;;  %1414 = vmatprep.mubr.bf16.mxu1 %v4035_v1 }
  0x4a   :  { %1062 = vmatmul.mubr.bf16.gmra.mrb[20].mxu0 %v4008_v38  ;;  %1415 = vmatmul.mubr.bf16.gmra.mrb[20].mxu1 %v4008_v38 }
  0x4b   :  { %1071 = vmatprep.mubr.bf16.mxu0 %v4035_v1  ;;  %1424 = vmatprep.mubr.bf16.mxu1 %v4035_v1 }
  0x52   :  { %1072 = vmatmul.mubr.bf16.gmra.mrb[24].mxu0 %v4009_v39  ;;  %1425 = vmatmul.mubr.bf16.gmra.mrb[24].mxu1 %v4009_v39 }
  0x53   :  { %1081 = vmatprep.mubr.bf16.mxu0 %v4035_v1  ;;  %1434 = vmatprep.mubr.bf16.mxu1 %v4035_v1 }
  0x5a   :  { %1082 = vmatmul.mubr.bf16.gmra.mrb[28].mxu0 %v4010_v40  ;;  %1435 = vmatmul.mubr.bf16.gmra.mrb[28].mxu1 %v4010_v40 }
  0x5b   :  { %1091 = vmatprep.mubr.bf16.mxu0 %v4035_v1  ;;  %1444 = vmatprep.mubr.bf16.mxu1 %v4035_v1 }
  0x62   :  { %1092 = vmatmul.mubr.bf16.gmra.mrb[32].mxu0 %v4011_v41  ;;  %1445 = vmatmul.mubr.bf16.gmra.mrb[32].mxu1 %v4011_v41 }
  0x63   :  { %1101 = vmatprep.mubr.bf16.mxu0 %v4035_v1  ;;  %1454 = vmatprep.mubr.bf16.mxu1 %v4035_v1 }
  0x6a   :  { %1102 = vmatmul.mubr.bf16.gmra.mrb[36].mxu0 %v4012_v42  ;;  %1455 = vmatmul.mubr.bf16.gmra.mrb[36].mxu1 %v4012_v42 }
  0x6b   :  { %1111 = vmatprep.mubr.bf16.mxu0 %v4035_v1  ;;  %1464 = vmatprep.mubr.bf16.mxu1 %v4035_v1 }
  0x72   :  { %1112 = vmatmul.mubr.bf16.gmra.mrb[40].mxu0 %v4013_v43  ;;  %1465 = vmatmul.mubr.bf16.gmra.mrb[40].mxu1 %v4013_v43 }
  0x73   :  { %1121 = vmatprep.mubr.bf16.mxu0 %v4035_v1  ;;  %1474 = vmatprep.mubr.bf16.mxu1 %v4035_v1 }
  0x7a   :  { %1122 = vmatmul.mubr.bf16.gmra.mrb[44].mxu0 %v4014_v44  ;;  %1475 = vmatmul.mubr.bf16.gmra.mrb[44].mxu1 %v4014_v44 }
  0x7b   :  { %1131 = vmatprep.mubr.bf16.mxu0 %v4035_v1  ;;  %1484 = vmatprep.mubr.bf16.mxu1 %v4035_v1 }
  0x82   :  { %1132 = vmatmul.mubr.bf16.gmra.mrb[48].mxu0 %v4015_v45  ;;  %1485 = vmatmul.mubr.bf16.gmra.mrb[48].mxu1 %v4015_v45 }
  0x83   :  { %1141 = vmatprep.mubr.bf16.mxu0 %v4035_v1  ;;  %1494 = vmatprep.mubr.bf16.mxu1 %v4035_v1 }
  0x8a   :  { %1142 = vmatmul.mubr.bf16.gmra.mrb[52].mxu0 %v4016_v46  ;;  %1495 = vmatmul.mubr.bf16.gmra.mrb[52].mxu1 %v4016_v46 }
  0x8b   :  { %1151 = vmatprep.mubr.bf16.mxu0 %v4035_v1  ;;  %1504 = vmatprep.mubr.bf16.mxu1 %v4035_v1 }
  0x92   :  { %1152 = vmatmul.mubr.bf16.gmra.mrb[56].mxu0 %v4017_v47  ;;  %1505 = vmatmul.mubr.bf16.gmra.mrb[56].mxu1 %v4017_v47 }
  0x93   :  { %1161 = vmatprep.mubr.bf16.mxu0 %v4035_v1  ;;  %1514 = vmatprep.mubr.bf16.mxu1 %v4035_v1 }
  0x9a   :  { %1162 = vmatmul.mubr.bf16.gmra.mrb[60].mxu0 %v4018_v48  ;;  %1515 = vmatmul.mubr.bf16.gmra.mrb[60].mxu1 %v4018_v48 }
  0x9b   :  { %1171 = vmatprep.mubr.bf16.mxu0 %v4035_v1  ;;  %1524 = vmatprep.mubr.bf16.mxu1 %v4035_v1 }
  0xa2   :  { %1172 = vmatmul.mubr.bf16.gmra.mrb[64].mxu0 %v4019_v49  ;;  %1525 = vmatmul.mubr.bf16.gmra.mrb[64].mxu1 %v4019_v49 }
  0xa3   :  { %1181 = vmatprep.mubr.bf16.mxu0 %v4035_v1  ;;  %1534 = vmatprep.mubr.bf16.mxu1 %v4035_v1 }
  0xaa   :  { %1182 = vmatmul.mubr.bf16.gmra.mrb[68].mxu0 %v4020_v50  ;;  %1535 = vmatmul.mubr.bf16.gmra.mrb[68].mxu1 %v4020_v50 }
  0xab   :  { %1191 = vmatprep.mubr.bf16.mxu0 %v4035_v1  ;;  %1544 = vmatprep.mubr.bf16.mxu1 %v4035_v1 }
  0xb2   :  { %1192 = vmatmul.mubr.bf16.gmra.mrb[72].mxu0 %v4021_v51  ;;  %1545 = vmatmul.mubr.bf16.gmra.mrb[72].mxu1 %v4021_v51 }
  0xb3   :  { %1201 = vmatprep.mubr.bf16.mxu0 %v4035_v1  ;;  %1554 = vmatprep.mubr.bf16.mxu1 %v4035_v1 }
  0xba   :  { %1202 = vmatmul.mubr.bf16.gmra.mrb[76].mxu0 %v4022_v52  ;;  %1555 = vmatmul.mubr.bf16.gmra.mrb[76].mxu1 %v4022_v52 }
  0xbb   :  { %1211 = vmatprep.mubr.bf16.mxu0 %v4035_v1  ;;  %1564 = vmatprep.mubr.bf16.mxu1 %v4035_v1 }
  0xc2   :  { %1212 = vmatmul.mubr.bf16.gmra.mrb[80].mxu0 %v4023_v53  ;;  %1565 = vmatmul.mubr.bf16.gmra.mrb[80].mxu1 %v4023_v53 }
  0xc3   :  { %1221 = vmatprep.mubr.bf16.mxu0 %v4035_v1  ;;  %1574 = vmatprep.mubr.bf16.mxu1 %v4035_v1 }
  0xca   :  { %1222 = vmatmul.mubr.bf16.gmra.mrb[84].mxu0 %v4024_v54  ;;  %1575 = vmatmul.mubr.bf16.gmra.mrb[84].mxu1 %v4024_v54 }
  0xcb   :  { %1231 = vmatprep.mubr.bf16.mxu0 %v4035_v1  ;;  %1584 = vmatprep.mubr.bf16.mxu1 %v4035_v1 }
  0xd2   :  { %1232 = vmatmul.mubr.bf16.gmra.mrb[88].mxu0 %v4025_v55  ;;  %1585 = vmatmul.mubr.bf16.gmra.mrb[88].mxu1 %v4025_v55 }
  0xd3   :  { %1241 = vmatprep.mubr.bf16.mxu0 %v4035_v1  ;;  %1594 = vmatprep.mubr.bf16.mxu1 %v4035_v1 }
  0xda   :  { %1242 = vmatmul.mubr.bf16.gmra.mrb[92].mxu0 %v4026_v56  ;;  %1595 = vmatmul.mubr.bf16.gmra.mrb[92].mxu1 %v4026_v56  ;;  %v4032_v56 = vld [vmem:[%s4964_s0 + $0xe8] sm:$0xff]  }
  0xdb   :  { %1251 = vmatprep.mubr.bf16.mxu0 %v4035_v1  ;;  %1604 = vmatprep.mubr.bf16.mxu1 %v4035_v1 }
  0xe2   :  { %1252 = vmatmul.mubr.bf16.gmra.mrb[96].mxu0 %v4027_v57  ;;  %1605 = vmatmul.mubr.bf16.gmra.mrb[96].mxu1 %v4027_v57 }
  0xe3   :  { %1261 = vmatprep.mubr.bf16.mxu0 %v4035_v1  ;;  %1614 = vmatprep.mubr.bf16.mxu1 %v4035_v1 }
  0xea   :  { %1262 = vmatmul.mubr.bf16.gmra.mrb[100].mxu0 %v4028_v58  ;;  %1615 = vmatmul.mubr.bf16.gmra.mrb[100].mxu1 %v4028_v58 }
  0xeb   :  { %1271 = vmatprep.mubr.bf16.mxu0 %v4035_v1  ;;  %1624 = vmatprep.mubr.bf16.mxu1 %v4035_v1 }
  0xf2   :  { %1272 = vmatmul.mubr.bf16.gmra.mrb[104].mxu0 %v4029_v61  ;;  %1625 = vmatmul.mubr.bf16.gmra.mrb[104].mxu1 %v4029_v61 }
  0xf3   :  { %1281 = vmatprep.mubr.bf16.mxu0 %v4035_v1  ;;  %1634 = vmatprep.mubr.bf16.mxu1 %v4035_v1 }
  0xf5   :  { %v1013_v8 = vpop.f32.mrb[0].mxu0  ;;  %v1366_v9 = vpop.f32.mrb[0].mxu1 }
  0xf6   :  { %v2478_v10 = vadd.f32 %v4290_v4, %v1013_v8  ;;  %v2480_v11 = vadd.f32 %v4292_v5, %v1366_v9  ;;  %v1015_v12 = vpop.f32.mrb[1].mxu0  ;;  %v1368_v13 = vpop.f32.mrb[1].mxu1 }
  0xf7   :  { %v2479_v15 = vadd.f32 %v4294_v6, %v1015_v12  ;;  %v2481_v16 = vadd.f32 %v4296_v7, %v1368_v13  ;;  %v1017_v17 = vpop.f32.mrb[2].mxu0  ;;  %v1370_v18 = vpop.f32.mrb[2].mxu1 }
  0xf8   :  { %v2482_v19 = vadd.f32 %v4290_v4, %v1017_v17  ;;  %v2484_v20 = vadd.f32 %v4292_v5, %v1370_v18  ;;  %v1019_v21 = vpop.f32.mrb[3].mxu0  ;;  %v1372_v22 = vpop.f32.mrb[3].mxu1  ;;  %v4033_v18 = vld [vmem:[%s4964_s0 + $0xf0] sm:$0xff]  }
  0xf9   :  { %v3826_v23 = vpack.c.bf16 %v2479_v15, %v2478_v10  ;;  %v3827_v24 = vpack.c.bf16 %v2481_v16, %v2480_v11  ;;  %v2483_v25 = vadd.f32 %v4294_v6, %v1019_v21  ;;  %v2485_v26 = vadd.f32 %v4296_v7, %v1372_v22 }
  0xfa   :  { %1282 = vmatmul.mubr.bf16.gmra.mrb[108].mxu0 %v4030_v14  ;;  %1635 = vmatmul.mubr.bf16.gmra.mrb[108].mxu1 %v4030_v14 }
  0xfb   :  { %3502 = vst [vmem:[%s4966_s3] sm:$0xff] %v3826_v23  ;;  %3503 = vst [vmem:[%s4966_s3 + $0x8] sm:$0xff] %v3827_v24  ;;  %v3828_v27 = vpack.c.bf16 %v2483_v25, %v2482_v19  ;;  %v3829_v28 = vpack.c.bf16 %v2485_v26, %v2484_v20  ;;  %1291 = vmatprep.mubr.bf16.mxu0 %v4035_v1  ;;  %1644 = vmatprep.mubr.bf16.mxu1 %v4035_v1 }
  0xfd   :  { %3504 = vst [vmem:[%s4966_s3 + $0x10] sm:$0xff] %v3828_v27  ;;  %3505 = vst [vmem:[%s4966_s3 + $0x18] sm:$0xff] %v3829_v28  ;;  %v1023_v29 = vpop.f32.mrb[4].mxu0  ;;  %v1376_v30 = vpop.f32.mrb[4].mxu1 }
  0xfe   :  { %v2486_v31 = vadd.f32 %v4290_v4, %v1023_v29  ;;  %v2488_v32 = vadd.f32 %v4292_v5, %v1376_v30  ;;  %v1025_v33 = vpop.f32.mrb[5].mxu0  ;;  %v1378_v34 = vpop.f32.mrb[5].mxu1 }
  0xff   :  { %v2487_v36 = vadd.f32 %v4294_v6, %v1025_v33  ;;  %v2489_v37 = vadd.f32 %v4296_v7, %v1378_v34  ;;  %v1027_v38 = vpop.f32.mrb[6].mxu0  ;;  %v1380_v39 = vpop.f32.mrb[6].mxu1 }
 0x100   :  { %v2490_v40 = vadd.f32 %v4290_v4, %v1027_v38  ;;  %v2492_v41 = vadd.f32 %v4292_v5, %v1380_v39  ;;  %v1029_v42 = vpop.f32.mrb[7].mxu0  ;;  %v1382_v43 = vpop.f32.mrb[7].mxu1 }
 0x101   :  { %v3830_v44 = vpack.c.bf16 %v2487_v36, %v2486_v31  ;;  %v3831_v45 = vpack.c.bf16 %v2489_v37, %v2488_v32  ;;  %v2491_v46 = vadd.f32 %v4294_v6, %v1029_v42  ;;  %v2493_v47 = vadd.f32 %v4296_v7, %v1382_v43 }
 0x102   :  { %1292 = vmatmul.mubr.bf16.gmra.mrb[112].mxu0 %v4031_v35  ;;  %1645 = vmatmul.mubr.bf16.gmra.mrb[112].mxu1 %v4031_v35 }
 0x103   :  { %3506 = vst [vmem:[%s4966_s3 + $0x20] sm:$0xff] %v3830_v44  ;;  %3507 = vst [vmem:[%s4966_s3 + $0x28] sm:$0xff] %v3831_v45  ;;  %v3832_v48 = vpack.c.bf16 %v2491_v46, %v2490_v40  ;;  %v3833_v49 = vpack.c.bf16 %v2493_v47, %v2492_v41  ;;  %1301 = vmatprep.mubr.bf16.mxu0 %v4035_v1  ;;  %1654 = vmatprep.mubr.bf16.mxu1 %v4035_v1 }
 0x105   :  { %3508 = vst [vmem:[%s4966_s3 + $0x30] sm:$0xff] %v3832_v48  ;;  %3509 = vst [vmem:[%s4966_s3 + $0x38] sm:$0xff] %v3833_v49  ;;  %v1033_v50 = vpop.f32.mrb[8].mxu0  ;;  %v1386_v51 = vpop.f32.mrb[8].mxu1 }
 0x106   :  { %v2494_v52 = vadd.f32 %v4290_v4, %v1033_v50  ;;  %v2496_v53 = vadd.f32 %v4292_v5, %v1386_v51  ;;  %v1035_v54 = vpop.f32.mrb[9].mxu0  ;;  %v1388_v55 = vpop.f32.mrb[9].mxu1 }
 0x107   :  { %v2495_v57 = vadd.f32 %v4294_v6, %v1035_v54  ;;  %v2497_v58 = vadd.f32 %v4296_v7, %v1388_v55  ;;  %v1037_v59 = vpop.f32.mrb[10].mxu0  ;;  %v1390_v60 = vpop.f32.mrb[10].mxu1 }
 0x108   :  { %v2498_v61 = vadd.f32 %v4290_v4, %v1037_v59  ;;  %v2500_v62 = vadd.f32 %v4292_v5, %v1390_v60  ;;  %v1039_v63 = vpop.f32.mrb[11].mxu0  ;;  %v1392_v0 = vpop.f32.mrb[11].mxu1 }
 0x109   :  { %v3834_v2 = vpack.c.bf16 %v2495_v57, %v2494_v52  ;;  %v3835_v3 = vpack.c.bf16 %v2497_v58, %v2496_v53  ;;  %v2499_v8 = vadd.f32 %v4294_v6, %v1039_v63  ;;  %v2501_v9 = vadd.f32 %v4296_v7, %v1392_v0 }
 0x10a   :  { %1302 = vmatmul.mubr.bf16.gmra.mrb[116].mxu0 %v4032_v56  ;;  %1655 = vmatmul.mubr.bf16.gmra.mrb[116].mxu1 %v4032_v56 }
 0x10b   :  { %3510 = vst [vmem:[%s4966_s3 + $0x40] sm:$0xff] %v3834_v2  ;;  %3511 = vst [vmem:[%s4966_s3 + $0x48] sm:$0xff] %v3835_v3  ;;  %v3836_v10 = vpack.c.bf16 %v2499_v8, %v2498_v61  ;;  %v3837_v11 = vpack.c.bf16 %v2501_v9, %v2500_v62  ;;  %1311 = vmatprep.mubr.bf16.mxu0 %v4035_v1  ;;  %1664 = vmatprep.mubr.bf16.mxu1 %v4035_v1 }
 0x10d   :  { %3512 = vst [vmem:[%s4966_s3 + $0x50] sm:$0xff] %v3836_v10  ;;  %3513 = vst [vmem:[%s4966_s3 + $0x58] sm:$0xff] %v3837_v11  ;;  %v1043_v12 = vpop.f32.mrb[12].mxu0  ;;  %v1396_v13 = vpop.f32.mrb[12].mxu1 }
 0x10e   :  { %v2502_v14 = vadd.f32 %v4290_v4, %v1043_v12  ;;  %v2504_v15 = vadd.f32 %v4292_v5, %v1396_v13  ;;  %v1045_v16 = vpop.f32.mrb[13].mxu0  ;;  %v1398_v17 = vpop.f32.mrb[13].mxu1 }
 0x10f   :  { %v2503_v19 = vadd.f32 %v4294_v6, %v1045_v16  ;;  %v2505_v20 = vadd.f32 %v4296_v7, %v1398_v17  ;;  %v1047_v21 = vpop.f32.mrb[14].mxu0  ;;  %v1400_v22 = vpop.f32.mrb[14].mxu1 }
 0x110   :  { %v2506_v23 = vadd.f32 %v4290_v4, %v1047_v21  ;;  %v2508_v24 = vadd.f32 %v4292_v5, %v1400_v22  ;;  %v1049_v25 = vpop.f32.mrb[15].mxu0  ;;  %v1402_v26 = vpop.f32.mrb[15].mxu1 }
 0x111   :  { %v3838_v27 = vpack.c.bf16 %v2503_v19, %v2502_v14  ;;  %v3839_v28 = vpack.c.bf16 %v2505_v20, %v2504_v15  ;;  %v2507_v29 = vadd.f32 %v4294_v6, %v1049_v25  ;;  %v2509_v30 = vadd.f32 %v4296_v7, %v1402_v26 }
 0x112   :  { %1312 = vmatmul.mubr.bf16.gmra.mrb[120].mxu0 %v4033_v18  ;;  %1665 = vmatmul.mubr.bf16.gmra.mrb[120].mxu1 %v4033_v18 }
 0x113   :  { %3514 = vst [vmem:[%s4966_s3 + $0x60] sm:$0xff] %v3838_v27  ;;  %3515 = vst [vmem:[%s4966_s3 + $0x68] sm:$0xff] %v3839_v28  ;;  %v3840_v31 = vpack.c.bf16 %v2507_v29, %v2506_v23  ;;  %v3841_v32 = vpack.c.bf16 %v2509_v30, %v2508_v24  ;;  %1321 = vmatprep.mubr.bf16.mxu0 %v4035_v1  ;;  %1674 = vmatprep.mubr.bf16.mxu1 %v4035_v1  ;;  %v4034_v1 = vld [vmem:[%s4964_s0 + $0xf8] sm:$0xff]  }
 0x115   :  { %3516 = vst [vmem:[%s4966_s3 + $0x70] sm:$0xff] %v3840_v31  ;;  %3517 = vst [vmem:[%s4966_s3 + $0x78] sm:$0xff] %v3841_v32  ;;  %v1053_v33 = vpop.f32.mrb[16].mxu0  ;;  %v1406_v34 = vpop.f32.mrb[16].mxu1 }
 0x116   :  { %v2510_v35 = vadd.f32 %v4290_v4, %v1053_v33  ;;  %v2512_v36 = vadd.f32 %v4292_v5, %v1406_v34  ;;  %v1055_v37 = vpop.f32.mrb[17].mxu0  ;;  %v1408_v38 = vpop.f32.mrb[17].mxu1 }
 0x117   :  { %v2511_v39 = vadd.f32 %v4294_v6, %v1055_v37  ;;  %v2513_v40 = vadd.f32 %v4296_v7, %v1408_v38  ;;  %v1057_v41 = vpop.f32.mrb[18].mxu0  ;;  %v1410_v42 = vpop.f32.mrb[18].mxu1 }
 0x118   :  { %v2514_v43 = vadd.f32 %v4290_v4, %v1057_v41  ;;  %v2516_v44 = vadd.f32 %v4292_v5, %v1410_v42  ;;  %v1059_v45 = vpop.f32.mrb[19].mxu0  ;;  %v1412_v46 = vpop.f32.mrb[19].mxu1 }
 0x119   :  { %v3842_v47 = vpack.c.bf16 %v2511_v39, %v2510_v35  ;;  %v3843_v48 = vpack.c.bf16 %v2513_v40, %v2512_v36  ;;  %v2515_v49 = vadd.f32 %v4294_v6, %v1059_v45  ;;  %v2517_v50 = vadd.f32 %v4296_v7, %v1412_v46 }
 0x11a   :  { %1322 = vmatmul.mubr.bf16.gmra.mrb[124].mxu0 %v4034_v1  ;;  %1675 = vmatmul.mubr.bf16.gmra.mrb[124].mxu1 %v4034_v1 }
 0x11b   :  { %3518 = vst [vmem:[%s4966_s3 + $0x80] sm:$0xff] %v3842_v47  ;;  %3519 = vst [vmem:[%s4966_s3 + $0x88] sm:$0xff] %v3843_v48  ;;  %v3844_v51 = vpack.c.bf16 %v2515_v49, %v2514_v43  ;;  %v3845_v52 = vpack.c.bf16 %v2517_v50, %v2516_v44 }
 0x11d   :  { %3520 = vst [vmem:[%s4966_s3 + $0x90] sm:$0xff] %v3844_v51  ;;  %3521 = vst [vmem:[%s4966_s3 + $0x98] sm:$0xff] %v3845_v52  ;;  %v1063_v53 = vpop.f32.mrb[20].mxu0  ;;  %v1416_v54 = vpop.f32.mrb[20].mxu1 }
 0x11e   :  { %v2518_v55 = vadd.f32 %v4290_v4, %v1063_v53  ;;  %v2520_v56 = vadd.f32 %v4292_v5, %v1416_v54  ;;  %v1065_v57 = vpop.f32.mrb[21].mxu0  ;;  %v1418_v58 = vpop.f32.mrb[21].mxu1 }
 0x11f   :  { %v2519_v59 = vadd.f32 %v4294_v6, %v1065_v57  ;;  %v2521_v60 = vadd.f32 %v4296_v7, %v1418_v58  ;;  %v1067_v61 = vpop.f32.mrb[22].mxu0  ;;  %v1420_v62 = vpop.f32.mrb[22].mxu1 }
 0x120   :  { %v2522_v63 = vadd.f32 %v4290_v4, %v1067_v61  ;;  %v2524_v0 = vadd.f32 %v4292_v5, %v1420_v62  ;;  %v1069_v2 = vpop.f32.mrb[23].mxu0  ;;  %v1422_v3 = vpop.f32.mrb[23].mxu1 }
 0x121   :  { %v3846_v8 = vpack.c.bf16 %v2519_v59, %v2518_v55  ;;  %v3847_v9 = vpack.c.bf16 %v2521_v60, %v2520_v56  ;;  %v2523_v10 = vadd.f32 %v4294_v6, %v1069_v2  ;;  %v2525_v11 = vadd.f32 %v4296_v7, %v1422_v3 }
 0x123   :  { %3522 = vst [vmem:[%s4966_s3 + $0xa0] sm:$0xff] %v3846_v8  ;;  %3523 = vst [vmem:[%s4966_s3 + $0xa8] sm:$0xff] %v3847_v9  ;;  %v3848_v12 = vpack.c.bf16 %v2523_v10, %v2522_v63  ;;  %v3849_v13 = vpack.c.bf16 %v2525_v11, %v2524_v0 }
 0x125   :  { %3524 = vst [vmem:[%s4966_s3 + $0xb0] sm:$0xff] %v3848_v12  ;;  %3525 = vst [vmem:[%s4966_s3 + $0xb8] sm:$0xff] %v3849_v13  ;;  %v1073_v14 = vpop.f32.mrb[24].mxu0  ;;  %v1426_v15 = vpop.f32.mrb[24].mxu1 }
 0x126   :  { %v2526_v16 = vadd.f32 %v4290_v4, %v1073_v14  ;;  %v2528_v17 = vadd.f32 %v4292_v5, %v1426_v15  ;;  %v1075_v18 = vpop.f32.mrb[25].mxu0  ;;  %v1428_v19 = vpop.f32.mrb[25].mxu1 }
 0x127   :  { %v2527_v20 = vadd.f32 %v4294_v6, %v1075_v18  ;;  %v2529_v21 = vadd.f32 %v4296_v7, %v1428_v19  ;;  %v1077_v22 = vpop.f32.mrb[26].mxu0  ;;  %v1430_v23 = vpop.f32.mrb[26].mxu1 }
 0x128   :  { %v2530_v24 = vadd.f32 %v4290_v4, %v1077_v22  ;;  %v2532_v25 = vadd.f32 %v4292_v5, %v1430_v23  ;;  %v1079_v26 = vpop.f32.mrb[27].mxu0  ;;  %v1432_v27 = vpop.f32.mrb[27].mxu1 }
 0x129   :  { %v3850_v28 = vpack.c.bf16 %v2527_v20, %v2526_v16  ;;  %v3851_v29 = vpack.c.bf16 %v2529_v21, %v2528_v17  ;;  %v2531_v30 = vadd.f32 %v4294_v6, %v1079_v26  ;;  %v2533_v31 = vadd.f32 %v4296_v7, %v1432_v27 }
 0x12b   :  { %3526 = vst [vmem:[%s4966_s3 + $0xc0] sm:$0xff] %v3850_v28  ;;  %3527 = vst [vmem:[%s4966_s3 + $0xc8] sm:$0xff] %v3851_v29  ;;  %v3852_v32 = vpack.c.bf16 %v2531_v30, %v2530_v24  ;;  %v3853_v33 = vpack.c.bf16 %v2533_v31, %v2532_v25 }
 0x12d   :  { %3528 = vst [vmem:[%s4966_s3 + $0xd0] sm:$0xff] %v3852_v32  ;;  %3529 = vst [vmem:[%s4966_s3 + $0xd8] sm:$0xff] %v3853_v33  ;;  %v1083_v34 = vpop.f32.mrb[28].mxu0  ;;  %v1436_v35 = vpop.f32.mrb[28].mxu1 }
 0x12e   :  { %v2534_v36 = vadd.f32 %v4290_v4, %v1083_v34  ;;  %v2536_v37 = vadd.f32 %v4292_v5, %v1436_v35  ;;  %v1085_v38 = vpop.f32.mrb[29].mxu0  ;;  %v1438_v1 = vpop.f32.mrb[29].mxu1 }
 0x12f   :  { %v2535_v39 = vadd.f32 %v4294_v6, %v1085_v38  ;;  %v2537_v40 = vadd.f32 %v4296_v7, %v1438_v1  ;;  %v1087_v41 = vpop.f32.mrb[30].mxu0  ;;  %v1440_v42 = vpop.f32.mrb[30].mxu1 }
 0x130   :  { %v2538_v43 = vadd.f32 %v4290_v4, %v1087_v41  ;;  %v2540_v44 = vadd.f32 %v4292_v5, %v1440_v42  ;;  %v1089_v45 = vpop.f32.mrb[31].mxu0  ;;  %v1442_v46 = vpop.f32.mrb[31].mxu1 }
 0x131   :  { %v3854_v47 = vpack.c.bf16 %v2535_v39, %v2534_v36  ;;  %v3855_v48 = vpack.c.bf16 %v2537_v40, %v2536_v37  ;;  %v2539_v49 = vadd.f32 %v4294_v6, %v1089_v45  ;;  %v2541_v50 = vadd.f32 %v4296_v7, %v1442_v46 }
 0x133   :  { %3530 = vst [vmem:[%s4966_s3 + $0xe0] sm:$0xff] %v3854_v47  ;;  %3531 = vst [vmem:[%s4966_s3 + $0xe8] sm:$0xff] %v3855_v48  ;;  %v3856_v51 = vpack.c.bf16 %v2539_v49, %v2538_v43  ;;  %v3857_v52 = vpack.c.bf16 %v2541_v50, %v2540_v44 }
 0x135   :  { %3532 = vst [vmem:[%s4966_s3 + $0xf0] sm:$0xff] %v3856_v51  ;;  %3533 = vst [vmem:[%s4966_s3 + $0xf8] sm:$0xff] %v3857_v52  ;;  %v1093_v53 = vpop.f32.mrb[32].mxu0  ;;  %v1446_v54 = vpop.f32.mrb[32].mxu1 }
 0x136   :  { %v2542_v55 = vadd.f32 %v4290_v4, %v1093_v53  ;;  %v2544_v56 = vadd.f32 %v4292_v5, %v1446_v54  ;;  %v1095_v57 = vpop.f32.mrb[33].mxu0  ;;  %v1448_v58 = vpop.f32.mrb[33].mxu1 }
 0x137   :  { %v2543_v59 = vadd.f32 %v4294_v6, %v1095_v57  ;;  %v2545_v60 = vadd.f32 %v4296_v7, %v1448_v58  ;;  %v1097_v61 = vpop.f32.mrb[34].mxu0  ;;  %v1450_v62 = vpop.f32.mrb[34].mxu1 }
 0x138   :  { %v2546_v63 = vadd.f32 %v4290_v4, %v1097_v61  ;;  %v2548_v0 = vadd.f32 %v4292_v5, %v1450_v62  ;;  %v1099_v2 = vpop.f32.mrb[35].mxu0  ;;  %v1452_v3 = vpop.f32.mrb[35].mxu1 }
 0x139   :  { %v3858_v8 = vpack.c.bf16 %v2543_v59, %v2542_v55  ;;  %v3859_v9 = vpack.c.bf16 %v2545_v60, %v2544_v56  ;;  %v2547_v10 = vadd.f32 %v4294_v6, %v1099_v2  ;;  %v2549_v11 = vadd.f32 %v4296_v7, %v1452_v3 }
 0x13b   :  { %3534 = vst [vmem:[%s4966_s3 + $0x100] sm:$0xff] %v3858_v8  ;;  %3535 = vst [vmem:[%s4966_s3 + $0x108] sm:$0xff] %v3859_v9  ;;  %v3860_v12 = vpack.c.bf16 %v2547_v10, %v2546_v63  ;;  %v3861_v13 = vpack.c.bf16 %v2549_v11, %v2548_v0 }
 0x13d   :  { %3536 = vst [vmem:[%s4966_s3 + $0x110] sm:$0xff] %v3860_v12  ;;  %3537 = vst [vmem:[%s4966_s3 + $0x118] sm:$0xff] %v3861_v13  ;;  %v1103_v14 = vpop.f32.mrb[36].mxu0  ;;  %v1456_v15 = vpop.f32.mrb[36].mxu1 }
 0x13e   :  { %v2550_v16 = vadd.f32 %v4290_v4, %v1103_v14  ;;  %v2552_v17 = vadd.f32 %v4292_v5, %v1456_v15  ;;  %v1105_v18 = vpop.f32.mrb[37].mxu0  ;;  %v1458_v19 = vpop.f32.mrb[37].mxu1 }
 0x13f   :  { %v2551_v20 = vadd.f32 %v4294_v6, %v1105_v18  ;;  %v2553_v21 = vadd.f32 %v4296_v7, %v1458_v19  ;;  %v1107_v22 = vpop.f32.mrb[38].mxu0  ;;  %v1460_v23 = vpop.f32.mrb[38].mxu1 }
 0x140   :  { %v2554_v24 = vadd.f32 %v4290_v4, %v1107_v22  ;;  %v2556_v25 = vadd.f32 %v4292_v5, %v1460_v23  ;;  %v1109_v26 = vpop.f32.mrb[39].mxu0  ;;  %v1462_v27 = vpop.f32.mrb[39].mxu1 }
 0x141   :  { %v3862_v28 = vpack.c.bf16 %v2551_v20, %v2550_v16  ;;  %v3863_v29 = vpack.c.bf16 %v2553_v21, %v2552_v17  ;;  %v2555_v30 = vadd.f32 %v4294_v6, %v1109_v26  ;;  %v2557_v31 = vadd.f32 %v4296_v7, %v1462_v27 }
 0x143   :  { %3538 = vst [vmem:[%s4966_s3 + $0x120] sm:$0xff] %v3862_v28  ;;  %3539 = vst [vmem:[%s4966_s3 + $0x128] sm:$0xff] %v3863_v29  ;;  %v3864_v32 = vpack.c.bf16 %v2555_v30, %v2554_v24  ;;  %v3865_v33 = vpack.c.bf16 %v2557_v31, %v2556_v25 }
 0x145   :  { %3540 = vst [vmem:[%s4966_s3 + $0x130] sm:$0xff] %v3864_v32  ;;  %3541 = vst [vmem:[%s4966_s3 + $0x138] sm:$0xff] %v3865_v33  ;;  %v1113_v34 = vpop.f32.mrb[40].mxu0  ;;  %v1466_v35 = vpop.f32.mrb[40].mxu1 }
 0x146   :  { %v2558_v36 = vadd.f32 %v4290_v4, %v1113_v34  ;;  %v2560_v37 = vadd.f32 %v4292_v5, %v1466_v35  ;;  %v1115_v38 = vpop.f32.mrb[41].mxu0  ;;  %v1468_v1 = vpop.f32.mrb[41].mxu1 }
 0x147   :  { %v2559_v39 = vadd.f32 %v4294_v6, %v1115_v38  ;;  %v2561_v40 = vadd.f32 %v4296_v7, %v1468_v1  ;;  %v1117_v41 = vpop.f32.mrb[42].mxu0  ;;  %v1470_v42 = vpop.f32.mrb[42].mxu1 }
 0x148   :  { %v2562_v43 = vadd.f32 %v4290_v4, %v1117_v41  ;;  %v2564_v44 = vadd.f32 %v4292_v5, %v1470_v42  ;;  %v1119_v45 = vpop.f32.mrb[43].mxu0  ;;  %v1472_v46 = vpop.f32.mrb[43].mxu1 }
 0x149   :  { %v3866_v47 = vpack.c.bf16 %v2559_v39, %v2558_v36  ;;  %v3867_v48 = vpack.c.bf16 %v2561_v40, %v2560_v37  ;;  %v2563_v49 = vadd.f32 %v4294_v6, %v1119_v45  ;;  %v2565_v50 = vadd.f32 %v4296_v7, %v1472_v46 }
 0x14b   :  { %3542 = vst [vmem:[%s4966_s3 + $0x140] sm:$0xff] %v3866_v47  ;;  %3543 = vst [vmem:[%s4966_s3 + $0x148] sm:$0xff] %v3867_v48  ;;  %v3868_v51 = vpack.c.bf16 %v2563_v49, %v2562_v43  ;;  %v3869_v52 = vpack.c.bf16 %v2565_v50, %v2564_v44 }
 0x14d   :  { %3544 = vst [vmem:[%s4966_s3 + $0x150] sm:$0xff] %v3868_v51  ;;  %3545 = vst [vmem:[%s4966_s3 + $0x158] sm:$0xff] %v3869_v52  ;;  %v1123_v53 = vpop.f32.mrb[44].mxu0  ;;  %v1476_v54 = vpop.f32.mrb[44].mxu1 }
 0x14e   :  { %v2566_v55 = vadd.f32 %v4290_v4, %v1123_v53  ;;  %v2568_v56 = vadd.f32 %v4292_v5, %v1476_v54  ;;  %v1125_v57 = vpop.f32.mrb[45].mxu0  ;;  %v1478_v58 = vpop.f32.mrb[45].mxu1 }
 0x14f   :  { %v2567_v59 = vadd.f32 %v4294_v6, %v1125_v57  ;;  %v2569_v60 = vadd.f32 %v4296_v7, %v1478_v58  ;;  %v1127_v61 = vpop.f32.mrb[46].mxu0  ;;  %v1480_v62 = vpop.f32.mrb[46].mxu1 }
 0x150   :  { %v2570_v63 = vadd.f32 %v4290_v4, %v1127_v61  ;;  %v2572_v0 = vadd.f32 %v4292_v5, %v1480_v62  ;;  %v1129_v2 = vpop.f32.mrb[47].mxu0  ;;  %v1482_v3 = vpop.f32.mrb[47].mxu1 }
 0x151   :  { %v3870_v8 = vpack.c.bf16 %v2567_v59, %v2566_v55  ;;  %v3871_v9 = vpack.c.bf16 %v2569_v60, %v2568_v56  ;;  %v2571_v10 = vadd.f32 %v4294_v6, %v1129_v2  ;;  %v2573_v11 = vadd.f32 %v4296_v7, %v1482_v3 }
 0x153   :  { %3546 = vst [vmem:[%s4966_s3 + $0x160] sm:$0xff] %v3870_v8  ;;  %3547 = vst [vmem:[%s4966_s3 + $0x168] sm:$0xff] %v3871_v9  ;;  %v3872_v12 = vpack.c.bf16 %v2571_v10, %v2570_v63  ;;  %v3873_v13 = vpack.c.bf16 %v2573_v11, %v2572_v0 }
 0x155   :  { %3548 = vst [vmem:[%s4966_s3 + $0x170] sm:$0xff] %v3872_v12  ;;  %3549 = vst [vmem:[%s4966_s3 + $0x178] sm:$0xff] %v3873_v13  ;;  %v1133_v14 = vpop.f32.mrb[48].mxu0  ;;  %v1486_v15 = vpop.f32.mrb[48].mxu1 }
 0x156   :  { %v2574_v16 = vadd.f32 %v4290_v4, %v1133_v14  ;;  %v2576_v17 = vadd.f32 %v4292_v5, %v1486_v15  ;;  %v1135_v18 = vpop.f32.mrb[49].mxu0  ;;  %v1488_v19 = vpop.f32.mrb[49].mxu1 }
 0x157   :  { %v2575_v20 = vadd.f32 %v4294_v6, %v1135_v18  ;;  %v2577_v21 = vadd.f32 %v4296_v7, %v1488_v19  ;;  %v1137_v22 = vpop.f32.mrb[50].mxu0  ;;  %v1490_v23 = vpop.f32.mrb[50].mxu1 }
 0x158   :  { %v2578_v24 = vadd.f32 %v4290_v4, %v1137_v22  ;;  %v2580_v25 = vadd.f32 %v4292_v5, %v1490_v23  ;;  %v1139_v26 = vpop.f32.mrb[51].mxu0  ;;  %v1492_v27 = vpop.f32.mrb[51].mxu1 }
 0x159   :  { %v3874_v28 = vpack.c.bf16 %v2575_v20, %v2574_v16  ;;  %v3875_v29 = vpack.c.bf16 %v2577_v21, %v2576_v17  ;;  %v2579_v30 = vadd.f32 %v4294_v6, %v1139_v26  ;;  %v2581_v31 = vadd.f32 %v4296_v7, %v1492_v27 }
 0x15b   :  { %3550 = vst [vmem:[%s4966_s3 + $0x180] sm:$0xff] %v3874_v28  ;;  %3551 = vst [vmem:[%s4966_s3 + $0x188] sm:$0xff] %v3875_v29  ;;  %v3876_v32 = vpack.c.bf16 %v2579_v30, %v2578_v24  ;;  %v3877_v33 = vpack.c.bf16 %v2581_v31, %v2580_v25 }
 0x15d   :  { %3552 = vst [vmem:[%s4966_s3 + $0x190] sm:$0xff] %v3876_v32  ;;  %3553 = vst [vmem:[%s4966_s3 + $0x198] sm:$0xff] %v3877_v33  ;;  %v1143_v34 = vpop.f32.mrb[52].mxu0  ;;  %v1496_v35 = vpop.f32.mrb[52].mxu1 }
 0x15e   :  { %v2582_v36 = vadd.f32 %v4290_v4, %v1143_v34  ;;  %v2584_v37 = vadd.f32 %v4292_v5, %v1496_v35  ;;  %v1145_v38 = vpop.f32.mrb[53].mxu0  ;;  %v1498_v1 = vpop.f32.mrb[53].mxu1 }
 0x15f   :  { %v2583_v39 = vadd.f32 %v4294_v6, %v1145_v38  ;;  %v2585_v40 = vadd.f32 %v4296_v7, %v1498_v1  ;;  %v1147_v41 = vpop.f32.mrb[54].mxu0  ;;  %v1500_v42 = vpop.f32.mrb[54].mxu1 }
 0x160   :  { %v2586_v43 = vadd.f32 %v4290_v4, %v1147_v41  ;;  %v2588_v44 = vadd.f32 %v4292_v5, %v1500_v42  ;;  %v1149_v45 = vpop.f32.mrb[55].mxu0  ;;  %v1502_v46 = vpop.f32.mrb[55].mxu1 }
 0x161   :  { %v3878_v47 = vpack.c.bf16 %v2583_v39, %v2582_v36  ;;  %v3879_v48 = vpack.c.bf16 %v2585_v40, %v2584_v37  ;;  %v2587_v49 = vadd.f32 %v4294_v6, %v1149_v45  ;;  %v2589_v50 = vadd.f32 %v4296_v7, %v1502_v46 }
 0x163   :  { %3554 = vst [vmem:[%s4966_s3 + $0x1a0] sm:$0xff] %v3878_v47  ;;  %3555 = vst [vmem:[%s4966_s3 + $0x1a8] sm:$0xff] %v3879_v48  ;;  %v3880_v51 = vpack.c.bf16 %v2587_v49, %v2586_v43  ;;  %v3881_v52 = vpack.c.bf16 %v2589_v50, %v2588_v44 }
 0x165   :  { %3556 = vst [vmem:[%s4966_s3 + $0x1b0] sm:$0xff] %v3880_v51  ;;  %3557 = vst [vmem:[%s4966_s3 + $0x1b8] sm:$0xff] %v3881_v52  ;;  %v1153_v53 = vpop.f32.mrb[56].mxu0  ;;  %v1506_v54 = vpop.f32.mrb[56].mxu1 }
 0x166   :  { %v2590_v55 = vadd.f32 %v4290_v4, %v1153_v53  ;;  %v2592_v56 = vadd.f32 %v4292_v5, %v1506_v54  ;;  %v1155_v57 = vpop.f32.mrb[57].mxu0  ;;  %v1508_v58 = vpop.f32.mrb[57].mxu1 }
 0x167   :  { %v2591_v59 = vadd.f32 %v4294_v6, %v1155_v57  ;;  %v2593_v60 = vadd.f32 %v4296_v7, %v1508_v58  ;;  %v1157_v61 = vpop.f32.mrb[58].mxu0  ;;  %v1510_v62 = vpop.f32.mrb[58].mxu1 }
 0x168   :  { %v2594_v63 = vadd.f32 %v4290_v4, %v1157_v61  ;;  %v2596_v0 = vadd.f32 %v4292_v5, %v1510_v62  ;;  %v1159_v2 = vpop.f32.mrb[59].mxu0  ;;  %v1512_v3 = vpop.f32.mrb[59].mxu1 }
 0x169   :  { %v3882_v8 = vpack.c.bf16 %v2591_v59, %v2590_v55  ;;  %v3883_v9 = vpack.c.bf16 %v2593_v60, %v2592_v56  ;;  %v2595_v10 = vadd.f32 %v4294_v6, %v1159_v2  ;;  %v2597_v11 = vadd.f32 %v4296_v7, %v1512_v3 }
 0x16b   :  { %3558 = vst [vmem:[%s4966_s3 + $0x1c0] sm:$0xff] %v3882_v8  ;;  %3559 = vst [vmem:[%s4966_s3 + $0x1c8] sm:$0xff] %v3883_v9  ;;  %v3884_v12 = vpack.c.bf16 %v2595_v10, %v2594_v63  ;;  %v3885_v13 = vpack.c.bf16 %v2597_v11, %v2596_v0 }
 0x16d   :  { %3560 = vst [vmem:[%s4966_s3 + $0x1d0] sm:$0xff] %v3884_v12  ;;  %3561 = vst [vmem:[%s4966_s3 + $0x1d8] sm:$0xff] %v3885_v13  ;;  %v1163_v14 = vpop.f32.mrb[60].mxu0  ;;  %v1516_v15 = vpop.f32.mrb[60].mxu1 }
 0x16e   :  { %v2598_v16 = vadd.f32 %v4290_v4, %v1163_v14  ;;  %v2600_v17 = vadd.f32 %v4292_v5, %v1516_v15  ;;  %v1165_v18 = vpop.f32.mrb[61].mxu0  ;;  %v1518_v19 = vpop.f32.mrb[61].mxu1 }
 0x16f   :  { %v2599_v20 = vadd.f32 %v4294_v6, %v1165_v18  ;;  %v2601_v21 = vadd.f32 %v4296_v7, %v1518_v19  ;;  %v1167_v22 = vpop.f32.mrb[62].mxu0  ;;  %v1520_v23 = vpop.f32.mrb[62].mxu1 }
 0x170   :  { %v2602_v24 = vadd.f32 %v4290_v4, %v1167_v22  ;;  %v2604_v25 = vadd.f32 %v4292_v5, %v1520_v23  ;;  %v1169_v26 = vpop.f32.mrb[63].mxu0  ;;  %v1522_v27 = vpop.f32.mrb[63].mxu1 }
 0x171   :  { %v3886_v28 = vpack.c.bf16 %v2599_v20, %v2598_v16  ;;  %v3887_v29 = vpack.c.bf16 %v2601_v21, %v2600_v17  ;;  %v2603_v30 = vadd.f32 %v4294_v6, %v1169_v26  ;;  %v2605_v31 = vadd.f32 %v4296_v7, %v1522_v27 }
 0x173   :  { %3562 = vst [vmem:[%s4966_s3 + $0x1e0] sm:$0xff] %v3886_v28  ;;  %3563 = vst [vmem:[%s4966_s3 + $0x1e8] sm:$0xff] %v3887_v29  ;;  %v3888_v32 = vpack.c.bf16 %v2603_v30, %v2602_v24  ;;  %v3889_v33 = vpack.c.bf16 %v2605_v31, %v2604_v25 }
 0x175   :  { %3564 = vst [vmem:[%s4966_s3 + $0x1f0] sm:$0xff] %v3888_v32  ;;  %3565 = vst [vmem:[%s4966_s3 + $0x1f8] sm:$0xff] %v3889_v33  ;;  %v1173_v34 = vpop.f32.mrb[64].mxu0  ;;  %v1526_v35 = vpop.f32.mrb[64].mxu1 }
 0x176   :  { %v2606_v36 = vadd.f32 %v4290_v4, %v1173_v34  ;;  %v2608_v37 = vadd.f32 %v4292_v5, %v1526_v35  ;;  %v1175_v38 = vpop.f32.mrb[65].mxu0  ;;  %v1528_v1 = vpop.f32.mrb[65].mxu1 }
 0x177   :  { %v2607_v39 = vadd.f32 %v4294_v6, %v1175_v38  ;;  %v2609_v40 = vadd.f32 %v4296_v7, %v1528_v1  ;;  %v1177_v41 = vpop.f32.mrb[66].mxu0  ;;  %v1530_v42 = vpop.f32.mrb[66].mxu1 }
 0x178   :  { %v2610_v43 = vadd.f32 %v4290_v4, %v1177_v41  ;;  %v2612_v44 = vadd.f32 %v4292_v5, %v1530_v42  ;;  %v1179_v45 = vpop.f32.mrb[67].mxu0  ;;  %v1532_v46 = vpop.f32.mrb[67].mxu1 }
 0x179   :  { %v3890_v47 = vpack.c.bf16 %v2607_v39, %v2606_v36  ;;  %v3891_v48 = vpack.c.bf16 %v2609_v40, %v2608_v37  ;;  %v2611_v49 = vadd.f32 %v4294_v6, %v1179_v45  ;;  %v2613_v50 = vadd.f32 %v4296_v7, %v1532_v46 }
 0x17b   :  { %3566 = vst [vmem:[%s4966_s3 + $0x200] sm:$0xff] %v3890_v47  ;;  %3567 = vst [vmem:[%s4966_s3 + $0x208] sm:$0xff] %v3891_v48  ;;  %v3892_v51 = vpack.c.bf16 %v2611_v49, %v2610_v43  ;;  %v3893_v52 = vpack.c.bf16 %v2613_v50, %v2612_v44 }
 0x17d   :  { %3568 = vst [vmem:[%s4966_s3 + $0x210] sm:$0xff] %v3892_v51  ;;  %3569 = vst [vmem:[%s4966_s3 + $0x218] sm:$0xff] %v3893_v52  ;;  %v1183_v53 = vpop.f32.mrb[68].mxu0  ;;  %v1536_v54 = vpop.f32.mrb[68].mxu1 }
 0x17e   :  { %v2614_v55 = vadd.f32 %v4290_v4, %v1183_v53  ;;  %v2616_v56 = vadd.f32 %v4292_v5, %v1536_v54  ;;  %v1185_v57 = vpop.f32.mrb[69].mxu0  ;;  %v1538_v58 = vpop.f32.mrb[69].mxu1 }
 0x17f   :  { %v2615_v59 = vadd.f32 %v4294_v6, %v1185_v57  ;;  %v2617_v60 = vadd.f32 %v4296_v7, %v1538_v58  ;;  %v1187_v61 = vpop.f32.mrb[70].mxu0  ;;  %v1540_v62 = vpop.f32.mrb[70].mxu1 }
 0x180   :  { %v2618_v63 = vadd.f32 %v4290_v4, %v1187_v61  ;;  %v2620_v0 = vadd.f32 %v4292_v5, %v1540_v62  ;;  %v1189_v2 = vpop.f32.mrb[71].mxu0  ;;  %v1542_v3 = vpop.f32.mrb[71].mxu1 }
 0x181   :  { %v3894_v8 = vpack.c.bf16 %v2615_v59, %v2614_v55  ;;  %v3895_v9 = vpack.c.bf16 %v2617_v60, %v2616_v56  ;;  %v2619_v10 = vadd.f32 %v4294_v6, %v1189_v2  ;;  %v2621_v11 = vadd.f32 %v4296_v7, %v1542_v3 }
 0x183   :  { %3570 = vst [vmem:[%s4966_s3 + $0x220] sm:$0xff] %v3894_v8  ;;  %3571 = vst [vmem:[%s4966_s3 + $0x228] sm:$0xff] %v3895_v9  ;;  %v3896_v12 = vpack.c.bf16 %v2619_v10, %v2618_v63  ;;  %v3897_v13 = vpack.c.bf16 %v2621_v11, %v2620_v0 }
 0x185   :  { %3572 = vst [vmem:[%s4966_s3 + $0x230] sm:$0xff] %v3896_v12  ;;  %3573 = vst [vmem:[%s4966_s3 + $0x238] sm:$0xff] %v3897_v13  ;;  %v1193_v14 = vpop.f32.mrb[72].mxu0  ;;  %v1546_v15 = vpop.f32.mrb[72].mxu1 }
 0x186   :  { %v2622_v16 = vadd.f32 %v4290_v4, %v1193_v14  ;;  %v2624_v17 = vadd.f32 %v4292_v5, %v1546_v15  ;;  %v1195_v18 = vpop.f32.mrb[73].mxu0  ;;  %v1548_v19 = vpop.f32.mrb[73].mxu1 }
 0x187   :  { %v2623_v20 = vadd.f32 %v4294_v6, %v1195_v18  ;;  %v2625_v21 = vadd.f32 %v4296_v7, %v1548_v19  ;;  %v1197_v22 = vpop.f32.mrb[74].mxu0  ;;  %v1550_v23 = vpop.f32.mrb[74].mxu1 }
 0x188   :  { %v2626_v24 = vadd.f32 %v4290_v4, %v1197_v22  ;;  %v2628_v25 = vadd.f32 %v4292_v5, %v1550_v23  ;;  %v1199_v26 = vpop.f32.mrb[75].mxu0  ;;  %v1552_v27 = vpop.f32.mrb[75].mxu1 }
 0x189   :  { %v3898_v28 = vpack.c.bf16 %v2623_v20, %v2622_v16  ;;  %v3899_v29 = vpack.c.bf16 %v2625_v21, %v2624_v17  ;;  %v2627_v30 = vadd.f32 %v4294_v6, %v1199_v26  ;;  %v2629_v31 = vadd.f32 %v4296_v7, %v1552_v27 }
 0x18b   :  { %3574 = vst [vmem:[%s4966_s3 + $0x240] sm:$0xff] %v3898_v28  ;;  %3575 = vst [vmem:[%s4966_s3 + $0x248] sm:$0xff] %v3899_v29  ;;  %v3900_v32 = vpack.c.bf16 %v2627_v30, %v2626_v24  ;;  %v3901_v33 = vpack.c.bf16 %v2629_v31, %v2628_v25 }
 0x18d   :  { %3576 = vst [vmem:[%s4966_s3 + $0x250] sm:$0xff] %v3900_v32  ;;  %3577 = vst [vmem:[%s4966_s3 + $0x258] sm:$0xff] %v3901_v33  ;;  %v1203_v34 = vpop.f32.mrb[76].mxu0  ;;  %v1556_v35 = vpop.f32.mrb[76].mxu1 }
 0x18e   :  { %v2630_v36 = vadd.f32 %v4290_v4, %v1203_v34  ;;  %v2632_v37 = vadd.f32 %v4292_v5, %v1556_v35  ;;  %v1205_v38 = vpop.f32.mrb[77].mxu0  ;;  %v1558_v1 = vpop.f32.mrb[77].mxu1 }
 0x18f   :  { %v2631_v39 = vadd.f32 %v4294_v6, %v1205_v38  ;;  %v2633_v40 = vadd.f32 %v4296_v7, %v1558_v1  ;;  %v1207_v41 = vpop.f32.mrb[78].mxu0  ;;  %v1560_v42 = vpop.f32.mrb[78].mxu1 }
 0x190   :  { %v2634_v43 = vadd.f32 %v4290_v4, %v1207_v41  ;;  %v2636_v44 = vadd.f32 %v4292_v5, %v1560_v42  ;;  %v1209_v45 = vpop.f32.mrb[79].mxu0  ;;  %v1562_v46 = vpop.f32.mrb[79].mxu1 }
 0x191   :  { %v3902_v47 = vpack.c.bf16 %v2631_v39, %v2630_v36  ;;  %v3903_v48 = vpack.c.bf16 %v2633_v40, %v2632_v37  ;;  %v2635_v49 = vadd.f32 %v4294_v6, %v1209_v45  ;;  %v2637_v50 = vadd.f32 %v4296_v7, %v1562_v46 }
 0x193   :  { %3578 = vst [vmem:[%s4966_s3 + $0x260] sm:$0xff] %v3902_v47  ;;  %3579 = vst [vmem:[%s4966_s3 + $0x268] sm:$0xff] %v3903_v48  ;;  %v3904_v51 = vpack.c.bf16 %v2635_v49, %v2634_v43  ;;  %v3905_v52 = vpack.c.bf16 %v2637_v50, %v2636_v44 }
 0x195   :  { %3580 = vst [vmem:[%s4966_s3 + $0x270] sm:$0xff] %v3904_v51  ;;  %3581 = vst [vmem:[%s4966_s3 + $0x278] sm:$0xff] %v3905_v52  ;;  %v1213_v53 = vpop.f32.mrb[80].mxu0  ;;  %v1566_v54 = vpop.f32.mrb[80].mxu1 }
 0x196   :  { %v2638_v55 = vadd.f32 %v4290_v4, %v1213_v53  ;;  %v2640_v56 = vadd.f32 %v4292_v5, %v1566_v54  ;;  %v1215_v57 = vpop.f32.mrb[81].mxu0  ;;  %v1568_v58 = vpop.f32.mrb[81].mxu1 }
 0x197   :  { %v2639_v59 = vadd.f32 %v4294_v6, %v1215_v57  ;;  %v2641_v60 = vadd.f32 %v4296_v7, %v1568_v58  ;;  %v1217_v61 = vpop.f32.mrb[82].mxu0  ;;  %v1570_v62 = vpop.f32.mrb[82].mxu1 }
 0x198   :  { %v2642_v63 = vadd.f32 %v4290_v4, %v1217_v61  ;;  %v2644_v0 = vadd.f32 %v4292_v5, %v1570_v62  ;;  %v1219_v2 = vpop.f32.mrb[83].mxu0  ;;  %v1572_v3 = vpop.f32.mrb[83].mxu1 }
 0x199   :  { %v3906_v8 = vpack.c.bf16 %v2639_v59, %v2638_v55  ;;  %v3907_v9 = vpack.c.bf16 %v2641_v60, %v2640_v56  ;;  %v2643_v10 = vadd.f32 %v4294_v6, %v1219_v2  ;;  %v2645_v11 = vadd.f32 %v4296_v7, %v1572_v3 }
 0x19b   :  { %3582 = vst [vmem:[%s4966_s3 + $0x280] sm:$0xff] %v3906_v8  ;;  %3583 = vst [vmem:[%s4966_s3 + $0x288] sm:$0xff] %v3907_v9  ;;  %v3908_v12 = vpack.c.bf16 %v2643_v10, %v2642_v63  ;;  %v3909_v13 = vpack.c.bf16 %v2645_v11, %v2644_v0 }
 0x19d   :  { %3584 = vst [vmem:[%s4966_s3 + $0x290] sm:$0xff] %v3908_v12  ;;  %3585 = vst [vmem:[%s4966_s3 + $0x298] sm:$0xff] %v3909_v13  ;;  %v1223_v14 = vpop.f32.mrb[84].mxu0  ;;  %v1576_v15 = vpop.f32.mrb[84].mxu1 }
 0x19e   :  { %v2646_v16 = vadd.f32 %v4290_v4, %v1223_v14  ;;  %v2648_v17 = vadd.f32 %v4292_v5, %v1576_v15  ;;  %v1225_v18 = vpop.f32.mrb[85].mxu0  ;;  %v1578_v19 = vpop.f32.mrb[85].mxu1 }
 0x19f   :  { %v2647_v20 = vadd.f32 %v4294_v6, %v1225_v18  ;;  %v2649_v21 = vadd.f32 %v4296_v7, %v1578_v19  ;;  %v1227_v22 = vpop.f32.mrb[86].mxu0  ;;  %v1580_v23 = vpop.f32.mrb[86].mxu1 }
 0x1a0   :  { %v2650_v24 = vadd.f32 %v4290_v4, %v1227_v22  ;;  %v2652_v25 = vadd.f32 %v4292_v5, %v1580_v23  ;;  %v1229_v26 = vpop.f32.mrb[87].mxu0  ;;  %v1582_v27 = vpop.f32.mrb[87].mxu1 }
 0x1a1   :  { %v3910_v28 = vpack.c.bf16 %v2647_v20, %v2646_v16  ;;  %v3911_v29 = vpack.c.bf16 %v2649_v21, %v2648_v17  ;;  %v2651_v30 = vadd.f32 %v4294_v6, %v1229_v26  ;;  %v2653_v31 = vadd.f32 %v4296_v7, %v1582_v27 }
 0x1a3   :  { %3586 = vst [vmem:[%s4966_s3 + $0x2a0] sm:$0xff] %v3910_v28  ;;  %3587 = vst [vmem:[%s4966_s3 + $0x2a8] sm:$0xff] %v3911_v29  ;;  %v3912_v32 = vpack.c.bf16 %v2651_v30, %v2650_v24  ;;  %v3913_v33 = vpack.c.bf16 %v2653_v31, %v2652_v25 }
 0x1a5   :  { %3588 = vst [vmem:[%s4966_s3 + $0x2b0] sm:$0xff] %v3912_v32  ;;  %3589 = vst [vmem:[%s4966_s3 + $0x2b8] sm:$0xff] %v3913_v33  ;;  %v1233_v34 = vpop.f32.mrb[88].mxu0  ;;  %v1586_v35 = vpop.f32.mrb[88].mxu1 }
 0x1a6   :  { %v2654_v36 = vadd.f32 %v4290_v4, %v1233_v34  ;;  %v2656_v37 = vadd.f32 %v4292_v5, %v1586_v35  ;;  %v1235_v38 = vpop.f32.mrb[89].mxu0  ;;  %v1588_v1 = vpop.f32.mrb[89].mxu1 }
 0x1a7   :  { %v2655_v39 = vadd.f32 %v4294_v6, %v1235_v38  ;;  %v2657_v40 = vadd.f32 %v4296_v7, %v1588_v1  ;;  %v1237_v41 = vpop.f32.mrb[90].mxu0  ;;  %v1590_v42 = vpop.f32.mrb[90].mxu1 }
 0x1a8   :  { %v2658_v43 = vadd.f32 %v4290_v4, %v1237_v41  ;;  %v2660_v44 = vadd.f32 %v4292_v5, %v1590_v42  ;;  %v1239_v45 = vpop.f32.mrb[91].mxu0  ;;  %v1592_v46 = vpop.f32.mrb[91].mxu1 }
 0x1a9   :  { %v3914_v47 = vpack.c.bf16 %v2655_v39, %v2654_v36  ;;  %v3915_v48 = vpack.c.bf16 %v2657_v40, %v2656_v37  ;;  %v2659_v49 = vadd.f32 %v4294_v6, %v1239_v45  ;;  %v2661_v50 = vadd.f32 %v4296_v7, %v1592_v46 }
 0x1ab   :  { %3590 = vst [vmem:[%s4966_s3 + $0x2c0] sm:$0xff] %v3914_v47  ;;  %3591 = vst [vmem:[%s4966_s3 + $0x2c8] sm:$0xff] %v3915_v48  ;;  %v3916_v51 = vpack.c.bf16 %v2659_v49, %v2658_v43  ;;  %v3917_v52 = vpack.c.bf16 %v2661_v50, %v2660_v44 }
 0x1ad   :  { %3592 = vst [vmem:[%s4966_s3 + $0x2d0] sm:$0xff] %v3916_v51  ;;  %3593 = vst [vmem:[%s4966_s3 + $0x2d8] sm:$0xff] %v3917_v52  ;;  %v1243_v53 = vpop.f32.mrb[92].mxu0  ;;  %v1596_v54 = vpop.f32.mrb[92].mxu1 }
 0x1ae   :  { %v2662_v55 = vadd.f32 %v4290_v4, %v1243_v53  ;;  %v2664_v56 = vadd.f32 %v4292_v5, %v1596_v54  ;;  %v1245_v57 = vpop.f32.mrb[93].mxu0  ;;  %v1598_v58 = vpop.f32.mrb[93].mxu1 }
 0x1af   :  { %v2663_v59 = vadd.f32 %v4294_v6, %v1245_v57  ;;  %v2665_v60 = vadd.f32 %v4296_v7, %v1598_v58  ;;  %v1247_v61 = vpop.f32.mrb[94].mxu0  ;;  %v1600_v62 = vpop.f32.mrb[94].mxu1 }
 0x1b0   :  { %v2666_v63 = vadd.f32 %v4290_v4, %v1247_v61  ;;  %v2668_v0 = vadd.f32 %v4292_v5, %v1600_v62  ;;  %v1249_v2 = vpop.f32.mrb[95].mxu0  ;;  %v1602_v3 = vpop.f32.mrb[95].mxu1 }
 0x1b1   :  { %v3918_v8 = vpack.c.bf16 %v2663_v59, %v2662_v55  ;;  %v3919_v9 = vpack.c.bf16 %v2665_v60, %v2664_v56  ;;  %v2667_v10 = vadd.f32 %v4294_v6, %v1249_v2  ;;  %v2669_v11 = vadd.f32 %v4296_v7, %v1602_v3 }
 0x1b3   :  { %3594 = vst [vmem:[%s4966_s3 + $0x2e0] sm:$0xff] %v3918_v8  ;;  %3595 = vst [vmem:[%s4966_s3 + $0x2e8] sm:$0xff] %v3919_v9  ;;  %v3920_v12 = vpack.c.bf16 %v2667_v10, %v2666_v63  ;;  %v3921_v13 = vpack.c.bf16 %v2669_v11, %v2668_v0 }
 0x1b5   :  { %3596 = vst [vmem:[%s4966_s3 + $0x2f0] sm:$0xff] %v3920_v12  ;;  %3597 = vst [vmem:[%s4966_s3 + $0x2f8] sm:$0xff] %v3921_v13  ;;  %v1253_v14 = vpop.f32.mrb[96].mxu0  ;;  %v1606_v15 = vpop.f32.mrb[96].mxu1 }
 0x1b6   :  { %v2670_v16 = vadd.f32 %v4290_v4, %v1253_v14  ;;  %v2672_v17 = vadd.f32 %v4292_v5, %v1606_v15  ;;  %v1255_v18 = vpop.f32.mrb[97].mxu0  ;;  %v1608_v19 = vpop.f32.mrb[97].mxu1 }
 0x1b7   :  { %v2671_v20 = vadd.f32 %v4294_v6, %v1255_v18  ;;  %v2673_v21 = vadd.f32 %v4296_v7, %v1608_v19  ;;  %v1257_v22 = vpop.f32.mrb[98].mxu0  ;;  %v1610_v23 = vpop.f32.mrb[98].mxu1 }
 0x1b8   :  { %v2674_v24 = vadd.f32 %v4290_v4, %v1257_v22  ;;  %v2676_v25 = vadd.f32 %v4292_v5, %v1610_v23  ;;  %v1259_v26 = vpop.f32.mrb[99].mxu0  ;;  %v1612_v27 = vpop.f32.mrb[99].mxu1 }
 0x1b9   :  { %v3922_v28 = vpack.c.bf16 %v2671_v20, %v2670_v16  ;;  %v3923_v29 = vpack.c.bf16 %v2673_v21, %v2672_v17  ;;  %v2675_v30 = vadd.f32 %v4294_v6, %v1259_v26  ;;  %v2677_v31 = vadd.f32 %v4296_v7, %v1612_v27 }
 0x1bb   :  { %3598 = vst [vmem:[%s4966_s3 + $0x300] sm:$0xff] %v3922_v28  ;;  %3599 = vst [vmem:[%s4966_s3 + $0x308] sm:$0xff] %v3923_v29  ;;  %v3924_v32 = vpack.c.bf16 %v2675_v30, %v2674_v24  ;;  %v3925_v33 = vpack.c.bf16 %v2677_v31, %v2676_v25 }
 0x1bd   :  { %3600 = vst [vmem:[%s4966_s3 + $0x310] sm:$0xff] %v3924_v32  ;;  %3601 = vst [vmem:[%s4966_s3 + $0x318] sm:$0xff] %v3925_v33  ;;  %v1263_v34 = vpop.f32.mrb[100].mxu0  ;;  %v1616_v35 = vpop.f32.mrb[100].mxu1 }
 0x1be   :  { %v2678_v36 = vadd.f32 %v4290_v4, %v1263_v34  ;;  %v2680_v37 = vadd.f32 %v4292_v5, %v1616_v35  ;;  %v1265_v38 = vpop.f32.mrb[101].mxu0  ;;  %v1618_v1 = vpop.f32.mrb[101].mxu1 }
 0x1bf   :  { %v2679_v39 = vadd.f32 %v4294_v6, %v1265_v38  ;;  %v2681_v40 = vadd.f32 %v4296_v7, %v1618_v1  ;;  %v1267_v41 = vpop.f32.mrb[102].mxu0  ;;  %v1620_v42 = vpop.f32.mrb[102].mxu1 }
 0x1c0   :  { %v2682_v43 = vadd.f32 %v4290_v4, %v1267_v41  ;;  %v2684_v44 = vadd.f32 %v4292_v5, %v1620_v42  ;;  %v1269_v45 = vpop.f32.mrb[103].mxu0  ;;  %v1622_v46 = vpop.f32.mrb[103].mxu1 }
 0x1c1   :  { %v3926_v47 = vpack.c.bf16 %v2679_v39, %v2678_v36  ;;  %v3927_v48 = vpack.c.bf16 %v2681_v40, %v2680_v37  ;;  %v2683_v49 = vadd.f32 %v4294_v6, %v1269_v45  ;;  %v2685_v50 = vadd.f32 %v4296_v7, %v1622_v46 }
 0x1c3   :  { %3602 = vst [vmem:[%s4966_s3 + $0x320] sm:$0xff] %v3926_v47  ;;  %3603 = vst [vmem:[%s4966_s3 + $0x328] sm:$0xff] %v3927_v48  ;;  %v3928_v51 = vpack.c.bf16 %v2683_v49, %v2682_v43  ;;  %v3929_v52 = vpack.c.bf16 %v2685_v50, %v2684_v44 }
 0x1c5   :  { %3604 = vst [vmem:[%s4966_s3 + $0x330] sm:$0xff] %v3928_v51  ;;  %3605 = vst [vmem:[%s4966_s3 + $0x338] sm:$0xff] %v3929_v52  ;;  %v1273_v53 = vpop.f32.mrb[104].mxu0  ;;  %v1626_v54 = vpop.f32.mrb[104].mxu1 }
 0x1c6   :  { %v2686_v55 = vadd.f32 %v4290_v4, %v1273_v53  ;;  %v2688_v56 = vadd.f32 %v4292_v5, %v1626_v54  ;;  %v1275_v57 = vpop.f32.mrb[105].mxu0  ;;  %v1628_v58 = vpop.f32.mrb[105].mxu1 }
 0x1c7   :  { %v2687_v59 = vadd.f32 %v4294_v6, %v1275_v57  ;;  %v2689_v60 = vadd.f32 %v4296_v7, %v1628_v58  ;;  %v1277_v61 = vpop.f32.mrb[106].mxu0  ;;  %v1630_v62 = vpop.f32.mrb[106].mxu1 }
 0x1c8   :  { %v2690_v63 = vadd.f32 %v4290_v4, %v1277_v61  ;;  %v2692_v0 = vadd.f32 %v4292_v5, %v1630_v62  ;;  %v1279_v2 = vpop.f32.mrb[107].mxu0  ;;  %v1632_v3 = vpop.f32.mrb[107].mxu1 }
 0x1c9   :  { %v3930_v8 = vpack.c.bf16 %v2687_v59, %v2686_v55  ;;  %v3931_v9 = vpack.c.bf16 %v2689_v60, %v2688_v56  ;;  %v2691_v10 = vadd.f32 %v4294_v6, %v1279_v2  ;;  %v2693_v11 = vadd.f32 %v4296_v7, %v1632_v3 }
 0x1cb   :  { %3606 = vst [vmem:[%s4966_s3 + $0x340] sm:$0xff] %v3930_v8  ;;  %3607 = vst [vmem:[%s4966_s3 + $0x348] sm:$0xff] %v3931_v9  ;;  %v3932_v12 = vpack.c.bf16 %v2691_v10, %v2690_v63  ;;  %v3933_v13 = vpack.c.bf16 %v2693_v11, %v2692_v0 }
 0x1cd   :  { %3608 = vst [vmem:[%s4966_s3 + $0x350] sm:$0xff] %v3932_v12  ;;  %3609 = vst [vmem:[%s4966_s3 + $0x358] sm:$0xff] %v3933_v13  ;;  %v1283_v14 = vpop.f32.mrb[108].mxu0  ;;  %v1636_v15 = vpop.f32.mrb[108].mxu1 }
 0x1ce   :  { %v2694_v16 = vadd.f32 %v4290_v4, %v1283_v14  ;;  %v2696_v17 = vadd.f32 %v4292_v5, %v1636_v15  ;;  %v1285_v18 = vpop.f32.mrb[109].mxu0  ;;  %v1638_v19 = vpop.f32.mrb[109].mxu1 }
 0x1cf   :  { %v2695_v20 = vadd.f32 %v4294_v6, %v1285_v18  ;;  %v2697_v21 = vadd.f32 %v4296_v7, %v1638_v19  ;;  %v1287_v22 = vpop.f32.mrb[110].mxu0  ;;  %v1640_v23 = vpop.f32.mrb[110].mxu1 }
 0x1d0   :  { %v2698_v24 = vadd.f32 %v4290_v4, %v1287_v22  ;;  %v2700_v25 = vadd.f32 %v4292_v5, %v1640_v23  ;;  %v1289_v26 = vpop.f32.mrb[111].mxu0  ;;  %v1642_v27 = vpop.f32.mrb[111].mxu1 }
 0x1d1   :  { %v3934_v28 = vpack.c.bf16 %v2695_v20, %v2694_v16  ;;  %v3935_v29 = vpack.c.bf16 %v2697_v21, %v2696_v17  ;;  %v2699_v30 = vadd.f32 %v4294_v6, %v1289_v26  ;;  %v2701_v31 = vadd.f32 %v4296_v7, %v1642_v27 }
 0x1d3   :  { %3610 = vst [vmem:[%s4966_s3 + $0x360] sm:$0xff] %v3934_v28  ;;  %3611 = vst [vmem:[%s4966_s3 + $0x368] sm:$0xff] %v3935_v29  ;;  %v3936_v32 = vpack.c.bf16 %v2699_v30, %v2698_v24  ;;  %v3937_v33 = vpack.c.bf16 %v2701_v31, %v2700_v25 }
 0x1d5   :  { %3612 = vst [vmem:[%s4966_s3 + $0x370] sm:$0xff] %v3936_v32  ;;  %3613 = vst [vmem:[%s4966_s3 + $0x378] sm:$0xff] %v3937_v33  ;;  %v1293_v34 = vpop.f32.mrb[112].mxu0  ;;  %v1646_v35 = vpop.f32.mrb[112].mxu1 }
 0x1d6   :  { %v2702_v36 = vadd.f32 %v4290_v4, %v1293_v34  ;;  %v2704_v37 = vadd.f32 %v4292_v5, %v1646_v35  ;;  %v1295_v38 = vpop.f32.mrb[113].mxu0  ;;  %v1648_v1 = vpop.f32.mrb[113].mxu1 }
 0x1d7   :  { %v2703_v39 = vadd.f32 %v4294_v6, %v1295_v38  ;;  %v2705_v40 = vadd.f32 %v4296_v7, %v1648_v1  ;;  %v1297_v41 = vpop.f32.mrb[114].mxu0  ;;  %v1650_v42 = vpop.f32.mrb[114].mxu1 }
 0x1d8   :  { %v2706_v43 = vadd.f32 %v4290_v4, %v1297_v41  ;;  %v2708_v44 = vadd.f32 %v4292_v5, %v1650_v42  ;;  %v1299_v45 = vpop.f32.mrb[115].mxu0  ;;  %v1652_v46 = vpop.f32.mrb[115].mxu1 }
 0x1d9   :  { %v3938_v47 = vpack.c.bf16 %v2703_v39, %v2702_v36  ;;  %v3939_v48 = vpack.c.bf16 %v2705_v40, %v2704_v37  ;;  %v2707_v49 = vadd.f32 %v4294_v6, %v1299_v45  ;;  %v2709_v50 = vadd.f32 %v4296_v7, %v1652_v46 }
 0x1db   :  { %3614 = vst [vmem:[%s4966_s3 + $0x380] sm:$0xff] %v3938_v47  ;;  %3615 = vst [vmem:[%s4966_s3 + $0x388] sm:$0xff] %v3939_v48  ;;  %v3940_v51 = vpack.c.bf16 %v2707_v49, %v2706_v43  ;;  %v3941_v52 = vpack.c.bf16 %v2709_v50, %v2708_v44 }
 0x1dd   :  { %3616 = vst [vmem:[%s4966_s3 + $0x390] sm:$0xff] %v3940_v51  ;;  %3617 = vst [vmem:[%s4966_s3 + $0x398] sm:$0xff] %v3941_v52  ;;  %v1303_v53 = vpop.f32.mrb[116].mxu0  ;;  %v1656_v54 = vpop.f32.mrb[116].mxu1 }
 0x1de   :  { %v2710_v55 = vadd.f32 %v4290_v4, %v1303_v53  ;;  %v2712_v56 = vadd.f32 %v4292_v5, %v1656_v54  ;;  %v1305_v57 = vpop.f32.mrb[117].mxu0  ;;  %v1658_v58 = vpop.f32.mrb[117].mxu1 }
 0x1df   :  { %v2711_v59 = vadd.f32 %v4294_v6, %v1305_v57  ;;  %v2713_v60 = vadd.f32 %v4296_v7, %v1658_v58  ;;  %v1307_v61 = vpop.f32.mrb[118].mxu0  ;;  %v1660_v62 = vpop.f32.mrb[118].mxu1 }
 0x1e0   :  { %v2714_v63 = vadd.f32 %v4290_v4, %v1307_v61  ;;  %v2716_v0 = vadd.f32 %v4292_v5, %v1660_v62  ;;  %v1309_v2 = vpop.f32.mrb[119].mxu0  ;;  %v1662_v3 = vpop.f32.mrb[119].mxu1 }
 0x1e1   :  { %v3942_v8 = vpack.c.bf16 %v2711_v59, %v2710_v55  ;;  %v3943_v9 = vpack.c.bf16 %v2713_v60, %v2712_v56  ;;  %v2715_v10 = vadd.f32 %v4294_v6, %v1309_v2  ;;  %v2717_v11 = vadd.f32 %v4296_v7, %v1662_v3 }
 0x1e3   :  { %3618 = vst [vmem:[%s4966_s3 + $0x3a0] sm:$0xff] %v3942_v8  ;;  %3619 = vst [vmem:[%s4966_s3 + $0x3a8] sm:$0xff] %v3943_v9  ;;  %v3944_v12 = vpack.c.bf16 %v2715_v10, %v2714_v63  ;;  %v3945_v13 = vpack.c.bf16 %v2717_v11, %v2716_v0 }
 0x1e5   :  { %3620 = vst [vmem:[%s4966_s3 + $0x3b0] sm:$0xff] %v3944_v12  ;;  %3621 = vst [vmem:[%s4966_s3 + $0x3b8] sm:$0xff] %v3945_v13  ;;  %v1313_v14 = vpop.f32.mrb[120].mxu0  ;;  %v1666_v15 = vpop.f32.mrb[120].mxu1 }
 0x1e6   :  { %v2718_v16 = vadd.f32 %v4290_v4, %v1313_v14  ;;  %v2720_v17 = vadd.f32 %v4292_v5, %v1666_v15  ;;  %v1315_v18 = vpop.f32.mrb[121].mxu0  ;;  %v1668_v19 = vpop.f32.mrb[121].mxu1 }
 0x1e7   :  { %v2719_v20 = vadd.f32 %v4294_v6, %v1315_v18  ;;  %v2721_v21 = vadd.f32 %v4296_v7, %v1668_v19  ;;  %v1317_v22 = vpop.f32.mrb[122].mxu0  ;;  %v1670_v23 = vpop.f32.mrb[122].mxu1 }
 0x1e8   :  { %v2722_v24 = vadd.f32 %v4290_v4, %v1317_v22  ;;  %v2724_v25 = vadd.f32 %v4292_v5, %v1670_v23  ;;  %v1319_v26 = vpop.f32.mrb[123].mxu0  ;;  %v1672_v27 = vpop.f32.mrb[123].mxu1 }
 0x1e9   :  { %v3946_v28 = vpack.c.bf16 %v2719_v20, %v2718_v16  ;;  %v3947_v29 = vpack.c.bf16 %v2721_v21, %v2720_v17  ;;  %v2723_v30 = vadd.f32 %v4294_v6, %v1319_v26  ;;  %v2725_v31 = vadd.f32 %v4296_v7, %v1672_v27 }
 0x1eb   :  { %3622 = vst [vmem:[%s4966_s3 + $0x3c0] sm:$0xff] %v3946_v28  ;;  %3623 = vst [vmem:[%s4966_s3 + $0x3c8] sm:$0xff] %v3947_v29  ;;  %v3948_v32 = vpack.c.bf16 %v2723_v30, %v2722_v24  ;;  %v3949_v33 = vpack.c.bf16 %v2725_v31, %v2724_v25 }
 0x1ed   :  { %3624 = vst [vmem:[%s4966_s3 + $0x3d0] sm:$0xff] %v3948_v32  ;;  %3625 = vst [vmem:[%s4966_s3 + $0x3d8] sm:$0xff] %v3949_v33  ;;  %v1323_v34 = vpop.f32.mrb[124].mxu0  ;;  %v1676_v35 = vpop.f32.mrb[124].mxu1 }
 0x1ee   :  { %v2726_v36 = vadd.f32 %v4290_v4, %v1323_v34  ;;  %v2728_v37 = vadd.f32 %v4292_v5, %v1676_v35  ;;  %v1325_v38 = vpop.f32.mrb[125].mxu0  ;;  %v1678_v1 = vpop.f32.mrb[125].mxu1 }
 0x1ef   :  { %v2727_v39 = vadd.f32 %v4294_v6, %v1325_v38  ;;  %v2729_v40 = vadd.f32 %v4296_v7, %v1678_v1  ;;  %v1327_v41 = vpop.f32.mrb[126].mxu0  ;;  %v1680_v42 = vpop.f32.mrb[126].mxu1 }
 0x1f0   :  { %v2730_v43 = vadd.f32 %v4290_v4, %v1327_v41  ;;  %v2732_v44 = vadd.f32 %v4292_v5, %v1680_v42  ;;  %v1329_v45 = vpop.f32.mrb[127].mxu0  ;;  %v1682_v46 = vpop.f32.mrb[127].mxu1 }
 0x1f1   :  { %v3950_v47 = vpack.c.bf16 %v2727_v39, %v2726_v36  ;;  %v3951_v48 = vpack.c.bf16 %v2729_v40, %v2728_v37  ;;  %v2731_v49 = vadd.f32 %v4294_v6, %v1329_v45  ;;  %v2733_v50 = vadd.f32 %v4296_v7, %v1682_v46 }
 0x1f3   :  { %3626 = vst [vmem:[%s4966_s3 + $0x3e0] sm:$0xff] %v3950_v47  ;;  %3627 = vst [vmem:[%s4966_s3 + $0x3e8] sm:$0xff] %v3951_v48  ;;  %v3952_v51 = vpack.c.bf16 %v2731_v49, %v2730_v43  ;;  %v3953_v4 = vpack.c.bf16 %v2733_v50, %v2732_v44 }
 0x1f5   :  { %3628 = vst [vmem:[%s4966_s3 + $0x3f0] sm:$0xff] %v3952_v51  ;;  %3629 = vst [vmem:[%s4966_s3 + $0x3f8] sm:$0xff] %v3953_v4 }

// kernel: _lambda_.21
= control target key start
LH: loop header
LB: loop body
LE: loop exit
PB: predicated region body
PF: predicated region fallthrough
CT: control target
= control target key end

     0   :  { %s3116_s9 = smov 0   ;;  %s3118_s10 = smov 0   ;;  %s3419_s0 = inlined_call_operand.vmem [shape: bf16[4,512,512], index: 0, kind: input, shape index: {}]   ;;  %s3420_s1 = inlined_call_operand.vmem [shape: bf16[4,512,128], index: 1, kind: input, shape index: {}]   ;;  %s3421_s2 = inlined_call_operand.vmem [shape: f32[4,512,128], index: 2, kind: output, shape index: {}]  }
   0x1   :  { %s3120_s11 = smov 0  }
   0x2 LB: > { %s38_s12 = sadd.s32 1, %s3094_s10  ;;  %p2463_p0 = scmp.ge.s32.totalorder %s3098_s11, 1  ;;  %s3098_s11 = sphi %s3120_s11, %s12_s11   ;;  %s3094_s10 = sphi %s3118_s10, %s3423_s10   ;;  %s3090_s9 = sphi %s3116_s9, %s3422_s9  }
   0x3   : > { %p40_p1 = scmp.ge.s32.totalorder %s38_s12, 4  ;;  %p179_p2 = scmp.lt.s32.totalorder %s3098_s11, 5 }
   0x5   : > { %s3425_s12 = smov (%p40_p1, %s38_s12), 0  ;;  %p180_p3 = pnand %p2463_p0, %p179_p2 }
   0x6   : > { %p231_p4 = scmp.lt.s32.totalorder (!%p180_p3), %s3090_s9, 3  ;;  %v3100_v0 = vmov (!%p180_p3), 0  }
   0x7   : > { %183 = sbr.rel (%p180_p3) target bundleno = 558 (0x22e), region = 28  ;;  %1428 = vmatprep.subr.bf16.mxu1 (!%p180_p3), %v3100_v0  ;;  %1717 = vmatprep.subr.bf16.mxu0 (!%p180_p3), %v3100_v0 }
   0xe   : > { %s3427_s9 = smov (!%p231_p4, %s3090_s9), 3 }
   0xf   : > { %s2633_s13 = sshll.u32 %s3427_s9, 8  ;;  %s2632_s17 = sshll.u32 %s3427_s9, 10 }
  0x10   : > { %s3142_s16 = scalar_lea.vmem %s3420_s1, %s2633_s13  ;;  %s3179_s20 = scalar_lea.vmem %s3419_s0, %s2632_s17 }
  0x11   : > { %v2724_v1 = vld [vmem:[%s3142_s16] sm:$0xff]   ;;  %v2726_v3 = vld [vmem:[%s3142_s16 + $0x8] sm:$0xff]   ;;  %v2728_v5 = vld [vmem:[%s3142_s16 + $0x10] sm:$0xff]   ;;  %s2634_s21 = sshll.u32 %s3427_s9, 9 }
  0x12   : > { %v2725_v2 = vld [vmem:[%s3142_s16 + $0x80] sm:$0xff]   ;;  %1429 = vmatpush1.bf16.msra.mxu1 %v2724_v1  ;;  %v2727_v4 = vld [vmem:[%s3142_s16 + $0x88] sm:$0xff]   ;;  %v2729_v6 = vld [vmem:[%s3142_s16 + $0x90] sm:$0xff]   ;;  %s3334_s24 = scalar_lea.vmem %s3421_s2, %s2634_s21 }
  0x13   : > { %1718 = vmatpush1.bf16.msra.mxu0 %v2725_v2  ;;  %1430 = vmatprep.subr.bf16.mxu1 %v3100_v0  ;;  %v2730_v7 = vld [vmem:[%s3142_s16 + $0x18] sm:$0xff]   ;;  %v2732_v9 = vld [vmem:[%s3142_s16 + $0x20] sm:$0xff]   ;;  %v2734_v11 = vld [vmem:[%s3142_s16 + $0x28] sm:$0xff]  }
  0x14   : > { %1719 = vmatprep.subr.bf16.mxu0 %v3100_v0  ;;  %v2731_v8 = vld [vmem:[%s3142_s16 + $0x98] sm:$0xff]   ;;  %v2733_v10 = vld [vmem:[%s3142_s16 + $0xa0] sm:$0xff]   ;;  %v2735_v12 = vld [vmem:[%s3142_s16 + $0xa8] sm:$0xff]  }
  0x15   : > { %v2736_v13 = vld [vmem:[%s3142_s16 + $0x30] sm:$0xff]   ;;  %v2738_v15 = vld [vmem:[%s3142_s16 + $0x38] sm:$0xff]   ;;  %v2740_v17 = vld [vmem:[%s3142_s16 + $0x40] sm:$0xff]  }
  0x16   : > { %1431 = vmatpush1.bf16.msra.mxu1 %v2726_v3  ;;  %v2737_v14 = vld [vmem:[%s3142_s16 + $0xb0] sm:$0xff]   ;;  %v2739_v16 = vld [vmem:[%s3142_s16 + $0xb8] sm:$0xff]   ;;  %v2741_v18 = vld [vmem:[%s3142_s16 + $0xc0] sm:$0xff]  }
  0x17   : > { %1720 = vmatpush1.bf16.msra.mxu0 %v2727_v4  ;;  %1432 = vmatprep.subr.bf16.mxu1 %v3100_v0  ;;  %v2758_v19 = vld [vmem:[%s3179_s20 + $0x4] ss:$16 sps:$4 sm:$0xff]   ;;  %v2742_v20 = vld [vmem:[%s3142_s16 + $0x48] sm:$0xff]   ;;  %v2746_v25 = vld [vmem:[%s3142_s16 + $0x58] sm:$0xff]  }
  0x18   : > { %1721 = vmatprep.subr.bf16.mxu0 %v3100_v0  ;;  %v2761_v21 = vld [vmem:[%s3179_s20 + $0xc] ss:$16 sps:$4 sm:$0xff]   ;;  %1460 = vmatprep.mubr.bf16.mxu1 %v2758_v19  ;;  %v2744_v23 = vld [vmem:[%s3142_s16 + $0x50] sm:$0xff]   ;;  %v2748_v27 = vld [vmem:[%s3142_s16 + $0x60] sm:$0xff]  }
  0x19   : > { %v2743_v22 = vld [vmem:[%s3142_s16 + $0xc8] sm:$0xff]   ;;  %1749 = vmatprep.mubr.bf16.mxu0 %v2761_v21  ;;  %v2745_v24 = vld [vmem:[%s3142_s16 + $0xd0] sm:$0xff]   ;;  %v2747_v26 = vld [vmem:[%s3142_s16 + $0xd8] sm:$0xff]  }
  0x1a   : > { %1433 = vmatpush1.bf16.msra.mxu1 %v2728_v5  ;;  %v2749_v28 = vld [vmem:[%s3142_s16 + $0xe0] sm:$0xff]   ;;  %v2750_v29 = vld [vmem:[%s3142_s16 + $0x68] sm:$0xff]   ;;  %v2752_v31 = vld [vmem:[%s3142_s16 + $0x70] sm:$0xff]  }
  0x1b   : > { %1722 = vmatpush1.bf16.msra.mxu0 %v2729_v6  ;;  %1434 = vmatprep.subr.bf16.mxu1 %v3100_v0  ;;  %v2751_v30 = vld [vmem:[%s3142_s16 + $0xe8] sm:$0xff]   ;;  %v2753_v32 = vld [vmem:[%s3142_s16 + $0xf0] sm:$0xff]   ;;  %v2754_v33 = vld [vmem:[%s3142_s16 + $0x78] sm:$0xff]  }
  0x1c   : > { %1723 = vmatprep.subr.bf16.mxu0 %v3100_v0  ;;  %v2755_v34 = vld [vmem:[%s3142_s16 + $0xf8] sm:$0xff]   ;;  %v2756_v35 = vld [vmem:[%s3179_s20] ss:$16 sps:$4 sm:$0xff]   ;;  %v2762_v37 = vld [vmem:[%s3179_s20 + $0x24] ss:$16 sps:$4 sm:$0xff]  }
  0x1d   : > { %v2759_v36 = vld [vmem:[%s3179_s20 + $0x8] ss:$16 sps:$4 sm:$0xff]   ;;  %v2764_v38 = vld [vmem:[%s3179_s20 + $0x2c] ss:$16 sps:$4 sm:$0xff]   ;;  %v2766_v39 = vld [vmem:[%s3179_s20 + $0x20] ss:$16 sps:$4 sm:$0xff]  }
  0x1e   : > { %1435 = vmatpush1.bf16.msra.mxu1 %v2730_v7  ;;  %v2767_v40 = vld [vmem:[%s3179_s20 + $0x28] ss:$16 sps:$4 sm:$0xff]   ;;  %v2768_v41 = vld [vmem:[%s3179_s20 + $0x44] ss:$16 sps:$4 sm:$0xff]   ;;  %v2770_v42 = vld [vmem:[%s3179_s20 + $0x4c] ss:$16 sps:$4 sm:$0xff]  }
  0x1f   : > { %1724 = vmatpush1.bf16.msra.mxu0 %v2731_v8  ;;  %1436 = vmatprep.subr.bf16.mxu1 %v3100_v0  ;;  %v2772_v43 = vld [vmem:[%s3179_s20 + $0x40] ss:$16 sps:$4 sm:$0xff]   ;;  %v2773_v44 = vld [vmem:[%s3179_s20 + $0x48] ss:$16 sps:$4 sm:$0xff]   ;;  %v2774_v45 = vld [vmem:[%s3179_s20 + $0x64] ss:$16 sps:$4 sm:$0xff]  }
  0x20   : > { %1725 = vmatprep.subr.bf16.mxu0 %v3100_v0  ;;  %v2776_v46 = vld [vmem:[%s3179_s20 + $0x6c] ss:$16 sps:$4 sm:$0xff]   ;;  %v2778_v47 = vld [vmem:[%s3179_s20 + $0x60] ss:$16 sps:$4 sm:$0xff]   ;;  %v2779_v48 = vld [vmem:[%s3179_s20 + $0x68] ss:$16 sps:$4 sm:$0xff]  }
  0x21   : > { %v2780_v49 = vld [vmem:[%s3179_s20 + $0x84] ss:$16 sps:$4 sm:$0xff]   ;;  %v2782_v50 = vld [vmem:[%s3179_s20 + $0x8c] ss:$16 sps:$4 sm:$0xff]   ;;  %v2784_v51 = vld [vmem:[%s3179_s20 + $0x80] ss:$16 sps:$4 sm:$0xff]  }
  0x22   : > { %1437 = vmatpush1.bf16.msra.mxu1 %v2732_v9  ;;  %v2785_v52 = vld [vmem:[%s3179_s20 + $0x88] ss:$16 sps:$4 sm:$0xff]   ;;  %v2786_v53 = vld [vmem:[%s3179_s20 + $0xa4] ss:$16 sps:$4 sm:$0xff]   ;;  %v2788_v54 = vld [vmem:[%s3179_s20 + $0xac] ss:$16 sps:$4 sm:$0xff]  }
  0x23   : > { %1726 = vmatpush1.bf16.msra.mxu0 %v2733_v10  ;;  %1438 = vmatprep.subr.bf16.mxu1 %v3100_v0  ;;  %v2790_v55 = vld [vmem:[%s3179_s20 + $0xa0] ss:$16 sps:$4 sm:$0xff]   ;;  %v2791_v56 = vld [vmem:[%s3179_s20 + $0xa8] ss:$16 sps:$4 sm:$0xff]   ;;  %v2792_v57 = vld [vmem:[%s3179_s20 + $0xc4] ss:$16 sps:$4 sm:$0xff]  }
  0x24   : > { %1727 = vmatprep.subr.bf16.mxu0 %v3100_v0  ;;  %v2794_v58 = vld [vmem:[%s3179_s20 + $0xcc] ss:$16 sps:$4 sm:$0xff]   ;;  %v2796_v59 = vld [vmem:[%s3179_s20 + $0xc0] ss:$16 sps:$4 sm:$0xff]   ;;  %v2797_v60 = vld [vmem:[%s3179_s20 + $0xc8] ss:$16 sps:$4 sm:$0xff]  }
  0x25   : > { %v2798_v61 = vld [vmem:[%s3179_s20 + $0xe4] ss:$16 sps:$4 sm:$0xff]   ;;  %v2800_v62 = vld [vmem:[%s3179_s20 + $0xec] ss:$16 sps:$4 sm:$0xff]   ;;  %v2802_v63 = vld [vmem:[%s3179_s20 + $0xe0] ss:$16 sps:$4 sm:$0xff]  }
  0x26   : > { %1439 = vmatpush1.bf16.msra.mxu1 %v2734_v11  ;;  %v2804_v1 = vld [vmem:[%s3179_s20 + $0x104] ss:$16 sps:$4 sm:$0xff]   ;;  %v2806_v2 = vld [vmem:[%s3179_s20 + $0x10c] ss:$16 sps:$4 sm:$0xff]   ;;  %v2808_v3 = vld [vmem:[%s3179_s20 + $0x100] ss:$16 sps:$4 sm:$0xff]  }
  0x27   : > { %1728 = vmatpush1.bf16.msra.mxu0 %v2735_v12  ;;  %1440 = vmatprep.subr.bf16.mxu1 %v3100_v0  ;;  %v2809_v4 = vld [vmem:[%s3179_s20 + $0x108] ss:$16 sps:$4 sm:$0xff]   ;;  %v2810_v5 = vld [vmem:[%s3179_s20 + $0x124] ss:$16 sps:$4 sm:$0xff]   ;;  %v2812_v6 = vld [vmem:[%s3179_s20 + $0x12c] ss:$16 sps:$4 sm:$0xff]  }
  0x28   : > { %1729 = vmatprep.subr.bf16.mxu0 %v3100_v0  ;;  %v2814_v7 = vld [vmem:[%s3179_s20 + $0x120] ss:$16 sps:$4 sm:$0xff]   ;;  %v2815_v8 = vld [vmem:[%s3179_s20 + $0x128] ss:$16 sps:$4 sm:$0xff]   ;;  %v2816_v9 = vld [vmem:[%s3179_s20 + $0x144] ss:$16 sps:$4 sm:$0xff]  }
  0x29   : > { %v2818_v10 = vld [vmem:[%s3179_s20 + $0x14c] ss:$16 sps:$4 sm:$0xff]   ;;  %v2820_v11 = vld [vmem:[%s3179_s20 + $0x140] ss:$16 sps:$4 sm:$0xff]   ;;  %v2821_v12 = vld [vmem:[%s3179_s20 + $0x148] ss:$16 sps:$4 sm:$0xff]  }
  0x2a   : > { %1441 = vmatpush1.bf16.msra.mxu1 %v2736_v13  ;;  %v2822_v13 = vld [vmem:[%s3179_s20 + $0x164] ss:$16 sps:$4 sm:$0xff]   ;;  %v2832_v19 = vld [vmem:[%s3179_s20 + $0x180] ss:$16 sps:$4 sm:$0xff]  }
  0x2b   : > { %1730 = vmatpush1.bf16.msra.mxu0 %v2737_v14  ;;  %1442 = vmatprep.subr.bf16.mxu1 %v3100_v0  ;;  %v2824_v14 = vld [vmem:[%s3179_s20 + $0x16c] ss:$16 sps:$4 sm:$0xff]   ;;  %v2834_v21 = vld [vmem:[%s3179_s20 + $0x1a4] ss:$16 sps:$4 sm:$0xff]  }
  0x2c   : > { %1731 = vmatprep.subr.bf16.mxu0 %v3100_v0 }
  0x2e   : > { %1443 = vmatpush1.bf16.msra.mxu1 %v2738_v15  ;;  %v2826_v15 = vld [vmem:[%s3179_s20 + $0x160] ss:$16 sps:$4 sm:$0xff]  }
  0x2f   : > { %1732 = vmatpush1.bf16.msra.mxu0 %v2739_v16  ;;  %1444 = vmatprep.subr.bf16.mxu1 %v3100_v0  ;;  %v2827_v16 = vld [vmem:[%s3179_s20 + $0x168] ss:$16 sps:$4 sm:$0xff]  }
  0x30   : > { %1733 = vmatprep.subr.bf16.mxu0 %v3100_v0 }
  0x32   : > { %1445 = vmatpush1.bf16.msra.mxu1 %v2740_v17  ;;  %v2828_v17 = vld [vmem:[%s3179_s20 + $0x184] ss:$16 sps:$4 sm:$0xff]  }
  0x33   : > { %1734 = vmatpush1.bf16.msra.mxu0 %v2741_v18  ;;  %1446 = vmatprep.subr.bf16.mxu1 %v3100_v0  ;;  %v2830_v18 = vld [vmem:[%s3179_s20 + $0x18c] ss:$16 sps:$4 sm:$0xff]  }
  0x34   : > { %1735 = vmatprep.subr.bf16.mxu0 %v3100_v0 }
  0x36   : > { %1447 = vmatpush1.bf16.msra.mxu1 %v2742_v20  ;;  %v2833_v20 = vld [vmem:[%s3179_s20 + $0x188] ss:$16 sps:$4 sm:$0xff]  }
  0x37   : > { %1736 = vmatpush1.bf16.msra.mxu0 %v2743_v22  ;;  %1448 = vmatprep.subr.bf16.mxu1 %v3100_v0  ;;  %v2836_v22 = vld [vmem:[%s3179_s20 + $0x1ac] ss:$16 sps:$4 sm:$0xff]  }
  0x38   : > { %1737 = vmatprep.subr.bf16.mxu0 %v3100_v0 }
  0x3a   : > { %1449 = vmatpush1.bf16.msra.mxu1 %v2744_v23  ;;  %v2838_v23 = vld [vmem:[%s3179_s20 + $0x1a0] ss:$16 sps:$4 sm:$0xff]  }
  0x3b   : > { %1738 = vmatpush1.bf16.msra.mxu0 %v2745_v24  ;;  %1450 = vmatprep.subr.bf16.mxu1 %v3100_v0  ;;  %v2839_v24 = vld [vmem:[%s3179_s20 + $0x1a8] ss:$16 sps:$4 sm:$0xff]  }
  0x3c   : > { %1739 = vmatprep.subr.bf16.mxu0 %v3100_v0 }
  0x3e   : > { %1451 = vmatpush1.bf16.msra.mxu1 %v2746_v25  ;;  %v2840_v25 = vld [vmem:[%s3179_s20 + $0x1c4] ss:$16 sps:$4 sm:$0xff]  }
  0x3f   : > { %1740 = vmatpush1.bf16.msra.mxu0 %v2747_v26  ;;  %1452 = vmatprep.subr.bf16.mxu1 %v3100_v0  ;;  %v2842_v26 = vld [vmem:[%s3179_s20 + $0x1cc] ss:$16 sps:$4 sm:$0xff]  }
  0x40   : > { %1741 = vmatprep.subr.bf16.mxu0 %v3100_v0 }
  0x42   : > { %1453 = vmatpush1.bf16.msra.mxu1 %v2748_v27  ;;  %v2844_v27 = vld [vmem:[%s3179_s20 + $0x1c0] ss:$16 sps:$4 sm:$0xff]  }
  0x43   : > { %1742 = vmatpush1.bf16.msra.mxu0 %v2749_v28  ;;  %1454 = vmatprep.subr.bf16.mxu1 %v3100_v0  ;;  %v2845_v28 = vld [vmem:[%s3179_s20 + $0x1c8] ss:$16 sps:$4 sm:$0xff]  }
  0x44   : > { %1743 = vmatprep.subr.bf16.mxu0 %v3100_v0 }
  0x46   : > { %1455 = vmatpush1.bf16.msra.mxu1 %v2750_v29  ;;  %v2846_v29 = vld [vmem:[%s3179_s20 + $0x1e4] ss:$16 sps:$4 sm:$0xff]  }
  0x47   : > { %1744 = vmatpush1.bf16.msra.mxu0 %v2751_v30  ;;  %1456 = vmatprep.subr.bf16.mxu1 %v3100_v0  ;;  %v2848_v30 = vld [vmem:[%s3179_s20 + $0x1ec] ss:$16 sps:$4 sm:$0xff]  }
  0x48   : > { %1745 = vmatprep.subr.bf16.mxu0 %v3100_v0 }
  0x4a   : > { %1457 = vmatpush1.bf16.msra.mxu1 %v2752_v31  ;;  %v2850_v31 = vld [vmem:[%s3179_s20 + $0x1e0] ss:$16 sps:$4 sm:$0xff]  }
  0x4b   : > { %1746 = vmatpush1.bf16.msra.mxu0 %v2753_v32  ;;  %1458 = vmatprep.subr.bf16.mxu1 %v3100_v0  ;;  %v2851_v32 = vld [vmem:[%s3179_s20 + $0x1e8] ss:$16 sps:$4 sm:$0xff]  }
  0x4c   : > { %1747 = vmatprep.subr.bf16.mxu0 %v3100_v0  ;;  %v2803_v0 = vld [vmem:[%s3179_s20 + $0xe8] ss:$16 sps:$4 sm:$0xff]  }
  0x4e   : > { %1459 = vmatpush1.bf16.msra.mxu1 %v2754_v33  ;;  %v2852_v33 = vld [vmem:[%s3179_s20 + $0x204] ss:$16 sps:$4 sm:$0xff]  }
  0x4f   : > { %1748 = vmatpush1.bf16.msra.mxu0 %v2755_v34  ;;  %v2854_v34 = vld [vmem:[%s3179_s20 + $0x20c] ss:$16 sps:$4 sm:$0xff]  }
  0x51   : > { %1461 = vmatmul.mubr.bf16.vlgmr.msra.gmra.mrb[0].mxu1 %v2756_v35  ;;  %v2856_v35 = vld [vmem:[%s3179_s20 + $0x200] ss:$16 sps:$4 sm:$0xff]  }
  0x52   : > { %1750 = vmatmul.mubr.bf16.vlgmr.msra.gmra.mrb[0].mxu0 %v2759_v36  ;;  %1468 = vmatprep.mubr.bf16.mxu1 %v2762_v37  ;;  %v2857_v36 = vld [vmem:[%s3179_s20 + $0x208] ss:$16 sps:$4 sm:$0xff]   ;;  %v2858_v37 = vld [vmem:[%s3179_s20 + $0x224] ss:$16 sps:$4 sm:$0xff]  }
  0x53   : > { %1757 = vmatprep.mubr.bf16.mxu0 %v2764_v38  ;;  %v2860_v38 = vld [vmem:[%s3179_s20 + $0x22c] ss:$16 sps:$4 sm:$0xff]  }
  0x59   : > { %1469 = vmatmul.mubr.bf16.gmra.mrb[4].mxu1 %v2766_v39  ;;  %v2862_v39 = vld [vmem:[%s3179_s20 + $0x220] ss:$16 sps:$4 sm:$0xff]  }
  0x5a   : > { %1758 = vmatmul.mubr.bf16.gmra.mrb[4].mxu0 %v2767_v40  ;;  %1476 = vmatprep.mubr.bf16.mxu1 %v2768_v41  ;;  %v2863_v40 = vld [vmem:[%s3179_s20 + $0x228] ss:$16 sps:$4 sm:$0xff]   ;;  %v2864_v41 = vld [vmem:[%s3179_s20 + $0x244] ss:$16 sps:$4 sm:$0xff]  }
  0x5b   : > { %1765 = vmatprep.mubr.bf16.mxu0 %v2770_v42  ;;  %v2866_v42 = vld [vmem:[%s3179_s20 + $0x24c] ss:$16 sps:$4 sm:$0xff]  }
  0x61   : > { %1477 = vmatmul.mubr.bf16.gmra.mrb[8].mxu1 %v2772_v43  ;;  %v2868_v43 = vld [vmem:[%s3179_s20 + $0x240] ss:$16 sps:$4 sm:$0xff]  }
  0x62   : > { %1766 = vmatmul.mubr.bf16.gmra.mrb[8].mxu0 %v2773_v44  ;;  %1484 = vmatprep.mubr.bf16.mxu1 %v2774_v45  ;;  %v2869_v44 = vld [vmem:[%s3179_s20 + $0x248] ss:$16 sps:$4 sm:$0xff]   ;;  %v2870_v45 = vld [vmem:[%s3179_s20 + $0x264] ss:$16 sps:$4 sm:$0xff]  }
  0x63   : > { %1773 = vmatprep.mubr.bf16.mxu0 %v2776_v46  ;;  %v2872_v46 = vld [vmem:[%s3179_s20 + $0x26c] ss:$16 sps:$4 sm:$0xff]  }
  0x69   : > { %1485 = vmatmul.mubr.bf16.gmra.mrb[12].mxu1 %v2778_v47  ;;  %v2874_v47 = vld [vmem:[%s3179_s20 + $0x260] ss:$16 sps:$4 sm:$0xff]  }
  0x6a   : > { %1774 = vmatmul.mubr.bf16.gmra.mrb[12].mxu0 %v2779_v48  ;;  %1492 = vmatprep.mubr.bf16.mxu1 %v2780_v49  ;;  %v2875_v48 = vld [vmem:[%s3179_s20 + $0x268] ss:$16 sps:$4 sm:$0xff]   ;;  %v2876_v49 = vld [vmem:[%s3179_s20 + $0x284] ss:$16 sps:$4 sm:$0xff]  }
  0x6b   : > { %1781 = vmatprep.mubr.bf16.mxu0 %v2782_v50  ;;  %v2878_v50 = vld [vmem:[%s3179_s20 + $0x28c] ss:$16 sps:$4 sm:$0xff]  }
  0x71   : > { %1493 = vmatmul.mubr.bf16.gmra.mrb[16].mxu1 %v2784_v51  ;;  %v2880_v51 = vld [vmem:[%s3179_s20 + $0x280] ss:$16 sps:$4 sm:$0xff]  }
  0x72   : > { %1782 = vmatmul.mubr.bf16.gmra.mrb[16].mxu0 %v2785_v52  ;;  %1500 = vmatprep.mubr.bf16.mxu1 %v2786_v53  ;;  %v2881_v52 = vld [vmem:[%s3179_s20 + $0x288] ss:$16 sps:$4 sm:$0xff]   ;;  %v2882_v53 = vld [vmem:[%s3179_s20 + $0x2a4] ss:$16 sps:$4 sm:$0xff]  }
  0x73   : > { %1789 = vmatprep.mubr.bf16.mxu0 %v2788_v54  ;;  %v2884_v54 = vld [vmem:[%s3179_s20 + $0x2ac] ss:$16 sps:$4 sm:$0xff]  }
  0x79   : > { %1501 = vmatmul.mubr.bf16.gmra.mrb[20].mxu1 %v2790_v55  ;;  %v2886_v55 = vld [vmem:[%s3179_s20 + $0x2a0] ss:$16 sps:$4 sm:$0xff]  }
  0x7a   : > { %1790 = vmatmul.mubr.bf16.gmra.mrb[20].mxu0 %v2791_v56  ;;  %1508 = vmatprep.mubr.bf16.mxu1 %v2792_v57  ;;  %v2887_v56 = vld [vmem:[%s3179_s20 + $0x2a8] ss:$16 sps:$4 sm:$0xff]   ;;  %v2888_v57 = vld [vmem:[%s3179_s20 + $0x2c4] ss:$16 sps:$4 sm:$0xff]  }
  0x7b   : > { %1797 = vmatprep.mubr.bf16.mxu0 %v2794_v58  ;;  %v2890_v58 = vld [vmem:[%s3179_s20 + $0x2cc] ss:$16 sps:$4 sm:$0xff]  }
  0x81   : > { %1509 = vmatmul.mubr.bf16.gmra.mrb[24].mxu1 %v2796_v59  ;;  %v2892_v59 = vld [vmem:[%s3179_s20 + $0x2c0] ss:$16 sps:$4 sm:$0xff]  }
  0x82   : > { %1798 = vmatmul.mubr.bf16.gmra.mrb[24].mxu0 %v2797_v60  ;;  %1516 = vmatprep.mubr.bf16.mxu1 %v2798_v61  ;;  %v2893_v60 = vld [vmem:[%s3179_s20 + $0x2c8] ss:$16 sps:$4 sm:$0xff]   ;;  %v2894_v61 = vld [vmem:[%s3179_s20 + $0x2e4] ss:$16 sps:$4 sm:$0xff]  }
  0x83   : > { %1805 = vmatprep.mubr.bf16.mxu0 %v2800_v62  ;;  %v2896_v62 = vld [vmem:[%s3179_s20 + $0x2ec] ss:$16 sps:$4 sm:$0xff]  }
  0x89   : > { %1517 = vmatmul.mubr.bf16.gmra.mrb[28].mxu1 %v2802_v63  ;;  %v2898_v63 = vld [vmem:[%s3179_s20 + $0x2e0] ss:$16 sps:$4 sm:$0xff]  }
  0x8a   : > { %1806 = vmatmul.mubr.bf16.gmra.mrb[28].mxu0 %v2803_v0  ;;  %1524 = vmatprep.mubr.bf16.mxu1 %v2804_v1  ;;  %v2899_v0 = vld [vmem:[%s3179_s20 + $0x2e8] ss:$16 sps:$4 sm:$0xff]   ;;  %v2900_v1 = vld [vmem:[%s3179_s20 + $0x304] ss:$16 sps:$4 sm:$0xff]  }
  0x8b   : > { %1813 = vmatprep.mubr.bf16.mxu0 %v2806_v2  ;;  %v2902_v2 = vld [vmem:[%s3179_s20 + $0x30c] ss:$16 sps:$4 sm:$0xff]  }
  0x91   : > { %1525 = vmatmul.mubr.bf16.gmra.mrb[32].mxu1 %v2808_v3  ;;  %v2904_v3 = vld [vmem:[%s3179_s20 + $0x300] ss:$16 sps:$4 sm:$0xff]  }
  0x92   : > { %1814 = vmatmul.mubr.bf16.gmra.mrb[32].mxu0 %v2809_v4  ;;  %1532 = vmatprep.mubr.bf16.mxu1 %v2810_v5  ;;  %v2905_v4 = vld [vmem:[%s3179_s20 + $0x308] ss:$16 sps:$4 sm:$0xff]   ;;  %v2906_v5 = vld [vmem:[%s3179_s20 + $0x324] ss:$16 sps:$4 sm:$0xff]  }
  0x93   : > { %1821 = vmatprep.mubr.bf16.mxu0 %v2812_v6  ;;  %v2908_v6 = vld [vmem:[%s3179_s20 + $0x32c] ss:$16 sps:$4 sm:$0xff]  }
  0x99   : > { %1533 = vmatmul.mubr.bf16.gmra.mrb[36].mxu1 %v2814_v7  ;;  %v2910_v7 = vld [vmem:[%s3179_s20 + $0x320] ss:$16 sps:$4 sm:$0xff]  }
  0x9a   : > { %1822 = vmatmul.mubr.bf16.gmra.mrb[36].mxu0 %v2815_v8  ;;  %1540 = vmatprep.mubr.bf16.mxu1 %v2816_v9  ;;  %v2911_v8 = vld [vmem:[%s3179_s20 + $0x328] ss:$16 sps:$4 sm:$0xff]   ;;  %v2912_v9 = vld [vmem:[%s3179_s20 + $0x344] ss:$16 sps:$4 sm:$0xff]  }
  0x9b   : > { %1829 = vmatprep.mubr.bf16.mxu0 %v2818_v10  ;;  %v2914_v10 = vld [vmem:[%s3179_s20 + $0x34c] ss:$16 sps:$4 sm:$0xff]  }
  0xa1   : > { %1541 = vmatmul.mubr.bf16.gmra.mrb[40].mxu1 %v2820_v11  ;;  %v2916_v11 = vld [vmem:[%s3179_s20 + $0x340] ss:$16 sps:$4 sm:$0xff]  }
  0xa2   : > { %1830 = vmatmul.mubr.bf16.gmra.mrb[40].mxu0 %v2821_v12  ;;  %1548 = vmatprep.mubr.bf16.mxu1 %v2822_v13  ;;  %v2917_v12 = vld [vmem:[%s3179_s20 + $0x348] ss:$16 sps:$4 sm:$0xff]   ;;  %v2918_v13 = vld [vmem:[%s3179_s20 + $0x364] ss:$16 sps:$4 sm:$0xff]  }
  0xa3   : > { %1837 = vmatprep.mubr.bf16.mxu0 %v2824_v14  ;;  %v2920_v14 = vld [vmem:[%s3179_s20 + $0x36c] ss:$16 sps:$4 sm:$0xff]  }
  0xa9   : > { %1549 = vmatmul.mubr.bf16.gmra.mrb[44].mxu1 %v2826_v15 }
  0xaa   : > { %1838 = vmatmul.mubr.bf16.gmra.mrb[44].mxu0 %v2827_v16  ;;  %1556 = vmatprep.mubr.bf16.mxu1 %v2828_v17 }
  0xab   : > { %1845 = vmatprep.mubr.bf16.mxu0 %v2830_v18  ;;  %v2922_v18 = vld [vmem:[%s3179_s20 + $0x360] ss:$16 sps:$4 sm:$0xff]  }
  0xb1   : > { %1557 = vmatmul.mubr.bf16.gmra.mrb[48].mxu1 %v2832_v19 }
  0xb2   : > { %1846 = vmatmul.mubr.bf16.gmra.mrb[48].mxu0 %v2833_v20  ;;  %1564 = vmatprep.mubr.bf16.mxu1 %v2834_v21 }
  0xb3   : > { %1853 = vmatprep.mubr.bf16.mxu0 %v2836_v22  ;;  %v2923_v22 = vld [vmem:[%s3179_s20 + $0x368] ss:$16 sps:$4 sm:$0xff]  }
  0xb9   : > { %1565 = vmatmul.mubr.bf16.gmra.mrb[52].mxu1 %v2838_v23  ;;  %v2924_v23 = vld [vmem:[%s3179_s20 + $0x384] ss:$16 sps:$4 sm:$0xff]  }
  0xba   : > { %1854 = vmatmul.mubr.bf16.gmra.mrb[52].mxu0 %v2839_v24  ;;  %1572 = vmatprep.mubr.bf16.mxu1 %v2840_v25 }
  0xbb   : > { %1861 = vmatprep.mubr.bf16.mxu0 %v2842_v26  ;;  %v2926_v26 = vld [vmem:[%s3179_s20 + $0x38c] ss:$16 sps:$4 sm:$0xff]  }
  0xc1   : > { %1573 = vmatmul.mubr.bf16.gmra.mrb[56].mxu1 %v2844_v27 }
  0xc2   : > { %1862 = vmatmul.mubr.bf16.gmra.mrb[56].mxu0 %v2845_v28  ;;  %1580 = vmatprep.mubr.bf16.mxu1 %v2846_v29 }
  0xc3   : > { %1869 = vmatprep.mubr.bf16.mxu0 %v2848_v30 }
  0xc9   : > { %1581 = vmatmul.mubr.bf16.gmra.mrb[60].mxu1 %v2850_v31 }
  0xca   : > { %1870 = vmatmul.mubr.bf16.gmra.mrb[60].mxu0 %v2851_v32  ;;  %1588 = vmatprep.mubr.bf16.mxu1 %v2852_v33  ;;  %v2928_v32 = vld [vmem:[%s3179_s20 + $0x380] ss:$16 sps:$4 sm:$0xff]  }
  0xcb   : > { %1877 = vmatprep.mubr.bf16.mxu0 %v2854_v34 }
  0xd1   : > { %1589 = vmatmul.mubr.bf16.gmra.mrb[64].mxu1 %v2856_v35 }
  0xd2   : > { %1878 = vmatmul.mubr.bf16.gmra.mrb[64].mxu0 %v2857_v36  ;;  %1596 = vmatprep.mubr.bf16.mxu1 %v2858_v37  ;;  %v2929_v36 = vld [vmem:[%s3179_s20 + $0x388] ss:$16 sps:$4 sm:$0xff]   ;;  %v2930_v37 = vld [vmem:[%s3179_s20 + $0x3a4] ss:$16 sps:$4 sm:$0xff]  }
  0xd3   : > { %1885 = vmatprep.mubr.bf16.mxu0 %v2860_v38 }
  0xd9   : > { %1597 = vmatmul.mubr.bf16.gmra.mrb[68].mxu1 %v2862_v39 }
  0xda   : > { %1886 = vmatmul.mubr.bf16.gmra.mrb[68].mxu0 %v2863_v40  ;;  %1604 = vmatprep.mubr.bf16.mxu1 %v2864_v41  ;;  %v2932_v40 = vld [vmem:[%s3179_s20 + $0x3ac] ss:$16 sps:$4 sm:$0xff]  }
  0xdb   : > { %1893 = vmatprep.mubr.bf16.mxu0 %v2866_v42 }
  0xe1   : > { %1605 = vmatmul.mubr.bf16.gmra.mrb[72].mxu1 %v2868_v43 }
  0xe2   : > { %1894 = vmatmul.mubr.bf16.gmra.mrb[72].mxu0 %v2869_v44  ;;  %1612 = vmatprep.mubr.bf16.mxu1 %v2870_v45 }
  0xe3   : > { %1901 = vmatprep.mubr.bf16.mxu0 %v2872_v46 }
  0xe9   : > { %1613 = vmatmul.mubr.bf16.gmra.mrb[76].mxu1 %v2874_v47 }
  0xea   : > { %1902 = vmatmul.mubr.bf16.gmra.mrb[76].mxu0 %v2875_v48  ;;  %1620 = vmatprep.mubr.bf16.mxu1 %v2876_v49  ;;  %v2934_v48 = vld [vmem:[%s3179_s20 + $0x3a0] ss:$16 sps:$4 sm:$0xff]  }
  0xeb   : > { %1909 = vmatprep.mubr.bf16.mxu0 %v2878_v50 }
  0xf1   : > { %1621 = vmatmul.mubr.bf16.gmra.mrb[80].mxu1 %v2880_v51 }
  0xf2   : > { %1910 = vmatmul.mubr.bf16.gmra.mrb[80].mxu0 %v2881_v52  ;;  %1628 = vmatprep.mubr.bf16.mxu1 %v2882_v53  ;;  %v2935_v52 = vld [vmem:[%s3179_s20 + $0x3a8] ss:$16 sps:$4 sm:$0xff]   ;;  %v2936_v53 = vld [vmem:[%s3179_s20 + $0x3c4] ss:$16 sps:$4 sm:$0xff]  }
  0xf3   : > { %1917 = vmatprep.mubr.bf16.mxu0 %v2884_v54 }
  0xf9   : > { %1629 = vmatmul.mubr.bf16.gmra.mrb[84].mxu1 %v2886_v55 }
  0xfa   : > { %1918 = vmatmul.mubr.bf16.gmra.mrb[84].mxu0 %v2887_v56  ;;  %1636 = vmatprep.mubr.bf16.mxu1 %v2888_v57  ;;  %v2938_v56 = vld [vmem:[%s3179_s20 + $0x3cc] ss:$16 sps:$4 sm:$0xff]  }
  0xfb   : > { %1925 = vmatprep.mubr.bf16.mxu0 %v2890_v58 }
 0x101   : > { %1637 = vmatmul.mubr.bf16.gmra.mrb[88].mxu1 %v2892_v59 }
 0x102   : > { %1926 = vmatmul.mubr.bf16.gmra.mrb[88].mxu0 %v2893_v60  ;;  %1644 = vmatprep.mubr.bf16.mxu1 %v2894_v61 }
 0x103   : > { %1933 = vmatprep.mubr.bf16.mxu0 %v2896_v62 }
 0x109   : > { %1645 = vmatmul.mubr.bf16.gmra.mrb[92].mxu1 %v2898_v63 }
 0x10a   : > { %1934 = vmatmul.mubr.bf16.gmra.mrb[92].mxu0 %v2899_v0  ;;  %1652 = vmatprep.mubr.bf16.mxu1 %v2900_v1  ;;  %v2940_v0 = vld [vmem:[%s3179_s20 + $0x3c0] ss:$16 sps:$4 sm:$0xff]  }
 0x10b   : > { %1941 = vmatprep.mubr.bf16.mxu0 %v2902_v2 }
 0x111   : > { %1653 = vmatmul.mubr.bf16.gmra.mrb[96].mxu1 %v2904_v3 }
 0x112   : > { %1942 = vmatmul.mubr.bf16.gmra.mrb[96].mxu0 %v2905_v4  ;;  %1660 = vmatprep.mubr.bf16.mxu1 %v2906_v5  ;;  %v2941_v4 = vld [vmem:[%s3179_s20 + $0x3c8] ss:$16 sps:$4 sm:$0xff]   ;;  %v2942_v5 = vld [vmem:[%s3179_s20 + $0x3e4] ss:$16 sps:$4 sm:$0xff]  }
 0x113   : > { %1949 = vmatprep.mubr.bf16.mxu0 %v2908_v6 }
 0x119   : > { %1661 = vmatmul.mubr.bf16.gmra.mrb[100].mxu1 %v2910_v7 }
 0x11a   : > { %1950 = vmatmul.mubr.bf16.gmra.mrb[100].mxu0 %v2911_v8  ;;  %1668 = vmatprep.mubr.bf16.mxu1 %v2912_v9  ;;  %v2944_v8 = vld [vmem:[%s3179_s20 + $0x3ec] ss:$16 sps:$4 sm:$0xff]  }
 0x11b   : > { %1957 = vmatprep.mubr.bf16.mxu0 %v2914_v10 }
 0x121   : > { %1669 = vmatmul.mubr.bf16.gmra.mrb[104].mxu1 %v2916_v11 }
 0x122   : > { %1958 = vmatmul.mubr.bf16.gmra.mrb[104].mxu0 %v2917_v12  ;;  %1676 = vmatprep.mubr.bf16.mxu1 %v2918_v13 }
 0x123   : > { %1965 = vmatprep.mubr.bf16.mxu0 %v2920_v14 }
 0x124   : > { %v1462_v15 = vpop.f32.mrb[0].mxu1 }
 0x125   : > { %v1751_v16 = vpop.f32.mrb[0].mxu0  ;;  %v1464_v17 = vpop.f32.mrb[1].mxu1 }
 0x126   : > { %v1752_v19 = vadd.f32 %v1751_v16, %v1462_v15  ;;  %v1753_v20 = vpop.f32.mrb[1].mxu0  ;;  %v1465_v21 = vpop.f32.mrb[2].mxu1  ;;  %v2946_v16 = vld [vmem:[%s3179_s20 + $0x3e0] ss:$16 sps:$4 sm:$0xff]  }
 0x127   : > { %v1754_v24 = vpop.f32.mrb[2].mxu0  ;;  %v1467_v25 = vpop.f32.mrb[3].mxu1  ;;  %v2947_v20 = vld [vmem:[%s3179_s20 + $0x3e8] ss:$16 sps:$4 sm:$0xff]  }
 0x128   : > { %2948 = vtanh.f32 %v1752_v19  ;;  %v1755_v27 = vadd.f32 %v1754_v24, %v1465_v21  ;;  %v1756_v28 = vpop.f32.mrb[3].mxu0 }
 0x129   : > { %1677 = vmatmul.mubr.bf16.gmra.mrb[108].mxu1 %v2922_v18 }
 0x12a   : > { %2950 = vtanh.f32 %v1755_v27  ;;  %1966 = vmatmul.mubr.bf16.gmra.mrb[108].mxu0 %v2923_v22  ;;  %1684 = vmatprep.mubr.bf16.mxu1 %v2924_v23 }
 0x12b   : > { %1973 = vmatprep.mubr.bf16.mxu0 %v2926_v26 }
 0x12c   : > { %v1470_v29 = vpop.f32.mrb[4].mxu1 }
 0x12d   : > { %v1759_v30 = vpop.f32.mrb[4].mxu0  ;;  %v1472_v31 = vpop.f32.mrb[5].mxu1 }
 0x12e   : > { %v1760_v33 = vadd.f32 %v1759_v30, %v1470_v29  ;;  %v1761_v34 = vpop.f32.mrb[5].mxu0  ;;  %v1473_v35 = vpop.f32.mrb[6].mxu1 }
 0x12f   : > { %v1762_v38 = vpop.f32.mrb[6].mxu0  ;;  %v1475_v39 = vpop.f32.mrb[7].mxu1 }
 0x130   : > { %2952 = vtanh.f32 %v1760_v33  ;;  %v1763_v41 = vadd.f32 %v1762_v38, %v1473_v35  ;;  %v1764_v42 = vpop.f32.mrb[7].mxu0 }
 0x131   : > { %1685 = vmatmul.mubr.bf16.gmra.mrb[112].mxu1 %v2928_v32 }
 0x132   : > { %v2949_v43 = vpop.eup %2948  ;;  %2954 = vtanh.f32 %v1763_v41  ;;  %1974 = vmatmul.mubr.bf16.gmra.mrb[112].mxu0 %v2929_v36  ;;  %1692 = vmatprep.mubr.bf16.mxu1 %v2930_v37 }
 0x133   : > { %2265 = vst [vmem:[%s3334_s24] sm:$0xff] %v2949_v43  ;;  %1981 = vmatprep.mubr.bf16.mxu0 %v2932_v40 }
 0x134   : > { %v2951_v44 = vpop.eup %2950  ;;  %v1478_v45 = vpop.f32.mrb[8].mxu1 }
 0x135   : > { %2266 = vst [vmem:[%s3334_s24 + $0x8] sm:$0xff] %v2951_v44  ;;  %v1767_v46 = vpop.f32.mrb[8].mxu0  ;;  %v1480_v47 = vpop.f32.mrb[9].mxu1 }
 0x136   : > { %v1768_v49 = vadd.f32 %v1767_v46, %v1478_v45  ;;  %v1769_v50 = vpop.f32.mrb[9].mxu0  ;;  %v1481_v51 = vpop.f32.mrb[10].mxu1 }
 0x137   : > { %v1770_v54 = vpop.f32.mrb[10].mxu0  ;;  %v1483_v55 = vpop.f32.mrb[11].mxu1 }
 0x138   : > { %2956 = vtanh.f32 %v1768_v49  ;;  %v1771_v57 = vadd.f32 %v1770_v54, %v1481_v51  ;;  %v1772_v58 = vpop.f32.mrb[11].mxu0 }
 0x139   : > { %1693 = vmatmul.mubr.bf16.gmra.mrb[116].mxu1 %v2934_v48 }
 0x13a   : > { %v2953_v59 = vpop.eup %2952  ;;  %2958 = vtanh.f32 %v1771_v57  ;;  %1982 = vmatmul.mubr.bf16.gmra.mrb[116].mxu0 %v2935_v52  ;;  %1700 = vmatprep.mubr.bf16.mxu1 %v2936_v53 }
 0x13b   : > { %2267 = vst [vmem:[%s3334_s24 + $0x10] sm:$0xff] %v2953_v59  ;;  %1989 = vmatprep.mubr.bf16.mxu0 %v2938_v56 }
 0x13c   : > { %v2955_v60 = vpop.eup %2954  ;;  %v1486_v61 = vpop.f32.mrb[12].mxu1 }
 0x13d   : > { %2268 = vst [vmem:[%s3334_s24 + $0x18] sm:$0xff] %v2955_v60  ;;  %v1775_v62 = vpop.f32.mrb[12].mxu0  ;;  %v1488_v63 = vpop.f32.mrb[13].mxu1 }
 0x13e   : > { %v1776_v1 = vadd.f32 %v1775_v62, %v1486_v61  ;;  %v1777_v2 = vpop.f32.mrb[13].mxu0  ;;  %v1489_v3 = vpop.f32.mrb[14].mxu1 }
 0x13f   : > { %v1778_v6 = vpop.f32.mrb[14].mxu0  ;;  %v1491_v7 = vpop.f32.mrb[15].mxu1 }
 0x140   : > { %2960 = vtanh.f32 %v1776_v1  ;;  %v1779_v9 = vadd.f32 %v1778_v6, %v1489_v3  ;;  %v1780_v10 = vpop.f32.mrb[15].mxu0 }
 0x141   : > { %1701 = vmatmul.mubr.bf16.gmra.mrb[120].mxu1 %v2940_v0 }
 0x142   : > { %v2957_v11 = vpop.eup %2956  ;;  %2962 = vtanh.f32 %v1779_v9  ;;  %1990 = vmatmul.mubr.bf16.gmra.mrb[120].mxu0 %v2941_v4  ;;  %1708 = vmatprep.mubr.bf16.mxu1 %v2942_v5 }
 0x143   : > { %2269 = vst [vmem:[%s3334_s24 + $0x20] sm:$0xff] %v2957_v11  ;;  %1997 = vmatprep.mubr.bf16.mxu0 %v2944_v8 }
 0x144   : > { %v2959_v12 = vpop.eup %2958  ;;  %v1494_v13 = vpop.f32.mrb[16].mxu1 }
 0x145   : > { %2270 = vst [vmem:[%s3334_s24 + $0x28] sm:$0xff] %v2959_v12  ;;  %v1783_v14 = vpop.f32.mrb[16].mxu0  ;;  %v1496_v15 = vpop.f32.mrb[17].mxu1 }
 0x146   : > { %v1784_v17 = vadd.f32 %v1783_v14, %v1494_v13  ;;  %v1785_v18 = vpop.f32.mrb[17].mxu0  ;;  %v1497_v19 = vpop.f32.mrb[18].mxu1 }
 0x147   : > { %v1786_v21 = vpop.f32.mrb[18].mxu0  ;;  %v1499_v22 = vpop.f32.mrb[19].mxu1 }
 0x148   : > { %2964 = vtanh.f32 %v1784_v17  ;;  %v1787_v23 = vadd.f32 %v1786_v21, %v1497_v19  ;;  %v1788_v24 = vpop.f32.mrb[19].mxu0 }
 0x149   : > { %1709 = vmatmul.mubr.bf16.gmra.mrb[124].mxu1 %v2946_v16 }
 0x14a   : > { %v2961_v25 = vpop.eup %2960  ;;  %2966 = vtanh.f32 %v1787_v23  ;;  %1998 = vmatmul.mubr.bf16.gmra.mrb[124].mxu0 %v2947_v20 }
 0x14b   : > { %2271 = vst [vmem:[%s3334_s24 + $0x30] sm:$0xff] %v2961_v25 }
 0x14c   : > { %v2963_v26 = vpop.eup %2962  ;;  %v1502_v27 = vpop.f32.mrb[20].mxu1 }
 0x14d   : > { %2272 = vst [vmem:[%s3334_s24 + $0x38] sm:$0xff] %v2963_v26  ;;  %v1791_v28 = vpop.f32.mrb[20].mxu0  ;;  %v1504_v29 = vpop.f32.mrb[21].mxu1 }
 0x14e   : > { %v1792_v30 = vadd.f32 %v1791_v28, %v1502_v27  ;;  %v1793_v31 = vpop.f32.mrb[21].mxu0  ;;  %v1505_v32 = vpop.f32.mrb[22].mxu1 }
 0x14f   : > { %v1794_v33 = vpop.f32.mrb[22].mxu0  ;;  %v1507_v34 = vpop.f32.mrb[23].mxu1 }
 0x150   : > { %2968 = vtanh.f32 %v1792_v30  ;;  %v1795_v35 = vadd.f32 %v1794_v33, %v1505_v32  ;;  %v1796_v36 = vpop.f32.mrb[23].mxu0 }
 0x152   : > { %v2965_v37 = vpop.eup %2964  ;;  %2970 = vtanh.f32 %v1795_v35 }
 0x153   : > { %2273 = vst [vmem:[%s3334_s24 + $0x40] sm:$0xff] %v2965_v37 }
 0x154   : > { %v2967_v38 = vpop.eup %2966  ;;  %v1510_v39 = vpop.f32.mrb[24].mxu1 }
 0x155   : > { %2274 = vst [vmem:[%s3334_s24 + $0x48] sm:$0xff] %v2967_v38  ;;  %v1799_v40 = vpop.f32.mrb[24].mxu0  ;;  %v1512_v41 = vpop.f32.mrb[25].mxu1 }
 0x156   : > { %v1800_v42 = vadd.f32 %v1799_v40, %v1510_v39  ;;  %v1801_v43 = vpop.f32.mrb[25].mxu0  ;;  %v1513_v44 = vpop.f32.mrb[26].mxu1 }
 0x157   : > { %v1802_v45 = vpop.f32.mrb[26].mxu0  ;;  %v1515_v46 = vpop.f32.mrb[27].mxu1 }
 0x158   : > { %2972 = vtanh.f32 %v1800_v42  ;;  %v1803_v47 = vadd.f32 %v1802_v45, %v1513_v44  ;;  %v1804_v48 = vpop.f32.mrb[27].mxu0 }
 0x15a   : > { %v2969_v49 = vpop.eup %2968  ;;  %2974 = vtanh.f32 %v1803_v47 }
 0x15b   : > { %2275 = vst [vmem:[%s3334_s24 + $0x50] sm:$0xff] %v2969_v49 }
 0x15c   : > { %v2971_v50 = vpop.eup %2970  ;;  %v1518_v51 = vpop.f32.mrb[28].mxu1 }
 0x15d   : > { %2276 = vst [vmem:[%s3334_s24 + $0x58] sm:$0xff] %v2971_v50  ;;  %v1807_v52 = vpop.f32.mrb[28].mxu0  ;;  %v1520_v53 = vpop.f32.mrb[29].mxu1 }
 0x15e   : > { %v1808_v54 = vadd.f32 %v1807_v52, %v1518_v51  ;;  %v1809_v55 = vpop.f32.mrb[29].mxu0  ;;  %v1521_v56 = vpop.f32.mrb[30].mxu1 }
 0x15f   : > { %v1810_v57 = vpop.f32.mrb[30].mxu0  ;;  %v1523_v58 = vpop.f32.mrb[31].mxu1 }
 0x160   : > { %2976 = vtanh.f32 %v1808_v54  ;;  %v1811_v59 = vadd.f32 %v1810_v57, %v1521_v56  ;;  %v1812_v60 = vpop.f32.mrb[31].mxu0 }
 0x162   : > { %v2973_v61 = vpop.eup %2972  ;;  %2978 = vtanh.f32 %v1811_v59 }
 0x163   : > { %2277 = vst [vmem:[%s3334_s24 + $0x60] sm:$0xff] %v2973_v61 }
 0x164   : > { %v2975_v62 = vpop.eup %2974  ;;  %v1526_v63 = vpop.f32.mrb[32].mxu1 }
 0x165   : > { %2278 = vst [vmem:[%s3334_s24 + $0x68] sm:$0xff] %v2975_v62  ;;  %v1815_v0 = vpop.f32.mrb[32].mxu0  ;;  %v1528_v1 = vpop.f32.mrb[33].mxu1 }
 0x166   : > { %v1816_v2 = vadd.f32 %v1815_v0, %v1526_v63  ;;  %v1817_v3 = vpop.f32.mrb[33].mxu0  ;;  %v1529_v4 = vpop.f32.mrb[34].mxu1 }
 0x167   : > { %v1818_v5 = vpop.f32.mrb[34].mxu0  ;;  %v1531_v6 = vpop.f32.mrb[35].mxu1 }
 0x168   : > { %2980 = vtanh.f32 %v1816_v2  ;;  %v1819_v7 = vadd.f32 %v1818_v5, %v1529_v4  ;;  %v1820_v8 = vpop.f32.mrb[35].mxu0 }
 0x16a   : > { %v2977_v9 = vpop.eup %2976  ;;  %2982 = vtanh.f32 %v1819_v7 }
 0x16b   : > { %2279 = vst [vmem:[%s3334_s24 + $0x70] sm:$0xff] %v2977_v9 }
 0x16c   : > { %v2979_v10 = vpop.eup %2978  ;;  %v1534_v11 = vpop.f32.mrb[36].mxu1 }
 0x16d   : > { %2280 = vst [vmem:[%s3334_s24 + $0x78] sm:$0xff] %v2979_v10  ;;  %v1823_v12 = vpop.f32.mrb[36].mxu0  ;;  %v1536_v13 = vpop.f32.mrb[37].mxu1 }
 0x16e   : > { %v1824_v14 = vadd.f32 %v1823_v12, %v1534_v11  ;;  %v1825_v15 = vpop.f32.mrb[37].mxu0  ;;  %v1537_v16 = vpop.f32.mrb[38].mxu1 }
 0x16f   : > { %v1826_v17 = vpop.f32.mrb[38].mxu0  ;;  %v1539_v18 = vpop.f32.mrb[39].mxu1 }
 0x170   : > { %2984 = vtanh.f32 %v1824_v14  ;;  %v1827_v19 = vadd.f32 %v1826_v17, %v1537_v16  ;;  %v1828_v20 = vpop.f32.mrb[39].mxu0 }
 0x172   : > { %v2981_v21 = vpop.eup %2980  ;;  %2986 = vtanh.f32 %v1827_v19 }
 0x173   : > { %2281 = vst [vmem:[%s3334_s24 + $0x80] sm:$0xff] %v2981_v21 }
 0x174   : > { %v2983_v22 = vpop.eup %2982  ;;  %v1542_v23 = vpop.f32.mrb[40].mxu1 }
 0x175   : > { %2282 = vst [vmem:[%s3334_s24 + $0x88] sm:$0xff] %v2983_v22  ;;  %v1831_v24 = vpop.f32.mrb[40].mxu0  ;;  %v1544_v25 = vpop.f32.mrb[41].mxu1 }
 0x176   : > { %v1832_v26 = vadd.f32 %v1831_v24, %v1542_v23  ;;  %v1833_v27 = vpop.f32.mrb[41].mxu0  ;;  %v1545_v28 = vpop.f32.mrb[42].mxu1 }
 0x177   : > { %v1834_v29 = vpop.f32.mrb[42].mxu0  ;;  %v1547_v30 = vpop.f32.mrb[43].mxu1 }
 0x178   : > { %2988 = vtanh.f32 %v1832_v26  ;;  %v1835_v31 = vadd.f32 %v1834_v29, %v1545_v28  ;;  %v1836_v32 = vpop.f32.mrb[43].mxu0 }
 0x17a   : > { %v2985_v33 = vpop.eup %2984  ;;  %2990 = vtanh.f32 %v1835_v31 }
 0x17b   : > { %2283 = vst [vmem:[%s3334_s24 + $0x90] sm:$0xff] %v2985_v33 }
 0x17c   : > { %v2987_v34 = vpop.eup %2986  ;;  %v1550_v35 = vpop.f32.mrb[44].mxu1 }
 0x17d   : > { %2284 = vst [vmem:[%s3334_s24 + $0x98] sm:$0xff] %v2987_v34  ;;  %v1839_v36 = vpop.f32.mrb[44].mxu0  ;;  %v1552_v37 = vpop.f32.mrb[45].mxu1 }
 0x17e   : > { %v1840_v38 = vadd.f32 %v1839_v36, %v1550_v35  ;;  %v1841_v39 = vpop.f32.mrb[45].mxu0  ;;  %v1553_v40 = vpop.f32.mrb[46].mxu1 }
 0x17f   : > { %v1842_v41 = vpop.f32.mrb[46].mxu0  ;;  %v1555_v42 = vpop.f32.mrb[47].mxu1 }
 0x180   : > { %2992 = vtanh.f32 %v1840_v38  ;;  %v1843_v43 = vadd.f32 %v1842_v41, %v1553_v40  ;;  %v1844_v44 = vpop.f32.mrb[47].mxu0 }
 0x182   : > { %v2989_v45 = vpop.eup %2988  ;;  %2994 = vtanh.f32 %v1843_v43 }
 0x183   : > { %2285 = vst [vmem:[%s3334_s24 + $0xa0] sm:$0xff] %v2989_v45 }
 0x184   : > { %v2991_v46 = vpop.eup %2990  ;;  %v1558_v47 = vpop.f32.mrb[48].mxu1 }
 0x185   : > { %2286 = vst [vmem:[%s3334_s24 + $0xa8] sm:$0xff] %v2991_v46  ;;  %v1847_v48 = vpop.f32.mrb[48].mxu0  ;;  %v1560_v49 = vpop.f32.mrb[49].mxu1 }
 0x186   : > { %v1848_v50 = vadd.f32 %v1847_v48, %v1558_v47  ;;  %v1849_v51 = vpop.f32.mrb[49].mxu0  ;;  %v1561_v52 = vpop.f32.mrb[50].mxu1 }
 0x187   : > { %v1850_v53 = vpop.f32.mrb[50].mxu0  ;;  %v1563_v54 = vpop.f32.mrb[51].mxu1 }
 0x188   : > { %2996 = vtanh.f32 %v1848_v50  ;;  %v1851_v55 = vadd.f32 %v1850_v53, %v1561_v52  ;;  %v1852_v56 = vpop.f32.mrb[51].mxu0 }
 0x18a   : > { %v2993_v57 = vpop.eup %2992  ;;  %2998 = vtanh.f32 %v1851_v55 }
 0x18b   : > { %2287 = vst [vmem:[%s3334_s24 + $0xb0] sm:$0xff] %v2993_v57 }
 0x18c   : > { %v2995_v58 = vpop.eup %2994  ;;  %v1566_v59 = vpop.f32.mrb[52].mxu1 }
 0x18d   : > { %2288 = vst [vmem:[%s3334_s24 + $0xb8] sm:$0xff] %v2995_v58  ;;  %v1855_v60 = vpop.f32.mrb[52].mxu0  ;;  %v1568_v61 = vpop.f32.mrb[53].mxu1 }
 0x18e   : > { %v1856_v62 = vadd.f32 %v1855_v60, %v1566_v59  ;;  %v1857_v63 = vpop.f32.mrb[53].mxu0  ;;  %v1569_v0 = vpop.f32.mrb[54].mxu1 }
 0x18f   : > { %v1858_v1 = vpop.f32.mrb[54].mxu0  ;;  %v1571_v2 = vpop.f32.mrb[55].mxu1 }
 0x190   : > { %3000 = vtanh.f32 %v1856_v62  ;;  %v1859_v3 = vadd.f32 %v1858_v1, %v1569_v0  ;;  %v1860_v4 = vpop.f32.mrb[55].mxu0 }
 0x192   : > { %v2997_v5 = vpop.eup %2996  ;;  %3002 = vtanh.f32 %v1859_v3 }
 0x193   : > { %2289 = vst [vmem:[%s3334_s24 + $0xc0] sm:$0xff] %v2997_v5 }
 0x194   : > { %v2999_v6 = vpop.eup %2998  ;;  %v1574_v7 = vpop.f32.mrb[56].mxu1 }
 0x195   : > { %2290 = vst [vmem:[%s3334_s24 + $0xc8] sm:$0xff] %v2999_v6  ;;  %v1863_v8 = vpop.f32.mrb[56].mxu0  ;;  %v1576_v9 = vpop.f32.mrb[57].mxu1 }
 0x196   : > { %v1864_v10 = vadd.f32 %v1863_v8, %v1574_v7  ;;  %v1865_v11 = vpop.f32.mrb[57].mxu0  ;;  %v1577_v12 = vpop.f32.mrb[58].mxu1 }
 0x197   : > { %v1866_v13 = vpop.f32.mrb[58].mxu0  ;;  %v1579_v14 = vpop.f32.mrb[59].mxu1 }
 0x198   : > { %3004 = vtanh.f32 %v1864_v10  ;;  %v1867_v15 = vadd.f32 %v1866_v13, %v1577_v12  ;;  %v1868_v16 = vpop.f32.mrb[59].mxu0 }
 0x19a   : > { %v3001_v17 = vpop.eup %3000  ;;  %3006 = vtanh.f32 %v1867_v15 }
 0x19b   : > { %2291 = vst [vmem:[%s3334_s24 + $0xd0] sm:$0xff] %v3001_v17 }
 0x19c   : > { %v3003_v18 = vpop.eup %3002  ;;  %v1582_v19 = vpop.f32.mrb[60].mxu1 }
 0x19d   : > { %2292 = vst [vmem:[%s3334_s24 + $0xd8] sm:$0xff] %v3003_v18  ;;  %v1871_v20 = vpop.f32.mrb[60].mxu0  ;;  %v1584_v21 = vpop.f32.mrb[61].mxu1 }
 0x19e   : > { %v1872_v22 = vadd.f32 %v1871_v20, %v1582_v19  ;;  %v1873_v23 = vpop.f32.mrb[61].mxu0  ;;  %v1585_v24 = vpop.f32.mrb[62].mxu1 }
 0x19f   : > { %v1874_v25 = vpop.f32.mrb[62].mxu0  ;;  %v1587_v26 = vpop.f32.mrb[63].mxu1 }
 0x1a0   : > { %3008 = vtanh.f32 %v1872_v22  ;;  %v1875_v27 = vadd.f32 %v1874_v25, %v1585_v24  ;;  %v1876_v28 = vpop.f32.mrb[63].mxu0 }
 0x1a2   : > { %v3005_v29 = vpop.eup %3004  ;;  %3010 = vtanh.f32 %v1875_v27 }
 0x1a3   : > { %2293 = vst [vmem:[%s3334_s24 + $0xe0] sm:$0xff] %v3005_v29 }
 0x1a4   : > { %v3007_v30 = vpop.eup %3006  ;;  %v1590_v31 = vpop.f32.mrb[64].mxu1 }
 0x1a5   : > { %2294 = vst [vmem:[%s3334_s24 + $0xe8] sm:$0xff] %v3007_v30  ;;  %v1879_v32 = vpop.f32.mrb[64].mxu0  ;;  %v1592_v33 = vpop.f32.mrb[65].mxu1 }
 0x1a6   : > { %v1880_v34 = vadd.f32 %v1879_v32, %v1590_v31  ;;  %v1881_v35 = vpop.f32.mrb[65].mxu0  ;;  %v1593_v36 = vpop.f32.mrb[66].mxu1 }
 0x1a7   : > { %v1882_v37 = vpop.f32.mrb[66].mxu0  ;;  %v1595_v38 = vpop.f32.mrb[67].mxu1 }
 0x1a8   : > { %3012 = vtanh.f32 %v1880_v34  ;;  %v1883_v39 = vadd.f32 %v1882_v37, %v1593_v36  ;;  %v1884_v40 = vpop.f32.mrb[67].mxu0 }
 0x1aa   : > { %v3009_v41 = vpop.eup %3008  ;;  %3014 = vtanh.f32 %v1883_v39 }
 0x1ab   : > { %2295 = vst [vmem:[%s3334_s24 + $0xf0] sm:$0xff] %v3009_v41 }
 0x1ac   : > { %v3011_v42 = vpop.eup %3010  ;;  %v1598_v43 = vpop.f32.mrb[68].mxu1 }
 0x1ad   : > { %2296 = vst [vmem:[%s3334_s24 + $0xf8] sm:$0xff] %v3011_v42  ;;  %v1887_v44 = vpop.f32.mrb[68].mxu0  ;;  %v1600_v45 = vpop.f32.mrb[69].mxu1 }
 0x1ae   : > { %v1888_v46 = vadd.f32 %v1887_v44, %v1598_v43  ;;  %v1889_v47 = vpop.f32.mrb[69].mxu0  ;;  %v1601_v48 = vpop.f32.mrb[70].mxu1 }
 0x1af   : > { %v1890_v49 = vpop.f32.mrb[70].mxu0  ;;  %v1603_v50 = vpop.f32.mrb[71].mxu1 }
 0x1b0   : > { %3016 = vtanh.f32 %v1888_v46  ;;  %v1891_v51 = vadd.f32 %v1890_v49, %v1601_v48  ;;  %v1892_v52 = vpop.f32.mrb[71].mxu0 }
 0x1b2   : > { %v3013_v53 = vpop.eup %3012  ;;  %3018 = vtanh.f32 %v1891_v51 }
 0x1b3   : > { %2297 = vst [vmem:[%s3334_s24 + $0x100] sm:$0xff] %v3013_v53 }
 0x1b4   : > { %v3015_v54 = vpop.eup %3014  ;;  %v1606_v55 = vpop.f32.mrb[72].mxu1 }
 0x1b5   : > { %2298 = vst [vmem:[%s3334_s24 + $0x108] sm:$0xff] %v3015_v54  ;;  %v1895_v56 = vpop.f32.mrb[72].mxu0  ;;  %v1608_v57 = vpop.f32.mrb[73].mxu1 }
 0x1b6   : > { %v1896_v58 = vadd.f32 %v1895_v56, %v1606_v55  ;;  %v1897_v59 = vpop.f32.mrb[73].mxu0  ;;  %v1609_v60 = vpop.f32.mrb[74].mxu1 }
 0x1b7   : > { %v1898_v61 = vpop.f32.mrb[74].mxu0  ;;  %v1611_v62 = vpop.f32.mrb[75].mxu1 }
 0x1b8   : > { %3020 = vtanh.f32 %v1896_v58  ;;  %v1899_v63 = vadd.f32 %v1898_v61, %v1609_v60  ;;  %v1900_v0 = vpop.f32.mrb[75].mxu0 }
 0x1ba   : > { %v3017_v1 = vpop.eup %3016  ;;  %3022 = vtanh.f32 %v1899_v63 }
 0x1bb   : > { %2299 = vst [vmem:[%s3334_s24 + $0x110] sm:$0xff] %v3017_v1 }
 0x1bc   : > { %v3019_v2 = vpop.eup %3018  ;;  %v1614_v3 = vpop.f32.mrb[76].mxu1 }
 0x1bd   : > { %2300 = vst [vmem:[%s3334_s24 + $0x118] sm:$0xff] %v3019_v2  ;;  %v1903_v4 = vpop.f32.mrb[76].mxu0  ;;  %v1616_v5 = vpop.f32.mrb[77].mxu1 }
 0x1be   : > { %v1904_v6 = vadd.f32 %v1903_v4, %v1614_v3  ;;  %v1905_v7 = vpop.f32.mrb[77].mxu0  ;;  %v1617_v8 = vpop.f32.mrb[78].mxu1 }
 0x1bf   : > { %v1906_v9 = vpop.f32.mrb[78].mxu0  ;;  %v1619_v10 = vpop.f32.mrb[79].mxu1 }
 0x1c0   : > { %3024 = vtanh.f32 %v1904_v6  ;;  %v1907_v11 = vadd.f32 %v1906_v9, %v1617_v8  ;;  %v1908_v12 = vpop.f32.mrb[79].mxu0 }
 0x1c2   : > { %v3021_v13 = vpop.eup %3020  ;;  %3026 = vtanh.f32 %v1907_v11 }
 0x1c3   : > { %2301 = vst [vmem:[%s3334_s24 + $0x120] sm:$0xff] %v3021_v13 }
 0x1c4   : > { %v3023_v14 = vpop.eup %3022  ;;  %v1622_v15 = vpop.f32.mrb[80].mxu1 }
 0x1c5   : > { %2302 = vst [vmem:[%s3334_s24 + $0x128] sm:$0xff] %v3023_v14  ;;  %v1911_v16 = vpop.f32.mrb[80].mxu0  ;;  %v1624_v17 = vpop.f32.mrb[81].mxu1 }
 0x1c6   : > { %v1912_v18 = vadd.f32 %v1911_v16, %v1622_v15  ;;  %v1913_v19 = vpop.f32.mrb[81].mxu0  ;;  %v1625_v20 = vpop.f32.mrb[82].mxu1 }
 0x1c7   : > { %v1914_v21 = vpop.f32.mrb[82].mxu0  ;;  %v1627_v22 = vpop.f32.mrb[83].mxu1 }
 0x1c8   : > { %3028 = vtanh.f32 %v1912_v18  ;;  %v1915_v23 = vadd.f32 %v1914_v21, %v1625_v20  ;;  %v1916_v24 = vpop.f32.mrb[83].mxu0 }
 0x1ca   : > { %v3025_v25 = vpop.eup %3024  ;;  %3030 = vtanh.f32 %v1915_v23 }
 0x1cb   : > { %2303 = vst [vmem:[%s3334_s24 + $0x130] sm:$0xff] %v3025_v25 }
 0x1cc   : > { %v3027_v26 = vpop.eup %3026  ;;  %v1630_v27 = vpop.f32.mrb[84].mxu1 }
 0x1cd   : > { %2304 = vst [vmem:[%s3334_s24 + $0x138] sm:$0xff] %v3027_v26  ;;  %v1919_v28 = vpop.f32.mrb[84].mxu0  ;;  %v1632_v29 = vpop.f32.mrb[85].mxu1 }
 0x1ce   : > { %v1920_v30 = vadd.f32 %v1919_v28, %v1630_v27  ;;  %v1921_v31 = vpop.f32.mrb[85].mxu0  ;;  %v1633_v32 = vpop.f32.mrb[86].mxu1 }
 0x1cf   : > { %v1922_v33 = vpop.f32.mrb[86].mxu0  ;;  %v1635_v34 = vpop.f32.mrb[87].mxu1 }
 0x1d0   : > { %3032 = vtanh.f32 %v1920_v30  ;;  %v1923_v35 = vadd.f32 %v1922_v33, %v1633_v32  ;;  %v1924_v36 = vpop.f32.mrb[87].mxu0 }
 0x1d2   : > { %v3029_v37 = vpop.eup %3028  ;;  %3034 = vtanh.f32 %v1923_v35 }
 0x1d3   : > { %2305 = vst [vmem:[%s3334_s24 + $0x140] sm:$0xff] %v3029_v37 }
 0x1d4   : > { %v3031_v38 = vpop.eup %3030  ;;  %v1638_v39 = vpop.f32.mrb[88].mxu1 }
 0x1d5   : > { %2306 = vst [vmem:[%s3334_s24 + $0x148] sm:$0xff] %v3031_v38  ;;  %v1927_v40 = vpop.f32.mrb[88].mxu0  ;;  %v1640_v41 = vpop.f32.mrb[89].mxu1 }
 0x1d6   : > { %v1928_v42 = vadd.f32 %v1927_v40, %v1638_v39  ;;  %v1929_v43 = vpop.f32.mrb[89].mxu0  ;;  %v1641_v44 = vpop.f32.mrb[90].mxu1 }
 0x1d7   : > { %v1930_v45 = vpop.f32.mrb[90].mxu0  ;;  %v1643_v46 = vpop.f32.mrb[91].mxu1 }
 0x1d8   : > { %3036 = vtanh.f32 %v1928_v42  ;;  %v1931_v47 = vadd.f32 %v1930_v45, %v1641_v44  ;;  %v1932_v48 = vpop.f32.mrb[91].mxu0 }
 0x1da   : > { %v3033_v49 = vpop.eup %3032  ;;  %3038 = vtanh.f32 %v1931_v47 }
 0x1db   : > { %2307 = vst [vmem:[%s3334_s24 + $0x150] sm:$0xff] %v3033_v49 }
 0x1dc   : > { %v3035_v50 = vpop.eup %3034  ;;  %v1646_v51 = vpop.f32.mrb[92].mxu1 }
 0x1dd   : > { %2308 = vst [vmem:[%s3334_s24 + $0x158] sm:$0xff] %v3035_v50  ;;  %v1935_v52 = vpop.f32.mrb[92].mxu0  ;;  %v1648_v53 = vpop.f32.mrb[93].mxu1 }
 0x1de   : > { %v1936_v54 = vadd.f32 %v1935_v52, %v1646_v51  ;;  %v1937_v55 = vpop.f32.mrb[93].mxu0  ;;  %v1649_v56 = vpop.f32.mrb[94].mxu1 }
 0x1df   : > { %v1938_v57 = vpop.f32.mrb[94].mxu0  ;;  %v1651_v58 = vpop.f32.mrb[95].mxu1 }
 0x1e0   : > { %3040 = vtanh.f32 %v1936_v54  ;;  %v1939_v59 = vadd.f32 %v1938_v57, %v1649_v56  ;;  %v1940_v60 = vpop.f32.mrb[95].mxu0 }
 0x1e2   : > { %v3037_v61 = vpop.eup %3036  ;;  %3042 = vtanh.f32 %v1939_v59 }
 0x1e3   : > { %2309 = vst [vmem:[%s3334_s24 + $0x160] sm:$0xff] %v3037_v61 }
 0x1e4   : > { %v3039_v62 = vpop.eup %3038  ;;  %v1654_v63 = vpop.f32.mrb[96].mxu1 }
 0x1e5   : > { %2310 = vst [vmem:[%s3334_s24 + $0x168] sm:$0xff] %v3039_v62  ;;  %v1943_v0 = vpop.f32.mrb[96].mxu0  ;;  %v1656_v1 = vpop.f32.mrb[97].mxu1 }
 0x1e6   : > { %v1944_v2 = vadd.f32 %v1943_v0, %v1654_v63  ;;  %v1945_v3 = vpop.f32.mrb[97].mxu0  ;;  %v1657_v4 = vpop.f32.mrb[98].mxu1 }
 0x1e7   : > { %v1946_v5 = vpop.f32.mrb[98].mxu0  ;;  %v1659_v6 = vpop.f32.mrb[99].mxu1 }
 0x1e8   : > { %3044 = vtanh.f32 %v1944_v2  ;;  %v1947_v7 = vadd.f32 %v1946_v5, %v1657_v4  ;;  %v1948_v8 = vpop.f32.mrb[99].mxu0 }
 0x1ea   : > { %v3041_v9 = vpop.eup %3040  ;;  %3046 = vtanh.f32 %v1947_v7 }
 0x1eb   : > { %2311 = vst [vmem:[%s3334_s24 + $0x170] sm:$0xff] %v3041_v9 }
 0x1ec   : > { %v3043_v10 = vpop.eup %3042  ;;  %v1662_v11 = vpop.f32.mrb[100].mxu1 }
 0x1ed   : > { %2312 = vst [vmem:[%s3334_s24 + $0x178] sm:$0xff] %v3043_v10  ;;  %v1951_v12 = vpop.f32.mrb[100].mxu0  ;;  %v1664_v13 = vpop.f32.mrb[101].mxu1 }
 0x1ee   : > { %v1952_v14 = vadd.f32 %v1951_v12, %v1662_v11  ;;  %v1953_v15 = vpop.f32.mrb[101].mxu0  ;;  %v1665_v16 = vpop.f32.mrb[102].mxu1 }
 0x1ef   : > { %v1954_v17 = vpop.f32.mrb[102].mxu0  ;;  %v1667_v18 = vpop.f32.mrb[103].mxu1 }
 0x1f0   : > { %3048 = vtanh.f32 %v1952_v14  ;;  %v1955_v19 = vadd.f32 %v1954_v17, %v1665_v16  ;;  %v1956_v20 = vpop.f32.mrb[103].mxu0 }
 0x1f2   : > { %v3045_v21 = vpop.eup %3044  ;;  %3050 = vtanh.f32 %v1955_v19 }
 0x1f3   : > { %2313 = vst [vmem:[%s3334_s24 + $0x180] sm:$0xff] %v3045_v21 }
 0x1f4   : > { %v3047_v22 = vpop.eup %3046  ;;  %v1670_v23 = vpop.f32.mrb[104].mxu1 }
 0x1f5   : > { %2314 = vst [vmem:[%s3334_s24 + $0x188] sm:$0xff] %v3047_v22  ;;  %v1959_v24 = vpop.f32.mrb[104].mxu0  ;;  %v1672_v25 = vpop.f32.mrb[105].mxu1 }
 0x1f6   : > { %v1960_v26 = vadd.f32 %v1959_v24, %v1670_v23  ;;  %v1961_v27 = vpop.f32.mrb[105].mxu0  ;;  %v1673_v28 = vpop.f32.mrb[106].mxu1 }
 0x1f7   : > { %v1962_v29 = vpop.f32.mrb[106].mxu0  ;;  %v1675_v30 = vpop.f32.mrb[107].mxu1 }
 0x1f8   : > { %3052 = vtanh.f32 %v1960_v26  ;;  %v1963_v31 = vadd.f32 %v1962_v29, %v1673_v28  ;;  %v1964_v32 = vpop.f32.mrb[107].mxu0 }
 0x1fa   : > { %v3049_v33 = vpop.eup %3048  ;;  %3054 = vtanh.f32 %v1963_v31 }
 0x1fb   : > { %2315 = vst [vmem:[%s3334_s24 + $0x190] sm:$0xff] %v3049_v33 }
 0x1fc   : > { %v3051_v34 = vpop.eup %3050  ;;  %v1678_v35 = vpop.f32.mrb[108].mxu1 }
 0x1fd   : > { %2316 = vst [vmem:[%s3334_s24 + $0x198] sm:$0xff] %v3051_v34  ;;  %v1967_v36 = vpop.f32.mrb[108].mxu0  ;;  %v1680_v37 = vpop.f32.mrb[109].mxu1 }
 0x1fe   : > { %v1968_v38 = vadd.f32 %v1967_v36, %v1678_v35  ;;  %v1969_v39 = vpop.f32.mrb[109].mxu0  ;;  %v1681_v40 = vpop.f32.mrb[110].mxu1 }
 0x1ff   : > { %v1970_v41 = vpop.f32.mrb[110].mxu0  ;;  %v1683_v42 = vpop.f32.mrb[111].mxu1 }
 0x200   : > { %3056 = vtanh.f32 %v1968_v38  ;;  %v1971_v43 = vadd.f32 %v1970_v41, %v1681_v40  ;;  %v1972_v44 = vpop.f32.mrb[111].mxu0 }
 0x202   : > { %v3053_v45 = vpop.eup %3052  ;;  %3058 = vtanh.f32 %v1971_v43 }
 0x203   : > { %2317 = vst [vmem:[%s3334_s24 + $0x1a0] sm:$0xff] %v3053_v45 }
 0x204   : > { %v3055_v46 = vpop.eup %3054  ;;  %v1686_v47 = vpop.f32.mrb[112].mxu1 }
 0x205   : > { %2318 = vst [vmem:[%s3334_s24 + $0x1a8] sm:$0xff] %v3055_v46  ;;  %v1975_v48 = vpop.f32.mrb[112].mxu0  ;;  %v1688_v49 = vpop.f32.mrb[113].mxu1 }
 0x206   : > { %v1976_v50 = vadd.f32 %v1975_v48, %v1686_v47  ;;  %v1977_v51 = vpop.f32.mrb[113].mxu0  ;;  %v1689_v52 = vpop.f32.mrb[114].mxu1 }
 0x207   : > { %v1978_v53 = vpop.f32.mrb[114].mxu0  ;;  %v1691_v54 = vpop.f32.mrb[115].mxu1 }
 0x208   : > { %3060 = vtanh.f32 %v1976_v50  ;;  %v1979_v55 = vadd.f32 %v1978_v53, %v1689_v52  ;;  %v1980_v56 = vpop.f32.mrb[115].mxu0 }
 0x20a   : > { %v3057_v57 = vpop.eup %3056  ;;  %3062 = vtanh.f32 %v1979_v55 }
 0x20b   : > { %2319 = vst [vmem:[%s3334_s24 + $0x1b0] sm:$0xff] %v3057_v57 }
 0x20c   : > { %v3059_v58 = vpop.eup %3058  ;;  %v1694_v59 = vpop.f32.mrb[116].mxu1 }
 0x20d   : > { %2320 = vst [vmem:[%s3334_s24 + $0x1b8] sm:$0xff] %v3059_v58  ;;  %v1983_v60 = vpop.f32.mrb[116].mxu0  ;;  %v1696_v61 = vpop.f32.mrb[117].mxu1 }
 0x20e   : > { %v1984_v62 = vadd.f32 %v1983_v60, %v1694_v59  ;;  %v1985_v63 = vpop.f32.mrb[117].mxu0  ;;  %v1697_v0 = vpop.f32.mrb[118].mxu1 }
 0x20f   : > { %v1986_v1 = vpop.f32.mrb[118].mxu0  ;;  %v1699_v2 = vpop.f32.mrb[119].mxu1 }
 0x210   : > { %3064 = vtanh.f32 %v1984_v62  ;;  %v1987_v3 = vadd.f32 %v1986_v1, %v1697_v0  ;;  %v1988_v4 = vpop.f32.mrb[119].mxu0 }
 0x212   : > { %v3061_v5 = vpop.eup %3060  ;;  %3066 = vtanh.f32 %v1987_v3 }
 0x213   : > { %2321 = vst [vmem:[%s3334_s24 + $0x1c0] sm:$0xff] %v3061_v5 }
 0x214   : > { %v3063_v6 = vpop.eup %3062  ;;  %v1702_v7 = vpop.f32.mrb[120].mxu1 }
 0x215   : > { %2322 = vst [vmem:[%s3334_s24 + $0x1c8] sm:$0xff] %v3063_v6  ;;  %v1991_v8 = vpop.f32.mrb[120].mxu0  ;;  %v1704_v9 = vpop.f32.mrb[121].mxu1 }
 0x216   : > { %v1992_v10 = vadd.f32 %v1991_v8, %v1702_v7  ;;  %v1993_v11 = vpop.f32.mrb[121].mxu0  ;;  %v1705_v12 = vpop.f32.mrb[122].mxu1 }
 0x217   : > { %v1994_v13 = vpop.f32.mrb[122].mxu0  ;;  %v1707_v14 = vpop.f32.mrb[123].mxu1 }
 0x218   : > { %3068 = vtanh.f32 %v1992_v10  ;;  %v1995_v15 = vadd.f32 %v1994_v13, %v1705_v12  ;;  %v1996_v16 = vpop.f32.mrb[123].mxu0 }
 0x21a   : > { %v3065_v17 = vpop.eup %3064  ;;  %3070 = vtanh.f32 %v1995_v15 }
 0x21b   : > { %2323 = vst [vmem:[%s3334_s24 + $0x1d0] sm:$0xff] %v3065_v17 }
 0x21c   : > { %v3067_v18 = vpop.eup %3066  ;;  %v1710_v19 = vpop.f32.mrb[124].mxu1 }
 0x21d   : > { %2324 = vst [vmem:[%s3334_s24 + $0x1d8] sm:$0xff] %v3067_v18  ;;  %v1999_v20 = vpop.f32.mrb[124].mxu0  ;;  %v1712_v21 = vpop.f32.mrb[125].mxu1 }
 0x21e   : > { %v2000_v22 = vadd.f32 %v1999_v20, %v1710_v19  ;;  %v2001_v23 = vpop.f32.mrb[125].mxu0  ;;  %v1713_v24 = vpop.f32.mrb[126].mxu1 }
 0x21f   : > { %v2002_v25 = vpop.f32.mrb[126].mxu0  ;;  %v1715_v26 = vpop.f32.mrb[127].mxu1 }
 0x220   : > { %3072 = vtanh.f32 %v2000_v22  ;;  %v2003_v27 = vadd.f32 %v2002_v25, %v1713_v24  ;;  %v2004_v28 = vpop.f32.mrb[127].mxu0 }
 0x222   : > { %v3069_v29 = vpop.eup %3068  ;;  %3074 = vtanh.f32 %v2003_v27 }
 0x223   : > { %2325 = vst [vmem:[%s3334_s24 + $0x1e0] sm:$0xff] %v3069_v29 }
 0x224   : > { %v3071_v30 = vpop.eup %3070 }
 0x225   : > { %2326 = vst [vmem:[%s3334_s24 + $0x1e8] sm:$0xff] %v3071_v30 }
 0x22a   : > { %v3073_v31 = vpop.eup %3072 }
 0x22b   : > { %2327 = vst [vmem:[%s3334_s24 + $0x1f0] sm:$0xff] %v3073_v31 }
 0x22c   : > { %v3075_v32 = vpop.eup %3074 }
 0x22d   : > { %2328 = vst [vmem:[%s3334_s24 + $0x1f8] sm:$0xff] %v3075_v32 }
 0x22e PF: > { %s12_s11 = sadd.s32 1, %s3098_s11   ;;  %s3422_s9 = smov %s3094_s10 }
 0x22f   : > { %p9_p5 = scmp.ge.s32.totalorder %s12_s11, 6   ;;  %s3423_s10 = smov %s3425_s12 }
 0x231   :  { %11 = sbr.rel (!%p9_p5) target bundleno = 2 (0x2), region = 69 }

</bundles_post_ra>
